<compile_context>
chip_gen: v7x
topology: tpu7x:2x2x1
jax: 0.10.0
libtpu: 0.0.40
codegen_flags: <defaults>
</compile_context>

<pallas_src>
import math
import functools

import numpy as np
import jax
import jax.numpy as jnp
from jax.experimental import pallas as pl
from jax.experimental.pallas import tpu as pltpu

NUM_STEP, NUM_TASK, NUM_TRIPLET = 7, 16, 39

# Row offsets of the six packed results inside the (128, B) output slab.
# 8-sublane aligned so every store starts on a vreg tile boundary.
_ROW_ST, _ROW_STR, _ROW_TS, _ROW_TTR, _ROW_TRS, _ROW_TRT = 0, 8, 16, 32, 48, 88
_OUT_ROWS = 128

_TID = {'idle': 0, 'AA1': 1, 'AA2': 2, 'AA3': 3, 'AA4': 4, 'AA5': 5, 'AA6': 6,
        'AB1': 7, 'AB2': 8, 'AB3': 9, 'AB4': 10, 'AB5': 11, 'AB6': 12, 'AB7': 13,
        'AB8': 14, 'AB9': 15, 'AB10': 16, 'AC1': 17, 'AC2': 18, 'AC3': 19, 'AC4': 20,
        'AC5': 21, 'AC6': 22, 'AC7': 23, 'AD1': 24, 'AD2': 25, 'AD3': 26, 'AE1': 27,
        'AF1': 28, 'AF2': 29, 'AG1': 30, 'AH1': 31, 'AI1': 32, 'AI2': 33, 'AI3': 34,
        'AJ1': 35, 'AK1': 36, 'AK2': 37, 'AK3': 38}


def build_prior_matrices():
    step_vs_task = np.zeros((NUM_STEP, NUM_TASK), np.float32)
    step_vs_task[0, 0] = 1
    step_vs_task[1, 1:6] = 1
    step_vs_task[2, 6:9] = 1
    step_vs_task[3, 9:11] = 1
    step_vs_task[4, 11:13] = 1
    step_vs_task[5, 13:15] = 1
    step_vs_task[6, 15] = 1

    task_rows = {
        0: ['idle'],
        1: ['AA1', 'AB1', 'AC1'],
        2: ['AA2', 'AB2', 'AC2'],
        3: ['AA3', 'AB3', 'AC3'],
        4: ['AA4', 'AB4', 'AC4'],
        5: ['AA5', 'AB5', 'AC5'],
        6: ['AA6', 'AB6', 'AC6', 'AD2'],
        7: ['AD1', 'AI1'],
        8: ['AD3', 'AI1'],
        9: ['AB7', 'AC6', 'AF1', 'AG1', 'AH1'],
        10: ['AC1', 'AC5', 'AC7', 'AB8'],
        11: ['AE1'],
        12: ['AJ1'],
        13: ['AB9'],
        14: ['AB9', 'AI1', 'AI2', 'AK1'],
        15: ['AB7', 'AB10', 'AI1'],
    }
    task_vs_triplet = np.zeros((NUM_TASK, NUM_TRIPLET), np.float32)
    for r, names in task_rows.items():
        for n in names:
            task_vs_triplet[r, _TID[n]] = 1

    step_rows = {
        0: ['idle'],
        1: ['AA1', 'AB1', 'AC1', 'AA2', 'AB2', 'AC2', 'AA3', 'AB3', 'AC3',
            'AA4', 'AB4', 'AC4', 'AA5', 'AB5', 'AC5'],
        2: ['AA6', 'AB6', 'AC6', 'AD2', 'AD1', 'AI1', 'AD3'],
        3: ['AB7', 'AC6', 'AF1', 'AG1', 'AH1', 'AC1', 'AC5', 'AC7', 'AB8',
            'AB10', 'AI1'],
        4: ['AE1', 'AJ1'],
        5: ['AB8', 'AB9', 'AI1', 'AI2', 'AK1'],
    }
    step_vs_triplet = np.zeros((NUM_STEP, NUM_TRIPLET), np.float32)
    for r, names in step_rows.items():
        for n in names:
            step_vs_triplet[r, _TID[n]] = 1

    return step_vs_task, step_vs_triplet, task_vs_triplet


# --------------------------------------------------------------------------------------
# Pallas kernel
# --------------------------------------------------------------------------------------
def hrca_kernel(scal_ref,                                    # SMEM (6,) f32
                xs_ref, xt_ref, xr_ref,                      # VMEM (7,BT) (16,BT) (39,BT)
                m_st_ref, m_str_ref, m_ts_ref,               # VMEM prior masks (I, J, 1)
                m_ttr_ref, m_trs_ref, m_trt_ref,
                out_ref,                                     # VMEM (128, BT) packed slab
                *, use_prior):
    xs = xs_ref[...]            # (7,  BT)  step scores, batch on lanes
    xt = xt_ref[...]            # (16, BT)  task scores
    xr = xr_ref[...]            # (39, BT)  triplet scores

    c_st = scal_ref[0]          # (w_step . w_task)    / sqrt(H)
    c_sr = scal_ref[1]          # (w_step . w_triplet) / sqrt(H)
    c_tr = scal_ref[2]          # (w_task . w_triplet) / sqrt(H)
    inv_s = scal_ref[3]         # 1 / max_b(range(step))     (global-batch, hoisted)
    inv_t = scal_ref[4]         # 1 / max_b(range(task))
    inv_r = scal_ref[5]         # 1 / max_b(range(triplet))

    def attend(x, y, c, mask_ref, inv_rng):
        # Rank-1 correlation (no MXU): corr[i,j,b] = x[i,b] * y[j,b] * c
        corr = x[:, None, :] * (y * c)[None, :, :]           # (I, J, B)
        # softmax over i == PyTorch nn.Softmax(dim=1), numerically stabilized
        m = jnp.max(corr, axis=0, keepdims=True)             # (1, J, B)  (VPU, major-axis max)
        e = jnp.exp(corr - m)                                # (I, J, B)  (EUP)
        denom = jnp.sum(e, axis=0)                           # (J, B)
        # Fold normalization into the value vector:  att @ y == sum_j e * (y / denom)
        yn = y * pl.reciprocal(denom, approx=True)           # (J, B)     (EUP recip)
        w = e * yn[None, :, :]                               # (I, J, B)
        if use_prior:
            w = w * mask_ref[...]                            # (I, J, 1) lane-broadcast
        return jnp.sum(w, axis=1) * inv_rng                  # (I, B)

    out_ref[_ROW_ST:_ROW_ST + NUM_STEP, :] = attend(xs, xt, c_st, m_st_ref, inv_s)       # step_task
    out_ref[_ROW_STR:_ROW_STR + NUM_STEP, :] = attend(xs, xr, c_sr, m_str_ref, inv_s)    # step_triplet
    out_ref[_ROW_TS:_ROW_TS + NUM_TASK, :] = attend(xt, xs, c_st, m_ts_ref, inv_t)       # task_step
    out_ref[_ROW_TTR:_ROW_TTR + NUM_TASK, :] = attend(xt, xr, c_tr, m_ttr_ref, inv_t)    # task_triplet
    out_ref[_ROW_TRS:_ROW_TRS + NUM_TRIPLET, :] = attend(xr, xs, c_sr, m_trs_ref, inv_r)  # triplet_step
    out_ref[_ROW_TRT:_ROW_TRT + NUM_TRIPLET, :] = attend(xr, xt, c_tr, m_trt_ref, inv_r)  # triplet_task


# --------------------------------------------------------------------------------------
# Wrapper
# --------------------------------------------------------------------------------------
def hrca_forward(inputs, w_step, w_task, w_trip, masks, *, hidden_dim,
                 use_prior_knowledge=True, block_batch=512):
    """
    inputs : dict with 'step' (B,7), 'task' (B,16), 'triplet' (B,39) f32
    w_*    : Conv1d(in=1, out=H, k=1) weights stored as (1, H) f32
    masks  : 6 prior matrices: (7,16), (7,39), (16,7), (16,39), (39,7), (39,16)
    """
    step = inputs['step'].astype(jnp.float32)
    task = inputs['task'].astype(jnp.float32)
    trip = inputs['triplet'].astype(jnp.float32)
    B = step.shape[0]

    # Batch tile: lane-aligned (multiple of 128). Default 512 amortizes per-step overhead;
    # keep it <= ~1024 so the live (I, J, BT) softmax tiles stay well under v7x's 64 MiB VMEM.
    bt = min(int(block_batch), ((B + 127) // 128) * 128)
    bt = max(128, (bt // 128) * 128)
    num_blocks = pl.cdiv(B, bt)
    bp = num_blocks * bt

    # ---- hoisted scalars (MUST be global-batch reductions for tiled correctness) ----
    inv_dk = 1.0 / math.sqrt(float(hidden_dim))
    c_st = jnp.sum(w_step * w_task) * inv_dk
    c_sr = jnp.sum(w_step * w_trip) * inv_dk
    c_tr = jnp.sum(w_task * w_trip) * inv_dk
    rng_s = jnp.max(jnp.max(step, axis=1) - jnp.min(step, axis=1))
    rng_t = jnp.max(jnp.max(task, axis=1) - jnp.min(task, axis=1))
    rng_r = jnp.max(jnp.max(trip, axis=1) - jnp.min(trip, axis=1))
    # 1/0 -> inf here reproduces the reference's x/0 behavior when a range is zero.
    scalars = jnp.stack([c_st, c_sr, c_tr,
                         1.0 / rng_s, 1.0 / rng_t, 1.0 / rng_r]).astype(jnp.float32)

    # ---- layout plumbing: batch on lanes, padded to the batch tile ----
    def to_lanes(x):
        x_t = jnp.transpose(x)                        # (N, B)
        return jnp.pad(x_t, ((0, 0), (0, bp - B)))    # (N, Bp)

    xs, xt, xr = to_lanes(step), to_lanes(task), to_lanes(trip)
    # Masks shaped (I, J, 1) so the kernel only ever lane-broadcasts them (no relayout).
    masks3 = tuple(jnp.asarray(m, jnp.float32)[:, :, None] for m in masks)

    smem_spec = pl.BlockSpec(memory_space=pltpu.MemorySpace.SMEM)

    def lane_spec(n):
        return pl.BlockSpec((n, bt), lambda i: (0, i))

    def mask_spec(m):
        return pl.BlockSpec(m.shape, lambda i: (0, 0, 0))   # fetched once (constant index)

    out_slab = pl.pallas_call(
        functools.partial(hrca_kernel, use_prior=use_prior_knowledge),
        grid=(num_blocks,),
        in_specs=[smem_spec,
                  lane_spec(NUM_STEP), lane_spec(NUM_TASK), lane_spec(NUM_TRIPLET)]
                 + [mask_spec(m) for m in masks3],
        out_specs=pl.BlockSpec((_OUT_ROWS, bt), lambda i: (0, i)),
        out_shape=jax.ShapeDtypeStruct((_OUT_ROWS, bp), jnp.float32),
        compiler_params=pltpu.CompilerParams(
            dimension_semantics=("parallel",)),   # batch tiles are independent (v7x 2 TCs)
    )(scalars, xs, xt, xr, *masks3)

    def unpack(off, n):
        # (n, B) lane-dense slab rows -> PyTorch's (B, n, 1)
        return jnp.transpose(out_slab[off:off + n, :B])[..., None]

    return {
        'step_task':    unpack(_ROW_ST, NUM_STEP),
        'step_triplet': unpack(_ROW_STR, NUM_STEP),
        'task_step':    unpack(_ROW_TS, NUM_TASK),
        'task_triplet': unpack(_ROW_TTR, NUM_TASK),
        'triplet_step': unpack(_ROW_TRS, NUM_TRIPLET),
        'triplet_task': unpack(_ROW_TRT, NUM_TRIPLET),
    }


# Pure-JAX reference (literal translation of the PyTorch math) for a sanity check.
def hrca_reference(inputs, w_step, w_task, w_trip, masks, *, hidden_dim, use_prior_knowledge=True):
    step, task, trip = inputs['step'], inputs['task'], inputs['triplet']
    dk = jnp.float32(math.sqrt(float(hidden_dim)))
    e_s = step[:, :, None] * w_step[None, :, :]
    e_t = task[:, :, None] * w_task[None, :, :]
    e_r = trip[:, :, None] * w_trip[None, :, :]
    rng_s = jnp.max(jnp.max(step, axis=1) - jnp.min(step, axis=1))
    rng_t = jnp.max(jnp.max(task, axis=1) - jnp.min(task, axis=1))
    rng_r = jnp.max(jnp.max(trip, axis=1) - jnp.min(trip, axis=1))

    def attend(ex, ey, y, mask, rng):
        corr = jnp.einsum('bih,bjh->bij', ex, ey, preferred_element_type=jnp.float32) / dk
        att = jax.nn.softmax(corr, axis=1)
        if use_prior_knowledge:
            att = att * mask[None, :, :]
        return (jnp.sum(att * y[:, None, :], axis=-1) / rng)[..., None]

    m_st, m_str, m_ts, m_ttr, m_trs, m_trt = masks
    return {
        'step_task': attend(e_s, e_t, task, m_st, rng_s),
        'step_triplet': attend(e_s, e_r, trip, m_str, rng_s),
        'task_step': attend(e_t, e_s, step, m_ts, rng_t),
        'task_triplet': attend(e_t, e_r, trip, m_ttr, rng_t),
        'triplet_step': attend(e_r, e_s, step, m_trs, rng_r),
        'triplet_task': attend(e_r, e_t, task, m_trt, rng_r),
    }


if __name__ == "__main__":
    B, HIDDEN = 2, 32
    key = jax.random.PRNGKey(0)
    k_s, k_t, k_r, k_ws, k_wt, k_wr = jax.random.split(key, 6)

    # class-score inputs (batch, num_classes)
    inputs = {
        'step': jax.random.uniform(k_s, (B, NUM_STEP), jnp.float32),
        'task': jax.random.uniform(k_t, (B, NUM_TASK), jnp.float32),
        'triplet': jax.random.uniform(k_r, (B, NUM_TRIPLET), jnp.float32),
    }

    # Conv1d(out=HIDDEN, in=1, k=1, bias=False) weights, stored as (1, HIDDEN)
    w_step = jax.random.normal(k_ws, (1, HIDDEN), jnp.float32) * 0.5
    w_task = jax.random.normal(k_wt, (1, HIDDEN), jnp.float32) * 0.5
    w_trip = jax.random.normal(k_wr, (1, HIDDEN), jnp.float32) * 0.5

    svt, svtr, tvtr = build_prior_matrices()
    masks = (jnp.asarray(svt),            # step_task     (7, 16)
             jnp.asarray(svtr),           # step_triplet  (7, 39)
             jnp.asarray(svt.T),          # task_step     (16, 7)
             jnp.asarray(tvtr),           # task_triplet  (16, 39)
             jnp.asarray(svtr.T),         # triplet_step  (39, 7)
             jnp.asarray(tvtr.T))         # triplet_task  (39, 16)

    out = hrca_forward(inputs, w_step, w_task, w_trip, masks,
                       hidden_dim=HIDDEN, use_prior_knowledge=True)
    out = jax.block_until_ready(out)

    ref = hrca_reference(inputs, w_step, w_task, w_trip, masks,
                         hidden_dim=HIDDEN, use_prior_knowledge=True)
    for k in out:
        np.testing.assert_allclose(np.asarray(out[k]), np.asarray(ref[k]),
                                   rtol=2e-2, atol=2e-3)

    print("KERNEL_OK")
</pallas_src>

<mosaic_0001>
module attributes {stable_mosaic.version = 11 : i64} {
  func.func @hrca_kernel(%arg0: i32, %arg1: memref<6xf32, #tpu.memory_space<smem>>, %arg2: memref<7x128xf32, #tpu.memory_space<vmem>>, %arg3: memref<16x128xf32, #tpu.memory_space<vmem>>, %arg4: memref<39x128xf32, #tpu.memory_space<vmem>>, %arg5: memref<7x16x1xf32, #tpu.memory_space<vmem>>, %arg6: memref<7x39x1xf32, #tpu.memory_space<vmem>>, %arg7: memref<16x7x1xf32, #tpu.memory_space<vmem>>, %arg8: memref<16x39x1xf32, #tpu.memory_space<vmem>>, %arg9: memref<39x7x1xf32, #tpu.memory_space<vmem>>, %arg10: memref<39x16x1xf32, #tpu.memory_space<vmem>>, %arg11: memref<128x128xf32, #tpu.memory_space<vmem>>) attributes {dimension_semantics = [#tpu.dimension_semantics<parallel>], iteration_bounds = array<i64: 1>, scalar_prefetch = 0 : i64, scratch_operands = 0 : i64, tpu.core_type = #tpu.core_type<tc>, window_params = [{transform_indices = @transform_0, window_bounds = array<i64: 6>}, {transform_indices = @transform_1, window_bounds = array<i64: 7, 128>}, {transform_indices = @transform_2, window_bounds = array<i64: 16, 128>}, {transform_indices = @transform_3, window_bounds = array<i64: 39, 128>}, {pipeline_mode = #tpu.pipeline_mode<synchronous>, transform_indices = @transform_4, window_bounds = array<i64: 7, 16, 1>}, {pipeline_mode = #tpu.pipeline_mode<synchronous>, transform_indices = @transform_5, window_bounds = array<i64: 7, 39, 1>}, {pipeline_mode = #tpu.pipeline_mode<synchronous>, transform_indices = @transform_6, window_bounds = array<i64: 16, 7, 1>}, {pipeline_mode = #tpu.pipeline_mode<synchronous>, transform_indices = @transform_7, window_bounds = array<i64: 16, 39, 1>}, {pipeline_mode = #tpu.pipeline_mode<synchronous>, transform_indices = @transform_8, window_bounds = array<i64: 39, 7, 1>}, {pipeline_mode = #tpu.pipeline_mode<synchronous>, transform_indices = @transform_9, window_bounds = array<i64: 39, 16, 1>}, {transform_indices = @transform_10, window_bounds = array<i64: 128, 128>}]} {
    %c0 = arith.constant 0 : index
    %c0_0 = arith.constant 0 : index
    %0 = vector.load %arg2[%c0, %c0_0] : memref<7x128xf32, #tpu.memory_space<vmem>>, vector<7x128xf32>
    %c0_1 = arith.constant 0 : index
    %c0_2 = arith.constant 0 : index
    %1 = vector.load %arg3[%c0_1, %c0_2] : memref<16x128xf32, #tpu.memory_space<vmem>>, vector<16x128xf32>
    %c0_3 = arith.constant 0 : index
    %c0_4 = arith.constant 0 : index
    %2 = vector.load %arg4[%c0_3, %c0_4] : memref<39x128xf32, #tpu.memory_space<vmem>>, vector<39x128xf32>
    %c0_5 = arith.constant 0 : index
    %3 = memref.load %arg1[%c0_5] : memref<6xf32, #tpu.memory_space<smem>>
    %c1 = arith.constant 1 : index
    %4 = memref.load %arg1[%c1] : memref<6xf32, #tpu.memory_space<smem>>
    %c2 = arith.constant 2 : index
    %5 = memref.load %arg1[%c2] : memref<6xf32, #tpu.memory_space<smem>>
    %c3 = arith.constant 3 : index
    %6 = memref.load %arg1[%c3] : memref<6xf32, #tpu.memory_space<smem>>
    %c4 = arith.constant 4 : index
    %7 = memref.load %arg1[%c4] : memref<6xf32, #tpu.memory_space<smem>>
    %c5 = arith.constant 5 : index
    %8 = memref.load %arg1[%c5] : memref<6xf32, #tpu.memory_space<smem>>
    %9 = vector.shape_cast %0 : vector<7x128xf32> to vector<7x1x128xf32>
    %10 = vector.broadcast %3 : f32 to vector<16x128xf32>
    %11 = arith.mulf %1, %10 : vector<16x128xf32>
    %12 = vector.shape_cast %11 : vector<16x128xf32> to vector<1x16x128xf32>
    %13 = vector.broadcast %9 : vector<7x1x128xf32> to vector<7x16x128xf32>
    %14 = vector.broadcast %12 : vector<1x16x128xf32> to vector<7x16x128xf32>
    %15 = arith.mulf %13, %14 : vector<7x16x128xf32>
    %cst = arith.constant dense<0xFF800000> : vector<16x128xf32>
    %16 = vector.multi_reduction <maximumf>, %15, %cst [0] : vector<7x16x128xf32> to vector<16x128xf32>
    %17 = vector.shape_cast %16 : vector<16x128xf32> to vector<1x16x128xf32>
    %18 = vector.broadcast %17 : vector<1x16x128xf32> to vector<7x16x128xf32>
    %19 = arith.subf %15, %18 : vector<7x16x128xf32>
    %20 = math.exp %19 : vector<7x16x128xf32>
    %cst_6 = arith.constant dense<0.000000e+00> : vector<16x128xf32>
    %21 = vector.multi_reduction <add>, %20, %cst_6 [0] : vector<7x16x128xf32> to vector<16x128xf32>
    %22 = tpu.reciprocal %21 {approx = true} : vector<16x128xf32> -> vector<16x128xf32>
    %23 = arith.mulf %1, %22 : vector<16x128xf32>
    %24 = vector.shape_cast %23 : vector<16x128xf32> to vector<1x16x128xf32>
    %25 = vector.broadcast %24 : vector<1x16x128xf32> to vector<7x16x128xf32>
    %26 = arith.mulf %20, %25 : vector<7x16x128xf32>
    %c0_7 = arith.constant 0 : index
    %c0_8 = arith.constant 0 : index
    %c0_9 = arith.constant 0 : index
    %27 = vector.load %arg5[%c0_7, %c0_8, %c0_9] : memref<7x16x1xf32, #tpu.memory_space<vmem>>, vector<7x16x1xf32>
    %28 = vector.broadcast %27 : vector<7x16x1xf32> to vector<7x16x128xf32>
    %29 = arith.mulf %26, %28 : vector<7x16x128xf32>
    %cst_10 = arith.constant dense<0.000000e+00> : vector<7x128xf32>
    %30 = vector.multi_reduction <add>, %29, %cst_10 [1] : vector<7x16x128xf32> to vector<7x128xf32>
    %31 = vector.broadcast %6 : f32 to vector<7x128xf32>
    %32 = arith.mulf %30, %31 : vector<7x128xf32>
    %c0_11 = arith.constant 0 : index
    %c0_12 = arith.constant 0 : index
    %33 = vector.load %arg11[%c0_11, %c0_12] : memref<128x128xf32, #tpu.memory_space<vmem>>, vector<7x128xf32>
    tpu.vector_store %arg11[%c0_11, %c0_12], %32 {strides = array<i32>} : memref<128x128xf32, #tpu.memory_space<vmem>>, vector<7x128xf32>,
    %34 = vector.shape_cast %0 : vector<7x128xf32> to vector<7x1x128xf32>
    %35 = vector.broadcast %4 : f32 to vector<39x128xf32>
    %36 = arith.mulf %2, %35 : vector<39x128xf32>
    %37 = vector.shape_cast %36 : vector<39x128xf32> to vector<1x39x128xf32>
    %38 = vector.broadcast %34 : vector<7x1x128xf32> to vector<7x39x128xf32>
    %39 = vector.broadcast %37 : vector<1x39x128xf32> to vector<7x39x128xf32>
    %40 = arith.mulf %38, %39 : vector<7x39x128xf32>
    %cst_13 = arith.constant dense<0xFF800000> : vector<39x128xf32>
    %41 = vector.multi_reduction <maximumf>, %40, %cst_13 [0] : vector<7x39x128xf32> to vector<39x128xf32>
    %42 = vector.shape_cast %41 : vector<39x128xf32> to vector<1x39x128xf32>
    %43 = vector.broadcast %42 : vector<1x39x128xf32> to vector<7x39x128xf32>
    %44 = arith.subf %40, %43 : vector<7x39x128xf32>
    %45 = math.exp %44 : vector<7x39x128xf32>
    %cst_14 = arith.constant dense<0.000000e+00> : vector<39x128xf32>
    %46 = vector.multi_reduction <add>, %45, %cst_14 [0] : vector<7x39x128xf32> to vector<39x128xf32>
    %47 = tpu.reciprocal %46 {approx = true} : vector<39x128xf32> -> vector<39x128xf32>
    %48 = arith.mulf %2, %47 : vector<39x128xf32>
    %49 = vector.shape_cast %48 : vector<39x128xf32> to vector<1x39x128xf32>
    %50 = vector.broadcast %49 : vector<1x39x128xf32> to vector<7x39x128xf32>
    %51 = arith.mulf %45, %50 : vector<7x39x128xf32>
    %c0_15 = arith.constant 0 : index
    %c0_16 = arith.constant 0 : index
    %c0_17 = arith.constant 0 : index
    %52 = vector.load %arg6[%c0_15, %c0_16, %c0_17] : memref<7x39x1xf32, #tpu.memory_space<vmem>>, vector<7x39x1xf32>
    %53 = vector.broadcast %52 : vector<7x39x1xf32> to vector<7x39x128xf32>
    %54 = arith.mulf %51, %53 : vector<7x39x128xf32>
    %cst_18 = arith.constant dense<0.000000e+00> : vector<7x128xf32>
    %55 = vector.multi_reduction <add>, %54, %cst_18 [1] : vector<7x39x128xf32> to vector<7x128xf32>
    %56 = vector.broadcast %6 : f32 to vector<7x128xf32>
    %57 = arith.mulf %55, %56 : vector<7x128xf32>
    %c8 = arith.constant 8 : index
    %c0_19 = arith.constant 0 : index
    %58 = vector.load %arg11[%c8, %c0_19] : memref<128x128xf32, #tpu.memory_space<vmem>>, vector<7x128xf32>
    tpu.vector_store %arg11[%c8, %c0_19], %57 {strides = array<i32>} : memref<128x128xf32, #tpu.memory_space<vmem>>, vector<7x128xf32>,
    %59 = vector.shape_cast %1 : vector<16x128xf32> to vector<16x1x128xf32>
    %60 = vector.broadcast %3 : f32 to vector<7x128xf32>
    %61 = arith.mulf %0, %60 : vector<7x128xf32>
    %62 = vector.shape_cast %61 : vector<7x128xf32> to vector<1x7x128xf32>
    %63 = vector.broadcast %59 : vector<16x1x128xf32> to vector<16x7x128xf32>
    %64 = vector.broadcast %62 : vector<1x7x128xf32> to vector<16x7x128xf32>
    %65 = arith.mulf %63, %64 : vector<16x7x128xf32>
    %cst_20 = arith.constant dense<0xFF800000> : vector<7x128xf32>
    %66 = vector.multi_reduction <maximumf>, %65, %cst_20 [0] : vector<16x7x128xf32> to vector<7x128xf32>
    %67 = vector.shape_cast %66 : vector<7x128xf32> to vector<1x7x128xf32>
    %68 = vector.broadcast %67 : vector<1x7x128xf32> to vector<16x7x128xf32>
    %69 = arith.subf %65, %68 : vector<16x7x128xf32>
    %70 = math.exp %69 : vector<16x7x128xf32>
    %cst_21 = arith.constant dense<0.000000e+00> : vector<7x128xf32>
    %71 = vector.multi_reduction <add>, %70, %cst_21 [0] : vector<16x7x128xf32> to vector<7x128xf32>
    %72 = tpu.reciprocal %71 {approx = true} : vector<7x128xf32> -> vector<7x128xf32>
    %73 = arith.mulf %0, %72 : vector<7x128xf32>
    %74 = vector.shape_cast %73 : vector<7x128xf32> to vector<1x7x128xf32>
    %75 = vector.broadcast %74 : vector<1x7x128xf32> to vector<16x7x128xf32>
    %76 = arith.mulf %70, %75 : vector<16x7x128xf32>
    %c0_22 = arith.constant 0 : index
    %c0_23 = arith.constant 0 : index
    %c0_24 = arith.constant 0 : index
    %77 = vector.load %arg7[%c0_22, %c0_23, %c0_24] : memref<16x7x1xf32, #tpu.memory_space<vmem>>, vector<16x7x1xf32>
    %78 = vector.broadcast %77 : vector<16x7x1xf32> to vector<16x7x128xf32>
    %79 = arith.mulf %76, %78 : vector<16x7x128xf32>
    %cst_25 = arith.constant dense<0.000000e+00> : vector<16x128xf32>
    %80 = vector.multi_reduction <add>, %79, %cst_25 [1] : vector<16x7x128xf32> to vector<16x128xf32>
    %81 = vector.broadcast %7 : f32 to vector<16x128xf32>
    %82 = arith.mulf %80, %81 : vector<16x128xf32>
    %c16 = arith.constant 16 : index
    %c0_26 = arith.constant 0 : index
    %83 = vector.load %arg11[%c16, %c0_26] : memref<128x128xf32, #tpu.memory_space<vmem>>, vector<16x128xf32>
    tpu.vector_store %arg11[%c16, %c0_26], %82 {strides = array<i32>} : memref<128x128xf32, #tpu.memory_space<vmem>>, vector<16x128xf32>,
    %84 = vector.shape_cast %1 : vector<16x128xf32> to vector<16x1x128xf32>
    %85 = vector.broadcast %5 : f32 to vector<39x128xf32>
    %86 = arith.mulf %2, %85 : vector<39x128xf32>
    %87 = vector.shape_cast %86 : vector<39x128xf32> to vector<1x39x128xf32>
    %88 = vector.broadcast %84 : vector<16x1x128xf32> to vector<16x39x128xf32>
    %89 = vector.broadcast %87 : vector<1x39x128xf32> to vector<16x39x128xf32>
    %90 = arith.mulf %88, %89 : vector<16x39x128xf32>
    %cst_27 = arith.constant dense<0xFF800000> : vector<39x128xf32>
    %91 = vector.multi_reduction <maximumf>, %90, %cst_27 [0] : vector<16x39x128xf32> to vector<39x128xf32>
    %92 = vector.shape_cast %91 : vector<39x128xf32> to vector<1x39x128xf32>
    %93 = vector.broadcast %92 : vector<1x39x128xf32> to vector<16x39x128xf32>
    %94 = arith.subf %90, %93 : vector<16x39x128xf32>
    %95 = math.exp %94 : vector<16x39x128xf32>
    %cst_28 = arith.constant dense<0.000000e+00> : vector<39x128xf32>
    %96 = vector.multi_reduction <add>, %95, %cst_28 [0] : vector<16x39x128xf32> to vector<39x128xf32>
    %97 = tpu.reciprocal %96 {approx = true} : vector<39x128xf32> -> vector<39x128xf32>
    %98 = arith.mulf %2, %97 : vector<39x128xf32>
    %99 = vector.shape_cast %98 : vector<39x128xf32> to vector<1x39x128xf32>
    %100 = vector.broadcast %99 : vector<1x39x128xf32> to vector<16x39x128xf32>
    %101 = arith.mulf %95, %100 : vector<16x39x128xf32>
    %c0_29 = arith.constant 0 : index
    %c0_30 = arith.constant 0 : index
    %c0_31 = arith.constant 0 : index
    %102 = vector.load %arg8[%c0_29, %c0_30, %c0_31] : memref<16x39x1xf32, #tpu.memory_space<vmem>>, vector<16x39x1xf32>
    %103 = vector.broadcast %102 : vector<16x39x1xf32> to vector<16x39x128xf32>
    %104 = arith.mulf %101, %103 : vector<16x39x128xf32>
    %cst_32 = arith.constant dense<0.000000e+00> : vector<16x128xf32>
    %105 = vector.multi_reduction <add>, %104, %cst_32 [1] : vector<16x39x128xf32> to vector<16x128xf32>
    %106 = vector.broadcast %7 : f32 to vector<16x128xf32>
    %107 = arith.mulf %105, %106 : vector<16x128xf32>
    %c32 = arith.constant 32 : index
    %c0_33 = arith.constant 0 : index
    %108 = vector.load %arg11[%c32, %c0_33] : memref<128x128xf32, #tpu.memory_space<vmem>>, vector<16x128xf32>
    tpu.vector_store %arg11[%c32, %c0_33], %107 {strides = array<i32>} : memref<128x128xf32, #tpu.memory_space<vmem>>, vector<16x128xf32>,
    %109 = vector.shape_cast %2 : vector<39x128xf32> to vector<39x1x128xf32>
    %110 = vector.broadcast %4 : f32 to vector<7x128xf32>
    %111 = arith.mulf %0, %110 : vector<7x128xf32>
    %112 = vector.shape_cast %111 : vector<7x128xf32> to vector<1x7x128xf32>
    %113 = vector.broadcast %109 : vector<39x1x128xf32> to vector<39x7x128xf32>
    %114 = vector.broadcast %112 : vector<1x7x128xf32> to vector<39x7x128xf32>
    %115 = arith.mulf %113, %114 : vector<39x7x128xf32>
    %cst_34 = arith.constant dense<0xFF800000> : vector<7x128xf32>
    %116 = vector.multi_reduction <maximumf>, %115, %cst_34 [0] : vector<39x7x128xf32> to vector<7x128xf32>
    %117 = vector.shape_cast %116 : vector<7x128xf32> to vector<1x7x128xf32>
    %118 = vector.broadcast %117 : vector<1x7x128xf32> to vector<39x7x128xf32>
    %119 = arith.subf %115, %118 : vector<39x7x128xf32>
    %120 = math.exp %119 : vector<39x7x128xf32>
    %cst_35 = arith.constant dense<0.000000e+00> : vector<7x128xf32>
    %121 = vector.multi_reduction <add>, %120, %cst_35 [0] : vector<39x7x128xf32> to vector<7x128xf32>
    %122 = tpu.reciprocal %121 {approx = true} : vector<7x128xf32> -> vector<7x128xf32>
    %123 = arith.mulf %0, %122 : vector<7x128xf32>
    %124 = vector.shape_cast %123 : vector<7x128xf32> to vector<1x7x128xf32>
    %125 = vector.broadcast %124 : vector<1x7x128xf32> to vector<39x7x128xf32>
    %126 = arith.mulf %120, %125 : vector<39x7x128xf32>
    %c0_36 = arith.constant 0 : index
    %c0_37 = arith.constant 0 : index
    %c0_38 = arith.constant 0 : index
    %127 = vector.load %arg9[%c0_36, %c0_37, %c0_38] : memref<39x7x1xf32, #tpu.memory_space<vmem>>, vector<39x7x1xf32>
    %128 = vector.broadcast %127 : vector<39x7x1xf32> to vector<39x7x128xf32>
    %129 = arith.mulf %126, %128 : vector<39x7x128xf32>
    %cst_39 = arith.constant dense<0.000000e+00> : vector<39x128xf32>
    %130 = vector.multi_reduction <add>, %129, %cst_39 [1] : vector<39x7x128xf32> to vector<39x128xf32>
    %131 = vector.broadcast %8 : f32 to vector<39x128xf32>
    %132 = arith.mulf %130, %131 : vector<39x128xf32>
    %c48 = arith.constant 48 : index
    %c0_40 = arith.constant 0 : index
    %133 = vector.load %arg11[%c48, %c0_40] : memref<128x128xf32, #tpu.memory_space<vmem>>, vector<39x128xf32>
    tpu.vector_store %arg11[%c48, %c0_40], %132 {strides = array<i32>} : memref<128x128xf32, #tpu.memory_space<vmem>>, vector<39x128xf32>,
    %134 = vector.shape_cast %2 : vector<39x128xf32> to vector<39x1x128xf32>
    %135 = vector.broadcast %5 : f32 to vector<16x128xf32>
    %136 = arith.mulf %1, %135 : vector<16x128xf32>
    %137 = vector.shape_cast %136 : vector<16x128xf32> to vector<1x16x128xf32>
    %138 = vector.broadcast %134 : vector<39x1x128xf32> to vector<39x16x128xf32>
    %139 = vector.broadcast %137 : vector<1x16x128xf32> to vector<39x16x128xf32>
    %140 = arith.mulf %138, %139 : vector<39x16x128xf32>
    %cst_41 = arith.constant dense<0xFF800000> : vector<16x128xf32>
    %141 = vector.multi_reduction <maximumf>, %140, %cst_41 [0] : vector<39x16x128xf32> to vector<16x128xf32>
    %142 = vector.shape_cast %141 : vector<16x128xf32> to vector<1x16x128xf32>
    %143 = vector.broadcast %142 : vector<1x16x128xf32> to vector<39x16x128xf32>
    %144 = arith.subf %140, %143 : vector<39x16x128xf32>
    %145 = math.exp %144 : vector<39x16x128xf32>
    %cst_42 = arith.constant dense<0.000000e+00> : vector<16x128xf32>
    %146 = vector.multi_reduction <add>, %145, %cst_42 [0] : vector<39x16x128xf32> to vector<16x128xf32>
    %147 = tpu.reciprocal %146 {approx = true} : vector<16x128xf32> -> vector<16x128xf32>
    %148 = arith.mulf %1, %147 : vector<16x128xf32>
    %149 = vector.shape_cast %148 : vector<16x128xf32> to vector<1x16x128xf32>
    %150 = vector.broadcast %149 : vector<1x16x128xf32> to vector<39x16x128xf32>
    %151 = arith.mulf %145, %150 : vector<39x16x128xf32>
    %c0_43 = arith.constant 0 : index
    %c0_44 = arith.constant 0 : index
    %c0_45 = arith.constant 0 : index
    %152 = vector.load %arg10[%c0_43, %c0_44, %c0_45] : memref<39x16x1xf32, #tpu.memory_space<vmem>>, vector<39x16x1xf32>
    %153 = vector.broadcast %152 : vector<39x16x1xf32> to vector<39x16x128xf32>
    %154 = arith.mulf %151, %153 : vector<39x16x128xf32>
    %cst_46 = arith.constant dense<0.000000e+00> : vector<39x128xf32>
    %155 = vector.multi_reduction <add>, %154, %cst_46 [1] : vector<39x16x128xf32> to vector<39x128xf32>
    %156 = vector.broadcast %8 : f32 to vector<39x128xf32>
    %157 = arith.mulf %155, %156 : vector<39x128xf32>
    %c88 = arith.constant 88 : index
    %c0_47 = arith.constant 0 : index
    %158 = vector.load %arg11[%c88, %c0_47] : memref<128x128xf32, #tpu.memory_space<vmem>>, vector<39x128xf32>
    tpu.vector_store %arg11[%c88, %c0_47], %157 {strides = array<i32>} : memref<128x128xf32, #tpu.memory_space<vmem>>, vector<39x128xf32>,
    return
  }
  func.func @transform_0(%arg0: i32) -> i32 {
    %c0_i32 = arith.constant 0 : i32
    %c0_i32_0 = arith.constant 0 : i32
    return %c0_i32 : i32
  }
  func.func @transform_1(%arg0: i32) -> (i32, i32) {
    %c0_i32 = arith.constant 0 : i32
    %c0_i32_0 = arith.constant 0 : i32
    return %c0_i32, %arg0 : i32, i32
  }
  func.func @transform_2(%arg0: i32) -> (i32, i32) {
    %c0_i32 = arith.constant 0 : i32
    %c0_i32_0 = arith.constant 0 : i32
    return %c0_i32, %arg0 : i32, i32
  }
  func.func @transform_3(%arg0: i32) -> (i32, i32) {
    %c0_i32 = arith.constant 0 : i32
    %c0_i32_0 = arith.constant 0 : i32
    return %c0_i32, %arg0 : i32, i32
  }
  func.func @transform_4(%arg0: i32) -> (i32, i32, i32) {
    %c0_i32 = arith.constant 0 : i32
    %c0_i32_0 = arith.constant 0 : i32
    %c0_i32_1 = arith.constant 0 : i32
    %c0_i32_2 = arith.constant 0 : i32
    return %c0_i32, %c0_i32_0, %c0_i32_1 : i32, i32, i32
  }
  func.func @transform_5(%arg0: i32) -> (i32, i32, i32) {
    %c0_i32 = arith.constant 0 : i32
    %c0_i32_0 = arith.constant 0 : i32
    %c0_i32_1 = arith.constant 0 : i32
    %c0_i32_2 = arith.constant 0 : i32
    return %c0_i32, %c0_i32_0, %c0_i32_1 : i32, i32, i32
  }
  func.func @transform_6(%arg0: i32) -> (i32, i32, i32) {
    %c0_i32 = arith.constant 0 : i32
    %c0_i32_0 = arith.constant 0 : i32
    %c0_i32_1 = arith.constant 0 : i32
    %c0_i32_2 = arith.constant 0 : i32
    return %c0_i32, %c0_i32_0, %c0_i32_1 : i32, i32, i32
  }
  func.func @transform_7(%arg0: i32) -> (i32, i32, i32) {
    %c0_i32 = arith.constant 0 : i32
    %c0_i32_0 = arith.constant 0 : i32
    %c0_i32_1 = arith.constant 0 : i32
    %c0_i32_2 = arith.constant 0 : i32
    return %c0_i32, %c0_i32_0, %c0_i32_1 : i32, i32, i32
  }
  func.func @transform_8(%arg0: i32) -> (i32, i32, i32) {
    %c0_i32 = arith.constant 0 : i32
    %c0_i32_0 = arith.constant 0 : i32
    %c0_i32_1 = arith.constant 0 : i32
    %c0_i32_2 = arith.constant 0 : i32
    return %c0_i32, %c0_i32_0, %c0_i32_1 : i32, i32, i32
  }
  func.func @transform_9(%arg0: i32) -> (i32, i32, i32) {
    %c0_i32 = arith.constant 0 : i32
    %c0_i32_0 = arith.constant 0 : i32
    %c0_i32_1 = arith.constant 0 : i32
    %c0_i32_2 = arith.constant 0 : i32
    return %c0_i32, %c0_i32_0, %c0_i32_1 : i32, i32, i32
  }
  func.func @transform_10(%arg0: i32) -> (i32, i32) {
    %c0_i32 = arith.constant 0 : i32
    %c0_i32_0 = arith.constant 0 : i32
    return %c0_i32, %arg0 : i32, i32
  }
}

</mosaic_0001>

<bundles_post_ra>
// kernel: tpu_custom_call.1
= control target key start
LH: loop header
LB: loop body
LE: loop exit
PB: predicated region body
PF: predicated region fallthrough
CT: control target
= control target key end

     0   :  { %15 = vsyncpa [#allocation4], 0  ;;  %s12812_s0 = inlined_call_operand.vmem [shape: f32[6], index: 0, kind: input, shape index: {}]   ;;  %s12813_s1 = inlined_call_operand.vmem [shape: f32[7,128], index: 1, kind: input, shape index: {}]   ;;  %s12814_s2 = inlined_call_operand.vmem [shape: f32[16,128], index: 2, kind: input, shape index: {}]   ;;  %s12815_s3 = inlined_call_operand.vmem [shape: f32[39,128], index: 3, kind: input, shape index: {}]   ;;  %s12816_s4 = inlined_call_operand.vmem [shape: f32[7,16,1], index: 4, kind: input, shape index: {}]   ;;  %s12817_s5 = inlined_call_operand.vmem [shape: f32[7,39,1], index: 5, kind: input, shape index: {}]   ;;  %s12818_s6 = inlined_call_operand.vmem [shape: f32[16,7,1], index: 6, kind: input, shape index: {}]   ;;  %s12819_s7 = inlined_call_operand.vmem [shape: f32[16,39,1], index: 7, kind: input, shape index: {}]   ;;  %s12820_s8 = inlined_call_operand.vmem [shape: f32[39,7,1], index: 8, kind: input, shape index: {}]   ;;  %s12821_s9 = inlined_call_operand.vmem [shape: f32[39,16,1], index: 9, kind: input, shape index: {}]   ;;  %s12822_s10 = inlined_call_operand.hbm [shape: f32[128,128], index: 10, kind: output, shape index: {}]  }
   0x1   :  { %16 = vsyncpa [#allocation3], 0  ;;  %s23_s15 = sshll.u32 %s12812_s0, 4  ;;  %s24_s15 = int_to_ptr.vmem [resolvable:$true] %s23_s15 }
   0x2   :  { %s6584_s16 = scalar_lea.vmem %s24_s15, 16  ;;  %p6589_p1 = scmp.lt.s32.totalorder %s24_s15, %s24_s15 }
   0x3   :  { %p6585_p0 = scmp.ne.s32.totalorder %s24_s15, %s6584_s16  ;;  %p6590_p2 = scmp.lt.s32.totalorder %s6584_s16, %s6584_s16 }
   0x5   :  { %p6591_p3 = por %p6590_p2, %p6589_p1 }
   0x7   :  { %p6592_p4 = pnand %p6591_p3, %p6585_p0 }
   0x9   :  { %6595 = shalt.err (!%p6592_p4)
}
   0xa   :  { %s6622_s17 = smov [#allocation2]  }
   0xb   :  { %26 = dma.vmem_to_smem %s24_s15, 16, %s6622_s17, [#allocation4]  }
   0xc   :  { %6618 = dma.done.wait [#allocation4], 16  }
   0xd   :  { %6619 = vsyncadd [#allocation4], 4294967280 }
   0xe   :  { %48 = sfence }
   0xf   :  { %v250_v0 = vld [vmem:[%s12816_s4 + $0x10] sm:$0xff]  ;;  %v248_v1 = vld [vmem:[%s12816_s4] sm:$0xff]  ;;  %v6623_v2 = vmov 0   ;;  %v251_v3 = vld [vmem:[%s12816_s4 + $0x18] sm:$0xff]  ;;  %v6624_v7 = vmov 1966171168   ;;  %v68_v9 = vlaneseq }
  0x10   :  { %6002 = vset.pattern.permute.xlu1 %v6623_v2  ;;  %6001 = vset.pattern.permute.xlu0 %v6623_v2  ;;  %v249_v4 = vld [vmem:[%s12816_s4 + $0x8] sm:$0xff]  ;;  %v252_v6 = vld [vmem:[%s12816_s4 + $0x20] sm:$0xff]  ;;  %v66_v8 = vunpack.c.l.s4 %v6624_v7  ;;  %v255_v10 = vld [vmem:[%s12816_s4 + $0x38] sm:$0xff]  ;;  %s57_s13 = sld [smem:[#allocation2]]  ;;  %s6743_s27 = sld [smem:[#allocation2 + $0x1]]  ;;  %vm489_vm0 = vcmask 1046528  }
  0x11   :  { %274 = vperm.xlu1 %6002, %v250_v0   ;;  %264 = vperm.xlu0 %6001, %v248_v1   ;;  %v253_v5 = vld [vmem:[%s12816_s4 + $0x28] sm:$0xff]  ;;  %v254_v11 = vld [vmem:[%s12816_s4 + $0x30] sm:$0xff]  ;;  %v69_v13 = vshrl.u32 %v68_v9, 7  ;;  %v256_v15 = vld [vmem:[%s12816_s4 + $0x40] sm:$0xff]  ;;  %s7512_s20 = sld [smem:[#allocation2 + $0x3]]  ;;  %s7787_s22 = sld [smem:[#allocation2 + $0x2]] }
  0x12   :  { %v67_v12 = vunpack.c.0.s8 %v66_v8  ;;  %v257_v14 = vld [vmem:[%s12816_s4 + $0x48] sm:$0xff]  ;;  %v259_v17 = vld [vmem:[%s12816_s4 + $0x58] sm:$0xff]  ;;  %v258_v18 = vld [vmem:[%s12816_s4 + $0x50] sm:$0xff]  ;;  %vm410_vm1 = vcmask 1041409   ;;  %s7830_s30 = sld [smem:[#allocation2 + $0x4]]  ;;  %vm412_vm2 = vcmask 1042434  }
  0x13   :  { %v6727_v19 = vld [vmem:[%s12813_s1] sm:$0x7f]  ;;  %v6741_v24 = vld [vmem:[%s12814_s2 + $0x8] sm:$0xff]  ;;  %v6751_v27 = vsub.s32 0, %v69_v13  ;;  %v693_v59 = vld [vmem:[%s12817_s5 + $0x18] sm:$0xff]  ;;  %vm414_vm3 = vcmask 1043459  }
  0x14   :  { %v6716_v16 = vsub.s32 %v67_v12, %v69_v13  ;;  %v6732_v20 = vld [vmem:[%s12814_s2] sm:$0xff]  ;;  %v64_v22 = vcombine.high %v6727_v19, %v6727_v19  ;;  %v261_v25 = vld [vmem:[%s12816_s4 + $0x68] sm:$0xff]  ;;  %v692_v60 = vld [vmem:[%s12817_s5 + $0x10] sm:$0xff]  ;;  %vm416_vm4 = vcmask 1044484   ;;  %vm418_vm5 = vcmask 1045509  }
  0x15   :  { %279 = vperm.xlu1 %6002, %v251_v3   ;;  %269 = vperm.xlu0 %6001, %v249_v4   ;;  %v260_v26 = vld [vmem:[%s12816_s4 + $0x60] sm:$0xff]  ;;  %13274 = vst [vmem:[#allocation9_spill] sm:$0xff] %v6751_v27  ;;  %v1036_v28 = vcombine.high %v6732_v20, %v6732_v20  ;;  %v691_v41 = vld [vmem:[%s12817_s5 + $0x8] sm:$0xff]  ;;  %vm420_vm6 = vcmask 1046534   ;;  %vm1622_vm7 = vcmask 1047559  }
  0x16   :  { %13273 = vst [vmem:[#allocation8_spill] sm:$0xff] %v6716_v16  ;;  %v112_v21 = vstv %s57_s13  ;;  %v71_v23 = vrot.slane %v6727_v19, %v6716_v16  ;;  %v6757_v29 = vrot.slane %v6732_v20, %v6716_v16  ;;  %v78_v30 = vrot.slane %v64_v22, %v6716_v16  ;;  %v690_v42 = vld [vmem:[%s12817_s5] sm:$0xff] }
  0x17   :  { %v113_v33 = vmul.f32 %v112_v21, %v6732_v20  ;;  %v114_v34 = vmul.f32 %v112_v21, %v6741_v24  ;;  %v6764_v35 = vmul.f32 %v112_v21, %v6727_v19  ;;  %v6767_v36 = vrot.slane %v1036_v28, %v6716_v16 }
  0x18   :  { %v79_v31 = vcombine.high %v71_v23, %v71_v23  ;;  %v87_v32 = vrot.slane %v71_v23, %v6716_v16  ;;  %v80_v38 = vcombine.high %v78_v30, %v78_v30  ;;  %v94_v39 = vrot.slane %v78_v30, %v6716_v16  ;;  %v54_v23 = vld [vmem:[%s12815_s3 + $0x10] sm:$0xff] }
  0x19   :  { %289 = vperm.xlu1 %6002, %v253_v5   ;;  %284 = vperm.xlu0 %6001, %v252_v6   ;;  %13275 = vst [vmem:[#allocation10_spill] sm:$0xff] %v6764_v35  ;;  %13276 = vst [vmem:[#allocation11_spill] sm:$0xff] %v6767_v36  ;;  %v6784_v45 = vrot.slane %v6757_v29, %v6716_v16  ;;  %v6814_v58 = vstv %s6743_s27  ;;  %v6843_v5 = vld [vmem:[%s12815_s3 + $0x8] sm:$0xff] }
  0x1a   :  { %v101_v40 = vrot.slane %v79_v31, %v6716_v16  ;;  %v109_v43 = vcombine.high %v87_v32, %v87_v32  ;;  %v6780_v44 = vrot.slane %v87_v32, %v6751_v27  ;;  %v108_v47 = vrot.slane %v80_v38, %v6716_v16  ;;  %13278 = vst [vmem:[#allocation13_spill] sm:$0xff] %v6843_v5 }
  0x1b   :  { %13277 = vst [vmem:[#allocation12_spill] sm:$0xff] %v6784_v45  ;;  %v110_v48 = vcombine.high %v94_v39, %v94_v39  ;;  %v6796_v52 = vrot.slane %v94_v39, %v6751_v27  ;;  %v426_v22 = vmul.f32 %v6814_v58, %v6843_v5  ;;  %v6894_v31 = vrot.slane %v6767_v36, %v6716_v16 }
  0x1c   :  { %v111_v49 = vcombine.high %v101_v40, %v101_v40  ;;  %v6790_v50 = vrot.slane %v101_v40, %v6751_v27  ;;  %v6793_v51 = vrot.slane %v109_v43, %v6751_v27  ;;  %v6799_v53 = vmul.f32 %v6780_v44, %v113_v33  ;;  %v696_v43 = vld [vmem:[%s12817_s5 + $0x30] sm:$0xff] }
  0x1d   :  { %299 = vperm.xlu1 %6002, %v255_v10   ;;  %294 = vperm.xlu0 %6001, %v254_v11   ;;  %v6802_v54 = vmul.f32 %v6780_v44, %v114_v34  ;;  %v6808_v56 = vrot.slane %v108_v47, %v6751_v27  ;;  %v6811_v57 = vrot.slane %v110_v48, %v6751_v27  ;;  %v6858_v10 = vld [vmem:[%s12815_s3] sm:$0xff] }
  0x1e   :  { %v6805_v55 = vrot.slane %v111_v49, %v6751_v27  ;;  %v152_v61 = vmul.f32 %v6790_v50, %v113_v33  ;;  %v154_v62 = vmul.f32 %v6793_v51, %v113_v33  ;;  %v6825_v63 = vmul.f32 %v6796_v52, %v113_v33  ;;  %13279 = vst [vmem:[#allocation14_spill] sm:$0xff] %v6858_v10 }
  0x1f   :  { %v6828_v0 = vmul.f32 %v6790_v50, %v114_v34  ;;  %v6832_v2 = vmul.f32 %v6808_v56, %v113_v33  ;;  %v6835_v3 = vmul.f32 %v6811_v57, %v113_v33  ;;  %v6838_v4 = vmul.f32 %v6793_v51, %v114_v34  ;;  %13281 = vst [vmem:[#allocation16_spill] sm:$0xff] %v6894_v31 }
  0x20   :  { %v156_v1 = vmul.f32 %v6805_v55, %v113_v33  ;;  %v164_v6 = vmax.f32 %v6799_v53, %v154_v62  ;;  %v6847_v7 = vmul.f32 %v6805_v55, %v114_v34  ;;  %v6850_v8 = vmul.f32 %v6796_v52, %v114_v34 }
  0x21   :  { %309 = vperm.xlu1 %6002, %v257_v14   ;;  %304 = vperm.xlu0 %6001, %v256_v15   ;;  %v6853_v9 = vmul.f32 %v6808_v56, %v114_v34  ;;  %v6861_v12 = vmul.f32 %v6811_v57, %v114_v34  ;;  %v170_v13 = vmax.f32 %v6802_v54, %v6838_v4  ;;  %v6868_v14 = vld [vmem:[%s12815_s3 + $0x18] sm:$0xff]  ;;  %v695_v15 = vld [vmem:[%s12817_s5 + $0x28] sm:$0xff] }
  0x22   :  { %v165_v11 = vmax.f32 %v152_v61, %v156_v1  ;;  %13280 = vst [vmem:[#allocation15_spill] sm:$0xff] %v6868_v14  ;;  %v171_v21 = vmax.f32 %v6828_v0, %v6847_v7  ;;  %v6890_v30 = vmul.f32 %v6814_v58, %v6858_v10  ;;  %v6899_v34 = vmul.f32 %v426_v22, %v6780_v44 }
  0x23   :  { %v172_v28 = vmax.f32 %v170_v13, %v6850_v8  ;;  %v6903_v38 = vmul.f32 %v6814_v58, %v6868_v14  ;;  %v6907_v40 = vmul.f32 %v426_v22, %v6790_v50  ;;  %v6919_v48 = vmul.f32 %v426_v22, %v6793_v51 }
  0x24   :  { %v173_v33 = vmax.f32 %v171_v21, %v6853_v9  ;;  %v6922_v49 = vmul.f32 %v426_v22, %v6805_v55 }
  0x25   :  { %319 = vperm.xlu1 %6002, %v259_v17   ;;  %314 = vperm.xlu0 %6001, %v258_v18   ;;  %v694_v17 = vld [vmem:[%s12817_s5 + $0x20] sm:$0x7f]  ;;  %v166_v18 = vmax.f32 %v164_v6, %v6825_v63  ;;  %v174_v39 = vmax.f32 %v172_v28, %v6861_v12  ;;  %v6928_v6 = vmul.f32 %v426_v22, %v6808_v56 }
  0x26   :  { %v471_v13 = vmax.f32 %v6899_v34, %v6907_v40 }
  0x27   :  { %v168_v32 = vmax.f32 %v166_v18, %v6835_v3 }
  0x29   :  { %329 = vperm.xlu1 %6002, %v261_v25   ;;  %324 = vperm.xlu0 %6001, %v260_v26   ;;  %v167_v26 = vmax.f32 %v165_v11, %v6832_v2  ;;  %v6931_v11 = vmul.f32 %v426_v22, %v6811_v57 }
  0x2b   :  { %v169_v47 = vmax.f32 %v168_v32, %v167_v26  ;;  %v698_v26 = vld [vmem:[%s12817_s5 + $0x40] sm:$0xff] }
  0x2d   :  { %732 = vperm.xlu1 %6002, %v691_v41   ;;  %727 = vperm.xlu0 %6001, %v690_v42   ;;  %v6910_v41 = vmul.f32 %v6814_v58, %v54_v23  ;;  %v697_v42 = vld [vmem:[%s12817_s5 + $0x38] sm:$0xff]  ;;  %v180_v18 = vsub.f32 %v154_v62, %v169_v47  ;;  %v182_v21 = vsub.f32 %v156_v1, %v169_v47  ;;  %v699_v23 = vld [vmem:[%s12817_s5 + $0x48] sm:$0x7f] }
  0x2e   :  { %v186_v28 = vsub.f32 %v6832_v2, %v169_v47  ;;  %v188_v32 = vsub.f32 %v6835_v3, %v169_v47 }
  0x2f   :  { %v198_v62 = vmul.f32 1.442695, %v180_v18 }
  0x30   :  { %v210_v46 = vmul.f32 1.442695, %v186_v28  ;;  %v6965_v28 = vmul.f32 %v6890_v30, %v6790_v50 }
  0x31   :  { %742 = vperm.xlu1 %6002, %v693_v59   ;;  %737 = vperm.xlu0 %6001, %v692_v60   ;;  %v6925_v59 = vmul.f32 %v426_v22, %v6796_v52  ;;  %v175_v60 = vmax.f32 %v174_v39, %v173_v33  ;;  %v184_v22 = vsub.f32 %v6825_v63, %v169_v47  ;;  %v202_v33 = vmul.f32 1.442695, %v182_v21 }
  0x33   :  { %v177_v1 = vsub.f32 %v6802_v54, %v175_v60  ;;  %v206_v39 = vmul.f32 1.442695, %v184_v22  ;;  %v181_v63 = vsub.f32 %v6838_v4, %v175_v60  ;;  %v183_v2 = vsub.f32 %v6847_v7, %v175_v60  ;;  %v701_v54 = vld [vmem:[%s12817_s5 + $0x58] sm:$0xff] }
  0x34   :  { %v185_v3 = vsub.f32 %v6850_v8, %v175_v60  ;;  %v214_v4 = vmul.f32 1.442695, %v188_v32  ;;  %v472_v22 = vmax.f32 %v471_v13, %v6919_v48  ;;  %v702_v13 = vld [vmem:[%s12817_s5 + $0x60] sm:$0xff]  ;;  %v6984_v32 = vmul.f32 %v6890_v30, %v6796_v52 }
  0x35   :  { %752 = vperm.xlu1 %6002, %v695_v15   ;;  %747 = vperm.xlu0 %6001, %v694_v17   ;;  %v176_v15 = vsub.f32 %v6799_v53, %v169_v47  ;;  %v178_v17 = vsub.f32 %v152_v61, %v169_v47  ;;  %v187_v47 = vsub.f32 %v6853_v9, %v175_v60  ;;  %v192_v7 = vmul.f32 1.442695, %v177_v1 }
  0x36   :  { %v200_v18 = vmul.f32 1.442695, %v181_v63  ;;  %v204_v21 = vmul.f32 1.442695, %v183_v2  ;;  %v6969_v9 = vmul.f32 %v6890_v30, %v6793_v51  ;;  %v6998_v1 = vmul.f32 %v6903_v38, %v6790_v50 }
  0x37   :  { %v190_v53 = vmul.f32 1.442695, %v176_v15  ;;  %v194_v61 = vmul.f32 1.442695, %v178_v17  ;;  %v189_v15 = vsub.f32 %v6861_v12, %v175_v60  ;;  %v6973_v12 = vmul.f32 %v6890_v30, %v6805_v55 }
  0x38   :  { %v7012_v2 = vmul.f32 %v6903_v38, %v6805_v55 }
  0x39   :  { %762 = vperm.xlu1 %6002, %v697_v42   ;;  %757 = vperm.xlu0 %6001, %v696_v43   ;;  %v179_v42 = vsub.f32 %v6828_v0, %v175_v60  ;;  %v6949_v43 = vmul.f32 %v6890_v30, %v6780_v44  ;;  %6011 = vpow2.f32 %v190_v53  ;;  %v700_v0 = vld [vmem:[%s12817_s5 + $0x50] sm:$0xff]  ;;  %v216_v8 = vmul.f32 1.442695, %v189_v15  ;;  %v703_v60 = vld [vmem:[%s12817_s5 + $0x68] sm:$0xff] }
  0x3a   :  { %6013 = vpow2.f32 %v194_v61  ;;  %v6988_v53 = vmul.f32 %v6890_v30, %v6808_v56  ;;  %v7029_v15 = vmul.f32 %v6903_v38, %v6808_v56 }
  0x3b   :  { %6015 = vpow2.f32 %v198_v62  ;;  %v196_v17 = vmul.f32 1.442695, %v179_v42  ;;  %v465_v61 = vmax.f32 %v6949_v43, %v6965_v28  ;;  %v6994_v62 = vmul.f32 %v6903_v38, %v6780_v44 }
  0x3c   :  { %6017 = vpow2.f32 %v202_v33  ;;  %v7007_v42 = vmul.f32 %v6903_v38, %v6793_v51 }
  0x3d   :  { %772 = vperm.xlu1 %6002, %v699_v23   ;;  %767 = vperm.xlu0 %6001, %v698_v26   ;;  %v208_v23 = vmul.f32 1.442695, %v185_v3  ;;  %6019 = vpow2.f32 %v206_v39  ;;  %v212_v26 = vmul.f32 1.442695, %v187_v47  ;;  %v7003_v39 = vmul.f32 %v6890_v30, %v6811_v57  ;;  %v705_v30 = vld [vmem:[%s12817_s5 + $0x78] sm:$0xff] }
  0x3e   :  { %6021 = vpow2.f32 %v210_v46  ;;  %v473_v46 = vmax.f32 %v472_v22, %v6922_v49  ;;  %v466_v63 = vmax.f32 %v465_v61, %v6969_v9  ;;  %v704_v3 = vld [vmem:[%s12817_s5 + $0x70] sm:$0x7f]  ;;  %v7055_v61 = vmul.f32 %v6910_v41, %v6790_v50 }
  0x3f   :  { %6023 = vpow2.f32 %v214_v4  ;;  %v483_v4 = vmax.f32 %v6994_v62, %v6998_v1 }
  0x40   :  { %6025 = vpow2.f32 %v192_v7  ;;  %v474_v33 = vmax.f32 %v473_v46, %v6925_v59 }
  0x41   :  { %782 = vperm.xlu1 %6002, %v701_v54   ;;  %777 = vperm.xlu0 %6001, %v700_v0   ;;  %6027 = vpow2.f32 %v196_v17  ;;  %v7016_v54 = vmul.f32 %v6903_v38, %v6796_v52  ;;  %v467_v17 = vmax.f32 %v466_v63, %v6973_v12  ;;  %v707_v63 = vld [vmem:[%s12817_s5 + $0x88] sm:$0xff] }
  0x42   :  { %6029 = vpow2.f32 %v200_v18  ;;  %v475_v47 = vmax.f32 %v474_v33, %v6928_v6  ;;  %v7038_v18 = vmul.f32 %v6903_v38, %v6811_v57  ;;  %v7059_v33 = vmul.f32 %v6910_v41, %v6793_v51 }
  0x43   :  { %v7018_v0 = vpop.eup %6011  ;;  %6031 = vpow2.f32 %v204_v21  ;;  %v7042_v21 = vmul.f32 %v6910_v41, %v6780_v44  ;;  %v468_v38 = vmax.f32 %v467_v17, %v6984_v32 }
  0x44   :  { %v7033_v7 = vpop.eup %6013  ;;  %6033 = vpow2.f32 %v208_v23  ;;  %v484_v23 = vmax.f32 %v483_v4, %v7007_v42 }
  0x45   :  { %792 = vperm.xlu1 %6002, %v703_v60   ;;  %787 = vperm.xlu0 %6001, %v702_v13   ;;  %v7044_v22 = vpop.eup %6015  ;;  %v218_v60 = vadd.f32 %v7033_v7, %v7018_v0  ;;  %6035 = vpow2.f32 %v212_v26  ;;  %v476_v13 = vmax.f32 %v475_v47, %v6931_v11 }
  0x46   :  { %v7050_v46 = vpop.eup %6017  ;;  %6037 = vpow2.f32 %v216_v8  ;;  %v706_v8 = vld [vmem:[%s12817_s5 + $0x80] sm:$0xff] }
  0x47   :  { %v7061_v26 = vpop.eup %6019  ;;  %v509_v47 = vsub.f32 %v6907_v40, %v476_v13  ;;  %v514_v4 = vsub.f32 %v6919_v48, %v476_v13  ;;  %v519_v25 = vsub.f32 %v6922_v49, %v476_v13  ;;  %v524_v37 = vsub.f32 %v6925_v59, %v476_v13 }
  0x48   :  { %v7073_v17 = vpop.eup %6021  ;;  %v529_v35 = vsub.f32 %v6928_v6, %v476_v13  ;;  %v534_v14 = vsub.f32 %v6931_v11, %v476_v13  ;;  %v469_v49 = vmax.f32 %v468_v38, %v6988_v53  ;;  %v7087_v59 = vmul.f32 %v6910_v41, %v6805_v55  ;;  %v709_v11 = vld [vmem:[%s12817_s5 + $0x98] sm:$0x7f] }
  0x49   :  { %802 = vperm.xlu1 %6002, %v705_v30   ;;  %797 = vperm.xlu0 %6001, %v704_v3   ;;  %v219_v30 = vadd.f32 %v7044_v22, %v218_v60  ;;  %v504_v3 = vsub.f32 %v6899_v34, %v476_v13  ;;  %v7079_v10 = vpop.eup %6023  ;;  %v550_v34 = vmul.f32 1.442695, %v509_v47  ;;  %v560_v31 = vmul.f32 1.442695, %v514_v4  ;;  %v708_v13 = vld [vmem:[%s12817_s5 + $0x90] sm:$0xff] }
  0x4a   :  { %v7082_v40 = vpop.eup %6025  ;;  %v570_v48 = vmul.f32 1.442695, %v519_v25  ;;  %v580_v45 = vmul.f32 1.442695, %v524_v37  ;;  %v590_v37 = vmul.f32 1.442695, %v529_v35  ;;  %v485_v25 = vmax.f32 %v484_v23, %v7012_v2 }
  0x4b   :  { %v220_v60 = vadd.f32 %v7050_v46, %v219_v30  ;;  %v540_v27 = vmul.f32 1.442695, %v504_v3  ;;  %v7089_v6 = vpop.eup %6027  ;;  %v600_v30 = vmul.f32 1.442695, %v534_v14  ;;  %v470_v3 = vmax.f32 %v469_v49, %v7003_v39 }
  0x4c   :  { %v7099_v38 = vpop.eup %6029 }
  0x4d   :  { %812 = vperm.xlu1 %6002, %v707_v63   ;;  %807 = vperm.xlu0 %6001, %v706_v8   ;;  %v221_v63 = vadd.f32 %v7061_v26, %v220_v60  ;;  %6039 = vpow2.f32 %v540_v27  ;;  %13282 = vst [vmem:[#allocation17_spill] sm:$0xff] %v7099_v38  ;;  %v224_v8 = vadd.f32 %v7089_v6, %v7082_v40  ;;  %v7104_v47 = vpop.eup %6031 }
  0x4e   :  { %6041 = vpow2.f32 %v550_v34  ;;  %v486_v60 = vmax.f32 %v485_v25, %v7016_v54  ;;  %v7110_v27 = vmul.f32 %v6910_v41, %v6796_v52  ;;  %v7112_v35 = vpop.eup %6033  ;;  %v503_v14 = vsub.f32 %v6949_v43, %v470_v3 }
  0x4f   :  { %v222_v4 = vadd.f32 %v7073_v17, %v221_v63  ;;  %6043 = vpow2.f32 %v560_v31  ;;  %v225_v23 = vadd.f32 %v7099_v38, %v224_v8  ;;  %v508_v34 = vsub.f32 %v6965_v28, %v470_v3  ;;  %v7117_v49 = vpop.eup %6035  ;;  %v711_v31 = vld [vmem:[%s12817_s5 + $0xa8] sm:$0xff]  ;;  %v710_v63 = vld [vmem:[%s12817_s5 + $0xa0] sm:$0xff] }
  0x50   :  { %6045 = vpow2.f32 %v570_v48  ;;  %v518_v48 = vsub.f32 %v6973_v12, %v470_v3  ;;  %v7128_v43 = vpop.eup %6037  ;;  %v523_v25 = vsub.f32 %v6984_v32, %v470_v3  ;;  %v528_v8 = vsub.f32 %v6988_v53, %v470_v3  ;;  %v713_v32 = vld [vmem:[%s12817_s5 + $0xb8] sm:$0xff]  ;;  %v712_v53 = vld [vmem:[%s12817_s5 + $0xb0] sm:$0xff] }
  0x51   :  { %822 = vperm.xlu1 %6002, %v709_v11   ;;  %817 = vperm.xlu0 %6001, %v708_v13   ;;  %v223_v11 = vadd.f32 %v7079_v10, %v222_v4  ;;  %6047 = vpow2.f32 %v580_v45  ;;  %v513_v13 = vsub.f32 %v6969_v9, %v470_v3  ;;  %13283 = vst [vmem:[#allocation18_spill] sm:$0xff] %v7128_v43  ;;  %v538_v5 = vmul.f32 1.442695, %v503_v14 }
  0x52   :  { %v226_v28 = vadd.f32 %v7104_v47, %v225_v23  ;;  %6049 = vpow2.f32 %v590_v37  ;;  %v533_v36 = vsub.f32 %v7003_v39, %v470_v3  ;;  %v548_v38 = vmul.f32 1.442695, %v508_v34  ;;  %v7138_v37 = vld [vmem:[%s12815_s3 + $0x20] sm:$0x7f] }
  0x53   :  { %6051 = vrcp.f32 %v223_v11  ;;  %v558_v9 = vmul.f32 1.442695, %v513_v13  ;;  %v568_v12 = vmul.f32 1.442695, %v518_v48  ;;  %13284 = vst [vmem:[#allocation19_spill] sm:$0xff] %v7138_v37  ;;  %v487_v14 = vmax.f32 %v486_v60, %v7029_v15  ;;  %v715_v13 = vld [vmem:[%s12817_s5 + $0xc8] sm:$0xff] }
  0x54   :  { %v227_v45 = vadd.f32 %v7112_v35, %v226_v28  ;;  %6053 = vpow2.f32 %v600_v30  ;;  %v578_v39 = vmul.f32 1.442695, %v523_v25  ;;  %v588_v3 = vmul.f32 1.442695, %v528_v8  ;;  %v714_v48 = vld [vmem:[%s12817_s5 + $0xc0] sm:$0x7f] }
  0x55   :  { %832 = vperm.xlu1 %6002, %v711_v31   ;;  %827 = vperm.xlu0 %6001, %v710_v63   ;;  %6055 = vpow2.f32 %v538_v5  ;;  %v7148_v30 = vmul.f32 %v6910_v41, %v6808_v56  ;;  %v598_v23 = vmul.f32 1.442695, %v533_v36  ;;  %v7156_v31 = vmul.f32 %v6910_v41, %v6811_v57 }
  0x56   :  { %v228_v4 = vadd.f32 %v7117_v49, %v227_v45  ;;  %6057 = vpow2.f32 %v548_v38  ;;  %v477_v5 = vmax.f32 %v7042_v21, %v7055_v61  ;;  %v7162_v63 = vmul.f32 %v6814_v58, %v7138_v37 }
  0x57   :  { %v7152_v34 = vpop.eup %6039  ;;  %6059 = vpow2.f32 %v558_v9  ;;  %v488_v38 = vmax.f32 %v487_v14, %v7038_v18  ;;  %v7170_v41 = vmul.f32 %v6814_v58, %v6727_v19  ;;  %v13286_v19 = vcombine.high %v6757_v29, %v6757_v29 }
  0x58   :  { %v7164_v11 = vpop.eup %6041  ;;  %v229_v36 = vadd.f32 %v7128_v43, %v228_v4  ;;  %6061 = vpow2.f32 %v568_v12  ;;  %v478_v25 = vmax.f32 %v477_v5, %v7059_v33  ;;  %v7201_v29 = vmul.f32 %v7162_v63, %v6780_v44  ;;  %v716_v44 = vld [vmem:[%s12817_s5 + $0xd0] sm:$0xff]  ;;  %v13296_v43 = vld [vmem:[#allocation12_spill] sm:$0xff] }
  0x59   :  { %842 = vperm.xlu1 %6002, %v713_v32   ;;  %837 = vperm.xlu0 %6001, %v712_v53   ;;  %13285 = vst [vmem:[#allocation20_spill] sm:$0xff] %v7170_v41  ;;  %v7172_v60 = vpop.eup %6043  ;;  %v614_v28 = vadd.f32 %v7164_v11, %v7152_v34  ;;  %6063 = vpow2.f32 %v578_v39  ;;  %v7187_v58 = vrot.slane %v13286_v19, %v6716_v16 }
  0x5a   :  { %v7189_v8 = vpop.eup %6045  ;;  %6065 = vrcp.f32 %v229_v36  ;;  %v506_v45 = vsub.f32 %v6994_v62, %v488_v38  ;;  %v511_v9 = vsub.f32 %v6998_v1, %v488_v38  ;;  %v516_v12 = vsub.f32 %v7007_v42, %v488_v38 }
  0x5b   :  { %v7194_v32 = vpop.eup %6047  ;;  %v615_v53 = vadd.f32 %v7172_v60, %v614_v28  ;;  %v521_v39 = vsub.f32 %v7012_v2, %v488_v38  ;;  %v526_v4 = vsub.f32 %v7016_v54, %v488_v38  ;;  %6067 = vpow2.f32 %v588_v3  ;;  %v717_v2 = vld [vmem:[%s12817_s5 + $0xd8] sm:$0xff] }
  0x5c   :  { %v7203_v14 = vpop.eup %6049  ;;  %v531_v62 = vsub.f32 %v7029_v15, %v488_v38  ;;  %v536_v1 = vsub.f32 %v7038_v18, %v488_v38  ;;  %v544_v42 = vmul.f32 1.442695, %v506_v45  ;;  %6069 = vpow2.f32 %v598_v23 }
  0x5d   :  { %852 = vperm.xlu1 %6002, %v715_v13   ;;  %847 = vperm.xlu0 %6001, %v714_v48   ;;  %v6052_v5 = vpop.eup %6051  ;;  %v616_v54 = vadd.f32 %v7189_v8, %v615_v53  ;;  %v554_v36 = vmul.f32 1.442695, %v511_v9  ;;  %v564_v13 = vmul.f32 1.442695, %v516_v12  ;;  %v574_v18 = vmul.f32 1.442695, %v521_v39 }
  0x5e   :  { %v7214_v3 = vpop.eup %6053  ;;  %v232_v15 = vmul.f32 %v6052_v5, %v6732_v20  ;;  %6071 = vpow2.f32 %v544_v42  ;;  %v584_v38 = vmul.f32 1.442695, %v526_v4  ;;  %v594_v19 = vmul.f32 1.442695, %v531_v62  ;;  %v719_v53 = vld [vmem:[%s12817_s5 + $0xe8] sm:$0x7f] }
  0x5f   :  { %v7217_v48 = vpop.eup %6055  ;;  %v617_v28 = vadd.f32 %v7194_v32, %v616_v54  ;;  %6073 = vpow2.f32 %v554_v36  ;;  %v479_v45 = vmax.f32 %v478_v25, %v7087_v59  ;;  %v604_v9 = vmul.f32 1.442695, %v536_v1  ;;  %v718_v25 = vld [vmem:[%s12817_s5 + $0xe0] sm:$0xff]  ;;  %v721_v36 = vld [vmem:[%s12817_s5 + $0xf8] sm:$0xff] }
  0x60   :  { %v7221_v41 = vpop.eup %6057  ;;  %v7224_v23 = vmul.f32 %v7033_v7, %v232_v15  ;;  %v7227_v20 = vmul.f32 %v7018_v0, %v232_v15  ;;  %6075 = vpow2.f32 %v564_v13  ;;  %v7238_v39 = vmul.f32 %v7044_v22, %v232_v15 }
  0x61   :  { %862 = vperm.xlu1 %6002, %v717_v2   ;;  %857 = vperm.xlu0 %6001, %v716_v44   ;;  %v7229_v12 = vpop.eup %6059  ;;  %v7241_v7 = vmul.f32 %v7050_v46, %v232_v15  ;;  %v7244_v0 = vmul.f32 %v7061_v26, %v232_v15  ;;  %v7247_v4 = vmul.f32 %v7073_v17, %v232_v15  ;;  %6077 = vpow2.f32 %v574_v18 }
  0x62   :  { %v7249_v62 = vpop.eup %6061  ;;  %v618_v1 = vadd.f32 %v7203_v14, %v617_v28  ;;  %v608_v42 = vadd.f32 %v7221_v41, %v7217_v48  ;;  %v480_v22 = vmax.f32 %v479_v45, %v7110_v27  ;;  %v7258_v46 = vmul.f32 %v7079_v10, %v232_v15 }
  0x63   :  { %13287 = vst [vmem:[#allocation21_spill] sm:$0xff] %v7244_v0  ;;  %13288 = vst [vmem:[#allocation22_spill] sm:$0xff] %v7247_v4  ;;  %v7255_v5 = vpop.eup %6063  ;;  %6079 = vpow2.f32 %v584_v38  ;;  %v7262_v26 = vmul.f32 %v7162_v63, %v6790_v50  ;;  %v7266_v17 = vmul.f32 %v7162_v63, %v6793_v51  ;;  %v720_v50 = vld [vmem:[%s12817_s5 + $0xf0] sm:$0xff]  ;;  %v7282_v13 = vmul.f32 %v7162_v63, %v6805_v55 }
  0x64   :  { %13289 = vst [vmem:[#allocation23_spill] sm:$0xff] %v7258_v46  ;;  %v6066_v2 = vpop.eup %6065  ;;  %v619_v44 = vadd.f32 %v7214_v3, %v618_v1  ;;  %v609_v54 = vadd.f32 %v7229_v12, %v608_v42  ;;  %6081 = vpow2.f32 %v594_v19  ;;  %v481_v10 = vmax.f32 %v480_v22, %v7148_v30 }
  0x65   :  { %872 = vperm.xlu1 %6002, %v719_v53   ;;  %867 = vperm.xlu0 %6001, %v718_v25   ;;  %v7278_v51 = vmul.f32 %v6066_v2, %v6741_v24  ;;  %6083 = vpow2.f32 %v604_v9  ;;  %v7286_v15 = vmul.f32 %v7162_v63, %v6796_v52  ;;  %v7288_v18 = vpop.eup %6067  ;;  %v7294_v19 = vmul.f32 %v7162_v63, %v6808_v56  ;;  %v13291_v9 = vld [vmem:[#allocation17_spill] sm:$0xff] }
  0x66   :  { %6085 = vrcp.f32 %v619_v44  ;;  %v610_v38 = vadd.f32 %v7249_v62, %v609_v54  ;;  %v482_v28 = vmax.f32 %v481_v10, %v7156_v31  ;;  %v7296_v45 = vpop.eup %6069  ;;  %v7312_v25 = vmul.f32 %v7162_v63, %v6811_v57  ;;  %v723_v57 = vld [vmem:[%s12817_s5 + $0x108] sm:$0xff] }
  0x67   :  { %13290 = vst [vmem:[#allocation24_spill] sm:$0xff] %v7278_v51  ;;  %v7300_v55 = vmul.f32 %v7089_v6, %v7278_v51  ;;  %v7304_v52 = vmul.f32 %v7082_v40, %v7278_v51  ;;  %v7308_v53 = vmul.f32 %v13291_v9, %v7278_v51  ;;  %v7318_v6 = vmul.f32 %v7104_v47, %v7278_v51  ;;  %v722_v47 = vld [vmem:[%s12817_s5 + $0x100] sm:$0xff] }
  0x68   :  { %v7314_v56 = vpop.eup %6071  ;;  %v7322_v40 = vmul.f32 %v7112_v35, %v7278_v51  ;;  %v7326_v1 = vmul.f32 %v7117_v49, %v7278_v51  ;;  %v611_v63 = vadd.f32 %v7255_v5, %v610_v38  ;;  %v505_v35 = vsub.f32 %v7042_v21, %v482_v28 }
  0x69   :  { %882 = vperm.xlu1 %6002, %v721_v36   ;;  %877 = vperm.xlu0 %6001, %v720_v50   ;;  %v7328_v42 = vpop.eup %6073  ;;  %v510_v22 = vsub.f32 %v7055_v61, %v482_v28  ;;  %v515_v49 = vsub.f32 %v7059_v33, %v482_v28  ;;  %v520_v54 = vsub.f32 %v7087_v59, %v482_v28  ;;  %v1359_v50 = vld [vmem:[%s12818_s6] sm:$0x7f] }
  0x6a   :  { %13292 = vst [vmem:[#allocation17_spill] sm:$0xff] %v7326_v1  ;;  %v7340_v2 = vpop.eup %6075  ;;  %v626_v44 = vadd.f32 %v7328_v42, %v7314_v56  ;;  %v525_v10 = vsub.f32 %v7110_v27, %v482_v28  ;;  %v530_v36 = vsub.f32 %v7148_v30, %v482_v28  ;;  %v612_v21 = vadd.f32 %v7288_v18, %v611_v63  ;;  %v724_v63 = vld [vmem:[%s12817_s5 + $0x110] sm:$0x7f]  ;;  %s5994_s5 = sld [smem:[#allocation2 + $0x5]] }
  0x6b   :  { %v535_v61 = vsub.f32 %v7156_v31, %v482_v28  ;;  %v542_v33 = vmul.f32 1.442695, %v505_v35  ;;  %v552_v38 = vmul.f32 1.442695, %v510_v22  ;;  %v7352_v9 = vpop.eup %6077  ;;  %v562_v46 = vmul.f32 1.442695, %v515_v49 }
  0x6c   :  { %v627_v59 = vadd.f32 %v7340_v2, %v626_v44  ;;  %v572_v27 = vmul.f32 1.442695, %v520_v54  ;;  %v490_v30 = vsel %vm489_vm0, %v7201_v29, -inf  ;;  %v613_v31 = vadd.f32 %v7296_v45, %v612_v21 }
  0x6d   :  { %892 = vperm.xlu1 %6002, %v723_v57   ;;  %887 = vperm.xlu0 %6001, %v722_v47   ;;  %v7357_v37 = vpop.eup %6079  ;;  %6087 = vpow2.f32 %v542_v33  ;;  %v582_v28 = vmul.f32 1.442695, %v525_v10  ;;  %v592_v35 = vmul.f32 1.442695, %v530_v36  ;;  %v491_v22 = vsel %vm489_vm0, %v7262_v26, -inf }
  0x6e   :  { %v7363_v57 = vpop.eup %6081  ;;  %v628_v47 = vadd.f32 %v7352_v9, %v627_v59  ;;  %6089 = vpow2.f32 %v552_v38  ;;  %v493_v49 = vsel %vm489_vm0, %v7266_v17, -inf  ;;  %v602_v54 = vmul.f32 1.442695, %v535_v61  ;;  %v1361_v61 = vld [vmem:[%s12818_s6 + $0x10] sm:$0x7f] }
  0x6f   :  { %v7370_v44 = vpop.eup %6083  ;;  %6091 = vrcp.f32 %v613_v31  ;;  %v492_v4 = vmax.f32 %v490_v30, %v491_v22  ;;  %v495_v10 = vsel %vm489_vm0, %v7282_v13, -inf  ;;  %v497_v33 = vsel %vm489_vm0, %v7286_v15, -inf  ;;  %v1360_v59 = vld [vmem:[%s12818_s6 + $0x8] sm:$0x7f] }
  0x70   :  { %v6086_v36 = vpop.eup %6085  ;;  %v629_v21 = vadd.f32 %v7357_v37, %v628_v47  ;;  %6093 = vpow2.f32 %v562_v46  ;;  %v499_v38 = vsel %vm489_vm0, %v7294_v19, -inf  ;;  %v13293_v30 = vld [vmem:[#allocation13_spill] sm:$0xff]  ;;  %v501_v46 = vsel %vm489_vm0, %v7312_v25, -inf  ;;  %v13294_v47 = vld [vmem:[#allocation11_spill] sm:$0xff] }
  0x71   :  { %1377 = vperm.xlu1 %6002, %v1359_v50   ;;  %897 = vperm.xlu0 %6001, %v724_v63   ;;  %v651_v50 = vmul.f32 %v6086_v36, %v13293_v30  ;;  %6095 = vpow2.f32 %v572_v27  ;;  %v494_v63 = vmax.f32 %v492_v4, %v493_v49  ;;  %v13295_v22 = vcombine.high %v13294_v47, %v13294_v47 }
  0x72   :  { %v630_v31 = vadd.f32 %v7363_v57, %v629_v21  ;;  %6097 = vpow2.f32 %v582_v28  ;;  %v1081_v51 = vcombine.high %v13296_v43, %v13296_v43 }
  0x73   :  { %v7393_v1 = vrot.slane %v13295_v22, %v6716_v16  ;;  %v7398_v0 = vmul.f32 %v7152_v34, %v651_v50  ;;  %6099 = vpow2.f32 %v592_v35  ;;  %v496_v4 = vmax.f32 %v494_v63, %v495_v10  ;;  %v1363_v34 = vld [vmem:[%s12818_s6 + $0x20] sm:$0x7f] }
  0x74   :  { %v7401_v27 = vmul.f32 %v7164_v11, %v651_v50  ;;  %v631_v28 = vadd.f32 %v7370_v44, %v630_v31  ;;  %6101 = vpow2.f32 %v602_v54  ;;  %v7405_v49 = vmul.f32 %v7172_v60, %v651_v50  ;;  %v1362_v11 = vld [vmem:[%s12818_s6 + $0x18] sm:$0x7f] }
  0x75   :  { %13297 = vst [vmem:[#allocation13_spill] sm:$0xff] %v7398_v0  ;;  %1387 = vperm.xlu1 %6002, %v1361_v61   ;;  %1382 = vperm.xlu0 %6001, %v1360_v59   ;;  %v7408_v36 = vmul.f32 %v7189_v8, %v651_v50  ;;  %v498_v35 = vmax.f32 %v496_v4, %v497_v33  ;;  %v13304_v8 = vld [vmem:[#allocation16_spill] sm:$0xff] }
  0x76   :  { %13298 = vst [vmem:[#allocation11_spill] sm:$0xff] %v7401_v27  ;;  %13299 = vst [vmem:[#allocation12_spill] sm:$0xff] %v7405_v49  ;;  %v7417_v10 = vmul.f32 %v7194_v32, %v651_v50  ;;  %v7420_v54 = vmul.f32 %v7203_v14, %v651_v50  ;;  %v7423_v60 = vmul.f32 %v7214_v3, %v651_v50  ;;  %6103 = vrcp.f32 %v631_v28  ;;  %v13306_v50 = vld [vmem:[#allocation9_spill] sm:$0xff] }
  0x77   :  { %13300 = vst [vmem:[#allocation25_spill] sm:$0xff] %v7408_v36  ;;  %v1092_v59 = vrot.slane %v6741_v24, %v6716_v16  ;;  %v7431_v33 = vpop.eup %6087  ;;  %v500_v32 = vmax.f32 %v498_v35, %v499_v38  ;;  %v13305_v3 = vcombine.high %v6741_v24, %v6741_v24  ;;  %v7443_v63 = vrot.slane %v13296_v43, %v13306_v50  ;;  %v1365_v24 = vld [vmem:[%s12818_s6 + $0x30] sm:$0x7f]  ;;  %v1364_v43 = vld [vmem:[%s12818_s6 + $0x28] sm:$0x7f] }
  0x78   :  { %13301 = vst [vmem:[#allocation26_spill] sm:$0xff] %v7417_v10  ;;  %13302 = vst [vmem:[#allocation27_spill] sm:$0xff] %v7420_v54  ;;  %v7445_v31 = vpop.eup %6089  ;;  %v7452_v22 = vrot.slane %v7187_v58, %v13306_v50  ;;  %v7465_v35 = vrot.slane %v1081_v51, %v13306_v50 }
  0x79   :  { %13303 = vst [vmem:[#allocation28_spill] sm:$0xff] %v7423_v60  ;;  %v7439_v30 = vrot.slane %v13305_v3, %v6716_v16  ;;  %13307 = vst [vmem:[#allocation16_spill] sm:$0xff] %v7443_v63  ;;  %1397 = vperm.xlu1 %6002, %v1363_v34   ;;  %1392 = vperm.xlu0 %6001, %v1362_v11   ;;  %v1100_v47 = vcombine.high %v1092_v59, %v1092_v59  ;;  %v6092_v4 = vpop.eup %6091  ;;  %v13310_v3 = vld [vmem:[#allocation14_spill] sm:$0xff] }
  0x7a   :  { %v7448_v38 = vrot.slane %v1092_v59, %v6716_v16  ;;  %13308 = vst [vmem:[#allocation29_spill] sm:$0xff] %v7452_v22  ;;  %v620_v28 = vadd.f32 %v7445_v31, %v7431_v33  ;;  %v502_v34 = vmax.f32 %v500_v32, %v501_v46  ;;  %13309 = vst [vmem:[#allocation30_spill] sm:$0xff] %v7465_v35  ;;  %v7467_v59 = vpop.eup %6093 }
  0x7b   :  { %v1101_v11 = vcombine.high %v7439_v30, %v7439_v30  ;;  %v650_v14 = vmul.f32 %v6092_v4, %v13310_v3  ;;  %v7472_v21 = vrot.slane %v7439_v30, %v6716_v16  ;;  %v7475_v61 = vrot.slane %v1100_v47, %v6716_v16  ;;  %v7479_v32 = vpop.eup %6095 }
  0x7c   :  { %v621_v60 = vadd.f32 %v7467_v59, %v620_v28  ;;  %v507_v51 = vsub.f32 %v7201_v29, %v502_v34  ;;  %v512_v54 = vsub.f32 %v7262_v26, %v502_v34  ;;  %v517_v4 = vsub.f32 %v7266_v17, %v502_v34  ;;  %v7485_v3 = vpop.eup %6097  ;;  %v1367_v29 = vld [vmem:[%s12818_s6 + $0x40] sm:$0x7f]  ;;  %v1366_v26 = vld [vmem:[%s12818_s6 + $0x38] sm:$0x7f] }
  0x7d   :  { %1407 = vperm.xlu1 %6002, %v1365_v24   ;;  %1402 = vperm.xlu0 %6001, %v1364_v43   ;;  %v7488_v30 = vmul.f32 %v7217_v48, %v650_v14  ;;  %v7491_v47 = vmul.f32 %v7221_v41, %v650_v14  ;;  %v522_v46 = vsub.f32 %v7282_v13, %v502_v34  ;;  %v7494_v10 = vpop.eup %6099 }
  0x7e   :  { %v622_v17 = vadd.f32 %v7479_v32, %v621_v60  ;;  %v527_v48 = vsub.f32 %v7286_v15, %v502_v34  ;;  %v532_v24 = vsub.f32 %v7294_v19, %v502_v34  ;;  %v537_v41 = vsub.f32 %v7312_v25, %v502_v34  ;;  %v7506_v43 = vpop.eup %6101  ;;  %v13315_v34 = vld [vmem:[#allocation15_spill] sm:$0xff] }
  0x7f   :  { %13311 = vst [vmem:[#allocation14_spill] sm:$0xff] %v7488_v30  ;;  %13312 = vst [vmem:[#allocation31_spill] sm:$0xff] %v7491_v47  ;;  %v546_v13 = vmul.f32 1.442695, %v507_v51  ;;  %v556_v28 = vmul.f32 1.442695, %v512_v54  ;;  %v7509_v49 = vmul.f32 %v7229_v12, %v650_v14  ;;  %v7515_v19 = vmul.f32 %v7249_v62, %v650_v14 }
  0x80   :  { %v566_v36 = vmul.f32 1.442695, %v517_v4  ;;  %v623_v27 = vadd.f32 %v7485_v3, %v622_v17  ;;  %v576_v47 = vmul.f32 1.442695, %v522_v46  ;;  %v586_v30 = vmul.f32 1.442695, %v527_v48  ;;  %v6104_v60 = vpop.eup %6103 }
  0x81   :  { %v596_v0 = vmul.f32 1.442695, %v532_v24  ;;  %1417 = vperm.xlu1 %6002, %v1367_v29   ;;  %1412 = vperm.xlu0 %6001, %v1366_v26   ;;  %6105 = vpow2.f32 %v546_v13  ;;  %v606_v15 = vmul.f32 1.442695, %v537_v41  ;;  %13313 = vst [vmem:[#allocation32_spill] sm:$0xff] %v7515_v19  ;;  %v7518_v25 = vmul.f32 %v7255_v5, %v650_v14 }
  0x82   :  { %v1369_v12 = vld [vmem:[%s12818_s6 + $0x50] sm:$0x7f]  ;;  %v1368_v54 = vld [vmem:[%s12818_s6 + $0x48] sm:$0x7f]  ;;  %v653_v46 = vmul.f32 %v6104_v60, %v13315_v34  ;;  %v624_v51 = vadd.f32 %v7494_v10, %v623_v27  ;;  %6107 = vpow2.f32 %v556_v28  ;;  %v7529_v4 = vmul.f32 %v7288_v18, %v650_v14 }
  0x83   :  { %13314 = vst [vmem:[#allocation33_spill] sm:$0xff] %v7518_v25  ;;  %6109 = vpow2.f32 %v566_v36  ;;  %v7532_v62 = vmul.f32 %v7296_v45, %v650_v14  ;;  %v1129_v5 = vrot.slane %v1101_v11, %v6716_v16  ;;  %v1131_v29 = vcombine.high %v7472_v21, %v7472_v21  ;;  %v1372_v60 = vld [vmem:[%s12818_s6 + $0x68] sm:$0x7f] }
  0x84   :  { %13316 = vst [vmem:[#allocation15_spill] sm:$0xff] %v7529_v4  ;;  %v7538_v26 = vmul.f32 %v7314_v56, %v653_v46  ;;  %v625_v17 = vadd.f32 %v7506_v43, %v624_v51  ;;  %6111 = vpow2.f32 %v576_v47  ;;  %v7542_v27 = vmul.f32 %v7328_v42, %v653_v46  ;;  %v1371_v56 = vld [vmem:[%s12818_s6 + $0x60] sm:$0x7f]  ;;  %v1370_v42 = vld [vmem:[%s12818_s6 + $0x58] sm:$0x7f] }
  0x85   :  { %13317 = vst [vmem:[#allocation34_spill] sm:$0xff] %v7532_v62  ;;  %1427 = vperm.xlu1 %6002, %v1369_v12   ;;  %1422 = vperm.xlu0 %6001, %v1368_v54   ;;  %6113 = vpow2.f32 %v586_v30  ;;  %v7545_v18 = vmul.f32 %v7340_v2, %v653_v46  ;;  %v7548_v45 = vmul.f32 %v7352_v9, %v653_v46  ;;  %v7594_v24 = vstv %s7512_s20 }
  0x86   :  { %v7551_v36 = vmul.f32 %v7357_v37, %v653_v46  ;;  %6115 = vrcp.f32 %v625_v17  ;;  %v7560_v14 = vmul.f32 %v7363_v57, %v653_v46  ;;  %v7563_v2 = vmul.f32 %v7370_v44, %v653_v46  ;;  %v13340_v46 = vld [vmem:[#allocation10_spill] sm:$0xff] }
  0x87   :  { %13318 = vst [vmem:[#allocation35_spill] sm:$0xff] %v7545_v18  ;;  %13319 = vst [vmem:[#allocation36_spill] sm:$0xff] %v7548_v45  ;;  %v1132_v37 = vcombine.high %v7475_v61, %v7475_v61  ;;  %6117 = vpow2.f32 %v596_v0  ;;  %v1133_v9 = vcombine.high %v1129_v5, %v1129_v5  ;;  %v13323_v11 = vcombine.high %v7187_v58, %v7187_v58 }
  0x88   :  { %13320 = vst [vmem:[#allocation37_spill] sm:$0xff] %v7551_v36  ;;  %13321 = vst [vmem:[#allocation38_spill] sm:$0xff] %v7560_v14  ;;  %v7575_v47 = vrot.slane %v13304_v8, %v13306_v50  ;;  %6119 = vpow2.f32 %v606_v15  ;;  %v7579_v57 = vrot.slane %v7393_v1, %v13306_v50  ;;  %v13327_v0 = vcombine.high %v13304_v8, %v13304_v8 }
  0x89   :  { %13322 = vst [vmem:[#allocation39_spill] sm:$0xff] %v7563_v2  ;;  %v7571_v30 = vrot.slane %v13323_v11, %v13306_v50  ;;  %v13329_v58 = vcombine.high %v7393_v1, %v7393_v1  ;;  %1437 = vperm.xlu1 %6002, %v1371_v56   ;;  %1432 = vperm.xlu0 %6001, %v1370_v42   ;;  %v1373_v1 = vld [vmem:[%s12818_s6 + $0x70] sm:$0x7f] }
  0x8a   :  { %13325 = vst [vmem:[#allocation41_spill] sm:$0xff] %v7575_v47  ;;  %13326 = vst [vmem:[#allocation42_spill] sm:$0xff] %v7579_v57  ;;  %v7585_v44 = vrot.slane %v13327_v0, %v13306_v50  ;;  %v7598_v41 = vrot.slane %v7448_v38, %v13306_v50  ;;  %v7602_v13 = vrot.slane %v7475_v61, %v13306_v50 }
  0x8b   :  { %13324 = vst [vmem:[#allocation40_spill] sm:$0xff] %v7571_v30  ;;  %v7591_v48 = vrot.slane %v13329_v58, %v13306_v50  ;;  %v13333_v8 = vcombine.high %v7448_v38, %v7448_v38  ;;  %v7617_v15 = vrot.slane %v1132_v37, %v13306_v50  ;;  %v7621_v61 = vrot.slane %v7472_v21, %v13306_v50  ;;  %v7629_v54 = vpop.eup %6105 }
  0x8c   :  { %13328 = vst [vmem:[#allocation43_spill] sm:$0xff] %v7585_v44  ;;  %13331 = vst [vmem:[#allocation45_spill] sm:$0xff] %v7598_v41  ;;  %v7624_v12 = vrot.slane %v1129_v5, %v13306_v50  ;;  %v7627_v38 = vrot.slane %v1131_v29, %v13306_v50  ;;  %v7632_v34 = vrot.slane %v1133_v9, %v13306_v50  ;;  %v7646_v5 = vpop.eup %6107  ;;  %v632_v29 = vsel %vm489_vm0, %v7629_v54, 0.0 }
  0x8d   :  { %13330 = vst [vmem:[#allocation44_spill] sm:$0xff] %v7591_v48  ;;  %13332 = vst [vmem:[#allocation46_spill] sm:$0xff] %v7602_v13  ;;  %v7608_v28 = vrot.slane %v13333_v8, %v13306_v50  ;;  %v7636_v51 = vmul.f32 %v7443_v63, %v13340_v46  ;;  %v7640_v17 = vmul.f32 %v7452_v22, %v13340_v46  ;;  %v7662_v9 = vpop.eup %6109  ;;  %1447 = vperm.xlu1 %6002, %v1373_v1   ;;  %v2233_v1 = vld [vmem:[%s12819_s7] sm:$0xff] }
  0x8e   :  { %13335 = vst [vmem:[#allocation48_spill] sm:$0xff] %v7617_v15  ;;  %13336 = vst [vmem:[#allocation49_spill] sm:$0xff] %v7621_v61  ;;  %v7644_v21 = vmul.f32 %v7465_v35, %v13340_v46  ;;  %v7652_v56 = vmul.f32 %v7571_v30, %v13340_v46  ;;  %v7656_v42 = vmul.f32 %v7575_v47, %v13340_v46  ;;  %1442 = vperm.xlu0 %6001, %v1372_v60   ;;  %v7678_v50 = vpop.eup %6111  ;;  %v1374_v60 = vld [vmem:[%s12818_s6 + $0x78] sm:$0x7f] }
  0x8f   :  { %13334 = vst [vmem:[#allocation47_spill] sm:$0xff] %v7608_v28  ;;  %13337 = vst [vmem:[#allocation50_spill] sm:$0xff] %v7624_v12  ;;  %v7660_v37 = vmul.f32 %v7579_v57, %v13340_v46  ;;  %v633_v11 = vsel %vm489_vm0, %v7646_v5, 0.0  ;;  %v7668_v0 = vmul.f32 %v7585_v44, %v13340_v46  ;;  %v7672_v58 = vmul.f32 %v7591_v48, %v13340_v46  ;;  %v7696_v4 = vpop.eup %6113 }
  0x90   :  { %13338 = vst [vmem:[#allocation51_spill] sm:$0xff] %v7627_v38  ;;  %13339 = vst [vmem:[#allocation52_spill] sm:$0xff] %v7632_v34  ;;  %v7676_v8 = vmul.f32 %v7598_v41, %v13340_v46  ;;  %v634_v16 = vadd.f32 %v633_v11, %v632_v29  ;;  %v635_v2 = vsel %vm489_vm0, %v7662_v9, 0.0  ;;  %v7690_v62 = vmul.f32 %v7602_v13, %v13340_v46  ;;  %v6116_v13 = vpop.eup %6115  ;;  %v265_v41 = vpop.permute.xlu0 %264 }
  0x91   :  { %v7694_v14 = vmul.f32 %v7608_v28, %v13340_v46  ;;  %v637_v36 = vsel %vm489_vm0, %v7678_v50, 0.0  ;;  %v7702_v25 = vmul.f32 %v7617_v15, %v13340_v46  ;;  %v7706_v29 = vmul.f32 %v7621_v61, %v13340_v46  ;;  %v275_v28 = vpop.permute.xlu1 %274  ;;  %v7722_v61 = vpop.eup %6117  ;;  %2315 = vperm.xlu1 %6002, %v2233_v1  }
  0x92   :  { %v7710_v11 = vmul.f32 %v7624_v12, %v13340_v46  ;;  %v636_v48 = vadd.f32 %v635_v2, %v634_v16  ;;  %v639_v45 = vsel %vm489_vm0, %v7696_v4, 0.0  ;;  %v7716_v44 = vmul.f32 %v7627_v38, %v13340_v46  ;;  %1452 = vperm.xlu0 %6001, %v1374_v60   ;;  %v7729_v16 = vld [vmem:[%s12815_s3 + $0x10] sm:$0xff] }
  0x93   :  { %v7720_v15 = vmul.f32 %v7632_v34, %v13340_v46  ;;  %v334_v12 = vmul.f32 %v275_v28, %v7224_v23  ;;  %v332_v57 = vmul.f32 %v265_v41, %v7227_v20  ;;  %v652_v2 = vmul.f32 %v7729_v16, %v6116_v13  ;;  %v7734_v46 = vpop.eup %6119  ;;  %v2235_v23 = vld [vmem:[%s12819_s7 + $0x10] sm:$0xff]  ;;  %v2234_v20 = vld [vmem:[%s12819_s7 + $0x8] sm:$0xff] }
  0x94   :  { %v1231_v38 = vsel %vm489_vm0, %v7636_v51, -inf  ;;  %13341 = vst [vmem:[#allocation10_spill] sm:$0xff] %v7734_v46  ;;  %v638_v41 = vadd.f32 %v637_v36, %v636_v48  ;;  %v641_v28 = vsel %vm489_vm0, %v7722_v61, 0.0  ;;  %v1232_v13 = vsel %vm489_vm0, %v7640_v17, -inf  ;;  %v270_v30 = vpop.permute.xlu0 %269 }
  0x95   :  { %v7748_v1 = vsel %vm489_vm0, %v7644_v21, -inf  ;;  %v7751_v60 = vmul.f32 %v7431_v33, %v652_v2  ;;  %v643_v34 = vsel %vm489_vm0, %v7734_v46, 0.0  ;;  %v7756_v47 = vmul.f32 %v7445_v31, %v652_v2  ;;  %v280_v48 = vpop.permute.xlu1 %279  ;;  %2325 = vperm.xlu1 %6002, %v2235_v23  }
  0x96   :  { %v7759_v36 = vmul.f32 %v7467_v59, %v652_v2  ;;  %v640_v35 = vadd.f32 %v639_v45, %v638_v41  ;;  %v7762_v19 = vmul.f32 %v7479_v32, %v652_v2  ;;  %v7765_v22 = vmul.f32 %v7485_v3, %v652_v2  ;;  %2320 = vperm.xlu0 %6001, %v2234_v20   ;;  %v2237_v59 = vld [vmem:[%s12819_s7 + $0x20] sm:$0x7f] }
  0x97   :  { %v7768_v33 = vmul.f32 %v7494_v10, %v652_v2  ;;  %v335_v18 = vmul.f32 %v280_v48, %v7300_v55  ;;  %v333_v31 = vmul.f32 %v270_v30, %v7304_v52  ;;  %v7776_v45 = vmul.f32 %v7506_v43, %v652_v2  ;;  %v2236_v10 = vld [vmem:[%s12819_s7 + $0x18] sm:$0xff] }
  0x98   :  { %13342 = vst [vmem:[#allocation53_spill] sm:$0xff] %v7759_v36  ;;  %13343 = vst [vmem:[#allocation54_spill] sm:$0xff] %v7762_v19  ;;  %v1235_v32 = vsel %vm489_vm0, %v7656_v42, -inf  ;;  %v642_v3 = vadd.f32 %v641_v28, %v640_v35  ;;  %v1234_v55 = vsel %vm489_vm0, %v7652_v56, -inf  ;;  %v1237_v30 = vsel %vm489_vm0, %v7660_v37, -inf  ;;  %v285_v48 = vpop.permute.xlu0 %284 }
  0x99   :  { %13344 = vst [vmem:[#allocation55_spill] sm:$0xff] %v7765_v22  ;;  %13345 = vst [vmem:[#allocation56_spill] sm:$0xff] %v7768_v33  ;;  %v1236_v52 = vmax.f32 %v1231_v38, %v1235_v32  ;;  %v353_v23 = vadd.f32 %v335_v18, %v334_v12  ;;  %v346_v43 = vadd.f32 %v333_v31, %v332_v57  ;;  %v1239_v20 = vsel %vm489_vm0, %v7668_v0, -inf  ;;  %v290_v41 = vpop.permute.xlu1 %289  ;;  %v2239_v12 = vld [vmem:[%s12819_s7 + $0x30] sm:$0xff] }
  0x9a   :  { %13346 = vst [vmem:[#allocation57_spill] sm:$0xff] %v7776_v45  ;;  %v1238_v2 = vmax.f32 %v1232_v13, %v1237_v30  ;;  %v644_v45 = vadd.f32 %v643_v34, %v642_v3  ;;  %v1241_v35 = vsel %vm489_vm0, %v7672_v58, -inf  ;;  %v1243_v38 = vsel %vm489_vm0, %v7676_v8, -inf  ;;  %2335 = vperm.xlu1 %6002, %v2237_v59   ;;  %2330 = vperm.xlu0 %6001, %v2236_v10   ;;  %v2238_v34 = vld [vmem:[%s12819_s7 + $0x28] sm:$0xff] }
  0x9b   :  { %v1245_v28 = vsel %vm489_vm0, %v7690_v62, -inf  ;;  %v354_v32 = vrot.slane %v353_v23, 4  ;;  %v347_v33 = vrot.slane %v346_v43, 4  ;;  %v337_v18 = vmul.f32 %v290_v41, %v7308_v53 }
  0x9c   :  { %v336_v57 = vmul.f32 %v285_v48, %v7238_v39  ;;  %6121 = vrcp.f32 %v644_v45  ;;  %v1240_v13 = vmax.f32 %v7748_v1, %v1239_v20  ;;  %v1242_v31 = vmax.f32 %v1234_v55, %v1241_v35  ;;  %v295_v10 = vpop.permute.xlu0 %294  ;;  %v2240_v20 = vld [vmem:[%s12819_s7 + $0x38] sm:$0xff] }
  0x9d   :  { %v1244_v3 = vmax.f32 %v1236_v52, %v1243_v38  ;;  %v355_v30 = vadd.f32 %v354_v32, %v353_v23  ;;  %v348_v22 = vadd.f32 %v347_v33, %v346_v43  ;;  %v1247_v39 = vsel %vm489_vm0, %v7694_v14, -inf  ;;  %v300_v59 = vpop.permute.xlu1 %299 }
  0x9e   :  { %v360_v53 = vadd.f32 %v337_v18, %v336_v57  ;;  %v1246_v41 = vmax.f32 %v1238_v2, %v1245_v28  ;;  %v1249_v48 = vsel %vm489_vm0, %v7702_v25, -inf  ;;  %v1251_v45 = vsel %vm489_vm0, %v7706_v29, -inf  ;;  %2345 = vperm.xlu1 %6002, %v2239_v12   ;;  %2340 = vperm.xlu0 %6001, %v2238_v34   ;;  %v2241_v2 = vld [vmem:[%s12819_s7 + $0x40] sm:$0xff] }
  0x9f   :  { %v1253_v1 = vsel %vm489_vm0, %v7710_v11, -inf  ;;  %v356_v55 = vrot.slane %v355_v30, 2  ;;  %v349_v33 = vrot.slane %v348_v22, 2  ;;  %v339_v23 = vmul.f32 %v300_v59, %v7318_v6 }
  0xa0   :  { %v361_v52 = vrot.slane %v360_v53, 4  ;;  %v338_v43 = vmul.f32 %v295_v10, %v7241_v7  ;;  %v1248_v35 = vmax.f32 %v1240_v13, %v1247_v39  ;;  %v1250_v38 = vmax.f32 %v1242_v31, %v1249_v48  ;;  %v305_v34 = vpop.permute.xlu0 %304  ;;  %v2242_v39 = vld [vmem:[%s12819_s7 + $0x48] sm:$0x7f]  ;;  %v13350_v48 = vld [vmem:[#allocation18_spill] sm:$0xff] }
  0xa1   :  { %v7823_v28 = vstv %s7787_s22  ;;  %v357_v32 = vadd.f32 %v356_v55, %v355_v30  ;;  %v350_v18 = vadd.f32 %v349_v33, %v348_v22  ;;  %v1255_v6 = vsel %vm489_vm0, %v7716_v44, -inf  ;;  %v310_v7 = vpop.permute.xlu1 %309  ;;  %v13348_v30 = vld [vmem:[#allocation21_spill] sm:$0xff] }
  0xa2   :  { %13347 = vst [vmem:[#allocation58_spill] sm:$0xff] %v7823_v28  ;;  %v362_v57 = vadd.f32 %v361_v52, %v360_v53  ;;  %v367_v12 = vadd.f32 %v339_v23, %v338_v43  ;;  %v1252_v59 = vmax.f32 %v1244_v3, %v1251_v45  ;;  %v1254_v10 = vmax.f32 %v1246_v41, %v1253_v1  ;;  %v2243_v3 = vld [vmem:[%s12819_s7 + $0x50] sm:$0xff]  ;;  %v13349_v41 = vld [vmem:[#allocation24_spill] sm:$0xff] }
  0xa3   :  { %v1257_v19 = vsel %vm489_vm0, %v7720_v15, -inf  ;;  %v358_v36 = vrot.slane %v357_v32, 1  ;;  %v351_v46 = vrot.slane %v350_v18, 1  ;;  %v341_v31 = vmul.f32 %v310_v7, %v7322_v40  ;;  %2355 = vperm.xlu1 %6002, %v2241_v2   ;;  %2350 = vperm.xlu0 %6001, %v2240_v20  }
  0xa4   :  { %v363_v13 = vrot.slane %v362_v57, 2  ;;  %v368_v22 = vrot.slane %v367_v12, 4  ;;  %v340_v53 = vmul.f32 %v305_v34, %v13348_v30  ;;  %v247_v45 = vmul.f32 %v13350_v48, %v13349_v41  ;;  %v315_v7 = vpop.permute.xlu0 %314  ;;  %v6568_v30 = vld [vmem:[%s12815_s3] sm:$0xff] }
  0xa5   :  { %v1256_v1 = vmax.f32 %v1248_v35, %v1255_v6  ;;  %v359_v40 = vadd.f32 %v358_v36, %v357_v32  ;;  %v352_v55 = vadd.f32 %v351_v46, %v350_v18  ;;  %v1258_v52 = vmax.f32 %v1250_v38, %v1257_v19  ;;  %v320_v20 = vpop.permute.xlu1 %319  ;;  %v13351_v19 = vld [vmem:[#allocation17_spill] sm:$0xff] }
  0xa6   :  { %v364_v33 = vadd.f32 %v363_v13, %v362_v57  ;;  %v6122_v23 = vpop.eup %6121  ;;  %v369_v43 = vadd.f32 %v368_v22, %v367_v12  ;;  %v374_v2 = vadd.f32 %v341_v31, %v340_v53  ;;  %v1259_v34 = vmax.f32 %v1252_v59, %v1254_v10  ;;  %v13352_v57 = vld [vmem:[#allocation22_spill] sm:$0xff]  ;;  %v2245_v12 = vld [vmem:[%s12819_s7 + $0x60] sm:$0xff]  ;;  %v2244_v59 = vld [vmem:[%s12819_s7 + $0x58] sm:$0xff] }
  0xa7   :  { %v7845_v63 = vmul.f32 %v6568_v30, %v7823_v28  ;;  %v397_v35 = vmul.f32 %v7594_v24, %v359_v40  ;;  %v396_v46 = vmul.f32 %v7594_v24, %v352_v55  ;;  %v343_v38 = vmul.f32 %v320_v20, %v13351_v19  ;;  %2365 = vperm.xlu1 %6002, %v2243_v3   ;;  %v13353_v10 = vld [vmem:[#allocation19_spill] sm:$0xff] }
  0xa8   :  { %v365_v36 = vrot.slane %v364_v33, 1  ;;  %2360 = vperm.xlu0 %6001, %v2242_v39   ;;  %v370_v32 = vrot.slane %v369_v43, 2  ;;  %v375_v18 = vrot.slane %v374_v2, 4  ;;  %v342_v6 = vmul.f32 %v315_v7, %v13352_v57  ;;  %v325_v55 = vpop.permute.xlu0 %324  ;;  %v13354_v30 = vld [vmem:[#allocation23_spill] sm:$0xff] }
  0xa9   :  { %v7858_v13 = vmul.f32 %v6122_v23, %v13353_v10  ;;  %v411_v31 = vsel %vm410_vm1, %v397_v35, %v396_v46  ;;  %v1260_v53 = vmax.f32 %v1256_v1, %v1258_v52  ;;  %v7863_v3 = vmul.f32 %v7729_v16, %v7823_v28  ;;  %v330_v40 = vpop.permute.xlu1 %329  ;;  %v13357_v10 = vld [vmem:[#allocation14_spill] sm:$0xff] }
  0xaa   :  { %v366_v22 = vadd.f32 %v365_v36, %v364_v33  ;;  %v371_v39 = vadd.f32 %v370_v32, %v369_v43  ;;  %v376_v41 = vadd.f32 %v375_v18, %v374_v2  ;;  %v381_v48 = vadd.f32 %v343_v38, %v342_v6  ;;  %v2247_v2 = vld [vmem:[%s12819_s7 + $0x70] sm:$0x7f] }
  0xab   :  { %v7867_v20 = vmul.f32 %v7629_v54, %v7858_v13  ;;  %v345_v7 = vmul.f32 %v330_v40, %v247_v45  ;;  %v344_v33 = vmul.f32 %v325_v55, %v13354_v30  ;;  %2375 = vperm.xlu1 %6002, %v2245_v12   ;;  %v7872_v1 = vstv %s7830_s30  ;;  %v2246_v54 = vld [vmem:[%s12819_s7 + $0x68] sm:$0xff] }
  0xac   :  { %v398_v23 = vmul.f32 %v7594_v24, %v366_v22  ;;  %2370 = vperm.xlu0 %6001, %v2244_v59   ;;  %13355 = vst [vmem:[#allocation21_spill] sm:$0xff] %v7872_v1  ;;  %v372_v16 = vrot.slane %v371_v39, 1  ;;  %v377_v52 = vrot.slane %v376_v41, 2  ;;  %v382_v43 = vrot.slane %v381_v48, 4  ;;  %v728_v6 = vpop.permute.xlu0 %727  ;;  %v13356_v59 = vld [vmem:[#allocation13_spill] sm:$0xff]  ;;  %v13397_v1 = vld [vmem:[#allocation46_spill] sm:$0xff] }
  0xad   :  { %v7882_v45 = vmul.f32 %v7646_v5, %v7858_v13  ;;  %v388_v35 = vadd.f32 %v345_v7, %v344_v33  ;;  %v7886_v46 = vmul.f32 %v7662_v9, %v7858_v13  ;;  %v7890_v36 = vmul.f32 %v7678_v50, %v7858_v13  ;;  %v733_v57 = vpop.permute.xlu1 %732 }
  0xae   :  { %v7892_v19 = vmax.f32 %v1259_v34, %v1260_v53  ;;  %v373_v38 = vadd.f32 %v372_v16, %v371_v39  ;;  %v378_v32 = vadd.f32 %v377_v52, %v376_v41  ;;  %v383_v18 = vadd.f32 %v382_v43, %v381_v48  ;;  %v2248_v48 = vld [vmem:[%s12819_s7 + $0x78] sm:$0xff] }
  0xaf   :  { %v7896_v5 = vmul.f32 %v7696_v4, %v7858_v13  ;;  %v389_v12 = vrot.slane %v388_v35, 4  ;;  %v901_v9 = vmul.f32 %v733_v57, %v13356_v59  ;;  %v900_v22 = vmul.f32 %v728_v6, %v13357_v10  ;;  %2385 = vperm.xlu1 %6002, %v2247_v2   ;;  %v2249_v4 = vld [vmem:[%s12819_s7 + $0x80] sm:$0xff] }
  0xb0   :  { %2380 = vperm.xlu0 %6001, %v2246_v54   ;;  %v7902_v50 = vmul.f32 %v7722_v61, %v7858_v13  ;;  %v413_v34 = vsel %vm412_vm2, %v398_v23, %v411_v31  ;;  %v399_v53 = vmul.f32 %v7594_v24, %v373_v38  ;;  %v379_v39 = vrot.slane %v378_v32, 1  ;;  %v738_v16 = vpop.permute.xlu0 %737  ;;  %v2251_v38 = vld [vmem:[%s12819_s7 + $0x90] sm:$0xff] }
  0xb1   :  { %v384_v41 = vrot.slane %v383_v18, 2  ;;  %v390_v40 = vadd.f32 %v389_v12, %v388_v35  ;;  %v935_v55 = vadd.f32 %v901_v9, %v900_v22  ;;  %v1262_v61 = vsub.f32 %v7636_v51, %v7892_v19  ;;  %v743_v33 = vpop.permute.xlu1 %742 }
  0xb2   :  { %v1263_v31 = vsub.f32 %v7640_v17, %v7892_v19  ;;  %v415_v23 = vsel %vm414_vm3, %v399_v53, %v413_v34  ;;  %v380_v7 = vadd.f32 %v379_v39, %v378_v32  ;;  %v1264_v52 = vsub.f32 %v7644_v21, %v7892_v19  ;;  %v2250_v21 = vld [vmem:[%s12819_s7 + $0x88] sm:$0xff]  ;;  %v13358_v53 = vld [vmem:[#allocation31_spill] sm:$0xff] }
  0xb3   :  { %v385_v30 = vadd.f32 %v384_v41, %v383_v18  ;;  %v391_v43 = vrot.slane %v390_v40, 2  ;;  %v903_v2 = vmul.f32 %v743_v33, %v7538_v26  ;;  %v902_v54 = vmul.f32 %v738_v16, %v7751_v60  ;;  %2395 = vperm.xlu1 %6002, %v2249_v4  }
  0xb4   :  { %2390 = vperm.xlu0 %6001, %v2248_v48   ;;  %v1265_v51 = vsub.f32 %v7652_v56, %v7892_v19  ;;  %v400_v17 = vmul.f32 %v7594_v24, %v380_v7  ;;  %v1266_v26 = vsub.f32 %v7656_v42, %v7892_v19  ;;  %v1267_v60 = vsub.f32 %v7660_v37, %v7892_v19  ;;  %v748_v9 = vpop.permute.xlu0 %747 }
  0xb5   :  { %v386_v35 = vrot.slane %v385_v30, 1  ;;  %v392_v32 = vadd.f32 %v391_v43, %v390_v40  ;;  %v936_v18 = vadd.f32 %v935_v55, %v902_v54  ;;  %v1268_v56 = vsub.f32 %v7668_v0, %v7892_v19  ;;  %v753_v59 = vpop.permute.xlu1 %752 }
  0xb6   :  { %v1269_v57 = vsub.f32 %v7672_v58, %v7892_v19  ;;  %v417_v6 = vsel %vm416_vm4, %v400_v17, %v415_v23  ;;  %v1270_v10 = vsub.f32 %v7676_v8, %v7892_v19  ;;  %v1271_v42 = vsub.f32 %v7690_v62, %v7892_v19  ;;  %v2253_v8 = vld [vmem:[%s12819_s7 + $0xa0] sm:$0xff]  ;;  %v2252_v62 = vld [vmem:[%s12819_s7 + $0x98] sm:$0x7f]  ;;  %v2255_v17 = vld [vmem:[%s12819_s7 + $0xb0] sm:$0xff] }
  0xb7   :  { %v387_v12 = vadd.f32 %v386_v35, %v385_v30  ;;  %v393_v37 = vrot.slane %v392_v32, 1  ;;  %v937_v22 = vadd.f32 %v936_v18, %v903_v2  ;;  %v904_v34 = vmul.f32 %v748_v9, %v7867_v20  ;;  %2405 = vperm.xlu1 %6002, %v2251_v38   ;;  %v13359_v2 = vld [vmem:[#allocation11_spill] sm:$0xff] }
  0xb8   :  { %2400 = vperm.xlu0 %6001, %v2250_v21   ;;  %v1272_v0 = vsub.f32 %v7694_v14, %v7892_v19  ;;  %v905_v39 = vmul.f32 %v753_v59, %v13358_v53  ;;  %v1273_v20 = vsub.f32 %v7702_v25, %v7892_v19  ;;  %v1274_v41 = vsub.f32 %v7706_v29, %v7892_v19  ;;  %v758_v30 = vpop.permute.xlu0 %757  ;;  %v2254_v21 = vld [vmem:[%s12819_s7 + $0xa8] sm:$0xff] }
  0xb9   :  { %v401_v58 = vmul.f32 %v7594_v24, %v387_v12  ;;  %v394_v4 = vadd.f32 %v393_v37, %v392_v32  ;;  %v938_v14 = vsel %vm489_vm0, %v904_v34, 0.0  ;;  %v1275_v48 = vsub.f32 %v7710_v11, %v7892_v19  ;;  %v763_v7 = vpop.permute.xlu1 %762 }
  0xba   :  { %v1276_v40 = vsub.f32 %v7716_v44, %v7892_v19  ;;  %v939_v23 = vadd.f32 %v938_v14, %v937_v22  ;;  %v1278_v33 = vmul.f32 1.442695, %v1262_v61  ;;  %v1280_v16 = vmul.f32 1.442695, %v1263_v31  ;;  %v2261_v44 = vld [vmem:[%s12819_s7 + $0xe0] sm:$0xff] }
  0xbb   :  { %v419_v55 = vsel %vm418_vm5, %v401_v58, %v417_v6  ;;  %v402_v25 = vmul.f32 %v7594_v24, %v394_v4  ;;  %v907_v43 = vmul.f32 %v763_v7, %v7756_v47  ;;  %v906_v54 = vmul.f32 %v758_v30, %v13359_v2  ;;  %2415 = vperm.xlu1 %6002, %v2253_v8  }
  0xbc   :  { %2410 = vperm.xlu0 %6001, %v2252_v62   ;;  %v1282_v35 = vmul.f32 1.442695, %v1264_v52  ;;  %v940_v38 = vrot.slane %v939_v23, 4  ;;  %6123 = vpow2.f32 %v1278_v33  ;;  %v1284_v61 = vmul.f32 1.442695, %v1265_v51  ;;  %v768_v59 = vpop.permute.xlu0 %767 }
  0xbd   :  { %v1286_v31 = vmul.f32 1.442695, %v1266_v26  ;;  %v421_v32 = vsel %vm420_vm6, %v402_v25, %v419_v55  ;;  %v946_v47 = vadd.f32 %v906_v54, %v905_v39  ;;  %6125 = vpow2.f32 %v1280_v16  ;;  %v773_v12 = vpop.permute.xlu1 %772  ;;  %v2257_v26 = vld [vmem:[%s12819_s7 + $0xc0] sm:$0x7f] }
  0xbe   :  { %v1288_v18 = vmul.f32 1.442695, %v1267_v60  ;;  %423 = vst [vmem:[#allocation5] sm:$0x7f] %v421_v32  ;;  %v941_v6 = vadd.f32 %v940_v38, %v939_v23  ;;  %6127 = vpow2.f32 %v1282_v35  ;;  %v1290_v9 = vmul.f32 1.442695, %v1268_v56 }
  0xbf   :  { %v1292_v52 = vmul.f32 1.442695, %v1269_v57  ;;  %v909_v37 = vmul.f32 %v773_v12, %v7882_v45  ;;  %v908_v22 = vmul.f32 %v768_v59, %v7542_v27  ;;  %v947_v34 = vadd.f32 %v946_v47, %v907_v43  ;;  %2425 = vperm.xlu1 %6002, %v2255_v17   ;;  %v2256_v60 = vld [vmem:[%s12819_s7 + $0xb8] sm:$0xff]  ;;  %v13360_v55 = vld [vmem:[#allocation12_spill] sm:$0xff] }
  0xc0   :  { %2420 = vperm.xlu0 %6001, %v2254_v21   ;;  %6129 = vpow2.f32 %v1284_v61  ;;  %v942_v51 = vrot.slane %v941_v6, 2  ;;  %v1277_v56 = vsub.f32 %v7720_v15, %v7892_v19  ;;  %v1294_v45 = vmul.f32 1.442695, %v1270_v10  ;;  %v778_v8 = vpop.permute.xlu0 %777  ;;  %v2259_v10 = vld [vmem:[%s12819_s7 + $0xd0] sm:$0xff]  ;;  %v13365_v21 = vld [vmem:[#allocation53_spill] sm:$0xff] }
  0xc1   :  { %6131 = vpow2.f32 %v1286_v31  ;;  %v949_v27 = vsel %vm489_vm0, %v909_v37, 0.0  ;;  %v948_v57 = vadd.f32 %v947_v34, %v908_v22  ;;  %v1296_v58 = vmul.f32 1.442695, %v1271_v42  ;;  %v783_v39 = vpop.permute.xlu1 %782  ;;  %v2258_v42 = vld [vmem:[%s12819_s7 + $0xc8] sm:$0xff]  ;;  %v13366_v31 = vld [vmem:[#allocation35_spill] sm:$0xff] }
  0xc2   :  { %6133 = vpow2.f32 %v1288_v18  ;;  %v943_v53 = vadd.f32 %v942_v51, %v941_v6  ;;  %v1298_v62 = vmul.f32 1.442695, %v1272_v0  ;;  %v1300_v4 = vmul.f32 1.442695, %v1273_v20  ;;  %v13361_v20 = vld [vmem:[#allocation16_spill] sm:$0xff]  ;;  %v2260_v6 = vld [vmem:[%s12819_s7 + $0xd8] sm:$0xff] }
  0xc3   :  { %6135 = vpow2.f32 %v1290_v9  ;;  %v950_v14 = vadd.f32 %v949_v27, %v948_v57  ;;  %v911_v23 = vmul.f32 %v783_v39, %v13360_v55  ;;  %v910_v7 = vmul.f32 %v778_v8, %v7509_v49  ;;  %2435 = vperm.xlu1 %6002, %v2257_v26   ;;  %v13369_v34 = vld [vmem:[#allocation29_spill] sm:$0xff]  ;;  %v2263_v39 = vld [vmem:[%s12819_s7 + $0xf0] sm:$0xff] }
  0xc4   :  { %2430 = vperm.xlu0 %6001, %v2256_v60   ;;  %6137 = vpow2.f32 %v1292_v52  ;;  %v944_v15 = vrot.slane %v943_v53, 1  ;;  %v1302_v0 = vmul.f32 1.442695, %v1274_v41  ;;  %v7998_v49 = vmul.f32 %v7845_v63, %v13361_v20  ;;  %v788_v54 = vpop.permute.xlu0 %787  ;;  %v13363_v41 = vld [vmem:[#allocation10_spill] sm:$0xff] }
  0xc5   :  { %6139 = vpow2.f32 %v1294_v45  ;;  %v951_v30 = vrot.slane %v950_v14, 4  ;;  %v957_v33 = vadd.f32 %v911_v23, %v910_v7  ;;  %v1304_v16 = vmul.f32 1.442695, %v1275_v48  ;;  %v793_v2 = vpop.permute.xlu1 %792  ;;  %v2262_v23 = vld [vmem:[%s12819_s7 + $0xe8] sm:$0x7f] }
  0xc6   :  { %13362 = vst [vmem:[#allocation24_spill] sm:$0xff] %v7998_v49  ;;  %6141 = vpow2.f32 %v1296_v58  ;;  %v8003_v25 = vpop.eup %6123  ;;  %v945_v43 = vadd.f32 %v944_v15, %v943_v53  ;;  %v1306_v29 = vmul.f32 1.442695, %v1276_v40  ;;  %v8010_v17 = vmul.f32 %v13363_v41, %v7858_v13  ;;  %v13373_v58 = vld [vmem:[#allocation32_spill] sm:$0xff]  ;;  %v13380_v41 = vld [vmem:[#allocation25_spill] sm:$0xff] }
  0xc7   :  { %6143 = vpow2.f32 %v1298_v62  ;;  %v8012_v35 = vpop.eup %6125  ;;  %v952_v38 = vadd.f32 %v951_v30, %v950_v14  ;;  %v912_v11 = vmul.f32 %v788_v54, %v13365_v21  ;;  %2445 = vperm.xlu1 %6002, %v2259_v10   ;;  %v1308_v48 = vmul.f32 1.442695, %v1277_v56  ;;  %v13374_v62 = vld [vmem:[#allocation30_spill] sm:$0xff] }
  0xc8   :  { %13364 = vst [vmem:[#allocation18_spill] sm:$0xff] %v8012_v35  ;;  %2440 = vperm.xlu0 %6001, %v2258_v42   ;;  %6145 = vpow2.f32 %v1300_v4  ;;  %v8015_v61 = vpop.eup %6127  ;;  %v913_v32 = vmul.f32 %v793_v2, %v13366_v31  ;;  %v1310_v13 = vsel %vm489_vm0, %v8003_v25, 0.0  ;;  %v1311_v19 = vsel %vm489_vm0, %v8012_v35, 0.0  ;;  %v798_v37 = vpop.permute.xlu0 %797  ;;  %v13404_v35 = vld [vmem:[#allocation52_spill] sm:$0xff] }
  0xc9   :  { %6147 = vpow2.f32 %v1302_v0  ;;  %v953_v47 = vrot.slane %v952_v38, 2  ;;  %v958_v18 = vadd.f32 %v957_v33, %v912_v11  ;;  %v1312_v12 = vadd.f32 %v1311_v19, %v1310_v13  ;;  %v803_v52 = vpop.permute.xlu1 %802  ;;  %v13381_v11 = vld [vmem:[#allocation41_spill] sm:$0xff]  ;;  %v2265_v19 = vld [vmem:[%s12819_s7 + $0x100] sm:$0xff] }
  0xca   :  { %v8025_v40 = vpop.eup %6129  ;;  %6149 = vpow2.f32 %v1304_v16  ;;  %v1012_v9 = vmul.f32 %v945_v43, %v7594_v24  ;;  %v1313_v22 = vsel %vm489_vm0, %v8015_v61, 0.0  ;;  %v8037_v51 = vmul.f32 %v7845_v63, %v13369_v34  ;;  %v13378_v43 = vld [vmem:[#allocation40_spill] sm:$0xff] }
  0xcb   :  { %13367 = vst [vmem:[#allocation17_spill] sm:$0xff] %v8025_v40  ;;  %v8030_v59 = vpop.eup %6131  ;;  %6151 = vpow2.f32 %v1306_v29  ;;  %v954_v60 = vadd.f32 %v953_v47, %v952_v38  ;;  %v959_v56 = vadd.f32 %v958_v18, %v913_v32  ;;  %v914_v45 = vmul.f32 %v798_v37, %v7886_v46  ;;  %2455 = vperm.xlu1 %6002, %v2261_v44   ;;  %v13384_v44 = vld [vmem:[#allocation54_spill] sm:$0xff]  ;;  %v2264_v37 = vld [vmem:[%s12819_s7 + $0xf8] sm:$0xff] }
  0xcc   :  { %13368 = vst [vmem:[#allocation22_spill] sm:$0xff] %v8030_v59  ;;  %13370 = vst [vmem:[#allocation19_spill] sm:$0xff] %v8037_v51  ;;  %v8039_v26 = vpop.eup %6133  ;;  %v1315_v27 = vsel %vm489_vm0, %v8025_v40, 0.0  ;;  %v915_v53 = vmul.f32 %v803_v52, %v13373_v58  ;;  %2450 = vperm.xlu0 %6001, %v2260_v6   ;;  %6153 = vpow2.f32 %v1308_v48  ;;  %v1314_v8 = vadd.f32 %v1313_v22, %v1312_v12  ;;  %v808_v30 = vpop.permute.xlu0 %807  ;;  %v13403_v40 = vld [vmem:[#allocation51_spill] sm:$0xff] }
  0xcd   :  { %13371 = vst [vmem:[#allocation23_spill] sm:$0xff] %v8039_v26  ;;  %v8044_v57 = vpop.eup %6135  ;;  %v8052_v4 = vmul.f32 %v7845_v63, %v13374_v62  ;;  %v955_v14 = vrot.slane %v954_v60, 1  ;;  %v960_v55 = vsel %vm489_vm0, %v914_v45, 0.0  ;;  %v1317_v7 = vsel %vm489_vm0, %v8030_v59, 0.0  ;;  %v813_v0 = vpop.permute.xlu1 %812 }
  0xce   :  { %13372 = vst [vmem:[#allocation13_spill] sm:$0xff] %v8044_v57  ;;  %v8054_v46 = vpop.eup %6137  ;;  %v1319_v15 = vsel %vm489_vm0, %v8039_v26, 0.0  ;;  %v961_v42 = vadd.f32 %v960_v55, %v959_v56  ;;  %v1316_v33 = vadd.f32 %v1315_v27, %v1314_v8  ;;  %v1321_v16 = vsel %vm489_vm0, %v8044_v57, 0.0  ;;  %v13402_v26 = vld [vmem:[#allocation55_spill] sm:$0xff] }
  0xcf   :  { %13375 = vst [vmem:[#allocation14_spill] sm:$0xff] %v8052_v4  ;;  %13376 = vst [vmem:[#allocation31_spill] sm:$0xff] %v8054_v46  ;;  %v8064_v10 = vpop.eup %6139  ;;  %v8070_v2 = vmul.f32 %v7845_v63, %v13378_v43  ;;  %v956_v29 = vadd.f32 %v955_v14, %v954_v60  ;;  %v916_v38 = vmul.f32 %v808_v30, %v13380_v41  ;;  %2465 = vperm.xlu1 %6002, %v2263_v39   ;;  %v13386_v60 = vld [vmem:[#allocation42_spill] sm:$0xff]  ;;  %v13388_v14 = vld [vmem:[#allocation43_spill] sm:$0xff] }
  0xd0   :  { %13377 = vst [vmem:[#allocation11_spill] sm:$0xff] %v8064_v10  ;;  %v8072_v54 = vpop.eup %6141  ;;  %v1323_v21 = vsel %vm489_vm0, %v8054_v46, 0.0  ;;  %v8079_v48 = vmul.f32 %v7845_v63, %v13381_v11  ;;  %v962_v32 = vrot.slane %v961_v42, 4  ;;  %v917_v13 = vmul.f32 %v813_v0, %v13384_v44  ;;  %2460 = vperm.xlu0 %6001, %v2262_v23   ;;  %v818_v39 = vpop.permute.xlu0 %817  ;;  %v13390_v30 = vld [vmem:[#allocation36_spill] sm:$0xff]  ;;  %v2267_v41 = vld [vmem:[%s12819_s7 + $0x110] sm:$0x7f] }
  0xd1   :  { %13379 = vst [vmem:[#allocation12_spill] sm:$0xff] %v8072_v54  ;;  %v8081_v31 = vpop.eup %6143  ;;  %v1318_v47 = vadd.f32 %v1317_v7, %v1316_v33  ;;  %v1325_v18 = vsel %vm489_vm0, %v8064_v10, 0.0  ;;  %v1013_v12 = vmul.f32 %v956_v29, %v7594_v24  ;;  %v968_v52 = vadd.f32 %v916_v38, %v915_v53  ;;  %v823_v58 = vpop.permute.xlu1 %822  ;;  %v13401_v46 = vld [vmem:[#allocation50_spill] sm:$0xff] }
  0xd2   :  { %13382 = vst [vmem:[#allocation16_spill] sm:$0xff] %v8079_v48  ;;  %13383 = vst [vmem:[#allocation10_spill] sm:$0xff] %v8081_v31  ;;  %v8089_v6 = vpop.eup %6145  ;;  %v1327_v22 = vsel %vm489_vm0, %v8072_v54, 0.0  ;;  %v8099_v56 = vmul.f32 %v7845_v63, %v13386_v60  ;;  %v963_v27 = vadd.f32 %v962_v32, %v961_v42  ;;  %v1329_v53 = vsel %vm489_vm0, %v8081_v31, 0.0 }
  0xd3   :  { %13385 = vst [vmem:[#allocation53_spill] sm:$0xff] %v8089_v6  ;;  %v8101_v45 = vpop.eup %6147  ;;  %v1320_v8 = vadd.f32 %v1319_v15, %v1318_v47  ;;  %v8107_v55 = vmul.f32 %v7845_v63, %v13388_v14  ;;  %v8112_v7 = vsel %vm410_vm1, %v1013_v12, %v1012_v9  ;;  %v919_v0 = vmul.f32 %v823_v58, %v7890_v36  ;;  %v13392_v9 = vld [vmem:[#allocation44_spill] sm:$0xff] }
  0xd4   :  { %13387 = vst [vmem:[#allocation35_spill] sm:$0xff] %v8101_v45  ;;  %v8109_v23 = vpop.eup %6149  ;;  %v918_v33 = vmul.f32 %v818_v39, %v13390_v30  ;;  %v969_v42 = vadd.f32 %v968_v52, %v917_v13  ;;  %2475 = vperm.xlu1 %6002, %v2265_v19   ;;  %v964_v15 = vrot.slane %v963_v27, 2  ;;  %2470 = vperm.xlu0 %6001, %v2264_v37   ;;  %v1331_v32 = vsel %vm489_vm0, %v8089_v6, 0.0  ;;  %v2266_v19 = vld [vmem:[%s12819_s7 + $0x108] sm:$0xff]  ;;  %v828_v58 = vpop.permute.xlu0 %827 }
  0xd5   :  { %13389 = vst [vmem:[#allocation29_spill] sm:$0xff] %v8109_v23  ;;  %v8116_v29 = vpop.eup %6151  ;;  %v1322_v38 = vadd.f32 %v1321_v16, %v1320_v8  ;;  %v8125_v44 = vmul.f32 %v7845_v63, %v13392_v9  ;;  %v971_v36 = vsel %vm489_vm0, %v919_v0, 0.0  ;;  %v1333_v47 = vsel %vm489_vm0, %v8101_v45, 0.0  ;;  %v833_v37 = vpop.permute.xlu1 %832  ;;  %v13394_v0 = vld [vmem:[#allocation45_spill] sm:$0xff] }
  0xd6   :  { %13391 = vst [vmem:[#allocation32_spill] sm:$0xff] %v8116_v29  ;;  %v970_v13 = vadd.f32 %v969_v42, %v918_v33  ;;  %v8135_v16 = vsel %vm489_vm0, %v8109_v23, 0.0  ;;  %v8137_v12 = vpop.eup %6153  ;;  %v965_v52 = vadd.f32 %v964_v15, %v963_v27  ;;  %v8141_v8 = vsel %vm489_vm0, %v8116_v29, 0.0  ;;  %v13395_v42 = vld [vmem:[#allocation26_spill] sm:$0xff]  ;;  %v13396_v45 = vld [vmem:[#allocation33_spill] sm:$0xff] }
  0xd7   :  { %13393 = vst [vmem:[#allocation30_spill] sm:$0xff] %v8137_v12  ;;  %v1324_v39 = vadd.f32 %v1323_v21, %v1322_v38  ;;  %v8145_v30 = vmul.f32 %v7845_v63, %v13394_v0  ;;  %v921_v6 = vmul.f32 %v833_v37, %v13395_v42  ;;  %v920_v23 = vmul.f32 %v828_v58, %v13396_v45  ;;  %v2269_v21 = vld [vmem:[%s12819_s7 + $0x120] sm:$0xff]  ;;  %v2268_v37 = vld [vmem:[%s12819_s7 + $0x118] sm:$0xff]  ;;  %v13400_v42 = vld [vmem:[#allocation49_spill] sm:$0xff] }
  0xd8   :  { %v972_v33 = vadd.f32 %v971_v36, %v970_v13  ;;  %2485 = vperm.xlu1 %6002, %v2267_v41   ;;  %v8151_v27 = vmul.f32 %v7845_v63, %v13397_v1  ;;  %v966_v15 = vrot.slane %v965_v52, 1  ;;  %2480 = vperm.xlu0 %6001, %v2266_v19   ;;  %v8158_v29 = vsel %vm489_vm0, %v8137_v12, 0.0  ;;  %v13398_v36 = vld [vmem:[#allocation47_spill] sm:$0xff]  ;;  %v13399_v19 = vld [vmem:[#allocation48_spill] sm:$0xff]  ;;  %v838_v54 = vpop.permute.xlu0 %837 }
  0xd9   :  { %v1326_v38 = vadd.f32 %v1325_v18, %v1324_v39  ;;  %v8162_v13 = vmul.f32 %v7845_v63, %v13398_v36  ;;  %v979_v41 = vadd.f32 %v921_v6, %v920_v23  ;;  %v8169_v58 = vmul.f32 %v7845_v63, %v13399_v19  ;;  %v843_v12 = vpop.permute.xlu1 %842 }
  0xda   :  { %v973_v45 = vrot.slane %v972_v33, 4  ;;  %v8173_v18 = vmul.f32 %v7845_v63, %v13400_v42  ;;  %v967_v39 = vadd.f32 %v966_v15, %v965_v52  ;;  %v8177_v10 = vmul.f32 %v7845_v63, %v13401_v46  ;;  %v13406_v15 = vld [vmem:[#allocation37_spill] sm:$0xff] }
  0xdb   :  { %v1328_v31 = vadd.f32 %v1327_v22, %v1326_v38  ;;  %v1721_v6 = vmax.f32 %v7998_v49, %v8037_v51  ;;  %v922_v57 = vmul.f32 %v838_v54, %v13402_v26  ;;  %v8184_v59 = vmul.f32 %v7845_v63, %v13403_v40  ;;  %v2270_v51 = vld [vmem:[%s12819_s7 + $0x128] sm:$0xff] }
  0xdc   :  { %v974_v23 = vadd.f32 %v973_v45, %v972_v33  ;;  %2495 = vperm.xlu1 %6002, %v2269_v21   ;;  %v8188_v52 = vmul.f32 %v7845_v63, %v13404_v35  ;;  %v1014_v22 = vmul.f32 %v967_v39, %v7594_v24  ;;  %v923_v38 = vmul.f32 %v843_v12, %v13406_v15  ;;  %v2271_v33 = vld [vmem:[%s12819_s7 + $0x130] sm:$0xff] }
  0xdd   :  { %2490 = vperm.xlu0 %6001, %v2268_v37   ;;  %v1330_v45 = vadd.f32 %v1329_v53, %v1328_v31  ;;  %v1722_v26 = vmax.f32 %v1721_v6, %v8052_v4  ;;  %v980_v21 = vadd.f32 %v979_v41, %v922_v57  ;;  %v8201_v63 = vmul.f32 %v7863_v3, %v13361_v20  ;;  %v853_v31 = vpop.permute.xlu1 %852  ;;  %v848_v53 = vpop.permute.xlu0 %847 }
  0xde   :  { %13405 = vst [vmem:[#allocation25_spill] sm:$0xff] %v8188_v52  ;;  %v975_v54 = vrot.slane %v974_v23, 2  ;;  %v8205_v12 = vmul.f32 %v7863_v3, %v13369_v34  ;;  %v1027_v37 = vsel %vm412_vm2, %v1014_v22, %v8112_v7  ;;  %v8212_v41 = vmul.f32 %v7863_v3, %v13374_v62  ;;  %v13411_v52 = vld [vmem:[#allocation15_spill] sm:$0xff] }
  0xdf   :  { %13407 = vst [vmem:[#allocation54_spill] sm:$0xff] %v8201_v63  ;;  %v1332_v39 = vadd.f32 %v1331_v32, %v1330_v45  ;;  %v1723_v57 = vmax.f32 %v1722_v26, %v8070_v2  ;;  %v981_v15 = vadd.f32 %v980_v21, %v923_v38  ;;  %v924_v4 = vmul.f32 %v848_v53, %v7896_v5  ;;  %v2273_v32 = vld [vmem:[%s12819_s7 + $0x140] sm:$0xff] }
  0xe0   :  { %13408 = vst [vmem:[#allocation36_spill] sm:$0xff] %v8205_v12  ;;  %13409 = vst [vmem:[#allocation26_spill] sm:$0xff] %v8212_v41  ;;  %v976_v6 = vadd.f32 %v975_v54, %v974_v23  ;;  %2505 = vperm.xlu1 %6002, %v2271_v33   ;;  %v8217_v49 = vmul.f32 %v7863_v3, %v13378_v43  ;;  %v925_v7 = vmul.f32 %v853_v31, %v13411_v52  ;;  %v2272_v33 = vld [vmem:[%s12819_s7 + $0x138] sm:$0x7f] }
  0xe1   :  { %2500 = vperm.xlu0 %6001, %v2270_v51   ;;  %v1334_v22 = vadd.f32 %v1333_v47, %v1332_v39  ;;  %v1724_v45 = vmax.f32 %v1723_v57, %v8079_v48  ;;  %v8226_v23 = vmul.f32 %v7863_v3, %v13381_v11  ;;  %v982_v38 = vsel %vm489_vm0, %v924_v4, 0.0  ;;  %v863_v26 = vpop.permute.xlu1 %862  ;;  %v858_v54 = vpop.permute.xlu0 %857  ;;  %v13416_v39 = vld [vmem:[#allocation27_spill] sm:$0xff] }
  0xe2   :  { %13410 = vst [vmem:[#allocation33_spill] sm:$0xff] %v8217_v49  ;;  %v977_v5 = vrot.slane %v976_v6, 1  ;;  %v8234_v51 = vmul.f32 %v7863_v3, %v13386_v60  ;;  %v8238_v47 = vmul.f32 %v7863_v3, %v13388_v14  ;;  %v983_v52 = vadd.f32 %v982_v38, %v981_v15 }
  0xe3   :  { %13412 = vst [vmem:[#allocation55_spill] sm:$0xff] %v8226_v23  ;;  %v1336_v21 = vadd.f32 %v8135_v16, %v1334_v22  ;;  %v1725_v31 = vmax.f32 %v1724_v45, %v8099_v56  ;;  %v8244_v4 = vmul.f32 %v7863_v3, %v13392_v9  ;;  %v926_v57 = vmul.f32 %v858_v54, %v13416_v39  ;;  %v13419_v16 = vld [vmem:[#allocation56_spill] sm:$0xff]  ;;  %v2275_v45 = vld [vmem:[%s12819_s7 + $0x150] sm:$0xff]  ;;  %v2274_v39 = vld [vmem:[%s12819_s7 + $0x148] sm:$0xff] }
  0xe4   :  { %13413 = vst [vmem:[#allocation37_spill] sm:$0xff] %v8234_v51  ;;  %13414 = vst [vmem:[#allocation15_spill] sm:$0xff] %v8238_v47  ;;  %v978_v53 = vadd.f32 %v977_v5, %v976_v6  ;;  %2515 = vperm.xlu1 %6002, %v2273_v32   ;;  %v8249_v48 = vmul.f32 %v7863_v3, %v13394_v0  ;;  %v8253_v15 = vmul.f32 %v7863_v3, %v13397_v1 }
  0xe5   :  { %13415 = vst [vmem:[#allocation59_spill] sm:$0xff] %v8244_v4  ;;  %v984_v38 = vrot.slane %v983_v52, 4  ;;  %v927_v22 = vmul.f32 %v863_v26, %v13419_v16  ;;  %2510 = vperm.xlu0 %6001, %v2272_v33   ;;  %v1338_v6 = vadd.f32 %v8141_v8, %v1336_v21  ;;  %v1726_v32 = vmax.f32 %v1725_v31, %v8107_v55  ;;  %v873_v16 = vpop.permute.xlu1 %872  ;;  %v868_v8 = vpop.permute.xlu0 %867 }
  0xe6   :  { %13417 = vst [vmem:[#allocation27_spill] sm:$0xff] %v8249_v48  ;;  %13418 = vst [vmem:[#allocation60_spill] sm:$0xff] %v8253_v15  ;;  %v1015_v5 = vmul.f32 %v978_v53, %v7594_v24  ;;  %v990_v54 = vadd.f32 %v926_v57, %v925_v7  ;;  %v8267_v15 = vmul.f32 %v7863_v3, %v13398_v36 }
  0xe7   :  { %v8271_v33 = vmul.f32 %v7863_v3, %v13399_v19  ;;  %v985_v26 = vadd.f32 %v984_v38, %v983_v52  ;;  %v1340_v21 = vadd.f32 %v8158_v29, %v1338_v6  ;;  %v1727_v31 = vmax.f32 %v1726_v32, %v8125_v44  ;;  %v2277_v29 = vld [vmem:[%s12819_s7 + $0x160] sm:$0x7f] }
  0xe8   :  { %13420 = vst [vmem:[#allocation56_spill] sm:$0xff] %v8267_v15  ;;  %v8277_v7 = vmul.f32 %v7863_v3, %v13400_v42  ;;  %v8280_v53 = vsel %vm414_vm3, %v1015_v5, %v1027_v37  ;;  %v929_v57 = vmul.f32 %v873_v16, %v7902_v50  ;;  %v13423_v15 = vld [vmem:[#allocation38_spill] sm:$0xff]  ;;  %v991_v4 = vadd.f32 %v990_v54, %v927_v22 }
  0xe9   :  { %13421 = vst [vmem:[#allocation61_spill] sm:$0xff] %v8271_v33  ;;  %v928_v48 = vmul.f32 %v868_v8, %v13423_v15  ;;  %2525 = vperm.xlu1 %6002, %v2275_v45   ;;  %v986_v52 = vrot.slane %v985_v26, 2  ;;  %2520 = vperm.xlu0 %6001, %v2274_v39   ;;  %6155 = vrcp.f32 %v1340_v21  ;;  %v1728_v38 = vmax.f32 %v1727_v31, %v8145_v30  ;;  %v2276_v15 = vld [vmem:[%s12819_s7 + $0x158] sm:$0xff]  ;;  %v6569_v45 = vld [vmem:[%s12815_s3 + $0x8] sm:$0xff]  ;;  %v883_v54 = vpop.permute.xlu1 %882  ;;  %v878_v39 = vpop.permute.xlu0 %877  ;;  %v13427_v21 = vld [vmem:[#allocation28_spill] sm:$0xff] }
  0xea   :  { %13422 = vst [vmem:[#allocation62_spill] sm:$0xff] %v8277_v7  ;;  %v8290_v6 = vmul.f32 %v7863_v3, %v13401_v46  ;;  %v993_v37 = vsel %vm489_vm0, %v929_v57, 0.0  ;;  %v1751_v22 = vmax.f32 %v8201_v63, %v8205_v12  ;;  %v8302_v32 = vmul.f32 %v6569_v45, %v7823_v28  ;;  %v13428_v57 = vld [vmem:[#allocation34_spill] sm:$0xff]  ;;  %v2281_v63 = vld [vmem:[%s12819_s7 + $0x180] sm:$0xff] }
  0xeb   :  { %v992_v50 = vadd.f32 %v991_v4, %v928_v48  ;;  %v987_v5 = vadd.f32 %v986_v52, %v985_v26  ;;  %v1729_v16 = vmax.f32 %v1728_v38, %v8151_v27  ;;  %v8307_v48 = vmul.f32 %v7863_v3, %v13403_v40  ;;  %v2279_v38 = vld [vmem:[%s12819_s7 + $0x170] sm:$0xff] }
  0xec   :  { %13424 = vst [vmem:[#allocation38_spill] sm:$0xff] %v8290_v6  ;;  %v8311_v4 = vmul.f32 %v7863_v3, %v13404_v35  ;;  %v931_v31 = vmul.f32 %v883_v54, %v13427_v21  ;;  %v930_v12 = vmul.f32 %v878_v39, %v13428_v57  ;;  %v1752_v26 = vmax.f32 %v1751_v22, %v8212_v41  ;;  %v6570_v3 = vld [vmem:[%s12815_s3 + $0x20] sm:$0x7f]  ;;  %v2278_v54 = vld [vmem:[%s12819_s7 + $0x168] sm:$0xff] }
  0xed   :  { %13425 = vst [vmem:[#allocation63_spill] sm:$0xff] %v8307_v48  ;;  %v994_v8 = vadd.f32 %v993_v37, %v992_v50  ;;  %2535 = vperm.xlu1 %6002, %v2277_v29   ;;  %v988_v52 = vrot.slane %v987_v5, 1  ;;  %2530 = vperm.xlu0 %6001, %v2276_v15   ;;  %v1730_v45 = vmax.f32 %v1729_v16, %v8162_v13  ;;  %v6571_v29 = vld [vmem:[%s12815_s3 + $0x18] sm:$0xff]  ;;  %v893_v57 = vpop.permute.xlu1 %892 }
  0xee   :  { %13426 = vst [vmem:[#allocation64_spill] sm:$0xff] %v8311_v4  ;;  %v8324_v37 = vmul.f32 %v6570_v3, %v7823_v28  ;;  %v8330_v50 = vmul.f32 %v6571_v29, %v7823_v28  ;;  %v1001_v22 = vadd.f32 %v931_v31, %v930_v12  ;;  %v1753_v39 = vmax.f32 %v1752_v26, %v8217_v49  ;;  %v888_v3 = vpop.permute.xlu0 %887  ;;  %v13433_v28 = vld [vmem:[#allocation57_spill] sm:$0xff]  ;;  %v6572_v4 = vld [vmem:[%s12813_s1] sm:$0x7f] }
  0xef   :  { %v995_v15 = vrot.slane %v994_v8, 4  ;;  %v8338_v16 = vmul.f32 %v8302_v32, %v13361_v20  ;;  %v989_v21 = vadd.f32 %v988_v52, %v987_v5  ;;  %v1731_v41 = vmax.f32 %v1730_v45, %v8169_v58  ;;  %v13435_v45 = vld [vmem:[#allocation39_spill] sm:$0xff] }
  0xf0   :  { %13429 = vst [vmem:[#allocation28_spill] sm:$0xff] %v8330_v50  ;;  %v8343_v29 = vmul.f32 %v8302_v32, %v13369_v34  ;;  %v8347_v12 = vmul.f32 %v8302_v32, %v13374_v62  ;;  %v932_v26 = vmul.f32 %v888_v3, %v13433_v28  ;;  %v1754_v50 = vmax.f32 %v1753_v39, %v8226_v23  ;;  %v2280_v39 = vld [vmem:[%s12819_s7 + $0x178] sm:$0xff] }
  0xf1   :  { %13430 = vst [vmem:[#allocation34_spill] sm:$0xff] %v8338_v16  ;;  %v996_v31 = vadd.f32 %v995_v15, %v994_v8  ;;  %2545 = vperm.xlu1 %6002, %v2279_v38   ;;  %v8353_v5 = vmul.f32 %v8302_v32, %v13378_v43  ;;  %v1016_v52 = vmul.f32 %v989_v21, %v7594_v24  ;;  %v1378_v3 = vpop.permute.xlu1 %1377  ;;  %v13451_v43 = vld [vmem:[#allocation21_spill] sm:$0xff] }
  0xf2   :  { %13431 = vst [vmem:[#allocation65_spill] sm:$0xff] %v8343_v29  ;;  %13432 = vst [vmem:[#allocation66_spill] sm:$0xff] %v8347_v12  ;;  %v933_v49 = vmul.f32 %v893_v57, %v13435_v45  ;;  %2540 = vperm.xlu0 %6001, %v2278_v54   ;;  %v1732_v8 = vmax.f32 %v1731_v41, %v8173_v18  ;;  %v8363_v28 = vmul.f32 %v8302_v32, %v13381_v11  ;;  %v898_v45 = vpop.permute.xlu0 %897 }
  0xf3   :  { %13434 = vst [vmem:[#allocation57_spill] sm:$0xff] %v8353_v5  ;;  %v997_v38 = vrot.slane %v996_v31, 2  ;;  %v1002_v15 = vadd.f32 %v1001_v22, %v932_v26  ;;  %v1755_v21 = vmax.f32 %v1754_v50, %v8234_v51  ;;  %v8371_v54 = vmul.f32 %v8302_v32, %v13386_v60  ;;  %v6156_v57 = vpop.eup %6155  ;;  %v2290_v5 = vld [vmem:[%s12819_s7 + $0x1c8] sm:$0xff] }
  0xf4   :  { %13436 = vst [vmem:[#allocation39_spill] sm:$0xff] %v8363_v28  ;;  %v1029_v41 = vsel %vm416_vm4, %v1016_v52, %v8280_v53  ;;  %v1733_v23 = vmax.f32 %v1732_v8, %v8177_v10  ;;  %v8378_v22 = vmul.f32 %v8302_v32, %v13388_v14  ;;  %v8382_v26 = vmul.f32 %v8302_v32, %v13392_v9  ;;  %v2283_v52 = vld [vmem:[%s12819_s7 + $0x190] sm:$0xff] }
  0xf5   :  { %13437 = vst [vmem:[#allocation67_spill] sm:$0xff] %v8371_v54  ;;  %v998_v50 = vadd.f32 %v997_v38, %v996_v31  ;;  %v1003_v51 = vadd.f32 %v1002_v15, %v933_v49  ;;  %v8387_v48 = vmul.f32 %v6572_v4, %v6156_v57  ;;  %v934_v53 = vmul.f32 %v898_v45, %v8010_v17  ;;  %v2282_v15 = vld [vmem:[%s12819_s7 + $0x188] sm:$0x7f]  ;;  %v13442_v45 = vld [vmem:[#allocation18_spill] sm:$0xff]  ;;  %v13447_v54 = vld [vmem:[#allocation11_spill] sm:$0xff] }
  0xf6   :  { %13438 = vst [vmem:[#allocation68_spill] sm:$0xff] %v8378_v22  ;;  %13439 = vst [vmem:[#allocation69_spill] sm:$0xff] %v8382_v26  ;;  %2555 = vperm.xlu1 %6002, %v2281_v63   ;;  %2550 = vperm.xlu0 %6001, %v2280_v39   ;;  %v8394_v8 = vmax.f32 %v1733_v23, %v8184_v59  ;;  %v8397_v31 = vmax.f32 %v1755_v21, %v8238_v47  ;;  %v1388_v21 = vpop.permute.xlu1 %1387  ;;  %v1383_v57 = vpop.permute.xlu0 %1382 }
  0xf7   :  { %v8401_v49 = vmul.f32 %v8302_v32, %v13394_v0  ;;  %v8405_v4 = vmul.f32 %v8302_v32, %v13397_v1  ;;  %v999_v17 = vrot.slane %v998_v50, 1  ;;  %v1343_v63 = vmul.f32 %v8003_v25, %v8387_v48  ;;  %v13444_v25 = vld [vmem:[#allocation17_spill] sm:$0xff] }
  0xf8   :  { %v1004_v38 = vsel %vm489_vm0, %v934_v53, 0.0  ;;  %v1345_v23 = vmul.f32 %v8015_v61, %v8387_v48  ;;  %v1344_v47 = vmul.f32 %v13442_v45, %v8387_v48  ;;  %v1346_v26 = vmul.f32 %v13444_v25, %v8387_v48  ;;  %v13445_v61 = vld [vmem:[#allocation13_spill] sm:$0xff]  ;;  %v13446_v45 = vld [vmem:[#allocation23_spill] sm:$0xff] }
  0xf9   :  { %13440 = vst [vmem:[#allocation70_spill] sm:$0xff] %v8401_v49  ;;  %13441 = vst [vmem:[#allocation71_spill] sm:$0xff] %v8405_v4  ;;  %v1005_v39 = vadd.f32 %v1004_v38, %v1003_v51  ;;  %v13443_v4 = vld [vmem:[#allocation22_spill] sm:$0xff]  ;;  %v1000_v53 = vadd.f32 %v999_v17, %v998_v50  ;;  %v1455_v22 = vmul.f32 %v1378_v3, %v1343_v63  ;;  %v2285_v38 = vld [vmem:[%s12819_s7 + $0x1a0] sm:$0xff] }
  0xfa   :  { %v1347_v49 = vmul.f32 %v13443_v4, %v8387_v48  ;;  %v1457_v6 = vmul.f32 %v1388_v21, %v1345_v23  ;;  %2565 = vperm.xlu1 %6002, %v2283_v52   ;;  %v1349_v1 = vmul.f32 %v13445_v61, %v8387_v48  ;;  %v1456_v51 = vmul.f32 %v1383_v57, %v1344_v47  ;;  %v2284_v47 = vld [vmem:[%s12819_s7 + $0x198] sm:$0xff]  ;;  %v1398_v57 = vpop.permute.xlu1 %1397  ;;  %v1393_v61 = vpop.permute.xlu0 %1392 }
  0xfb   :  { %v1006_v0 = vrot.slane %v1005_v39, 4  ;;  %2560 = vperm.xlu0 %6001, %v2282_v15   ;;  %v1348_v4 = vmul.f32 %v13446_v45, %v8387_v48  ;;  %v8430_v25 = vmul.f32 %v13447_v54, %v8387_v48  ;;  %v1017_v3 = vmul.f32 %v1000_v53, %v7594_v24  ;;  %v13448_v17 = vld [vmem:[#allocation31_spill] sm:$0xff] }
  0xfc   :  { %v1471_v50 = vsel %vm489_vm0, %v1455_v22, 0.0  ;;  %v1485_v52 = vsel %vm489_vm0, %v1457_v6, 0.0  ;;  %v8440_v63 = vmul.f32 %v13448_v17, %v8387_v48  ;;  %v1478_v54 = vsel %vm489_vm0, %v1456_v51, 0.0  ;;  %v2287_v17 = vld [vmem:[%s12819_s7 + $0x1b0] sm:$0x7f] }
  0xfd   :  { %v1472_v23 = vrot.slane %v1471_v50, 4  ;;  %v1007_v15 = vadd.f32 %v1006_v0, %v1005_v39  ;;  %v1486_v21 = vrot.slane %v1485_v52, 4  ;;  %v1030_v53 = vsel %vm418_vm5, %v1017_v3, %v1029_v41  ;;  %v13449_v0 = vld [vmem:[#allocation10_spill] sm:$0xff] }
  0xfe   :  { %v1479_v22 = vrot.slane %v1478_v54, 4  ;;  %v1459_v45 = vmul.f32 %v1398_v57, %v1347_v49  ;;  %v1458_v6 = vmul.f32 %v1393_v61, %v1346_v26  ;;  %2575 = vperm.xlu1 %6002, %v2285_v38   ;;  %v8449_v39 = vmul.f32 %v13449_v0, %v8387_v48  ;;  %v2286_v26 = vld [vmem:[%s12819_s7 + $0x1a8] sm:$0xff]  ;;  %v13450_v49 = vld [vmem:[#allocation12_spill] sm:$0xff] }
  0xff   :  { %v1473_v7 = vadd.f32 %v1472_v23, %v1471_v50  ;;  %v1008_v9 = vrot.slane %v1007_v15, 2  ;;  %v1487_v14 = vadd.f32 %v1486_v21, %v1485_v52  ;;  %2570 = vperm.xlu0 %6001, %v2284_v47   ;;  %v8458_v38 = vmul.f32 %v13450_v49, %v8387_v48  ;;  %v1408_v23 = vpop.permute.xlu1 %1407  ;;  %v1403_v21 = vpop.permute.xlu0 %1402  ;;  %v2289_v49 = vld [vmem:[%s12819_s7 + $0x1c0] sm:$0xff] }
 0x100   :  { %v1480_v51 = vadd.f32 %v1479_v22, %v1478_v54  ;;  %v1499_v28 = vsel %vm489_vm0, %v1459_v45, 0.0  ;;  %v1492_v41 = vsel %vm489_vm0, %v1458_v6, 0.0  ;;  %v1461_v61 = vmul.f32 %v1408_v23, %v1349_v1  ;;  %v2288_v1 = vld [vmem:[%s12819_s7 + $0x1b8] sm:$0xff] }
 0x101   :  { %v1474_v3 = vrot.slane %v1473_v7, 2  ;;  %v1009_v50 = vadd.f32 %v1008_v9, %v1007_v15  ;;  %v1488_v52 = vrot.slane %v1487_v14, 2  ;;  %v1500_v47 = vrot.slane %v1499_v28, 4 }
 0x102   :  { %v1481_v57 = vrot.slane %v1480_v51, 2  ;;  %v1493_v54 = vrot.slane %v1492_v41, 4  ;;  %v1460_v22 = vmul.f32 %v1403_v21, %v1348_v4  ;;  %2585 = vperm.xlu1 %6002, %v2287_v17   ;;  %v1513_v15 = vsel %vm489_vm0, %v1461_v61, 0.0 }
 0x103   :  { %v1475_v45 = vadd.f32 %v1474_v3, %v1473_v7  ;;  %v1010_v6 = vrot.slane %v1009_v50, 1  ;;  %v1489_v0 = vadd.f32 %v1488_v52, %v1487_v14  ;;  %v1501_v33 = vadd.f32 %v1500_v47, %v1499_v28  ;;  %2580 = vperm.xlu0 %6001, %v2286_v26   ;;  %v1418_v28 = vpop.permute.xlu1 %1417  ;;  %v1413_v23 = vpop.permute.xlu0 %1412 }
 0x104   :  { %v1482_v60 = vadd.f32 %v1481_v57, %v1480_v51  ;;  %v1494_v9 = vadd.f32 %v1493_v54, %v1492_v41  ;;  %v1506_v11 = vsel %vm489_vm0, %v1460_v22, 0.0  ;;  %v1514_v52 = vrot.slane %v1513_v15, 4  ;;  %v2291_v54 = vld [vmem:[%s12819_s7 + $0x1d0] sm:$0xff] }
 0x105   :  { %v1476_v4 = vrot.slane %v1475_v45, 1  ;;  %v1011_v7 = vadd.f32 %v1010_v6, %v1009_v50  ;;  %v1490_v17 = vrot.slane %v1489_v0, 1  ;;  %v1502_v14 = vrot.slane %v1501_v33, 2 }
 0x106   :  { %v1483_v26 = vrot.slane %v1482_v60, 1  ;;  %v1495_v3 = vrot.slane %v1494_v9, 2  ;;  %v1507_v47 = vrot.slane %v1506_v11, 4  ;;  %2595 = vperm.xlu1 %6002, %v2289_v49   ;;  %v1515_v22 = vadd.f32 %v1514_v52, %v1513_v15 }
 0x107   :  { %v1477_v51 = vadd.f32 %v1476_v4, %v1475_v45  ;;  %v1018_v41 = vmul.f32 %v1011_v7, %v7594_v24  ;;  %v1491_v21 = vadd.f32 %v1490_v17, %v1489_v0  ;;  %v1503_v57 = vadd.f32 %v1502_v14, %v1501_v33  ;;  %2590 = vperm.xlu0 %6001, %v2288_v1   ;;  %v1428_v0 = vpop.permute.xlu1 %1427 }
 0x108   :  { %v1484_v50 = vadd.f32 %v1483_v26, %v1482_v60  ;;  %v1496_v61 = vadd.f32 %v1495_v3, %v1494_v9  ;;  %v1508_v6 = vadd.f32 %v1507_v47, %v1506_v11  ;;  %v1516_v60 = vrot.slane %v1515_v22, 2  ;;  %v1423_v47 = vpop.permute.xlu0 %1422 }
 0x109   :  { %v1584_v49 = vmul.f32 %v13451_v43, %v1477_v51  ;;  %v1031_v45 = vsel %vm420_vm6, %v1018_v41, %v1030_v53  ;;  %v1586_v24 = vmul.f32 %v13451_v43, %v1491_v21  ;;  %v1504_v33 = vrot.slane %v1503_v57, 1  ;;  %v2293_v53 = vld [vmem:[%s12819_s7 + $0x1e0] sm:$0xff]  ;;  %v2292_v51 = vld [vmem:[%s12819_s7 + $0x1d8] sm:$0x7f] }
 0x10a   :  { %1033 = vst [vmem:[#allocation5 + $0x8] sm:$0x7f] %v1031_v45  ;;  %v1585_v1 = vmul.f32 %v13451_v43, %v1484_v50  ;;  %v1497_v4 = vrot.slane %v1496_v61, 1  ;;  %v1509_v9 = vrot.slane %v1508_v6, 2  ;;  %2605 = vperm.xlu1 %6002, %v2291_v54   ;;  %v1463_v15 = vmul.f32 %v1418_v28, %v8430_v25 }
 0x10b   :  { %v1505_v11 = vadd.f32 %v1504_v33, %v1503_v57  ;;  %v1462_v7 = vmul.f32 %v1413_v23, %v8440_v63  ;;  %v1465_v17 = vmul.f32 %v1428_v0, %v8449_v39  ;;  %2600 = vperm.xlu0 %6001, %v2290_v5   ;;  %v1517_v3 = vadd.f32 %v1516_v60, %v1515_v22  ;;  %v1438_v57 = vpop.permute.xlu1 %1437  ;;  %v13452_v22 = vld [vmem:[#allocation35_spill] sm:$0xff] }
 0x10c   :  { %v1616_v14 = vsel %vm410_vm1, %v1585_v1, %v1584_v49  ;;  %v1498_v26 = vadd.f32 %v1497_v4, %v1496_v61  ;;  %v1510_v52 = vadd.f32 %v1509_v9, %v1508_v6  ;;  %v1527_v5 = vsel %vm489_vm0, %v1463_v15, 0.0  ;;  %v2295_v49 = vld [vmem:[%s12819_s7 + $0x1f0] sm:$0xff]  ;;  %v2294_v1 = vld [vmem:[%s12819_s7 + $0x1e8] sm:$0xff] }
 0x10d   :  { %v1588_v25 = vmul.f32 %v13451_v43, %v1505_v11  ;;  %v1617_v63 = vsel %vm412_vm2, %v1586_v24, %v1616_v14  ;;  %v1520_v39 = vsel %vm489_vm0, %v1462_v7, 0.0  ;;  %v1518_v23 = vrot.slane %v1517_v3, 1 }
 0x10e   :  { %v1587_v28 = vmul.f32 %v13451_v43, %v1498_v26  ;;  %v1511_v41 = vrot.slane %v1510_v52, 1  ;;  %v1528_v21 = vrot.slane %v1527_v5, 4  ;;  %2615 = vperm.xlu1 %6002, %v2293_v53   ;;  %v1521_v54 = vrot.slane %v1520_v39, 4  ;;  %v1433_v53 = vpop.permute.xlu0 %1432 }
 0x10f   :  { %v1541_v50 = vsel %vm489_vm0, %v1465_v17, 0.0  ;;  %v1464_v61 = vmul.f32 %v1423_v47, %v8458_v38  ;;  %v1355_v6 = vmul.f32 %v13452_v22, %v8387_v48  ;;  %2610 = vperm.xlu0 %6001, %v2292_v51   ;;  %v1519_v24 = vadd.f32 %v1518_v23, %v1517_v3  ;;  %v2297_v51 = vld [vmem:[%s12819_s7 + $0x200] sm:$0x7f] }
 0x110   :  { %v1618_v45 = vsel %vm414_vm3, %v1587_v28, %v1617_v63  ;;  %v1512_v33 = vadd.f32 %v1511_v41, %v1510_v52  ;;  %v1529_v0 = vadd.f32 %v1528_v21, %v1527_v5  ;;  %v1522_v38 = vadd.f32 %v1521_v54, %v1520_v39  ;;  %v13453_v52 = vld [vmem:[#allocation53_spill] sm:$0xff]  ;;  %v1448_v39 = vpop.permute.xlu1 %1447  ;;  %v13454_v28 = vld [vmem:[#allocation32_spill] sm:$0xff]  ;;  %v2296_v41 = vld [vmem:[%s12819_s7 + $0x1f8] sm:$0xff] }
 0x111   :  { %v1619_v4 = vsel %vm416_vm4, %v1588_v25, %v1618_v45  ;;  %v1542_v60 = vrot.slane %v1541_v50, 4  ;;  %v1534_v9 = vsel %vm489_vm0, %v1464_v61, 0.0  ;;  %v1590_v11 = vmul.f32 %v13451_v43, %v1519_v24 }
 0x112   :  { %v1589_v15 = vmul.f32 %v13451_v43, %v1512_v33  ;;  %v1530_v7 = vrot.slane %v1529_v0, 2  ;;  %v1535_v17 = vrot.slane %v1534_v9, 4  ;;  %2625 = vperm.xlu1 %6002, %v2295_v49   ;;  %v1523_v14 = vrot.slane %v1522_v38, 2 }
 0x113   :  { %v1543_v26 = vadd.f32 %v1542_v60, %v1541_v50  ;;  %v1467_v3 = vmul.f32 %v1438_v57, %v1355_v6  ;;  %v1354_v47 = vmul.f32 %v13453_v52, %v8387_v48  ;;  %2620 = vperm.xlu0 %6001, %v2294_v1   ;;  %v1357_v23 = vmul.f32 %v13454_v28, %v8387_v48 }
 0x114   :  { %v1620_v25 = vsel %vm418_vm5, %v1589_v15, %v1619_v4  ;;  %v1531_v63 = vadd.f32 %v1530_v7, %v1529_v0  ;;  %v1536_v5 = vadd.f32 %v1535_v17, %v1534_v9  ;;  %v1524_v21 = vadd.f32 %v1523_v14, %v1522_v38  ;;  %v13455_v0 = vld [vmem:[#allocation29_spill] sm:$0xff]  ;;  %v2299_v4 = vld [vmem:[%s12819_s7 + $0x210] sm:$0xff]  ;;  %v1443_v15 = vpop.permute.xlu0 %1442 }
 0x115   :  { %v1621_v57 = vsel %vm420_vm6, %v1590_v11, %v1620_v25  ;;  %v1544_v54 = vrot.slane %v1543_v26, 2  ;;  %v1555_v50 = vsel %vm489_vm0, %v1467_v3, 0.0  ;;  %v1466_v49 = vmul.f32 %v1433_v53, %v1354_v47  ;;  %v2298_v7 = vld [vmem:[%s12819_s7 + $0x208] sm:$0xff] }
 0x116   :  { %v1532_v61 = vrot.slane %v1531_v63, 1  ;;  %v1537_v22 = vrot.slane %v1536_v5, 2  ;;  %v1556_v6 = vrot.slane %v1555_v50, 4  ;;  %2635 = vperm.xlu1 %6002, %v2297_v51   ;;  %v1525_v45 = vrot.slane %v1524_v21, 1 }
 0x117   :  { %v1545_v24 = vadd.f32 %v1544_v54, %v1543_v26  ;;  %v1469_v33 = vmul.f32 %v1448_v39, %v1357_v23  ;;  %v1356_v1 = vmul.f32 %v13455_v0, %v8387_v48  ;;  %2630 = vperm.xlu0 %6001, %v2296_v41   ;;  %v1548_v11 = vsel %vm489_vm0, %v1466_v49, 0.0 }
 0x118   :  { %v1533_v38 = vadd.f32 %v1532_v61, %v1531_v63  ;;  %v1538_v60 = vadd.f32 %v1537_v22, %v1536_v5  ;;  %v1557_v9 = vadd.f32 %v1556_v6, %v1555_v50  ;;  %v1526_v17 = vadd.f32 %v1525_v45, %v1524_v21  ;;  %v13456_v21 = vld [vmem:[#allocation25_spill] sm:$0xff] }
 0x119   :  { %v1546_v53 = vrot.slane %v1545_v24, 1  ;;  %v1549_v14 = vrot.slane %v1548_v11, 4  ;;  %v1569_v26 = vsel %vm489_vm0, %v1469_v33, 0.0  ;;  %v1468_v39 = vmul.f32 %v1443_v15, %v1356_v1  ;;  %v13457_v1 = vld [vmem:[#allocation24_spill] sm:$0xff] }
 0x11a   :  { %v1592_v3 = vmul.f32 %v13451_v43, %v1533_v38  ;;  %v1539_v52 = vrot.slane %v1538_v60, 1  ;;  %v1558_v47 = vrot.slane %v1557_v9, 2  ;;  %v1570_v51 = vrot.slane %v1569_v26, 4  ;;  %2645 = vperm.xlu1 %6002, %v2299_v4  }
 0x11b   :  { %v1591_v25 = vmul.f32 %v13451_v43, %v1526_v17  ;;  %v1547_v63 = vadd.f32 %v1546_v53, %v1545_v24  ;;  %v1550_v5 = vadd.f32 %v1549_v14, %v1548_v11  ;;  %2640 = vperm.xlu0 %6001, %v2298_v7   ;;  %v8536_v54 = vmax.f32 %v8394_v8, %v13456_v21  ;;  %v13458_v17 = vld [vmem:[#allocation19_spill] sm:$0xff]  ;;  %v13459_v14 = vld [vmem:[#allocation14_spill] sm:$0xff] }
 0x11c   :  { %v1540_v28 = vadd.f32 %v1539_v52, %v1538_v60  ;;  %v1559_v23 = vadd.f32 %v1558_v47, %v1557_v9  ;;  %v1571_v41 = vadd.f32 %v1570_v51, %v1569_v26  ;;  %v1562_v6 = vsel %vm489_vm0, %v1468_v39, 0.0 }
 0x11d   :  { %v1623_v50 = vsel %vm1622_vm7, %v1591_v25, %v1621_v57  ;;  %v1594_v61 = vmul.f32 %v13451_v43, %v1547_v63  ;;  %v1551_v22 = vrot.slane %v1550_v5, 2  ;;  %v1563_v33 = vrot.slane %v1562_v6, 4  ;;  %v13460_v25 = vld [vmem:[#allocation16_spill] sm:$0xff] }
 0x11e   :  { %1633 = vst [vmem:[#allocation5 + $0x10] sm:$0xff] %v1623_v50  ;;  %v1593_v49 = vmul.f32 %v13451_v43, %v1540_v28  ;;  %v1560_v45 = vrot.slane %v1559_v23, 1  ;;  %v1572_v24 = vrot.slane %v1571_v41, 2  ;;  %v1812_v4 = vsub.f32 %v13457_v1, %v8536_v54 }
 0x11f   :  { %v1552_v0 = vadd.f32 %v1551_v22, %v1550_v5  ;;  %v8546_v8 = vmul.f32 %v8302_v32, %v13398_v36  ;;  %v8550_v57 = vmul.f32 %v8302_v32, %v13399_v19  ;;  %v1564_v11 = vadd.f32 %v1563_v33, %v1562_v6 }
 0x120   :  { %v1624_v38 = vsel %vm410_vm1, %v1593_v49, %v1592_v3  ;;  %v1561_v60 = vadd.f32 %v1560_v45, %v1559_v23  ;;  %v1573_v9 = vadd.f32 %v1572_v24, %v1571_v41  ;;  %v1817_v53 = vsub.f32 %v13458_v17, %v8536_v54 }
 0x121   :  { %v1553_v15 = vrot.slane %v1552_v0, 1  ;;  %v1625_v7 = vsel %vm412_vm2, %v1594_v61, %v1624_v38  ;;  %v1822_v26 = vsub.f32 %v13459_v14, %v8536_v54  ;;  %v1565_v47 = vrot.slane %v1564_v11, 2  ;;  %v1453_v14 = vpop.permute.xlu0 %1452 }
 0x122   :  { %v1574_v52 = vrot.slane %v1573_v9, 1  ;;  %v1827_v51 = vsub.f32 %v8070_v2, %v8536_v54  ;;  %v1832_v3 = vsub.f32 %v13460_v25, %v8536_v54  ;;  %v1596_v63 = vmul.f32 %v13451_v43, %v1561_v60  ;;  %v13462_v25 = vld [vmem:[#allocation59_spill] sm:$0xff] }
 0x123   :  { %v1554_v5 = vadd.f32 %v1553_v15, %v1552_v0  ;;  %v1837_v39 = vsub.f32 %v8099_v56, %v8536_v54  ;;  %v1842_v28 = vsub.f32 %v8107_v55, %v8536_v54  ;;  %v1566_v41 = vadd.f32 %v1565_v47, %v1564_v11 }
 0x124   :  { %v1575_v23 = vadd.f32 %v1574_v52, %v1573_v9  ;;  %v1847_v50 = vsub.f32 %v8125_v44, %v8536_v54  ;;  %v1852_v2 = vsub.f32 %v8145_v30, %v8536_v54  ;;  %v1857_v22 = vsub.f32 %v8151_v27, %v8536_v54 }
 0x125   :  { %v1595_v61 = vmul.f32 %v13451_v43, %v1554_v5  ;;  %v1862_v6 = vsub.f32 %v8162_v13, %v8536_v54  ;;  %v1867_v56 = vsub.f32 %v8169_v58, %v8536_v54  ;;  %v1567_v49 = vrot.slane %v1566_v41, 1 }
 0x126   :  { %v1598_v55 = vmul.f32 %v13451_v43, %v1575_v23  ;;  %v1872_v44 = vsub.f32 %v8173_v18, %v8536_v54  ;;  %v1877_v30 = vsub.f32 %v8177_v10, %v8536_v54  ;;  %v1892_v24 = vmul.f32 1.442695, %v1812_v4 }
 0x127   :  { %v1626_v45 = vsel %vm414_vm3, %v1595_v61, %v1625_v7  ;;  %v1902_v33 = vmul.f32 1.442695, %v1817_v53  ;;  %v1912_v27 = vmul.f32 1.442695, %v1822_v26  ;;  %v1568_v0 = vadd.f32 %v1567_v49, %v1566_v41 }
 0x128   :  { %v1627_v13 = vsel %vm416_vm4, %v1596_v63, %v1626_v45  ;;  %v1882_v58 = vsub.f32 %v8184_v59, %v8536_v54  ;;  %v1922_v1 = vmul.f32 1.442695, %v1827_v51  ;;  %v1887_v38 = vsub.f32 %v13456_v21, %v8536_v54  ;;  %v13461_v54 = vld [vmem:[#allocation30_spill] sm:$0xff] }
 0x129   :  { %6157 = vpow2.f32 %v1892_v24  ;;  %v1932_v18 = vmul.f32 1.442695, %v1832_v3  ;;  %v1942_v60 = vmul.f32 1.442695, %v1837_v39  ;;  %v1597_v10 = vmul.f32 %v13451_v43, %v1568_v0  ;;  %v13473_v0 = vld [vmem:[#allocation57_spill] sm:$0xff] }
 0x12a   :  { %6159 = vpow2.f32 %v1902_v33  ;;  %v1952_v9 = vmul.f32 1.442695, %v1842_v28  ;;  %v1962_v4 = vmul.f32 1.442695, %v1847_v50  ;;  %v1972_v11 = vmul.f32 1.442695, %v1852_v2 }
 0x12b   :  { %6161 = vpow2.f32 %v1912_v27  ;;  %v1982_v15 = vmul.f32 1.442695, %v1857_v22  ;;  %v1992_v7 = vmul.f32 1.442695, %v1862_v6  ;;  %v1628_v17 = vsel %vm418_vm5, %v1597_v10, %v1627_v13  ;;  %v13465_v22 = vld [vmem:[#allocation60_spill] sm:$0xff] }
 0x12c   :  { %6163 = vpow2.f32 %v1922_v1  ;;  %v2002_v59 = vmul.f32 1.442695, %v1867_v56  ;;  %v2012_v53 = vmul.f32 1.442695, %v1872_v44  ;;  %v2022_v21 = vmul.f32 1.442695, %v1877_v30 }
 0x12d   :  { %6165 = vpow2.f32 %v1932_v18  ;;  %v1358_v26 = vmul.f32 %v13461_v54, %v8387_v48  ;;  %v8594_v52 = vsel %vm420_vm6, %v1598_v55, %v1628_v17  ;;  %v2032_v47 = vmul.f32 1.442695, %v1882_v58  ;;  %v13463_v48 = vld [vmem:[#allocation27_spill] sm:$0xff]  ;;  %v13469_v44 = vld [vmem:[#allocation40_spill] sm:$0xff] }
 0x12e   :  { %6167 = vpow2.f32 %v1942_v60  ;;  %v2042_v51 = vmul.f32 1.442695, %v1887_v38  ;;  %v1757_v3 = vmax.f32 %v8397_v31, %v13462_v25  ;;  %v8600_v5 = vmul.f32 %v8302_v32, %v13400_v42  ;;  %v13472_v33 = vld [vmem:[#allocation56_spill] sm:$0xff]  ;;  %v13475_v38 = vld [vmem:[#allocation41_spill] sm:$0xff]  ;;  %v13477_v60 = vld [vmem:[#allocation42_spill] sm:$0xff] }
 0x12f   :  { %6169 = vpow2.f32 %v1952_v9  ;;  %v1470_v63 = vmul.f32 %v1453_v14, %v1358_v26  ;;  %v8604_v39 = vmul.f32 %v8302_v32, %v13401_v46  ;;  %v8609_v23 = vmul.f32 %v8302_v32, %v13403_v40  ;;  %v13483_v14 = vld [vmem:[#allocation43_spill] sm:$0xff]  ;;  %v13485_v26 = vld [vmem:[#allocation44_spill] sm:$0xff] }
 0x130   :  { %6171 = vpow2.f32 %v1962_v4  ;;  %v1758_v28 = vmax.f32 %v1757_v3, %v13463_v48  ;;  %v1736_v31 = vmax.f32 %v8338_v16, %v8343_v29  ;;  %v8616_v50 = vmul.f32 %v8302_v32, %v13404_v35 }
 0x131   :  { %6173 = vpow2.f32 %v1972_v11  ;;  %v1576_v41 = vsel %vm489_vm0, %v1470_v63, 0.0  ;;  %v8620_v2 = vmul.f32 %v8324_v37, %v13361_v20  ;;  %v8628_v49 = vmul.f32 %v8324_v37, %v13369_v34  ;;  %v13480_v11 = vld [vmem:[#allocation61_spill] sm:$0xff] }
 0x132   :  { %6175 = vpow2.f32 %v1982_v15  ;;  %v1577_v61 = vrot.slane %v1576_v41, 4  ;;  %v1759_v6 = vmax.f32 %v1758_v28, %v13465_v22  ;;  %v1737_v56 = vmax.f32 %v1736_v31, %v8347_v12  ;;  %v13487_v28 = vld [vmem:[#allocation62_spill] sm:$0xff]  ;;  %v13498_v12 = vld [vmem:[#allocation69_spill] sm:$0xff] }
 0x133   :  { %13464 = vst [vmem:[#allocation18_spill] sm:$0xff] %v8620_v2  ;;  %v8624_v55 = vpop.eup %6157  ;;  %6177 = vpow2.f32 %v1992_v7  ;;  %13467 = vst [vmem:[#allocation17_spill] sm:$0xff] %v8628_v49  ;;  %v8632_v32 = vmul.f32 %v8324_v37, %v13374_v62  ;;  %v8636_v30 = vmul.f32 %v8324_v37, %v13469_v44  ;;  %v8648_v18 = vmul.f32 %v8324_v37, %v13475_v38  ;;  %v13481_v7 = vld [vmem:[#allocation39_spill] sm:$0xff] }
 0x134   :  { %13466 = vst [vmem:[#allocation22_spill] sm:$0xff] %v8624_v55  ;;  %v8638_v45 = vpop.eup %6159  ;;  %6179 = vpow2.f32 %v2002_v59  ;;  %v1578_v24 = vadd.f32 %v1577_v61, %v1576_v41  ;;  %v1760_v27 = vmax.f32 %v1759_v6, %v13472_v33  ;;  %v1738_v13 = vmax.f32 %v1737_v56, %v13473_v0  ;;  %v13488_v41 = vld [vmem:[#allocation67_spill] sm:$0xff]  ;;  %v13489_v6 = vld [vmem:[#allocation45_spill] sm:$0xff] }
 0x135   :  { %13468 = vst [vmem:[#allocation13_spill] sm:$0xff] %v8632_v32  ;;  %13470 = vst [vmem:[#allocation23_spill] sm:$0xff] %v8636_v30  ;;  %v8642_v58 = vpop.eup %6161  ;;  %6181 = vpow2.f32 %v2012_v53  ;;  %v2052_v1 = vadd.f32 %v8638_v45, %v8624_v55  ;;  %v8652_v10 = vmul.f32 %v8324_v37, %v13477_v60  ;;  %v8663_v54 = vmul.f32 %v8324_v37, %v13483_v14 }
 0x136   :  { %13471 = vst [vmem:[#allocation11_spill] sm:$0xff] %v8638_v45  ;;  %13474 = vst [vmem:[#allocation31_spill] sm:$0xff] %v8642_v58  ;;  %v8654_v9 = vpop.eup %6163  ;;  %6183 = vpow2.f32 %v2022_v21  ;;  %v1579_v4 = vrot.slane %v1578_v24, 2  ;;  %v1761_v15 = vmax.f32 %v1760_v27, %v13480_v11  ;;  %v1739_v17 = vmax.f32 %v1738_v13, %v13481_v7  ;;  %v13491_v13 = vld [vmem:[#allocation46_spill] sm:$0xff]  ;;  %v13494_v45 = vld [vmem:[#allocation68_spill] sm:$0xff] }
 0x137   :  { %13476 = vst [vmem:[#allocation10_spill] sm:$0xff] %v8648_v18  ;;  %13478 = vst [vmem:[#allocation12_spill] sm:$0xff] %v8652_v10  ;;  %v8658_v59 = vpop.eup %6165  ;;  %6185 = vpow2.f32 %v2032_v47  ;;  %v2053_v53 = vadd.f32 %v8642_v58, %v2052_v1  ;;  %v8667_v3 = vmul.f32 %v8324_v37, %v13485_v26  ;;  %v8675_v47 = vmul.f32 %v8324_v37, %v13489_v6 }
 0x138   :  { %13479 = vst [vmem:[#allocation35_spill] sm:$0xff] %v8654_v9  ;;  %13482 = vst [vmem:[#allocation53_spill] sm:$0xff] %v8658_v59  ;;  %v8669_v63 = vpop.eup %6167  ;;  %v1580_v21 = vadd.f32 %v1579_v4, %v1578_v24  ;;  %v1762_v31 = vmax.f32 %v1761_v15, %v13487_v28  ;;  %v1740_v61 = vmax.f32 %v1739_v17, %v13488_v41  ;;  %6187 = vpow2.f32 %v2042_v51  ;;  %v13493_v17 = vld [vmem:[#allocation38_spill] sm:$0xff] }
 0x139   :  { %13484 = vst [vmem:[#allocation32_spill] sm:$0xff] %v8663_v54  ;;  %13486 = vst [vmem:[#allocation29_spill] sm:$0xff] %v8669_v63  ;;  %v8677_v56 = vpop.eup %6169  ;;  %v2054_v27 = vadd.f32 %v8654_v9, %v2053_v53  ;;  %v8682_v1 = vmul.f32 %v8324_v37, %v13491_v13  ;;  %v8686_v24 = vmul.f32 %v8324_v37, %v13398_v36  ;;  %v13513_v13 = vld [vmem:[#allocation15_spill] sm:$0xff] }
 0x13a   :  { %13490 = vst [vmem:[#allocation25_spill] sm:$0xff] %v8677_v56  ;;  %v8688_v4 = vpop.eup %6171  ;;  %v1581_v15 = vrot.slane %v1580_v21, 1  ;;  %v1763_v58 = vmax.f32 %v1762_v31, %v13493_v17  ;;  %v1741_v55 = vmax.f32 %v1740_v61, %v13494_v45  ;;  %v8694_v51 = vmul.f32 %v8324_v37, %v13399_v19  ;;  %v13497_v19 = vld [vmem:[#allocation63_spill] sm:$0xff] }
 0x13b   :  { %13492 = vst [vmem:[#allocation24_spill] sm:$0xff] %v8688_v4  ;;  %v8696_v53 = vpop.eup %6173  ;;  %v2055_v9 = vadd.f32 %v8658_v59, %v2054_v27  ;;  %v8701_v41 = vmul.f32 %v8324_v37, %v13400_v42  ;;  %v8705_v7 = vmul.f32 %v8324_v37, %v13401_v46  ;;  %v1781_v31 = vsel %vm489_vm0, %v8620_v2, -inf }
 0x13c   :  { %13495 = vst [vmem:[#allocation19_spill] sm:$0xff] %v8696_v53  ;;  %v8709_v61 = vpop.eup %6175  ;;  %v1582_v45 = vadd.f32 %v1581_v15, %v1580_v21  ;;  %v1764_v0 = vmax.f32 %v1763_v58, %v13497_v19  ;;  %v1742_v29 = vmax.f32 %v1741_v55, %v13498_v12  ;;  %v1782_v27 = vsel %vm489_vm0, %v8628_v49, -inf  ;;  %v13501_v55 = vld [vmem:[#allocation64_spill] sm:$0xff] }
 0x13d   :  { %13496 = vst [vmem:[#allocation14_spill] sm:$0xff] %v8709_v61  ;;  %v8715_v59 = vpop.eup %6177  ;;  %v2056_v42 = vadd.f32 %v8669_v63, %v2055_v9  ;;  %v8720_v46 = vmul.f32 %v8324_v37, %v13403_v40  ;;  %v1783_v36 = vmax.f32 %v1781_v31, %v1782_v27  ;;  %v1784_v2 = vsel %vm489_vm0, %v8632_v32, -inf  ;;  %v13503_v27 = vld [vmem:[#allocation70_spill] sm:$0xff] }
 0x13e   :  { %13499 = vst [vmem:[#allocation16_spill] sm:$0xff] %v8715_v59  ;;  %v8724_v21 = vpop.eup %6179  ;;  %v1599_v58 = vmul.f32 %v13451_v43, %v1582_v45  ;;  %v8728_v15 = vmax.f32 %v1764_v0, %v13501_v55  ;;  %v8732_v49 = vmul.f32 %v8324_v37, %v13404_v35  ;;  %v8736_v9 = vsel %vm489_vm0, %v8636_v30, -inf  ;;  %v8750_v37 = vpop.permute.xlu1 %2315  ;;  %v13506_v30 = vld [vmem:[#allocation54_spill] sm:$0xff] }
 0x13f   :  { %13500 = vst [vmem:[#allocation30_spill] sm:$0xff] %v8724_v21  ;;  %v8738_v63 = vpop.eup %6181  ;;  %v2057_v31 = vadd.f32 %v8677_v56, %v2056_v42  ;;  %v1743_v32 = vmax.f32 %v1742_v29, %v13503_v27  ;;  %v8742_v40 = vmax.f32 %v1783_v36, %v1784_v2  ;;  %v8746_v45 = vsel %vm489_vm0, %v8648_v18, -inf  ;;  %13505 = vst [vmem:[#allocation60_spill] sm:$0xff] %v8750_v37  ;;  %v13508_v18 = vld [vmem:[#allocation36_spill] sm:$0xff] }
 0x140   :  { %13502 = vst [vmem:[#allocation59_spill] sm:$0xff] %v8738_v63  ;;  %v8748_v0 = vpop.eup %6183  ;;  %v1630_v43 = vsel %vm1622_vm7, %v1599_v58, %v8594_v52  ;;  %v1814_v35 = vsub.f32 %v13506_v30, %v8728_v15  ;;  %v8758_v42 = vsel %vm489_vm0, %v8652_v10, -inf  ;;  %v8762_v36 = vsel %vm489_vm0, %v8663_v54, -inf  ;;  %v13509_v52 = vld [vmem:[#allocation26_spill] sm:$0xff]  ;;  %v13510_v30 = vld [vmem:[#allocation33_spill] sm:$0xff]  ;;  %v13511_v10 = vld [vmem:[#allocation55_spill] sm:$0xff] }
 0x141   :  { %13504 = vst [vmem:[#allocation27_spill] sm:$0xff] %v8748_v0  ;;  %v8764_v29 = vpop.eup %6185  ;;  %v2058_v2 = vadd.f32 %v8688_v4, %v2057_v31  ;;  %1634 = vst [vmem:[#allocation5 + $0x18] sm:$0xff] %v1630_v43  ;;  %v1819_v56 = vsub.f32 %v13508_v18, %v8728_v15  ;;  %v1824_v58 = vsub.f32 %v13509_v52, %v8728_v15  ;;  %v13512_v54 = vld [vmem:[#allocation37_spill] sm:$0xff] }
 0x142   :  { %13507 = vst [vmem:[#allocation40_spill] sm:$0xff] %v8764_v29  ;;  %v1829_v37 = vsub.f32 %v13510_v30, %v8728_v15  ;;  %v1834_v27 = vsub.f32 %v13511_v10, %v8728_v15  ;;  %v1839_v12 = vsub.f32 %v13512_v54, %v8728_v15  ;;  %v1844_v16 = vsub.f32 %v13513_v13, %v8728_v15  ;;  %v8781_v31 = vpop.eup %6187  ;;  %v8797_v26 = vpop.permute.xlu1 %2325 }
 0x143   :  { %v1849_v43 = vsub.f32 %v13462_v25, %v8728_v15  ;;  %13514 = vst [vmem:[#allocation56_spill] sm:$0xff] %v8781_v31  ;;  %v2059_v18 = vadd.f32 %v8696_v53, %v2058_v2  ;;  %v1854_v52 = vsub.f32 %v13463_v48, %v8728_v15  ;;  %v1859_v30 = vsub.f32 %v13465_v22, %v8728_v15 }
 0x144   :  { %v1864_v10 = vsub.f32 %v13472_v33, %v8728_v15  ;;  %v1869_v54 = vsub.f32 %v13480_v11, %v8728_v15  ;;  %v1874_v13 = vsub.f32 %v13487_v28, %v8728_v15  ;;  %v1879_v25 = vsub.f32 %v13493_v17, %v8728_v15  ;;  %13515 = vst [vmem:[#allocation41_spill] sm:$0xff] %v8797_v26  ;;  %v8803_v28 = vpop.permute.xlu0 %2320 }
 0x145   :  { %v1896_v4 = vmul.f32 1.442695, %v1814_v35  ;;  %v2060_v2 = vadd.f32 %v8709_v61, %v2059_v18  ;;  %v1906_v53 = vmul.f32 1.442695, %v1819_v56  ;;  %v1916_v48 = vmul.f32 1.442695, %v1824_v58 }
 0x146   :  { %v1926_v6 = vmul.f32 1.442695, %v1829_v37  ;;  %v1884_v22 = vsub.f32 %v13497_v19, %v8728_v15  ;;  %v1889_v33 = vsub.f32 %v13501_v55, %v8728_v15  ;;  %v1936_v11 = vmul.f32 1.442695, %v1834_v27  ;;  %13516 = vst [vmem:[#allocation42_spill] sm:$0xff] %v8803_v28  ;;  %v13517_v15 = vld [vmem:[#allocation71_spill] sm:$0xff] }
 0x147   :  { %6189 = vpow2.f32 %v1896_v4  ;;  %v2061_v17 = vadd.f32 %v8715_v59, %v2060_v2  ;;  %v1946_v35 = vmul.f32 1.442695, %v1839_v12  ;;  %v1956_v18 = vmul.f32 1.442695, %v1844_v16 }
 0x148   :  { %6191 = vpow2.f32 %v1906_v53  ;;  %v1966_v56 = vmul.f32 1.442695, %v1849_v43  ;;  %v1976_v37 = vmul.f32 1.442695, %v1854_v52  ;;  %v1986_v58 = vmul.f32 1.442695, %v1859_v30  ;;  %v8818_v30 = vpop.permute.xlu0 %2330 }
 0x149   :  { %6193 = vpow2.f32 %v1916_v48  ;;  %v2062_v26 = vadd.f32 %v8724_v21, %v2061_v17  ;;  %v1996_v19 = vmul.f32 1.442695, %v1864_v10  ;;  %v2006_v61 = vmul.f32 1.442695, %v1869_v54  ;;  %13519 = vst [vmem:[#allocation43_spill] sm:$0xff] %v8818_v30 }
 0x14a   :  { %6195 = vpow2.f32 %v1926_v6  ;;  %v2016_v55 = vmul.f32 1.442695, %v1874_v13  ;;  %v2026_v4 = vmul.f32 1.442695, %v1879_v25  ;;  %v1744_v27 = vmax.f32 %v1743_v32, %v13517_v15  ;;  %v8814_v6 = vpop.permute.xlu1 %2335  ;;  %v2301_v13 = vld [vmem:[%s12819_s7 + $0x220] sm:$0xff] }
 0x14b   :  { %6197 = vpow2.f32 %v1936_v11  ;;  %v2063_v28 = vadd.f32 %v8738_v63, %v2062_v26  ;;  %v2036_v53 = vmul.f32 1.442695, %v1884_v22  ;;  %v1787_v16 = vmax.f32 %v8742_v40, %v8736_v9  ;;  %13518 = vst [vmem:[#allocation61_spill] sm:$0xff] %v8814_v6  ;;  %2655 = vperm.xlu1 %6002, %v2301_v13  }
 0x14c   :  { %6199 = vpow2.f32 %v1946_v35  ;;  %v8811_v12 = vmul.f32 1.442695, %v1889_v33  ;;  %v1745_v43 = vmax.f32 %v1744_v27, %v8546_v8  ;;  %v1794_v52 = vsel %vm489_vm0, %v8667_v3, -inf }
 0x14d   :  { %6201 = vpow2.f32 %v1956_v18  ;;  %v2064_v32 = vadd.f32 %v8748_v0, %v2063_v28  ;;  %v1789_v26 = vmax.f32 %v1787_v16, %v8746_v45  ;;  %v1796_v40 = vsel %vm489_vm0, %v8675_v47, -inf  ;;  %v2300_v45 = vld [vmem:[%s12819_s7 + $0x218] sm:$0xff] }
 0x14e   :  { %6203 = vpow2.f32 %v1966_v56  ;;  %v1746_v9 = vmax.f32 %v1745_v43, %v8550_v57  ;;  %v8827_v10 = vsel %vm489_vm0, %v8682_v1, -inf  ;;  %v8831_v54 = vsel %vm489_vm0, %v8686_v24, -inf  ;;  %2650 = vperm.xlu0 %6001, %v2300_v45   ;;  %v8873_v27 = vpop.permute.xlu1 %2345 }
 0x14f   :  { %6205 = vpow2.f32 %v1976_v37  ;;  %v2065_v25 = vadd.f32 %v8764_v29, %v2064_v32  ;;  %v1791_v2 = vmax.f32 %v1789_v26, %v8758_v42  ;;  %v8843_v48 = vsel %vm489_vm0, %v8694_v51, -inf  ;;  %13523 = vst [vmem:[#allocation64_spill] sm:$0xff] %v8873_v27  ;;  %v13525_v32 = vld [vmem:[#allocation28_spill] sm:$0xff]  ;;  %v13544_v27 = vld [vmem:[#allocation57_spill] sm:$0xff]  ;;  %v13545_v29 = vld [vmem:[#allocation39_spill] sm:$0xff] }
 0x150   :  { %6207 = vpow2.f32 %v1986_v58  ;;  %v1747_v33 = vmax.f32 %v1746_v9, %v8600_v5  ;;  %v8850_v11 = vsel %vm489_vm0, %v8701_v41, -inf  ;;  %v8854_v28 = vsel %vm489_vm0, %v8705_v7, -inf }
 0x151   :  { %v8845_v22 = vpop.eup %6189  ;;  %6209 = vpow2.f32 %v1996_v19  ;;  %v2066_v17 = vadd.f32 %v8781_v31, %v2065_v25  ;;  %v1793_v35 = vmax.f32 %v1791_v2, %v8762_v36  ;;  %v8862_v18 = vsel %vm489_vm0, %v8720_v46, -inf  ;;  %v2303_v36 = vld [vmem:[%s12819_s7 + $0x230] sm:$0xff] }
 0x152   :  { %13520 = vst [vmem:[#allocation62_spill] sm:$0xff] %v8845_v22  ;;  %v8856_v42 = vpop.eup %6191  ;;  %6211 = vpow2.f32 %v2006_v61  ;;  %v1748_v58 = vmax.f32 %v1747_v33, %v8604_v39  ;;  %v8871_v19 = vsel %vm489_vm0, %v8732_v49, -inf  ;;  %v8875_v61 = vpop.permute.xlu0 %2340  ;;  %v8887_v26 = vmul.f32 %v13525_v32, %v13361_v20  ;;  %2665 = vperm.xlu1 %6002, %v2303_v36   ;;  %v13543_v31 = vld [vmem:[#allocation66_spill] sm:$0xff] }
 0x153   :  { %13521 = vst [vmem:[#allocation38_spill] sm:$0xff] %v8856_v42  ;;  %v8864_v56 = vpop.eup %6193  ;;  %6213 = vpow2.f32 %v2016_v55  ;;  %v2082_v37 = vadd.f32 %v8856_v42, %v8845_v22  ;;  %v2302_v55 = vld [vmem:[%s12819_s7 + $0x228] sm:$0x7f]  ;;  %v1795_v43 = vmax.f32 %v1793_v35, %v1794_v52  ;;  %v8891_v9 = vmul.f32 %v13525_v32, %v13369_v34 }
 0x154   :  { %13522 = vst [vmem:[#allocation63_spill] sm:$0xff] %v8864_v56  ;;  %v8883_v16 = vpop.eup %6195  ;;  %6215 = vrcp.f32 %v2066_v17  ;;  %2660 = vperm.xlu0 %6001, %v2302_v55   ;;  %v1749_v25 = vmax.f32 %v1748_v58, %v8609_v23  ;;  %v8899_v52 = vmul.f32 %v13525_v32, %v13374_v62  ;;  %v8907_v34 = vmul.f32 %v13525_v32, %v13469_v44  ;;  %v8927_v44 = vpop.permute.xlu1 %2355  ;;  %v13535_v55 = vld [vmem:[#allocation45_spill] sm:$0xff] }
 0x155   :  { %13524 = vst [vmem:[#allocation54_spill] sm:$0xff] %v8883_v16  ;;  %v8893_v13 = vpop.eup %6197  ;;  %6217 = vpow2.f32 %v2026_v4  ;;  %v2083_v45 = vadd.f32 %v8864_v56, %v2082_v37  ;;  %v8903_v20 = vmax.f32 %v1795_v43, %v1796_v40  ;;  %v8911_v4 = vmul.f32 %v13525_v32, %v13475_v38  ;;  %13530 = vst [vmem:[#allocation37_spill] sm:$0xff] %v8927_v44  ;;  %v2305_v38 = vld [vmem:[%s12819_s7 + $0x240] sm:$0xff]  ;;  %v2304_v37 = vld [vmem:[%s12819_s7 + $0x238] sm:$0xff] }
 0x156   :  { %13526 = vst [vmem:[#allocation36_spill] sm:$0xff] %v8893_v13  ;;  %v8901_v2 = vpop.eup %6199  ;;  %6219 = vpow2.f32 %v2036_v53  ;;  %v8917_v62 = vmax.f32 %v1749_v25, %v8616_v50  ;;  %v8921_v53 = vmul.f32 %v13525_v32, %v13477_v60  ;;  %v8925_v40 = vmul.f32 %v13525_v32, %v13483_v14  ;;  %v8929_v35 = vpop.permute.xlu0 %2350  ;;  %v13533_v14 = vld [vmem:[#allocation44_spill] sm:$0xff]  ;;  %2675 = vperm.xlu1 %6002, %v2305_v38   ;;  %v13537_v44 = vld [vmem:[#allocation34_spill] sm:$0xff]  ;;  %v13542_v38 = vld [vmem:[#allocation65_spill] sm:$0xff] }
 0x157   :  { %13527 = vst [vmem:[#allocation26_spill] sm:$0xff] %v8901_v2  ;;  %13528 = vst [vmem:[#allocation33_spill] sm:$0xff] %v8911_v4  ;;  %v8913_v33 = vpop.eup %6201  ;;  %v2084_v17 = vadd.f32 %v8883_v16, %v2083_v45  ;;  %6221 = vpow2.f32 %v8811_v12  ;;  %v1799_v60 = vmax.f32 %v8903_v20, %v8827_v10  ;;  %v8944_v36 = vmul.f32 %v13525_v32, %v13533_v14  ;;  %v13538_v12 = vld [vmem:[#allocation46_spill] sm:$0xff]  ;;  %v13540_v10 = vld [vmem:[#allocation47_spill] sm:$0xff] }
 0x158   :  { %13529 = vst [vmem:[#allocation55_spill] sm:$0xff] %v8913_v33  ;;  %13531 = vst [vmem:[#allocation15_spill] sm:$0xff] %v8929_v35  ;;  %v8937_v58 = vpop.eup %6203  ;;  %v8948_v43 = vmul.f32 %v13525_v32, %v13535_v55  ;;  %v1813_v30 = vsub.f32 %v13537_v44, %v8917_v62  ;;  %v8957_v6 = vmul.f32 %v13525_v32, %v13538_v12  ;;  %2670 = vperm.xlu0 %6001, %v2304_v37   ;;  %v13546_v37 = vld [vmem:[#allocation67_spill] sm:$0xff] }
 0x159   :  { %13532 = vst [vmem:[#allocation71_spill] sm:$0xff] %v8937_v58  ;;  %13534 = vst [vmem:[#allocation28_spill] sm:$0xff] %v8944_v36  ;;  %v8950_v45 = vpop.eup %6205  ;;  %v2085_v25 = vadd.f32 %v8893_v13, %v2084_v17  ;;  %v8961_v20 = vmul.f32 %v13525_v32, %v13540_v10  ;;  %v1818_v55 = vsub.f32 %v13542_v38, %v8917_v62  ;;  %v13547_v13 = vld [vmem:[#allocation68_spill] sm:$0xff]  ;;  %v13548_v38 = vld [vmem:[#allocation69_spill] sm:$0xff] }
 0x15a   :  { %13536 = vst [vmem:[#allocation44_spill] sm:$0xff] %v8948_v43  ;;  %13539 = vst [vmem:[#allocation45_spill] sm:$0xff] %v8957_v6  ;;  %v8963_v14 = vpop.eup %6207  ;;  %v1823_v17 = vsub.f32 %v13543_v31, %v8917_v62  ;;  %v1828_v44 = vsub.f32 %v13544_v27, %v8917_v62  ;;  %v1833_v12 = vsub.f32 %v13545_v29, %v8917_v62  ;;  %v8982_v31 = vpop.permute.xlu1 %2365  ;;  %v2307_v29 = vld [vmem:[%s12819_s7 + $0x250] sm:$0x7f]  ;;  %v2306_v27 = vld [vmem:[%s12819_s7 + $0x248] sm:$0xff] }
 0x15b   :  { %13541 = vst [vmem:[#allocation34_spill] sm:$0xff] %v8961_v20  ;;  %v8973_v0 = vpop.eup %6209  ;;  %v2086_v10 = vadd.f32 %v8901_v2, %v2085_v25  ;;  %v1838_v63 = vsub.f32 %v13546_v37, %v8917_v62  ;;  %v1843_v20 = vsub.f32 %v13547_v13, %v8917_v62  ;;  %v1848_v35 = vsub.f32 %v13548_v38, %v8917_v62  ;;  %v8984_v6 = vpop.permute.xlu0 %2360  ;;  %v13550_v37 = vld [vmem:[#allocation70_spill] sm:$0xff] }
 0x15c   :  { %13549 = vst [vmem:[#allocation46_spill] sm:$0xff] %v8984_v6  ;;  %v8992_v25 = vpop.eup %6211  ;;  %v1853_v13 = vsub.f32 %v13550_v37, %v8917_v62  ;;  %v1858_v38 = vsub.f32 %v13517_v15, %v8917_v62  ;;  %v1863_v2 = vsub.f32 %v8546_v8, %v8917_v62  ;;  %v1868_v6 = vsub.f32 %v8550_v57, %v8917_v62 }
 0x15d   :  { %2685 = vperm.xlu1 %6002, %v2307_v29   ;;  %v9002_v16 = vpop.eup %6213  ;;  %v2087_v56 = vadd.f32 %v8913_v33, %v2086_v10  ;;  %v1873_v43 = vsub.f32 %v8600_v5, %v8917_v62  ;;  %v1878_v37 = vsub.f32 %v8604_v39, %v8917_v62  ;;  %v1894_v21 = vmul.f32 1.442695, %v1813_v30  ;;  %2680 = vperm.xlu0 %6001, %v2306_v27   ;;  %v6573_v10 = vld [vmem:[%s12815_s3] sm:$0xff] }
 0x15e   :  { %v6216_v15 = vpop.eup %6215  ;;  %v1883_v8 = vsub.f32 %v8609_v23, %v8917_v62  ;;  %v1904_v59 = vmul.f32 1.442695, %v1818_v55  ;;  %v1914_v42 = vmul.f32 1.442695, %v1823_v17  ;;  %v1924_v57 = vmul.f32 1.442695, %v1828_v44  ;;  %v9019_v30 = vpop.permute.xlu1 %2375 }
 0x15f   :  { %v9011_v29 = vpop.eup %6217  ;;  %v9016_v33 = vmul.f32 %v6573_v10, %v6216_v15  ;;  %v2088_v5 = vadd.f32 %v8937_v58, %v2087_v56  ;;  %6223 = vpow2.f32 %v1894_v21  ;;  %v1934_v39 = vmul.f32 1.442695, %v1833_v12  ;;  %13552 = vst [vmem:[#allocation65_spill] sm:$0xff] %v9019_v30  ;;  %v9021_v27 = vpop.permute.xlu0 %2370  ;;  %v2309_v23 = vld [vmem:[%s12819_s7 + $0x260] sm:$0xff]  ;;  %v2308_v55 = vld [vmem:[%s12819_s7 + $0x258] sm:$0xff]  ;;  %v13554_v12 = vld [vmem:[#allocation22_spill] sm:$0xff] }
 0x160   :  { %13553 = vst [vmem:[#allocation66_spill] sm:$0xff] %v9021_v27  ;;  %v9029_v17 = vpop.eup %6219  ;;  %v1888_v44 = vsub.f32 %v8616_v50, %v8917_v62  ;;  %6225 = vpow2.f32 %v1904_v59  ;;  %v1944_v21 = vmul.f32 1.442695, %v1838_v63  ;;  %v1801_v56 = vmax.f32 %v1799_v60, %v8831_v54  ;;  %v2310_v60 = vld [vmem:[%s12819_s7 + $0x268] sm:$0xff] }
 0x161   :  { %13551 = vst [vmem:[#allocation47_spill] sm:$0xff] %v9016_v33  ;;  %2695 = vperm.xlu1 %6002, %v2309_v23   ;;  %v2153_v15 = vmul.f32 %v13554_v12, %v9016_v33  ;;  %v2089_v10 = vadd.f32 %v8950_v45, %v2088_v5  ;;  %6227 = vpow2.f32 %v1914_v42  ;;  %v1954_v27 = vmul.f32 1.442695, %v1843_v20  ;;  %2690 = vperm.xlu0 %6001, %v2308_v55   ;;  %v9037_v58 = vpop.eup %6221  ;;  %v2311_v42 = vld [vmem:[%s12819_s7 + $0x270] sm:$0xff]  ;;  %v3815_v5 = vld [vmem:[%s12820_s8] sm:$0x7f] }
 0x162   :  { %13555 = vst [vmem:[#allocation57_spill] sm:$0xff] %v9037_v58  ;;  %6229 = vpow2.f32 %v1924_v57  ;;  %v1964_v30 = vmul.f32 1.442695, %v1848_v35  ;;  %v1974_v36 = vmul.f32 1.442695, %v1853_v13  ;;  %v9040_v54 = vpop.permute.xlu1 %2385  ;;  %v13558_v35 = vld [vmem:[#allocation60_spill] sm:$0xff]  ;;  %v1803_v57 = vmax.f32 %v1801_v56, %v8843_v48 }
 0x163   :  { %v1984_v22 = vmul.f32 1.442695, %v1858_v38  ;;  %v2090_v50 = vadd.f32 %v8963_v14, %v2089_v10  ;;  %6231 = vpow2.f32 %v1934_v39  ;;  %v1994_v59 = vmul.f32 1.442695, %v1863_v2  ;;  %13556 = vst [vmem:[#allocation39_spill] sm:$0xff] %v9040_v54  ;;  %v9042_v62 = vpop.permute.xlu0 %2380  ;;  %v13560_v23 = vld [vmem:[#allocation48_spill] sm:$0xff] }
 0x164   :  { %v2004_v63 = vmul.f32 1.442695, %v1868_v6  ;;  %13557 = vst [vmem:[#allocation67_spill] sm:$0xff] %v9042_v62  ;;  %v9051_v20 = vmul.f32 %v13558_v35, %v2153_v15  ;;  %6233 = vpow2.f32 %v1944_v21  ;;  %v2014_v13 = vmul.f32 1.442695, %v1873_v43  ;;  %v13561_v43 = vld [vmem:[#allocation49_spill] sm:$0xff] }
 0x165   :  { %v2024_v38 = vmul.f32 1.442695, %v1878_v37  ;;  %2705 = vperm.xlu1 %6002, %v2311_v42   ;;  %v2091_v6 = vadd.f32 %v8973_v0, %v2090_v50  ;;  %6235 = vpow2.f32 %v1954_v27  ;;  %v2034_v2 = vmul.f32 1.442695, %v1883_v8  ;;  %2700 = vperm.xlu0 %6001, %v2310_v60   ;;  %v2312_v8 = vld [vmem:[%s12819_s7 + $0x278] sm:$0x7f] }
 0x166   :  { %13559 = vst [vmem:[#allocation68_spill] sm:$0xff] %v9051_v20  ;;  %6237 = vpow2.f32 %v1964_v30  ;;  %v2044_v39 = vmul.f32 1.442695, %v1888_v44  ;;  %v9060_v55 = vmul.f32 %v13525_v32, %v13560_v23  ;;  %v9064_v37 = vmul.f32 %v13525_v32, %v13561_v43  ;;  %v13562_v21 = vld [vmem:[#allocation50_spill] sm:$0xff]  ;;  %v9075_v44 = vpop.permute.xlu1 %2395  ;;  %v13564_v15 = vld [vmem:[#allocation11_spill] sm:$0xff] }
 0x167   :  { %v2092_v48 = vadd.f32 %v8992_v25, %v2091_v6  ;;  %6239 = vpow2.f32 %v1974_v36  ;;  %v1805_v27 = vmax.f32 %v1803_v57, %v8850_v11  ;;  %v9073_v30 = vmul.f32 %v13525_v32, %v13562_v21  ;;  %13563 = vst [vmem:[#allocation69_spill] sm:$0xff] %v9075_v44  ;;  %v2391_v56 = vpop.permute.xlu0 %2390  ;;  %v13565_v50 = vld [vmem:[#allocation31_spill] sm:$0xff]  ;;  %v3817_v6 = vld [vmem:[%s12820_s8 + $0x10] sm:$0x7f] }
 0x168   :  { %6241 = vpow2.f32 %v1984_v22  ;;  %v1766_v12 = vmax.f32 %v8887_v26, %v8891_v9  ;;  %v2158_v10 = vmul.f32 %v13564_v15, %v9016_v33  ;;  %v2163_v42 = vmul.f32 %v13565_v50, %v9016_v33  ;;  %v13567_v35 = vld [vmem:[#allocation51_spill] sm:$0xff]  ;;  %v13588_v54 = vld [vmem:[#allocation10_spill] sm:$0xff] }
 0x169   :  { %3856 = vperm.xlu1 %6002, %v3815_v5   ;;  %v9083_v36 = vpop.eup %6223  ;;  %v2093_v11 = vadd.f32 %v9002_v16, %v2092_v48  ;;  %6243 = vpow2.f32 %v1994_v59  ;;  %v1807_v60 = vmax.f32 %v1805_v27, %v8854_v28  ;;  %v9089_v22 = vmul.f32 %v13525_v32, %v13567_v35  ;;  %2710 = vperm.xlu0 %6001, %v2312_v8   ;;  %v13569_v5 = vld [vmem:[#allocation52_spill] sm:$0xff]  ;;  %v13570_v28 = vld [vmem:[#allocation35_spill] sm:$0xff]  ;;  %v3816_v8 = vld [vmem:[%s12820_s8 + $0x8] sm:$0x7f] }
 0x16a   :  { %13566 = vst [vmem:[#allocation70_spill] sm:$0xff] %v9083_v36  ;;  %v9094_v57 = vpop.eup %6225  ;;  %6245 = vpow2.f32 %v2004_v63  ;;  %v9098_v23 = vmul.f32 %v13525_v32, %v13569_v5  ;;  %v1767_v59 = vmax.f32 %v1766_v12, %v8899_v52  ;;  %v2168_v43 = vmul.f32 %v13570_v28, %v9016_v33  ;;  %v9112_v21 = vpop.permute.xlu1 %2405 }
 0x16b   :  { %13568 = vst [vmem:[#allocation22_spill] sm:$0xff] %v9094_v57  ;;  %v9106_v48 = vpop.eup %6227  ;;  %v2094_v27 = vadd.f32 %v9011_v29, %v2093_v11  ;;  %6247 = vpow2.f32 %v2014_v13  ;;  %v2067_v63 = vadd.f32 %v9094_v57, %v9083_v36  ;;  %v1809_v32 = vmax.f32 %v1807_v60, %v8862_v18  ;;  %13572 = vst [vmem:[#allocation48_spill] sm:$0xff] %v9112_v21  ;;  %v9114_v12 = vpop.permute.xlu0 %2400  ;;  %v13586_v21 = vld [vmem:[#allocation13_spill] sm:$0xff] }
 0x16c   :  { %13571 = vst [vmem:[#allocation60_spill] sm:$0xff] %v9106_v48  ;;  %v9116_v15 = vpop.eup %6229  ;;  %6249 = vpow2.f32 %v2024_v38  ;;  %v1768_v50 = vmax.f32 %v1767_v59, %v8907_v34  ;;  %v9120_v35 = vmul.f32 %v8875_v61, %v2158_v10  ;;  %v9123_v11 = vmul.f32 %v8982_v31, %v2163_v42  ;;  %v3819_v61 = vld [vmem:[%s12820_s8 + $0x20] sm:$0x7f] }
 0x16d   :  { %13573 = vst [vmem:[#allocation49_spill] sm:$0xff] %v9116_v15  ;;  %3866 = vperm.xlu1 %6002, %v3817_v6   ;;  %v9125_v13 = vpop.eup %6231  ;;  %v2095_v18 = vadd.f32 %v9029_v17, %v2094_v27  ;;  %6251 = vpow2.f32 %v2034_v2  ;;  %v2068_v60 = vadd.f32 %v9106_v48, %v2067_v63  ;;  %v9130_v5 = vmax.f32 %v1809_v32, %v8871_v19  ;;  %v13579_v2 = vld [vmem:[#allocation53_spill] sm:$0xff]  ;;  %v3818_v19 = vld [vmem:[%s12820_s8 + $0x18] sm:$0x7f] }
 0x16e   :  { %13574 = vst [vmem:[#allocation50_spill] sm:$0xff] %v9120_v35  ;;  %13575 = vst [vmem:[#allocation11_spill] sm:$0xff] %v9123_v11  ;;  %3861 = vperm.xlu0 %6001, %v3816_v8   ;;  %v9135_v38 = vpop.eup %6233  ;;  %6253 = vpow2.f32 %v2044_v39  ;;  %v9138_v31 = vmax.f32 %v1768_v50, %v8911_v4  ;;  %v9140_v10 = vmul.f32 %v2391_v56, %v2168_v43  ;;  %v9153_v39 = vpop.permute.xlu1 %2415  ;;  %v13582_v56 = vld [vmem:[#allocation29_spill] sm:$0xff]  ;;  %v13584_v50 = vld [vmem:[#allocation18_spill] sm:$0xff] }
 0x16f   :  { %13576 = vst [vmem:[#allocation31_spill] sm:$0xff] %v9125_v13  ;;  %13577 = vst [vmem:[#allocation51_spill] sm:$0xff] %v9135_v38  ;;  %v9144_v42 = vmul.f32 %v13579_v2, %v9016_v33  ;;  %v9149_v6 = vpop.eup %6235  ;;  %v2096_v59 = vadd.f32 %v9037_v58, %v2095_v18  ;;  %v2069_v28 = vadd.f32 %v9116_v15, %v2068_v60  ;;  %v9155_v8 = vpop.permute.xlu0 %2410  ;;  %v13583_v27 = vld [vmem:[#allocation25_spill] sm:$0xff]  ;;  %v13587_v58 = vld [vmem:[#allocation23_spill] sm:$0xff] }
 0x170   :  { %13578 = vst [vmem:[#allocation52_spill] sm:$0xff] %v9140_v10  ;;  %13580 = vst [vmem:[#allocation35_spill] sm:$0xff] %v9149_v6  ;;  %v9159_v43 = vmul.f32 %v13582_v56, %v9016_v33  ;;  %v9163_v63 = vmul.f32 %v13583_v27, %v9016_v33  ;;  %v9165_v32 = vpop.eup %6237  ;;  %v1816_v2 = vsub.f32 %v13584_v50, %v9130_v5  ;;  %v13585_v18 = vld [vmem:[#allocation17_spill] sm:$0xff]  ;;  %v13589_v50 = vld [vmem:[#allocation12_spill] sm:$0xff] }
 0x171   :  { %13581 = vst [vmem:[#allocation53_spill] sm:$0xff] %v9155_v8  ;;  %v1821_v60 = vsub.f32 %v13585_v18, %v9130_v5  ;;  %v1826_v62 = vsub.f32 %v13586_v21, %v9130_v5  ;;  %v1831_v8 = vsub.f32 %v13587_v58, %v9130_v5  ;;  %3876 = vperm.xlu1 %6002, %v3819_v61   ;;  %v9175_v56 = vpop.eup %6239  ;;  %6255 = vrcp.f32 %v2096_v59  ;;  %v3821_v21 = vld [vmem:[%s12820_s8 + $0x30] sm:$0x7f]  ;;  %v13590_v58 = vld [vmem:[#allocation32_spill] sm:$0xff] }
 0x172   :  { %v2070_v27 = vadd.f32 %v9125_v13, %v2069_v28  ;;  %v1836_v10 = vsub.f32 %v13588_v54, %v9130_v5  ;;  %v1841_v11 = vsub.f32 %v13589_v50, %v9130_v5  ;;  %3871 = vperm.xlu0 %6001, %v3818_v19   ;;  %v9185_v18 = vpop.eup %6241  ;;  %v1846_v61 = vsub.f32 %v13590_v58, %v9130_v5  ;;  %v3820_v19 = vld [vmem:[%s12820_s8 + $0x28] sm:$0x7f]  ;;  %v9207_v44 = vpop.permute.xlu1 %2425 }
 0x173   :  { %v1851_v59 = vsub.f32 %v8667_v3, %v9130_v5  ;;  %v1856_v28 = vsub.f32 %v8675_v47, %v9130_v5  ;;  %v1861_v54 = vsub.f32 %v8682_v1, %v9130_v5  ;;  %v9198_v50 = vpop.eup %6243  ;;  %v1866_v58 = vsub.f32 %v8686_v24, %v9130_v5  ;;  %v9209_v1 = vpop.permute.xlu0 %2420 }
 0x174   :  { %13591 = vst [vmem:[#allocation29_spill] sm:$0xff] %v9198_v50  ;;  %v2071_v35 = vadd.f32 %v9135_v38, %v2070_v27  ;;  %v1871_v3 = vsub.f32 %v8694_v51, %v9130_v5  ;;  %v1876_v47 = vsub.f32 %v8701_v41, %v9130_v5  ;;  %13592 = vst [vmem:[#allocation25_spill] sm:$0xff] %v9209_v1  ;;  %v9211_v13 = vpop.eup %6245  ;;  %v1900_v48 = vmul.f32 1.442695, %v1816_v2 }
 0x175   :  { %13593 = vst [vmem:[#allocation18_spill] sm:$0xff] %v9211_v13  ;;  %v1881_v15 = vsub.f32 %v8705_v7, %v9130_v5  ;;  %v1910_v27 = vmul.f32 1.442695, %v1821_v60  ;;  %v1920_v38 = vmul.f32 1.442695, %v1826_v62  ;;  %3886 = vperm.xlu1 %6002, %v3821_v21   ;;  %v9215_v24 = vpop.eup %6247  ;;  %v1886_v41 = vsub.f32 %v8720_v46, %v9130_v5 }
 0x176   :  { %13594 = vst [vmem:[#allocation17_spill] sm:$0xff] %v9215_v24  ;;  %v2072_v51 = vadd.f32 %v9149_v6, %v2071_v35  ;;  %v1891_v57 = vsub.f32 %v8732_v49, %v9130_v5  ;;  %v1930_v1 = vmul.f32 1.442695, %v1831_v8  ;;  %3881 = vperm.xlu0 %6001, %v3820_v19   ;;  %v3823_v7 = vld [vmem:[%s12820_s8 + $0x40] sm:$0x7f]  ;;  %v9228_v2 = vpop.eup %6249  ;;  %6257 = vpow2.f32 %v1900_v48  ;;  %v9233_v19 = vpop.permute.xlu1 %2435 }
 0x177   :  { %v3822_v62 = vld [vmem:[%s12820_s8 + $0x38] sm:$0x7f]  ;;  %v1940_v35 = vmul.f32 1.442695, %v1836_v10  ;;  %v1950_v60 = vmul.f32 1.442695, %v1841_v11  ;;  %v9230_v46 = vpop.eup %6251  ;;  %6259 = vpow2.f32 %v1910_v27  ;;  %v9235_v6 = vpop.permute.xlu0 %2430 }
 0x178   :  { %v1960_v21 = vmul.f32 1.442695, %v1846_v61  ;;  %13595 = vst [vmem:[#allocation13_spill] sm:$0xff] %v9230_v46  ;;  %v2073_v49 = vadd.f32 %v9165_v32, %v2072_v51  ;;  %v1970_v5 = vmul.f32 1.442695, %v1851_v59  ;;  %13596 = vst [vmem:[#allocation23_spill] sm:$0xff] %v9233_v19  ;;  %v9237_v20 = vpop.eup %6253  ;;  %6261 = vpow2.f32 %v1920_v38 }
 0x179   :  { %v1980_v8 = vmul.f32 1.442695, %v1856_v28  ;;  %13597 = vst [vmem:[#allocation10_spill] sm:$0xff] %v9235_v6  ;;  %v1990_v36 = vmul.f32 1.442695, %v1861_v54  ;;  %3896 = vperm.xlu1 %6002, %v3823_v7   ;;  %6263 = vpow2.f32 %v1930_v1  ;;  %v1770_v38 = vmax.f32 %v9138_v31, %v8921_v53  ;;  %v9264_v31 = vld [vmem:[%s12815_s3 + $0x10] sm:$0xff] }
 0x17a   :  { %v2000_v4 = vmul.f32 1.442695, %v1866_v58  ;;  %v2010_v48 = vmul.f32 1.442695, %v1871_v3  ;;  %v2074_v11 = vadd.f32 %v9175_v56, %v2073_v49  ;;  %v2020_v10 = vmul.f32 1.442695, %v1876_v47  ;;  %3891 = vperm.xlu0 %6001, %v3822_v62   ;;  %v9255_v47 = vpop.permute.xlu1 %2445 }
 0x17b   :  { %v2030_v61 = vmul.f32 1.442695, %v1881_v15  ;;  %v3825_v59 = vld [vmem:[%s12820_s8 + $0x50] sm:$0x7f]  ;;  %6265 = vpow2.f32 %v1940_v35  ;;  %v2040_v28 = vmul.f32 1.442695, %v1886_v41  ;;  %v6256_v58 = vpop.eup %6255  ;;  %v9253_v15 = vmul.f32 %v9153_v39, %v9144_v42  ;;  %v2441_v1 = vpop.permute.xlu0 %2440 }
 0x17c   :  { %v9243_v27 = vmul.f32 1.442695, %v1891_v57  ;;  %v3824_v54 = vld [vmem:[%s12820_s8 + $0x48] sm:$0x7f]  ;;  %v2075_v3 = vadd.f32 %v9185_v18, %v2074_v11  ;;  %6267 = vpow2.f32 %v1950_v60  ;;  %v13598_v57 = vld [vmem:[#allocation24_spill] sm:$0xff]  ;;  %13599 = vst [vmem:[#allocation12_spill] sm:$0xff] %v9264_v31  ;;  %v9267_v41 = vmul.f32 %v9264_v31, %v6256_v58 }
 0x17d   :  { %v9259_v51 = vmul.f32 %v13598_v57, %v9016_v33  ;;  %6269 = vpow2.f32 %v1960_v21  ;;  %v1771_v7 = vmax.f32 %v1770_v38, %v8925_v40  ;;  %3906 = vperm.xlu1 %6002, %v3825_v59   ;;  %v13601_v42 = vld [vmem:[#allocation19_spill] sm:$0xff]  ;;  %v9276_v35 = vmul.f32 %v2441_v1, %v9159_v43  ;;  %v3827_v60 = vld [vmem:[%s12820_s8 + $0x60] sm:$0x7f]  ;;  %v13602_v21 = vld [vmem:[#allocation14_spill] sm:$0xff] }
 0x17e   :  { %13600 = vst [vmem:[#allocation32_spill] sm:$0xff] %v9267_v41  ;;  %v9272_v39 = vmul.f32 %v13601_v42, %v9016_v33  ;;  %v2076_v62 = vadd.f32 %v9198_v50, %v2075_v3  ;;  %6271 = vpow2.f32 %v1970_v5  ;;  %3901 = vperm.xlu0 %6001, %v3824_v54   ;;  %v9283_v49 = vmul.f32 %v13602_v21, %v9016_v33  ;;  %v13604_v11 = vld [vmem:[#allocation62_spill] sm:$0xff]  ;;  %v13605_v38 = vld [vmem:[#allocation28_spill] sm:$0xff]  ;;  %v3826_v43 = vld [vmem:[%s12820_s8 + $0x58] sm:$0x7f]  ;;  %v9294_v1 = vpop.permute.xlu1 %2455 }
 0x17f   :  { %v2155_v59 = vmul.f32 %v13604_v11, %v9267_v41  ;;  %6273 = vpow2.f32 %v1980_v8  ;;  %v1772_v58 = vmax.f32 %v1771_v7, %v13605_v38  ;;  %v13606_v5 = vld [vmem:[#allocation38_spill] sm:$0xff]  ;;  %13607 = vst [vmem:[#allocation19_spill] sm:$0xff] %v9294_v1  ;;  %v9296_v57 = vpop.permute.xlu0 %2450  ;;  %v13608_v42 = vld [vmem:[#allocation16_spill] sm:$0xff] }
 0x180   :  { %13603 = vst [vmem:[#allocation24_spill] sm:$0xff] %v9283_v49  ;;  %v2160_v3 = vmul.f32 %v13606_v5, %v9267_v41  ;;  %v2077_v54 = vadd.f32 %v9211_v13, %v2076_v62  ;;  %6275 = vpow2.f32 %v1990_v36  ;;  %v9300_v21 = vmul.f32 %v13608_v42, %v9016_v33  ;;  %v13610_v8 = vld [vmem:[#allocation30_spill] sm:$0xff]  ;;  %v9306_v11 = vpop.eup %6257  ;;  %v13613_v5 = vld [vmem:[#allocation44_spill] sm:$0xff]  ;;  %v13614_v62 = vld [vmem:[#allocation63_spill] sm:$0xff] }
 0x181   :  { %v9304_v7 = vmul.f32 %v13610_v8, %v9016_v33  ;;  %13612 = vst [vmem:[#allocation28_spill] sm:$0xff] %v9306_v11  ;;  %6277 = vpow2.f32 %v2000_v4  ;;  %v1773_v6 = vmax.f32 %v1772_v58, %v13613_v5  ;;  %v2165_v36 = vmul.f32 %v13614_v62, %v9267_v41  ;;  %v13615_v1 = vld [vmem:[#allocation54_spill] sm:$0xff]  ;;  %3916 = vperm.xlu1 %6002, %v3827_v60   ;;  %v9313_v19 = vpop.eup %6259  ;;  %v13617_v42 = vld [vmem:[#allocation41_spill] sm:$0xff]  ;;  %v13625_v50 = vld [vmem:[#allocation36_spill] sm:$0xff] }
 0x182   :  { %13609 = vst [vmem:[#allocation14_spill] sm:$0xff] %v9300_v21  ;;  %v2170_v31 = vmul.f32 %v13615_v1, %v9267_v41  ;;  %13616 = vst [vmem:[#allocation38_spill] sm:$0xff] %v9313_v19  ;;  %v9316_v21 = vmul.f32 %v13617_v42, %v2155_v59  ;;  %v2078_v8 = vadd.f32 %v9215_v24, %v2077_v54  ;;  %6279 = vpow2.f32 %v2010_v48  ;;  %v3829_v58 = vld [vmem:[%s12820_s8 + $0x70] sm:$0x7f]  ;;  %v9324_v62 = vpop.eup %6261  ;;  %v13619_v1 = vld [vmem:[#allocation45_spill] sm:$0xff]  ;;  %v2466_v24 = vpop.permute.xlu1 %2465 }
 0x183   :  { %13611 = vst [vmem:[#allocation62_spill] sm:$0xff] %v9304_v7  ;;  %v2112_v4 = vsel %vm489_vm0, %v9306_v11, 0.0  ;;  %3911 = vperm.xlu0 %6001, %v3826_v43   ;;  %13618 = vst [vmem:[#allocation16_spill] sm:$0xff] %v9324_v62  ;;  %6281 = vpow2.f32 %v2020_v10  ;;  %v2113_v60 = vsel %vm489_vm0, %v9313_v19, 0.0  ;;  %v1774_v59 = vmax.f32 %v1773_v6, %v13619_v1  ;;  %v13620_v42 = vld [vmem:[#allocation15_spill] sm:$0xff]  ;;  %v9335_v43 = vpop.eup %6263  ;;  %v9340_v19 = vpop.permute.xlu0 %2460 }
 0x184   :  { %v9330_v7 = vmul.f32 %v13620_v42, %v2160_v3  ;;  %v3828_v48 = vld [vmem:[%s12820_s8 + $0x68] sm:$0x7f]  ;;  %13621 = vst [vmem:[#allocation30_spill] sm:$0xff] %v9335_v43  ;;  %v2079_v54 = vadd.f32 %v9228_v2, %v2078_v8  ;;  %6283 = vpow2.f32 %v2030_v61  ;;  %v2114_v11 = vadd.f32 %v2113_v60, %v2112_v4  ;;  %13622 = vst [vmem:[#allocation44_spill] sm:$0xff] %v9340_v19  ;;  %v13624_v42 = vld [vmem:[#allocation34_spill] sm:$0xff] }
 0x185   :  { %v2115_v10 = vsel %vm489_vm0, %v9324_v62, 0.0  ;;  %v9342_v6 = vpop.eup %6265  ;;  %6285 = vpow2.f32 %v2040_v28  ;;  %v2117_v3 = vsel %vm489_vm0, %v9335_v43, 0.0  ;;  %v1775_v13 = vmax.f32 %v1774_v59, %v13624_v42  ;;  %3926 = vperm.xlu1 %6002, %v3829_v58   ;;  %v13627_v60 = vld [vmem:[#allocation65_spill] sm:$0xff]  ;;  %v3831_v28 = vld [vmem:[%s12820_s8 + $0x80] sm:$0x7f] }
 0x186   :  { %13623 = vst [vmem:[#allocation63_spill] sm:$0xff] %v9342_v6  ;;  %v2175_v49 = vmul.f32 %v13625_v50, %v9267_v41  ;;  %v9349_v61 = vpop.eup %6267  ;;  %v2080_v8 = vadd.f32 %v9230_v46, %v2079_v54  ;;  %6287 = vpow2.f32 %v9243_v27  ;;  %v2116_v4 = vadd.f32 %v2115_v10, %v2114_v11  ;;  %v13629_v27 = vld [vmem:[#allocation26_spill] sm:$0xff] }
 0x187   :  { %13626 = vst [vmem:[#allocation54_spill] sm:$0xff] %v9349_v61  ;;  %v9354_v19 = vmul.f32 %v13627_v60, %v2165_v36  ;;  %3921 = vperm.xlu0 %6001, %v3828_v48   ;;  %v9359_v59 = vpop.eup %6269  ;;  %v2119_v50 = vsel %vm489_vm0, %v9342_v6, 0.0  ;;  %v1776_v58 = vmax.f32 %v1775_v13, %v9060_v55  ;;  %v9365_v54 = vmul.f32 %v9114_v12, %v2170_v31  ;;  %v3830_v36 = vld [vmem:[%s12820_s8 + $0x78] sm:$0x7f]  ;;  %v2476_v12 = vpop.permute.xlu1 %2475 }
 0x188   :  { %13628 = vst [vmem:[#allocation41_spill] sm:$0xff] %v9359_v59  ;;  %v2180_v11 = vmul.f32 %v13629_v27, %v9267_v41  ;;  %v9372_v48 = vpop.eup %6271  ;;  %v2081_v10 = vadd.f32 %v9237_v20, %v2080_v8  ;;  %v2118_v60 = vadd.f32 %v2117_v3, %v2116_v4  ;;  %v2121_v6 = vsel %vm489_vm0, %v9349_v61, 0.0  ;;  %v9380_v31 = vpop.permute.xlu0 %2470  ;;  %v13632_v3 = vld [vmem:[#allocation55_spill] sm:$0xff] }
 0x189   :  { %13630 = vst [vmem:[#allocation45_spill] sm:$0xff] %v9372_v48  ;;  %v9378_v13 = vmul.f32 %v9207_v44, %v2175_v49  ;;  %v9382_v43 = vpop.eup %6273  ;;  %v2123_v27 = vsel %vm489_vm0, %v9359_v59, 0.0  ;;  %v1777_v62 = vmax.f32 %v1776_v58, %v9064_v37  ;;  %v9388_v46 = vmul.f32 %v2466_v24, %v9163_v63  ;;  %3936 = vperm.xlu1 %6002, %v3831_v28   ;;  %v3833_v63 = vld [vmem:[%s12820_s8 + $0x90] sm:$0x7f] }
 0x18a   :  { %13631 = vst [vmem:[#allocation15_spill] sm:$0xff] %v9382_v43  ;;  %v2185_v8 = vmul.f32 %v13632_v3, %v9267_v41  ;;  %v9392_v4 = vpop.eup %6275  ;;  %6289 = vrcp.f32 %v2081_v10  ;;  %v2120_v44 = vadd.f32 %v2119_v50, %v2118_v60  ;;  %v2125_v49 = vsel %vm489_vm0, %v9372_v48, 0.0  ;;  %v3832_v50 = vld [vmem:[%s12820_s8 + $0x88] sm:$0x7f]  ;;  %v13635_v10 = vld [vmem:[#allocation71_spill] sm:$0xff] }
 0x18b   :  { %13633 = vst [vmem:[#allocation34_spill] sm:$0xff] %v9392_v4  ;;  %v9397_v61 = vmul.f32 %v9296_v57, %v2180_v11  ;;  %3931 = vperm.xlu0 %6001, %v3830_v36   ;;  %v9402_v24 = vpop.eup %6277  ;;  %v2127_v28 = vsel %vm489_vm0, %v9382_v43, 0.0  ;;  %v1778_v58 = vmax.f32 %v1777_v62, %v9073_v30  ;;  %v9412_v57 = vmul.f32 %v13635_v10, %v9267_v41  ;;  %v9422_v43 = vpop.permute.xlu1 %2485 }
 0x18c   :  { %13634 = vst [vmem:[#allocation36_spill] sm:$0xff] %v9402_v24  ;;  %v9416_v11 = vmul.f32 %v8950_v45, %v9267_v41  ;;  %v9418_v36 = vpop.eup %6279  ;;  %v2122_v60 = vadd.f32 %v2121_v6, %v2120_v44  ;;  %v2129_v3 = vsel %vm489_vm0, %v9392_v4, 0.0  ;;  %13637 = vst [vmem:[#allocation26_spill] sm:$0xff] %v9422_v43  ;;  %v9424_v62 = vpop.permute.xlu0 %2480  ;;  %v9428_v48 = vmul.f32 %v8963_v14, %v9267_v41 }
 0x18d   :  { %13636 = vst [vmem:[#allocation65_spill] sm:$0xff] %v9418_v36  ;;  %13638 = vst [vmem:[#allocation55_spill] sm:$0xff] %v9424_v62  ;;  %v9432_v10 = vmul.f32 %v8973_v0, %v9267_v41  ;;  %v9434_v45 = vpop.eup %6281  ;;  %v2131_v6 = vsel %vm489_vm0, %v9402_v24, 0.0  ;;  %v1779_v44 = vmax.f32 %v1778_v58, %v9089_v22  ;;  %v9439_v4 = vmul.f32 %v2476_v12, %v2185_v8  ;;  %v3835_v24 = vld [vmem:[%s12820_s8 + $0xa0] sm:$0x7f]  ;;  %v13643_v58 = vld [vmem:[#allocation59_spill] sm:$0xff] }
 0x18e   :  { %13640 = vst [vmem:[#allocation72_spill] sm:$0xff] %v9434_v45  ;;  %3946 = vperm.xlu1 %6002, %v3833_v63   ;;  %v9443_v62 = vmul.f32 %v8992_v25, %v9267_v41  ;;  %v9445_v14 = vpop.eup %6283  ;;  %v2124_v43 = vadd.f32 %v2123_v27, %v2122_v60  ;;  %v2133_v0 = vsel %vm489_vm0, %v9418_v36, 0.0  ;;  %v9454_v12 = vmul.f32 %v13643_v58, %v9016_v33  ;;  %v13647_v60 = vld [vmem:[#allocation27_spill] sm:$0xff]  ;;  %v13651_v36 = vld [vmem:[#allocation40_spill] sm:$0xff] }
 0x18f   :  { %13639 = vst [vmem:[#allocation71_spill] sm:$0xff] %v9432_v10  ;;  %13642 = vst [vmem:[#allocation74_spill] sm:$0xff] %v9445_v14  ;;  %3941 = vperm.xlu0 %6001, %v3832_v50   ;;  %v9458_v8 = vmul.f32 %v9002_v16, %v9267_v41  ;;  %v9460_v25 = vpop.eup %6285  ;;  %v9464_v27 = vsel %vm489_vm0, %v9434_v45, 0.0  ;;  %v9467_v63 = vmax.f32 %v1779_v44, %v9098_v23  ;;  %v3834_v50 = vld [vmem:[%s12820_s8 + $0x98] sm:$0x7f]  ;;  %v9486_v44 = vpop.permute.xlu1 %2495 }
 0x190   :  { %13641 = vst [vmem:[#allocation73_spill] sm:$0xff] %v9443_v62  ;;  %13644 = vst [vmem:[#allocation59_spill] sm:$0xff] %v9454_v12  ;;  %v9474_v58 = vmul.f32 %v13647_v60, %v9016_v33  ;;  %v9478_v16 = vmul.f32 %v9011_v29, %v9267_v41  ;;  %v2126_v12 = vadd.f32 %v2125_v49, %v2124_v43  ;;  %v9484_v62 = vsel %vm489_vm0, %v9445_v14, 0.0  ;;  %v9488_v45 = vpop.permute.xlu0 %2490 }
 0x191   :  { %13645 = vst [vmem:[#allocation75_spill] sm:$0xff] %v9458_v8  ;;  %13646 = vst [vmem:[#allocation76_spill] sm:$0xff] %v9460_v25  ;;  %v9480_v8 = vpop.eup %6287  ;;  %v9492_v10 = vmul.f32 %v13651_v36, %v9016_v33  ;;  %v9496_v60 = vmul.f32 %v9029_v17, %v9267_v41  ;;  %v9500_v29 = vsel %vm489_vm0, %v9460_v25, 0.0  ;;  %v1815_v49 = vsub.f32 %v8887_v26, %v9467_v63 }
 0x192   :  { %13648 = vst [vmem:[#allocation27_spill] sm:$0xff] %v9474_v58  ;;  %13649 = vst [vmem:[#allocation77_spill] sm:$0xff] %v9478_v16  ;;  %v9504_v43 = vsel %vm489_vm0, %v9480_v8, 0.0  ;;  %v1820_v16 = vsub.f32 %v8891_v9, %v9467_v63  ;;  %3956 = vperm.xlu1 %6002, %v3835_v24   ;;  %v2128_v36 = vadd.f32 %v2127_v28, %v2126_v12  ;;  %v3836_v24 = vld [vmem:[%s12820_s8 + $0xa8] sm:$0x7f] }
 0x193   :  { %13650 = vst [vmem:[#allocation78_spill] sm:$0xff] %v9480_v8  ;;  %13652 = vst [vmem:[#allocation40_spill] sm:$0xff] %v9492_v10  ;;  %v1825_v17 = vsub.f32 %v8899_v52, %v9467_v63  ;;  %v13654_v10 = vld [vmem:[#allocation33_spill] sm:$0xff]  ;;  %3951 = vperm.xlu0 %6001, %v3834_v50   ;;  %v3837_v8 = vld [vmem:[%s12820_s8 + $0xb0] sm:$0x7f]  ;;  %v1840_v26 = vsub.f32 %v8921_v53, %v9467_v63  ;;  %v1845_v9 = vsub.f32 %v8925_v40, %v9467_v63  ;;  %v9536_v50 = vpop.permute.xlu1 %2505 }
 0x194   :  { %13653 = vst [vmem:[#allocation79_spill] sm:$0xff] %v9496_v60  ;;  %v1830_v60 = vsub.f32 %v8907_v34, %v9467_v63  ;;  %v1835_v58 = vsub.f32 %v13654_v10, %v9467_v63  ;;  %v1850_v52 = vsub.f32 %v13605_v38, %v9467_v63  ;;  %v1855_v34 = vsub.f32 %v13613_v5, %v9467_v63  ;;  %v6290_v28 = vpop.eup %6289  ;;  %v9538_v38 = vpop.permute.xlu0 %2500  ;;  %v9543_v5 = vld [vmem:[%s12815_s3 + $0x8] sm:$0xff] }
 0x195   :  { %v2130_v10 = vadd.f32 %v2129_v3, %v2128_v36  ;;  %v1860_v12 = vsub.f32 %v13619_v1, %v9467_v63  ;;  %v1865_v53 = vsub.f32 %v13624_v42, %v9467_v63  ;;  %v1870_v40 = vsub.f32 %v9060_v55, %v9467_v63  ;;  %13655 = vst [vmem:[#allocation33_spill] sm:$0xff] %v9536_v50  ;;  %v3839_v36 = vld [vmem:[%s12820_s8 + $0xc0] sm:$0x7f] }
 0x196   :  { %13656 = vst [vmem:[#allocation80_spill] sm:$0xff] %v9543_v5  ;;  %v9546_v3 = vmul.f32 %v9543_v5, %v6290_v28  ;;  %v1875_v1 = vsub.f32 %v9064_v37, %v9467_v63  ;;  %v1880_v42 = vsub.f32 %v9073_v30, %v9467_v63  ;;  %v1885_v55 = vsub.f32 %v9089_v22, %v9467_v63  ;;  %v13657_v28 = vld [vmem:[#allocation70_spill] sm:$0xff]  ;;  %v3838_v22 = vld [vmem:[%s12820_s8 + $0xb8] sm:$0x7f] }
 0x197   :  { %3966 = vperm.xlu1 %6002, %v3837_v8   ;;  %v2132_v50 = vadd.f32 %v2131_v6, %v2130_v10  ;;  %v1898_v41 = vmul.f32 1.442695, %v1815_v49  ;;  %v1908_v25 = vmul.f32 1.442695, %v1820_v16  ;;  %v1918_v14 = vmul.f32 1.442695, %v1825_v17  ;;  %3961 = vperm.xlu0 %6001, %v3836_v24   ;;  %v9564_v49 = vpop.permute.xlu1 %2515 }
 0x198   :  { %v2154_v5 = vmul.f32 %v13657_v28, %v9546_v3  ;;  %v1928_v30 = vmul.f32 1.442695, %v1830_v60  ;;  %v1938_v59 = vmul.f32 1.442695, %v1835_v58  ;;  %v1948_v33 = vmul.f32 1.442695, %v1840_v26  ;;  %v9566_v16 = vpop.permute.xlu0 %2510 }
 0x199   :  { %v2134_v8 = vadd.f32 %v2133_v0, %v2132_v50  ;;  %6291 = vpow2.f32 %v1898_v41  ;;  %v1958_v6 = vmul.f32 1.442695, %v1845_v9  ;;  %v13658_v17 = vld [vmem:[#allocation42_spill] sm:$0xff]  ;;  %v1968_v10 = vmul.f32 1.442695, %v1850_v52  ;;  %v13659_v0 = vld [vmem:[#allocation68_spill] sm:$0xff] }
 0x19a   :  { %v2714_v24 = vmul.f32 %v13658_v17, %v2154_v5  ;;  %6293 = vpow2.f32 %v1908_v25  ;;  %v1978_v28 = vmul.f32 1.442695, %v1855_v34  ;;  %v1988_v60 = vmul.f32 1.442695, %v1860_v12  ;;  %v3841_v41 = vld [vmem:[%s12820_s8 + $0xd0] sm:$0x7f] }
 0x19b   :  { %3976 = vperm.xlu1 %6002, %v3839_v36   ;;  %v2136_v58 = vadd.f32 %v9464_v27, %v2134_v8  ;;  %6295 = vpow2.f32 %v1918_v14  ;;  %v1998_v37 = vmul.f32 1.442695, %v1865_v53  ;;  %3971 = vperm.xlu0 %6001, %v3838_v22   ;;  %v2008_v9 = vmul.f32 1.442695, %v1870_v40  ;;  %v3840_v25 = vld [vmem:[%s12820_s8 + $0xc8] sm:$0x7f]  ;;  %v9580_v34 = vpop.permute.xlu1 %2525 }
 0x19c   :  { %v2793_v26 = vadd.f32 %v2714_v24, %v13659_v0  ;;  %6297 = vpow2.f32 %v1928_v30  ;;  %v2018_v50 = vmul.f32 1.442695, %v1875_v1  ;;  %v2028_v14 = vmul.f32 1.442695, %v1880_v42  ;;  %v9582_v12 = vpop.permute.xlu0 %2520  ;;  %v13660_v40 = vld [vmem:[#allocation22_spill] sm:$0xff]  ;;  %v13661_v1 = vld [vmem:[#allocation60_spill] sm:$0xff] }
 0x19d   :  { %v2138_v52 = vadd.f32 %v9484_v62, %v2136_v58  ;;  %6299 = vpow2.f32 %v1938_v59  ;;  %v9578_v27 = vmul.f32 1.442695, %v1885_v55  ;;  %v2159_v5 = vmul.f32 %v13660_v40, %v9546_v3  ;;  %v13662_v62 = vld [vmem:[#allocation49_spill] sm:$0xff]  ;;  %v13663_v55 = vld [vmem:[#allocation31_spill] sm:$0xff]  ;;  %v13665_v8 = vld [vmem:[#allocation66_spill] sm:$0xff] }
 0x19e   :  { %6301 = vpow2.f32 %v1948_v33  ;;  %v9585_v53 = vadd.f32 %v2793_v26, %v9316_v21  ;;  %v2164_v36 = vmul.f32 %v13661_v1, %v9546_v3  ;;  %v2169_v42 = vmul.f32 %v13662_v62, %v9546_v3  ;;  %v3843_v33 = vld [vmem:[%s12820_s8 + $0xe0] sm:$0x7f]  ;;  %v13666_v24 = vld [vmem:[#allocation51_spill] sm:$0xff]  ;;  %v13668_v26 = vld [vmem:[#allocation25_spill] sm:$0xff] }
 0x19f   :  { %3986 = vperm.xlu1 %6002, %v3841_v41   ;;  %v2140_v59 = vadd.f32 %v9500_v29, %v2138_v52  ;;  %6303 = vpow2.f32 %v1958_v6  ;;  %v2174_v30 = vmul.f32 %v13663_v55, %v9546_v3  ;;  %3981 = vperm.xlu0 %6001, %v3840_v25   ;;  %v13664_v21 = vld [vmem:[#allocation64_spill] sm:$0xff]  ;;  %v2179_v29 = vmul.f32 %v13666_v24, %v9546_v3  ;;  %v3842_v6 = vld [vmem:[%s12820_s8 + $0xd8] sm:$0x7f]  ;;  %v13667_v41 = vld [vmem:[#allocation69_spill] sm:$0xff]  ;;  %v9609_v52 = vpop.permute.xlu1 %2535 }
 0x1a0   :  { %6305 = vpow2.f32 %v1968_v10  ;;  %v2719_v22 = vmul.f32 %v13664_v21, %v2159_v5  ;;  %v2724_v17 = vmul.f32 %v13665_v8, %v2164_v36  ;;  %v2729_v0 = vmul.f32 %v13667_v41, %v2169_v42  ;;  %v9611_v10 = vpop.permute.xlu0 %2530  ;;  %v13669_v40 = vld [vmem:[#allocation50_spill] sm:$0xff]  ;;  %v13670_v1 = vld [vmem:[#allocation11_spill] sm:$0xff]  ;;  %v3844_v8 = vld [vmem:[%s12820_s8 + $0xe8] sm:$0x7f] }
 0x1a1   :  { %v2142_v58 = vadd.f32 %v9504_v43, %v2140_v59  ;;  %6307 = vpow2.f32 %v1978_v28  ;;  %v2734_v25 = vmul.f32 %v13668_v26, %v2174_v30  ;;  %v2739_v62 = vmul.f32 %v9255_v47, %v2179_v29  ;;  %v13671_v43 = vld [vmem:[#allocation52_spill] sm:$0xff]  ;;  %v13672_v42 = vld [vmem:[#allocation35_spill] sm:$0xff] }
 0x1a2   :  { %6309 = vpow2.f32 %v1988_v60  ;;  %v2804_v5 = vadd.f32 %v2719_v22, %v13669_v40  ;;  %v2815_v36 = vadd.f32 %v2724_v17, %v13670_v1  ;;  %v2826_v28 = vadd.f32 %v2729_v0, %v13671_v43  ;;  %v3845_v60 = vld [vmem:[%s12820_s8 + $0xf0] sm:$0x7f]  ;;  %v13675_v40 = vld [vmem:[#allocation24_spill] sm:$0xff]  ;;  %v3848_v43 = vld [vmem:[%s12820_s8 + $0x108] sm:$0x7f] }
 0x1a3   :  { %3996 = vperm.xlu1 %6002, %v3843_v33   ;;  %v9616_v55 = vpop.eup %6291  ;;  %6311 = vrcp.f32 %v2142_v58  ;;  %v2837_v59 = vadd.f32 %v2734_v25, %v9253_v15  ;;  %v2184_v30 = vmul.f32 %v13672_v42, %v9546_v3  ;;  %3991 = vperm.xlu0 %6001, %v3842_v6   ;;  %v13673_v47 = vsub.f32 %v9098_v23, %v9467_v63 }
 0x1a4   :  { %v9625_v21 = vpop.eup %6293  ;;  %6313 = vpow2.f32 %v1998_v37  ;;  %v9631_v22 = vadd.f32 %v2804_v5, %v9330_v7  ;;  %v9634_v15 = vadd.f32 %v2815_v36, %v9354_v19  ;;  %v9644_v24 = vadd.f32 %v2826_v28, %v9365_v54  ;;  %v2546_v7 = vpop.permute.xlu1 %2545 }
 0x1a5   :  { %v2048_v33 = vmul.f32 1.442695, %v13673_v47  ;;  %v9639_v17 = vpop.eup %6295  ;;  %6315 = vpow2.f32 %v2008_v9  ;;  %v2097_v37 = vadd.f32 %v9625_v21, %v9616_v55  ;;  %v2848_v23 = vadd.f32 %v2739_v62, %v9276_v35  ;;  %v2541_v63 = vpop.permute.xlu0 %2540 }
 0x1a6   :  { %v9647_v29 = vpop.eup %6297  ;;  %6317 = vpow2.f32 %v2018_v50  ;;  %v9650_v19 = vadd.f32 %v2837_v59, %v9378_v13  ;;  %v2744_v6 = vmul.f32 %v9380_v31, %v2184_v30  ;;  %v2189_v9 = vmul.f32 %v9165_v32, %v9546_v3  ;;  %v3847_v13 = vld [vmem:[%s12820_s8 + $0x100] sm:$0x7f]  ;;  %v13678_v59 = vld [vmem:[#allocation17_spill] sm:$0xff] }
 0x1a7   :  { %4006 = vperm.xlu1 %6002, %v3845_v60   ;;  %v9655_v58 = vpop.eup %6299  ;;  %6319 = vpow2.f32 %v2028_v14  ;;  %v2098_v54 = vadd.f32 %v9639_v17, %v2097_v37  ;;  %v9659_v35 = vadd.f32 %v2848_v23, %v9397_v61  ;;  %v2748_v50 = vmul.f32 %v9488_v45, %v9259_v51  ;;  %4001 = vperm.xlu0 %6001, %v3844_v8   ;;  %v3846_v51 = vld [vmem:[%s12820_s8 + $0xf8] sm:$0x7f]  ;;  %v13679_v37 = vld [vmem:[#allocation13_spill] sm:$0xff] }
 0x1a8   :  { %v9666_v31 = vpop.eup %6301  ;;  %6321 = vpow2.f32 %v9578_v27  ;;  %v2859_v32 = vadd.f32 %v2744_v6, %v9388_v46  ;;  %v2749_v14 = vmul.f32 %v9486_v44, %v2189_v9  ;;  %v2750_v61 = vmul.f32 %v9538_v38, %v9412_v57  ;;  %v9683_v27 = vpop.permute.xlu1 %2555 }
 0x1a9   :  { %v9676_v45 = vpop.eup %6303  ;;  %6323 = vpow2.f32 %v2048_v33  ;;  %v2099_v41 = vadd.f32 %v9647_v29, %v2098_v54  ;;  %v2753_v0 = vmul.f32 %v9564_v49, %v9272_v39  ;;  %v2194_v46 = vmul.f32 %v9175_v56, %v9546_v3  ;;  %13674 = vst [vmem:[#allocation70_spill] sm:$0xff] %v9683_v27  ;;  %v2551_v44 = vpop.permute.xlu0 %2550 }
 0x1aa   :  { %v9685_v26 = vpop.eup %6305  ;;  %v9688_v57 = vadd.f32 %v2859_v32, %v9439_v4  ;;  %v2755_v38 = vmul.f32 %v9580_v34, %v9416_v11  ;;  %v2199_v25 = vmul.f32 %v9185_v18, %v9546_v3  ;;  %v2758_v5 = vmul.f32 %v2541_v63, %v13675_v40  ;;  %v3849_v4 = vld [vmem:[%s12820_s8 + $0x110] sm:$0x7f]  ;;  %v13676_v11 = vld [vmem:[#allocation29_spill] sm:$0xff]  ;;  %v9738_v63 = vld [vmem:[%s12815_s3 + $0x20] sm:$0x7f] }
 0x1ab   :  { %4016 = vperm.xlu1 %6002, %v3847_v13   ;;  %v9695_v39 = vpop.eup %6307  ;;  %v2100_v56 = vadd.f32 %v9655_v58, %v2099_v41  ;;  %v2870_v49 = vadd.f32 %v2749_v14, %v2748_v50  ;;  %v2754_v1 = vmul.f32 %v9582_v12, %v2194_v46  ;;  %4011 = vperm.xlu0 %6001, %v3846_v51   ;;  %v13677_v12 = vld [vmem:[#allocation18_spill] sm:$0xff]  ;;  %v13685_v41 = vld [vmem:[#allocation47_spill] sm:$0xff]  ;;  %v13690_v40 = vld [vmem:[#allocation16_spill] sm:$0xff] }
 0x1ac   :  { %v9704_v34 = vmul.f32 %v13676_v11, %v9546_v3  ;;  %v9706_v18 = vpop.eup %6309  ;;  %v2759_v36 = vmul.f32 %v2546_v7, %v2199_v25  ;;  %v9709_v62 = vmul.f32 %v2551_v44, %v9428_v48  ;;  %v9716_v28 = vmul.f32 %v13677_v12, %v9546_v3  ;;  %v2566_v33 = vpop.permute.xlu1 %2565  ;;  %v13684_v14 = vld [vmem:[#allocation14_spill] sm:$0xff] }
 0x1ad   :  { %v9720_v42 = vmul.f32 %v13678_v59, %v9546_v3  ;;  %v6312_v30 = vpop.eup %6311  ;;  %v2101_v60 = vadd.f32 %v9666_v31, %v2100_v56  ;;  %v2881_v47 = vadd.f32 %v2754_v1, %v2753_v0  ;;  %v9723_v8 = vpop.permute.xlu0 %2560  ;;  %v9727_v48 = vmul.f32 %v9228_v2, %v9546_v3  ;;  %v13686_v0 = vld [vmem:[#allocation56_spill] sm:$0xff]  ;;  %v13689_v25 = vld [vmem:[#allocation38_spill] sm:$0xff]  ;;  %v3850_v1 = vld [vmem:[%s12820_s8 + $0x118] sm:$0x7f] }
 0x1ae   :  { %v9731_v23 = vmul.f32 %v13679_v37, %v9546_v3  ;;  %v9733_v7 = vpop.eup %6313  ;;  %v9741_v6 = vmul.f32 %v9738_v63, %v6312_v30  ;;  %v9743_v9 = vadd.f32 %v2870_v49, %v2750_v61  ;;  %v2892_v54 = vadd.f32 %v2759_v36, %v2758_v5  ;;  %v3851_v61 = vld [vmem:[%s12820_s8 + $0x120] sm:$0x7f]  ;;  %v13691_v56 = vld [vmem:[#allocation30_spill] sm:$0xff]  ;;  %v13692_v36 = vld [vmem:[#allocation63_spill] sm:$0xff] }
 0x1af   :  { %4026 = vperm.xlu1 %6002, %v3849_v4   ;;  %v9747_v2 = vmul.f32 %v9237_v20, %v9546_v3  ;;  %v9749_v50 = vpop.eup %6315  ;;  %v2102_v13 = vadd.f32 %v9676_v45, %v2101_v60  ;;  %v9752_v32 = vadd.f32 %v2881_v47, %v2755_v38  ;;  %v2763_v51 = vmul.f32 %v2566_v33, %v13684_v14  ;;  %v13688_v20 = vld [vmem:[#allocation28_spill] sm:$0xff]  ;;  %v13693_v12 = vld [vmem:[#allocation54_spill] sm:$0xff]  ;;  %v13694_v30 = vld [vmem:[#allocation41_spill] sm:$0xff] }
 0x1b0   :  { %13680 = vst [vmem:[#allocation42_spill] sm:$0xff] %v9731_v23  ;;  %13681 = vst [vmem:[#allocation68_spill] sm:$0xff] %v9741_v6  ;;  %4021 = vperm.xlu0 %6001, %v3848_v43   ;;  %v9760_v46 = vmul.f32 %v13686_v0, %v13685_v41  ;;  %v9762_v44 = vpop.eup %6317  ;;  %v2157_v3 = vmul.f32 %v13688_v20, %v9741_v6  ;;  %v2162_v38 = vmul.f32 %v13689_v25, %v9741_v6  ;;  %v2576_v47 = vpop.permute.xlu1 %2575  ;;  %v13696_v14 = vld [vmem:[#allocation61_spill] sm:$0xff]  ;;  %v13697_v0 = vld [vmem:[#allocation46_spill] sm:$0xff] }
 0x1b1   :  { %13682 = vst [vmem:[#allocation22_spill] sm:$0xff] %v9747_v2  ;;  %13683 = vst [vmem:[#allocation60_spill] sm:$0xff] %v9752_v32  ;;  %v2167_v5 = vmul.f32 %v13690_v40, %v9741_v6  ;;  %v2172_v49 = vmul.f32 %v13691_v56, %v9741_v6  ;;  %v9775_v4 = vpop.eup %6319  ;;  %v2103_v11 = vadd.f32 %v9685_v26, %v2102_v13  ;;  %v2571_v33 = vpop.permute.xlu0 %2570  ;;  %v13698_v25 = vld [vmem:[#allocation39_spill] sm:$0xff]  ;;  %v13699_v13 = vld [vmem:[#allocation53_spill] sm:$0xff] }
 0x1b2   :  { %13687 = vst [vmem:[#allocation49_spill] sm:$0xff] %v9760_v46  ;;  %v2177_v43 = vmul.f32 %v13692_v36, %v9741_v6  ;;  %v2182_v59 = vmul.f32 %v13693_v12, %v9741_v6  ;;  %v2187_v60 = vmul.f32 %v13694_v30, %v9741_v6  ;;  %v9784_v37 = vpop.eup %6321  ;;  %v2717_v41 = vmul.f32 %v13696_v14, %v2157_v3  ;;  %v13700_v46 = vld [vmem:[#allocation23_spill] sm:$0xff]  ;;  %v13701_v30 = vld [vmem:[#allocation44_spill] sm:$0xff]  ;;  %v13702_v32 = vld [vmem:[#allocation26_spill] sm:$0xff] }
 0x1b3   :  { %13695 = vst [vmem:[#allocation31_spill] sm:$0xff] %v9784_v37  ;;  %v2722_v20 = vmul.f32 %v13697_v0, %v2162_v38  ;;  %v2727_v40 = vmul.f32 %v13698_v25, %v2167_v5  ;;  %v2732_v56 = vmul.f32 %v13699_v13, %v2172_v49  ;;  %4036 = vperm.xlu1 %6002, %v3851_v61   ;;  %v9790_v36 = vpop.eup %6323  ;;  %v3853_v3 = vld [vmem:[%s12820_s8 + $0x130] sm:$0x7f]  ;;  %v13703_v14 = vld [vmem:[#allocation45_spill] sm:$0xff]  ;;  %v13704_v0 = vld [vmem:[#allocation15_spill] sm:$0xff] }
 0x1b4   :  { %v2104_v12 = vadd.f32 %v9695_v39, %v2103_v11  ;;  %v2737_v2 = vmul.f32 %v13700_v46, %v2177_v43  ;;  %v2742_v23 = vmul.f32 %v13701_v30, %v2182_v59  ;;  %v2747_v27 = vmul.f32 %v13702_v32, %v2187_v60  ;;  %4031 = vperm.xlu0 %6001, %v3850_v1   ;;  %v3852_v32 = vld [vmem:[%s12820_s8 + $0x128] sm:$0x7f]  ;;  %v2586_v59 = vpop.permute.xlu1 %2585 }
 0x1b5   :  { %v9800_v38 = vsel %vm489_vm0, %v2717_v41, 0.0  ;;  %v9803_v61 = vsel %vm489_vm0, %v2722_v20, 0.0  ;;  %v9806_v5 = vsel %vm489_vm0, %v2727_v40, 0.0  ;;  %v9809_v46 = vsel %vm489_vm0, %v2732_v56, 0.0  ;;  %v9824_v60 = vpop.permute.xlu0 %2580 }
 0x1b6   :  { %v2105_v49 = vadd.f32 %v9706_v18, %v2104_v12  ;;  %v9816_v1 = vsel %vm489_vm0, %v2737_v2, 0.0  ;;  %v9819_v11 = vsel %vm489_vm0, %v2742_v23, 0.0  ;;  %v9822_v43 = vsel %vm489_vm0, %v2747_v27, 0.0  ;;  %v13705_v2 = vld [vmem:[#allocation34_spill] sm:$0xff]  ;;  %v13706_v27 = vld [vmem:[#allocation71_spill] sm:$0xff]  ;;  %v13707_v12 = vld [vmem:[#allocation36_spill] sm:$0xff] }
 0x1b7   :  { %v2192_v41 = vmul.f32 %v13703_v14, %v9741_v6  ;;  %v2197_v20 = vmul.f32 %v13704_v0, %v9741_v6  ;;  %v9831_v25 = vadd.f32 %v2892_v54, %v9709_v62  ;;  %v2202_v40 = vmul.f32 %v13705_v2, %v9741_v6  ;;  %4046 = vperm.xlu1 %6002, %v3853_v3   ;;  %v5033_v14 = vld [vmem:[%s12821_s9 + $0x8] sm:$0xff] }
 0x1b8   :  { %v2106_v23 = vadd.f32 %v9733_v7, %v2105_v49  ;;  %v2765_v13 = vmul.f32 %v2576_v47, %v13706_v27  ;;  %v2764_v56 = vmul.f32 %v2571_v33, %v9704_v34  ;;  %v2207_v30 = vmul.f32 %v13707_v12, %v9741_v6  ;;  %4041 = vperm.xlu0 %6001, %v3852_v32   ;;  %v5032_v47 = vld [vmem:[%s12821_s9] sm:$0xff]  ;;  %v13708_v34 = vld [vmem:[#allocation65_spill] sm:$0xff]  ;;  %v2596_v2 = vpop.permute.xlu1 %2595 }
 0x1b9   :  { %v2752_v62 = vmul.f32 %v9566_v16, %v2192_v41  ;;  %v2757_v54 = vmul.f32 %v9609_v52, %v2197_v20  ;;  %v2762_v3 = vmul.f32 %v9723_v8, %v2202_v40  ;;  %v2212_v33 = vmul.f32 %v13708_v34, %v9741_v6  ;;  %v2591_v27 = vpop.permute.xlu0 %2590  ;;  %v13709_v12 = vld [vmem:[#allocation72_spill] sm:$0xff]  ;;  %v13720_v34 = vld [vmem:[#allocation57_spill] sm:$0xff] }
 0x1ba   :  { %v2107_v49 = vadd.f32 %v9749_v50, %v2106_v23  ;;  %v2903_v32 = vadd.f32 %v2764_v56, %v2763_v51  ;;  %v2767_v0 = vmul.f32 %v2586_v59, %v2207_v30  ;;  %v9854_v16 = vmul.f32 %v13709_v12, %v9741_v6  ;;  %v13714_v23 = vld [vmem:[#allocation62_spill] sm:$0xff]  ;;  %v5035_v30 = vld [vmem:[%s12821_s9 + $0x18] sm:$0xff] }
 0x1bb   :  { %v9857_v52 = vsel %vm489_vm0, %v2752_v62, 0.0  ;;  %v9860_v8 = vsel %vm489_vm0, %v2757_v54, 0.0  ;;  %v9863_v41 = vsel %vm489_vm0, %v2762_v3, 0.0  ;;  %v2769_v20 = vmul.f32 %v2596_v2, %v9716_v28  ;;  %5117 = vperm.xlu1 %6002, %v5033_v14   ;;  %v5034_v62 = vld [vmem:[%s12821_s9 + $0x10] sm:$0xff]  ;;  %v13717_v54 = vld [vmem:[#allocation76_spill] sm:$0xff] }
 0x1bc   :  { %13710 = vst [vmem:[#allocation64_spill] sm:$0xff] %v9860_v8  ;;  %13711 = vst [vmem:[#allocation66_spill] sm:$0xff] %v9863_v41  ;;  %v2108_v51 = vadd.f32 %v9762_v44, %v2107_v49  ;;  %v9868_v59 = vsel %vm489_vm0, %v2767_v0, 0.0  ;;  %v9870_v40 = vadd.f32 %v2903_v32, %v2765_v13  ;;  %v2768_v56 = vmul.f32 %v2591_v27, %v13714_v23  ;;  %v13715_v28 = vld [vmem:[#allocation74_spill] sm:$0xff]  ;;  %v13719_v13 = vld [vmem:[#allocation32_spill] sm:$0xff]  ;;  %v9895_v27 = vpop.permute.xlu1 %2605 }
 0x1bd   :  { %13712 = vst [vmem:[#allocation51_spill] sm:$0xff] %v9868_v59  ;;  %5112 = vperm.xlu0 %6001, %v5032_v47   ;;  %v9881_v14 = vmul.f32 %v13715_v28, %v9741_v6  ;;  %v9885_v3 = vmul.f32 %v13717_v54, %v9741_v6  ;;  %v9889_v49 = vmul.f32 %v13720_v34, %v13719_v13  ;;  %v6577_v47 = vld [vmem:[%s12815_s3] sm:$0xff]  ;;  %v2601_v12 = vpop.permute.xlu0 %2600  ;;  %v13724_v6 = vld [vmem:[#allocation73_spill] sm:$0xff] }
 0x1be   :  { %13713 = vst [vmem:[#allocation69_spill] sm:$0xff] %v9870_v40  ;;  %v3024_v32 = vcombine.high %v6577_v47, %v6577_v47  ;;  %v2109_v0 = vadd.f32 %v9775_v4, %v2108_v51  ;;  %v2914_v2 = vadd.f32 %v2769_v20, %v2768_v56  ;;  %v13722_v23 = vld [vmem:[#allocation8_spill] sm:$0xff]  ;;  %v5037_v56 = vld [vmem:[%s12821_s9 + $0x28] sm:$0xff] }
 0x1bf   :  { %13716 = vst [vmem:[#allocation25_spill] sm:$0xff] %v9881_v14  ;;  %13718 = vst [vmem:[#allocation50_spill] sm:$0xff] %v9885_v3  ;;  %v3031_v28 = vrot.slane %v6577_v47, %v13722_v23  ;;  %v13723_v14 = vld [vmem:[#allocation80_spill] sm:$0xff]  ;;  %v2770_v3 = vmul.f32 %v2601_v12, %v13724_v6  ;;  %5127 = vperm.xlu1 %6002, %v5035_v30  }
 0x1c0   :  { %13721 = vst [vmem:[#allocation11_spill] sm:$0xff] %v9889_v49  ;;  %v3073_v54 = vcombine.high %v13723_v14, %v13723_v14  ;;  %v3038_v13 = vrot.slane %v3024_v32, %v13722_v23  ;;  %v3080_v34 = vrot.slane %v13723_v14, %v13722_v23  ;;  %v13725_v49 = vld [vmem:[#allocation12_spill] sm:$0xff]  ;;  %v2110_v20 = vadd.f32 %v9784_v37, %v2109_v0  ;;  %v2616_v37 = vpop.permute.xlu1 %2615 }
 0x1c1   :  { %v3122_v51 = vcombine.high %v13725_v49, %v13725_v49  ;;  %5122 = vperm.xlu0 %6001, %v5034_v62   ;;  %v3039_v47 = vcombine.high %v3031_v28, %v3031_v28  ;;  %v9911_v59 = vrot.slane %v3031_v28, %v13722_v23  ;;  %v9914_v30 = vadd.f32 %v2914_v2, %v2770_v3  ;;  %v5036_v14 = vld [vmem:[%s12821_s9 + $0x20] sm:$0xff]  ;;  %v2611_v41 = vpop.permute.xlu0 %2610 }
 0x1c2   :  { %v3087_v6 = vrot.slane %v3073_v54, %v13722_v23  ;;  %v3040_v32 = vcombine.high %v3038_v13, %v3038_v13  ;;  %v9920_v0 = vrot.slane %v3038_v13, %v13722_v23  ;;  %v3088_v62 = vcombine.high %v3080_v34, %v3080_v34  ;;  %v13730_v54 = vld [vmem:[#allocation59_spill] sm:$0xff] }
 0x1c3   :  { %13726 = vst [vmem:[#allocation52_spill] sm:$0xff] %v9911_v59  ;;  %13727 = vst [vmem:[#allocation35_spill] sm:$0xff] %v9914_v30  ;;  %v2111_v12 = vadd.f32 %v9790_v36, %v2110_v20  ;;  %v9924_v28 = vrot.slane %v3039_v47, %v13722_v23  ;;  %v2773_v8 = vmul.f32 %v2616_v37, %v13730_v54  ;;  %5137 = vperm.xlu1 %6002, %v5037_v56   ;;  %v5039_v20 = vld [vmem:[%s12821_s9 + $0x38] sm:$0xff] }
 0x1c4   :  { %13728 = vst [vmem:[#allocation24_spill] sm:$0xff] %v9920_v0  ;;  %v3089_v2 = vcombine.high %v3087_v6, %v3087_v6  ;;  %v2772_v30 = vmul.f32 %v2611_v41, %v2212_v33  ;;  %v9930_v40 = vrot.slane %v3040_v32, %v13722_v23  ;;  %v9940_v3 = vrot.slane %v3080_v34, %v13722_v23  ;;  %v5038_v41 = vld [vmem:[%s12821_s9 + $0x30] sm:$0xff]  ;;  %v2626_v34 = vpop.permute.xlu1 %2625  ;;  %v13736_v56 = vld [vmem:[#allocation75_spill] sm:$0xff] }
 0x1c5   :  { %13729 = vst [vmem:[#allocation29_spill] sm:$0xff] %v9924_v28  ;;  %6325 = vrcp.f32 %v2111_v12  ;;  %5132 = vperm.xlu0 %6001, %v5036_v14   ;;  %v9943_v37 = vrot.slane %v3087_v6, %v13722_v23  ;;  %v9954_v14 = vrot.slane %v3088_v62, %v13722_v23  ;;  %v2621_v12 = vpop.permute.xlu0 %2620  ;;  %v3129_v54 = vrot.slane %v13725_v49, %v13722_v23  ;;  %v13752_v28 = vld [vmem:[#allocation10_spill] sm:$0xff]  ;;  %v13753_v59 = vld [vmem:[#allocation19_spill] sm:$0xff] }
 0x1c6   :  { %13731 = vst [vmem:[#allocation18_spill] sm:$0xff] %v9930_v40  ;;  %13732 = vst [vmem:[#allocation17_spill] sm:$0xff] %v9940_v3  ;;  %v9946_v33 = vsel %vm489_vm0, %v2772_v30, 0.0  ;;  %v9957_v32 = vrot.slane %v3089_v2, %v13722_v23  ;;  %v3136_v13 = vrot.slane %v3122_v51, %v13722_v23  ;;  %v2775_v47 = vmul.f32 %v2626_v34, %v13736_v56  ;;  %v5041_v30 = vld [vmem:[%s12821_s9 + $0x48] sm:$0xff] }
 0x1c7   :  { %13733 = vst [vmem:[#allocation13_spill] sm:$0xff] %v9943_v37  ;;  %13734 = vst [vmem:[#allocation14_spill] sm:$0xff] %v9954_v14  ;;  %v2774_v62 = vmul.f32 %v2621_v12, %v9720_v42  ;;  %5147 = vperm.xlu1 %6002, %v5039_v20   ;;  %v3137_v6 = vcombine.high %v3129_v54, %v3129_v54  ;;  %v9976_v51 = vrot.slane %v3129_v54, %v13722_v23  ;;  %v5040_v20 = vld [vmem:[%s12821_s9 + $0x40] sm:$0xff] }
 0x1c8   :  { %13735 = vst [vmem:[#allocation47_spill] sm:$0xff] %v9957_v32  ;;  %v3138_v49 = vcombine.high %v3136_v13, %v3136_v13  ;;  %v9979_v56 = vrot.slane %v3136_v13, %v13722_v23  ;;  %v3220_v40 = vcombine.high %v9738_v63, %v9738_v63  ;;  %v2636_v54 = vpop.permute.xlu1 %2635 }
 0x1c9   :  { %5142 = vperm.xlu0 %6001, %v5038_v41   ;;  %13737 = vst [vmem:[#allocation56_spill] sm:$0xff] %v9976_v51  ;;  %v2925_v42 = vadd.f32 %v2774_v62, %v2773_v8  ;;  %v6578_v41 = vld [vmem:[%s12815_s3 + $0x18] sm:$0xff]  ;;  %v9990_v2 = vpop.permute.xlu0 %2630  ;;  %v9993_v13 = vrot.slane %v3137_v6, %v13722_v23  ;;  %v2777_v37 = vmul.f32 %v2636_v54, %v9854_v16 }
 0x1ca   :  { %13738 = vst [vmem:[#allocation28_spill] sm:$0xff] %v9979_v56  ;;  %v3171_v34 = vcombine.high %v6578_v41, %v6578_v41  ;;  %v3178_v12 = vrot.slane %v6578_v41, %v13722_v23  ;;  %v9996_v8 = vrot.slane %v3138_v49, %v13722_v23  ;;  %v5043_v6 = vld [vmem:[%s12821_s9 + $0x58] sm:$0xff]  ;;  %v10018_v16 = vrot.slane %v9738_v63, %v13722_v23 }
 0x1cb   :  { %13739 = vst [vmem:[#allocation38_spill] sm:$0xff] %v9993_v13  ;;  %v10003_v14 = vadd.f32 %v2925_v42, %v2775_v47  ;;  %5157 = vperm.xlu1 %6002, %v5041_v30   ;;  %v10021_v47 = vsel %vm489_vm0, %v2777_v37, 0.0  ;;  %v5042_v30 = vld [vmem:[%s12821_s9 + $0x50] sm:$0xff]  ;;  %v10035_v37 = vrot.slane %v3220_v40, %v13722_v23  ;;  %v13746_v56 = vld [vmem:[#allocation27_spill] sm:$0xff]  ;;  %v5045_v40 = vld [vmem:[%s12821_s9 + $0x68] sm:$0xff] }
 0x1cc   :  { %13740 = vst [vmem:[#allocation16_spill] sm:$0xff] %v9996_v8  ;;  %v3185_v3 = vrot.slane %v3171_v34, %v13722_v23  ;;  %v3186_v0 = vcombine.high %v3178_v12, %v3178_v12  ;;  %v10014_v32 = vrot.slane %v3178_v12, %v13722_v23  ;;  %v2646_v54 = vpop.permute.xlu1 %2645  ;;  %v10041_v8 = vrot.slane %v10018_v16, %v13722_v23 }
 0x1cd   :  { %5152 = vperm.xlu0 %6001, %v5040_v20   ;;  %v2641_v62 = vpop.permute.xlu0 %2640  ;;  %13744 = vst [vmem:[#allocation41_spill] sm:$0xff] %v10035_v37 }
 0x1ce   :  { %13741 = vst [vmem:[#allocation30_spill] sm:$0xff] %v10014_v32  ;;  %v3187_v42 = vcombine.high %v3185_v3, %v3185_v3  ;;  %v10027_v20 = vrot.slane %v3185_v3, %v13722_v23  ;;  %v10030_v34 = vrot.slane %v3186_v0, %v13722_v23  ;;  %13745 = vst [vmem:[#allocation61_spill] sm:$0xff] %v10041_v8  ;;  %v13751_v32 = vld [vmem:[#allocation48_spill] sm:$0xff] }
 0x1cf   :  { %v6326_v12 = vpop.eup %6325  ;;  %v10046_v0 = vmul.f32 %v2646_v54, %v9727_v48  ;;  %v10049_v13 = vmul.f32 %v2641_v62, %v13746_v56  ;;  %5167 = vperm.xlu1 %6002, %v5043_v6   ;;  %v10065_v56 = vrot.slane %v10035_v37, %v13722_v23  ;;  %v13749_v48 = vld [vmem:[#allocation37_spill] sm:$0xff] }
 0x1d0   :  { %13742 = vst [vmem:[#allocation63_spill] sm:$0xff] %v10027_v20  ;;  %13743 = vst [vmem:[#allocation54_spill] sm:$0xff] %v10030_v34  ;;  %v10043_v3 = vmul.f32 %v6578_v41, %v6326_v12  ;;  %v10052_v63 = vrot.slane %v3187_v42, %v13722_v23  ;;  %v5044_v12 = vld [vmem:[%s12821_s9 + $0x60] sm:$0xff]  ;;  %v13750_v20 = vld [vmem:[#allocation67_spill] sm:$0xff] }
 0x1d1   :  { %5162 = vperm.xlu0 %6001, %v5042_v30   ;;  %13747 = vst [vmem:[#allocation46_spill] sm:$0xff] %v10065_v56  ;;  %v13755_v37 = vld [vmem:[#allocation33_spill] sm:$0xff] }
 0x1d2   :  { %v2156_v62 = vmul.f32 %v9616_v55, %v10043_v3  ;;  %v2161_v6 = vmul.f32 %v9625_v21, %v10043_v3  ;;  %v2166_v30 = vmul.f32 %v9639_v17, %v10043_v3  ;;  %v2171_v42 = vmul.f32 %v9647_v29, %v10043_v3  ;;  %v13748_v17 = vld [vmem:[#allocation43_spill] sm:$0xff] }
 0x1d3   :  { %v2176_v54 = vmul.f32 %v9655_v58, %v10043_v3  ;;  %v2181_v49 = vmul.f32 %v9666_v31, %v10043_v3  ;;  %v2186_v55 = vmul.f32 %v9676_v45, %v10043_v3  ;;  %v2191_v21 = vmul.f32 %v9685_v26, %v10043_v3  ;;  %5177 = vperm.xlu1 %6002, %v5045_v40   ;;  %v13754_v31 = vld [vmem:[#allocation55_spill] sm:$0xff] }
 0x1d4   :  { %v2716_v41 = vmul.f32 %v13748_v17, %v2156_v62  ;;  %v2721_v29 = vmul.f32 %v13749_v48, %v2161_v6  ;;  %v2726_v34 = vmul.f32 %v13750_v20, %v2166_v30  ;;  %v2731_v51 = vmul.f32 %v13751_v32, %v2171_v42  ;;  %v5047_v26 = vld [vmem:[%s12821_s9 + $0x78] sm:$0xff] }
 0x1d5   :  { %v2736_v58 = vmul.f32 %v13752_v28, %v2176_v54  ;;  %v2741_v56 = vmul.f32 %v13753_v59, %v2181_v49  ;;  %v2746_v8 = vmul.f32 %v13754_v31, %v2186_v55  ;;  %v2751_v45 = vmul.f32 %v13755_v37, %v2191_v21  ;;  %5172 = vperm.xlu0 %6001, %v5044_v12   ;;  %v5046_v59 = vld [vmem:[%s12821_s9 + $0x70] sm:$0xff]  ;;  %v10122_v55 = vpop.permute.xlu0 %2650  ;;  %v5051_v21 = vld [vmem:[%s12821_s9 + $0x98] sm:$0xff] }
 0x1d6   :  { %v2795_v48 = vadd.f32 %v9585_v53, %v2716_v41  ;;  %v2806_v20 = vadd.f32 %v9631_v22, %v2721_v29  ;;  %v2817_v32 = vadd.f32 %v9634_v15, %v2726_v34  ;;  %v2828_v40 = vadd.f32 %v9644_v24, %v2731_v51 }
 0x1d7   :  { %v2839_v28 = vadd.f32 %v9650_v19, %v2736_v58  ;;  %v2850_v49 = vadd.f32 %v9659_v35, %v2741_v56  ;;  %v2861_v37 = vadd.f32 %v9688_v57, %v2746_v8  ;;  %v2872_v62 = vadd.f32 %v9743_v9, %v2751_v45  ;;  %5187 = vperm.xlu1 %6002, %v5047_v26   ;;  %v5049_v57 = vld [vmem:[%s12821_s9 + $0x88] sm:$0xff]  ;;  %v5050_v45 = vld [vmem:[%s12821_s9 + $0x90] sm:$0xff] }
 0x1d8   :  { %v2797_v53 = vadd.f32 %v9800_v38, %v2795_v48  ;;  %v2808_v22 = vadd.f32 %v9803_v61, %v2806_v20  ;;  %v2819_v15 = vadd.f32 %v9806_v5, %v2817_v32  ;;  %v2830_v24 = vadd.f32 %v9809_v46, %v2828_v40  ;;  %v5048_v46 = vld [vmem:[%s12821_s9 + $0x80] sm:$0xff]  ;;  %v10130_v40 = vpop.permute.xlu1 %2655 }
 0x1d9   :  { %v2841_v51 = vadd.f32 %v9816_v1, %v2839_v28  ;;  %v2852_v34 = vadd.f32 %v9819_v11, %v2850_v49  ;;  %v2863_v19 = vadd.f32 %v9822_v43, %v2861_v37  ;;  %v2874_v35 = vadd.f32 %v9857_v52, %v2872_v62  ;;  %5182 = vperm.xlu0 %6001, %v5046_v59  }
 0x1da   :  { %v2798_v9 = vrot.slane %v2797_v53, 4  ;;  %v2809_v38 = vrot.slane %v2808_v22, 4  ;;  %v2820_v61 = vrot.slane %v2819_v15, 4  ;;  %v2831_v5 = vrot.slane %v2830_v24, 4 }
 0x1db   :  { %v2842_v1 = vrot.slane %v2841_v51, 4  ;;  %v2853_v8 = vrot.slane %v2852_v34, 4  ;;  %v2864_v11 = vrot.slane %v2863_v19, 4  ;;  %v2875_v41 = vrot.slane %v2874_v35, 4  ;;  %5197 = vperm.xlu1 %6002, %v5049_v57   ;;  %v5052_v57 = vld [vmem:[%s12821_s9 + $0xa0] sm:$0xff] }
 0x1dc   :  { %v2799_v43 = vadd.f32 %v2798_v9, %v2797_v53  ;;  %v2810_v56 = vadd.f32 %v2809_v38, %v2808_v22  ;;  %v2821_v52 = vadd.f32 %v2820_v61, %v2819_v15  ;;  %v2832_v6 = vadd.f32 %v2831_v5, %v2830_v24  ;;  %v5053_v24 = vld [vmem:[%s12821_s9 + $0xa8] sm:$0xff] }
 0x1dd   :  { %v2843_v30 = vadd.f32 %v2842_v1, %v2841_v51  ;;  %v2854_v42 = vadd.f32 %v2853_v8, %v2852_v34  ;;  %v2865_v12 = vadd.f32 %v2864_v11, %v2863_v19  ;;  %v2876_v54 = vadd.f32 %v2875_v41, %v2874_v35  ;;  %5192 = vperm.xlu0 %6001, %v5048_v46   ;;  %v10138_v46 = vpop.permute.xlu0 %2660 }
 0x1de   :  { %v2800_v17 = vrot.slane %v2799_v43, 2  ;;  %v2811_v29 = vrot.slane %v2810_v56, 2  ;;  %v2822_v58 = vrot.slane %v2821_v52, 2  ;;  %v2833_v31 = vrot.slane %v2832_v6, 2 }
 0x1df   :  { %v2844_v26 = vrot.slane %v2843_v30, 2  ;;  %v2855_v48 = vrot.slane %v2854_v42, 2  ;;  %v2866_v20 = vrot.slane %v2865_v12, 2  ;;  %v2877_v32 = vrot.slane %v2876_v54, 2  ;;  %5207 = vperm.xlu1 %6002, %v5051_v21  }
 0x1e0   :  { %v2801_v59 = vadd.f32 %v2800_v17, %v2799_v43  ;;  %v2812_v28 = vadd.f32 %v2811_v29, %v2810_v56  ;;  %v2823_v49 = vadd.f32 %v2822_v58, %v2821_v52  ;;  %v2834_v37 = vadd.f32 %v2833_v31, %v2832_v6  ;;  %v5054_v58 = vld [vmem:[%s12821_s9 + $0xb0] sm:$0xff] }
 0x1e1   :  { %v2845_v62 = vadd.f32 %v2844_v26, %v2843_v30  ;;  %v2856_v53 = vadd.f32 %v2855_v48, %v2854_v42  ;;  %v2867_v22 = vadd.f32 %v2866_v20, %v2865_v12  ;;  %v2878_v15 = vadd.f32 %v2877_v32, %v2876_v54  ;;  %5202 = vperm.xlu0 %6001, %v5050_v45   ;;  %v2666_v30 = vpop.permute.xlu1 %2665  ;;  %v5055_v42 = vld [vmem:[%s12821_s9 + $0xb8] sm:$0xff]  ;;  %v13756_v12 = vld [vmem:[#allocation21_spill] sm:$0xff] }
 0x1e2   :  { %v2802_v51 = vrot.slane %v2801_v59, 1  ;;  %v2813_v34 = vrot.slane %v2812_v28, 1  ;;  %v2824_v19 = vrot.slane %v2823_v49, 1  ;;  %v2835_v35 = vrot.slane %v2834_v37, 1 }
 0x1e3   :  { %v2846_v9 = vrot.slane %v2845_v62, 1  ;;  %v2857_v38 = vrot.slane %v2856_v53, 1  ;;  %v2868_v61 = vrot.slane %v2867_v22, 1  ;;  %v2879_v5 = vrot.slane %v2878_v15, 1  ;;  %5217 = vperm.xlu1 %6002, %v5053_v24  }
 0x1e4   :  { %v2803_v1 = vadd.f32 %v2802_v51, %v2801_v59  ;;  %v2814_v8 = vadd.f32 %v2813_v34, %v2812_v28  ;;  %v2825_v11 = vadd.f32 %v2824_v19, %v2823_v49  ;;  %v2836_v41 = vadd.f32 %v2835_v35, %v2834_v37  ;;  %v13758_v19 = vld [vmem:[#allocation60_spill] sm:$0xff] }
 0x1e5   :  { %v2847_v43 = vadd.f32 %v2846_v9, %v2845_v62  ;;  %v2858_v56 = vadd.f32 %v2857_v38, %v2856_v53  ;;  %v2869_v52 = vadd.f32 %v2868_v61, %v2867_v22  ;;  %v2880_v6 = vadd.f32 %v2879_v5, %v2878_v15  ;;  %5212 = vperm.xlu0 %6001, %v5052_v57   ;;  %v2671_v22 = vpop.permute.xlu0 %2670  ;;  %v13757_v15 = vld [vmem:[#allocation70_spill] sm:$0xff]  ;;  %v13759_v57 = vld [vmem:[#allocation69_spill] sm:$0xff]  ;;  %v13760_v38 = vld [vmem:[#allocation35_spill] sm:$0xff] }
 0x1e6   :  { %v2969_v54 = vmul.f32 %v2803_v1, %v13756_v12  ;;  %v2970_v21 = vmul.f32 %v2814_v8, %v13756_v12  ;;  %v2971_v17 = vmul.f32 %v2825_v11, %v13756_v12  ;;  %v2972_v29 = vmul.f32 %v2836_v41, %v13756_v12  ;;  %v13762_v8 = vld [vmem:[#allocation66_spill] sm:$0xff]  ;;  %v13763_v41 = vld [vmem:[#allocation51_spill] sm:$0xff] }
 0x1e7   :  { %v2973_v31 = vmul.f32 %v2847_v43, %v13756_v12  ;;  %v2974_v45 = vmul.f32 %v2858_v56, %v13756_v12  ;;  %v2975_v26 = vmul.f32 %v2869_v52, %v13756_v12  ;;  %v2976_v48 = vmul.f32 %v2880_v6, %v13756_v12  ;;  %5227 = vperm.xlu1 %6002, %v5055_v42   ;;  %v13764_v52 = vld [vmem:[#allocation77_spill] sm:$0xff]  ;;  %v13765_v42 = vld [vmem:[#allocation40_spill] sm:$0xff] }
 0x1e8   :  { %v3001_v20 = vsel %vm410_vm1, %v2970_v21, %v2969_v54  ;;  %v2196_v32 = vmul.f32 %v9695_v39, %v10043_v3  ;;  %v2201_v59 = vmul.f32 %v9706_v18, %v10043_v3  ;;  %v2206_v28 = vmul.f32 %v9733_v7, %v10043_v3 }
 0x1e9   :  { %v3002_v49 = vsel %vm412_vm2, %v2971_v17, %v3001_v20  ;;  %v2211_v37 = vmul.f32 %v9749_v50, %v10043_v3  ;;  %v2216_v62 = vmul.f32 %v9762_v44, %v10043_v3  ;;  %v2936_v53 = vadd.f32 %v10046_v0, %v10049_v13  ;;  %5222 = vperm.xlu0 %6001, %v5054_v58   ;;  %v2676_v13 = vpop.permute.xlu1 %2675  ;;  %v2681_v54 = vpop.permute.xlu0 %2680 }
 0x1ea   :  { %v3003_v39 = vsel %vm414_vm3, %v2972_v29, %v3002_v49  ;;  %v2756_v18 = vmul.f32 %v9611_v10, %v2196_v32  ;;  %v2761_v7 = vmul.f32 %v13757_v15, %v2201_v59  ;;  %v2766_v24 = vmul.f32 %v9824_v60, %v2206_v28  ;;  %v13766_v29 = vld [vmem:[#allocation25_spill] sm:$0xff] }
 0x1eb   :  { %v3004_v51 = vsel %vm416_vm4, %v2973_v31, %v3003_v39  ;;  %v2771_v50 = vmul.f32 %v9895_v27, %v2211_v37  ;;  %v2776_v34 = vmul.f32 %v9990_v2, %v2216_v62  ;;  %v2221_v44 = vmul.f32 %v9775_v4, %v10043_v3  ;;  %v13761_v4 = vld [vmem:[#allocation64_spill] sm:$0xff]  ;;  %v13768_v37 = vld [vmem:[#allocation42_spill] sm:$0xff] }
 0x1ec   :  { %v3005_v0 = vsel %vm418_vm5, %v2974_v45, %v3004_v51  ;;  %v2883_v35 = vadd.f32 %v13758_v19, %v2756_v18  ;;  %v2894_v10 = vadd.f32 %v9831_v25, %v2761_v7  ;;  %v2905_v9 = vadd.f32 %v13759_v57, %v2766_v24 }
 0x1ed   :  { %v3006_v60 = vsel %vm420_vm6, %v2975_v26, %v3005_v0  ;;  %v2916_v61 = vadd.f32 %v13760_v38, %v2771_v50  ;;  %v2927_v27 = vadd.f32 %v10003_v14, %v2776_v34  ;;  %v2781_v2 = vmul.f32 %v10130_v40, %v2221_v44  ;;  %v2691_v34 = vpop.permute.xlu0 %2690 }
 0x1ee   :  { %v3007_v5 = vsel %vm1622_vm7, %v2976_v48, %v3006_v60  ;;  %v2885_v1 = vadd.f32 %v13761_v4, %v2883_v35  ;;  %v2896_v11 = vadd.f32 %v13762_v8, %v2894_v10  ;;  %v2907_v43 = vadd.f32 %v13763_v41, %v2905_v9  ;;  %v13767_v48 = vld [vmem:[#allocation79_spill] sm:$0xff] }
 0x1ef   :  { %3017 = vst [vmem:[#allocation5 + $0x20] sm:$0xff] %v3007_v5  ;;  %v2918_v25 = vadd.f32 %v9946_v33, %v2916_v61  ;;  %v2929_v56 = vadd.f32 %v10021_v47, %v2927_v27  ;;  %v2780_v6 = vmul.f32 %v10122_v55, %v13764_v52  ;;  %v2783_v14 = vmul.f32 %v2666_v30, %v13765_v42  ;;  %v2686_v33 = vpop.permute.xlu1 %2685 }
 0x1f0   :  { %v2886_v40 = vrot.slane %v2885_v1, 4  ;;  %v2897_v21 = vrot.slane %v2896_v11, 4  ;;  %v2908_v17 = vrot.slane %v2907_v43, 4  ;;  %v2782_v58 = vmul.f32 %v10138_v46, %v13766_v29  ;;  %v13769_v46 = vld [vmem:[#allocation50_spill] sm:$0xff] }
 0x1f1   :  { %v2919_v31 = vrot.slane %v2918_v25, 4  ;;  %v2930_v45 = vrot.slane %v2929_v56, 4  ;;  %v2937_v26 = vadd.f32 %v2936_v53, %v2780_v6  ;;  %v2785_v20 = vmul.f32 %v2676_v13, %v13767_v48 }
 0x1f2   :  { %v2887_v32 = vadd.f32 %v2886_v40, %v2885_v1  ;;  %v2898_v47 = vadd.f32 %v2897_v21, %v2896_v11  ;;  %v2909_v59 = vadd.f32 %v2908_v17, %v2907_v43  ;;  %v2939_v55 = vsel %vm489_vm0, %v2782_v58, 0.0  ;;  %v2701_v40 = vpop.permute.xlu0 %2700  ;;  %v13772_v58 = vld [vmem:[#allocation49_spill] sm:$0xff] }
 0x1f3   :  { %v2920_v28 = vadd.f32 %v2919_v31, %v2918_v25  ;;  %v2931_v30 = vadd.f32 %v2930_v45, %v2929_v56  ;;  %v2938_v49 = vadd.f32 %v2937_v26, %v2781_v2  ;;  %v2784_v62 = vmul.f32 %v2671_v22, %v13768_v37  ;;  %v13770_v22 = vld [vmem:[#allocation31_spill] sm:$0xff]  ;;  %v2696_v60 = vpop.permute.xlu1 %2695  ;;  %v13771_v25 = vld [vmem:[#allocation22_spill] sm:$0xff] }
 0x1f4   :  { %v2888_v39 = vrot.slane %v2887_v32, 2  ;;  %v2899_v18 = vrot.slane %v2898_v47, 2  ;;  %v2910_v15 = vrot.slane %v2909_v59, 2  ;;  %v2787_v7 = vmul.f32 %v2686_v33, %v13769_v46 }
 0x1f5   :  { %v2921_v24 = vrot.slane %v2920_v28, 2  ;;  %v2932_v53 = vrot.slane %v2931_v30, 2  ;;  %v2940_v51 = vadd.f32 %v2939_v55, %v2938_v49  ;;  %v2947_v50 = vadd.f32 %v2784_v62, %v2783_v14 }
 0x1f6   :  { %v2889_v44 = vadd.f32 %v2888_v39, %v2887_v32  ;;  %v2900_v13 = vadd.f32 %v2899_v18, %v2898_v47  ;;  %v2911_v0 = vadd.f32 %v2910_v15, %v2909_v59  ;;  %v2950_v19 = vsel %vm489_vm0, %v2787_v7, 0.0  ;;  %v13773_v59 = vld [vmem:[#allocation11_spill] sm:$0xff] }
 0x1f7   :  { %v2922_v35 = vadd.f32 %v2921_v24, %v2920_v28  ;;  %v2933_v10 = vadd.f32 %v2932_v53, %v2931_v30  ;;  %v2941_v57 = vrot.slane %v2940_v51, 4  ;;  %v2226_v9 = vmul.f32 %v13770_v22, %v10043_v3  ;;  %v13775_v24 = vld [vmem:[#allocation41_spill] sm:$0xff] }
 0x1f8   :  { %v2890_v38 = vrot.slane %v2889_v44, 1  ;;  %v2901_v61 = vrot.slane %v2900_v13, 1  ;;  %v2912_v27 = vrot.slane %v2911_v0, 1  ;;  %v2948_v2 = vadd.f32 %v2947_v50, %v2785_v20  ;;  %v2706_v20 = vpop.permute.xlu1 %2705 }
 0x1f9   :  { %v2923_v5 = vrot.slane %v2922_v35, 1  ;;  %v2934_v4 = vrot.slane %v2933_v10, 1  ;;  %v2942_v1 = vadd.f32 %v2941_v57, %v2940_v51  ;;  %v2786_v8 = vmul.f32 %v2681_v54, %v2226_v9  ;;  %v13780_v57 = vld [vmem:[#allocation52_spill] sm:$0xff]  ;;  %v13781_v9 = vld [vmem:[#allocation29_spill] sm:$0xff] }
 0x1fa   :  { %v2891_v11 = vadd.f32 %v2890_v38, %v2889_v44  ;;  %v2902_v41 = vadd.f32 %v2901_v61, %v2900_v13  ;;  %v2913_v43 = vadd.f32 %v2912_v27, %v2911_v0  ;;  %v2789_v56 = vmul.f32 %v2696_v60, %v13771_v25  ;;  %v13778_v13 = vld [vmem:[#allocation46_spill] sm:$0xff] }
 0x1fb   :  { %v2924_v52 = vadd.f32 %v2923_v5, %v2922_v35  ;;  %v2935_v6 = vadd.f32 %v2934_v4, %v2933_v10  ;;  %v2943_v42 = vrot.slane %v2942_v1, 2  ;;  %v2949_v14 = vadd.f32 %v2948_v2, %v2786_v8  ;;  %v13779_v10 = vld [vmem:[#allocation9_spill] sm:$0xff]  ;;  %v13784_v2 = vld [vmem:[#allocation24_spill] sm:$0xff]  ;;  %v13785_v4 = vld [vmem:[#allocation18_spill] sm:$0xff] }
 0x1fc   :  { %v2977_v21 = vmul.f32 %v2891_v11, %v13756_v12  ;;  %v2978_v17 = vmul.f32 %v2902_v41, %v13756_v12  ;;  %v2979_v29 = vmul.f32 %v2913_v43, %v13756_v12  ;;  %v2788_v31 = vmul.f32 %v2691_v34, %v13772_v58  ;;  %v13777_v34 = vld [vmem:[#allocation61_spill] sm:$0xff] }
 0x1fd   :  { %v2980_v54 = vmul.f32 %v2924_v52, %v13756_v12  ;;  %v2981_v45 = vmul.f32 %v2935_v6, %v13756_v12  ;;  %v2944_v26 = vadd.f32 %v2943_v42, %v2942_v1  ;;  %v2951_v48 = vadd.f32 %v2950_v19, %v2949_v14  ;;  %v13790_v52 = vld [vmem:[#allocation17_spill] sm:$0xff]  ;;  %v13792_v42 = vld [vmem:[#allocation14_spill] sm:$0xff] }
 0x1fe   :  { %v3008_v33 = vsel %vm410_vm1, %v2978_v17, %v2977_v21  ;;  %v2958_v32 = vadd.f32 %v2789_v56, %v2788_v31  ;;  %v2231_v47 = vmul.f32 %v9790_v36, %v10043_v3  ;;  %v2790_v55 = vmul.f32 %v2701_v40, %v13773_v59  ;;  %v13798_v31 = vld [vmem:[#allocation13_spill] sm:$0xff] }
 0x1ff   :  { %v3009_v28 = vsel %vm412_vm2, %v2979_v29, %v3008_v33  ;;  %v2945_v30 = vrot.slane %v2944_v26, 1  ;;  %v2952_v49 = vrot.slane %v2951_v48, 4  ;;  %v3219_v37 = vcombine.high %v10052_v63, %v10052_v63 }
 0x200   :  { %v3010_v62 = vsel %vm414_vm3, %v2980_v54, %v3009_v28  ;;  %v2791_v39 = vmul.f32 %v2706_v20, %v2231_v47  ;;  %v2959_v18 = vadd.f32 %v2958_v32, %v2790_v55  ;;  %v13774_v15 = vcombine.high %v10018_v16, %v10018_v16  ;;  %v13806_v47 = vld [vmem:[#allocation56_spill] sm:$0xff]  ;;  %v13808_v55 = vld [vmem:[#allocation38_spill] sm:$0xff] }
 0x201   :  { %v3011_v36 = vsel %vm416_vm4, %v2981_v45, %v3010_v62  ;;  %v2946_v3 = vadd.f32 %v2945_v30, %v2944_v26  ;;  %v2953_v7 = vadd.f32 %v2952_v49, %v2951_v48  ;;  %v13776_v53 = vcombine.high %v13775_v24, %v13775_v24  ;;  %v13800_v45 = vld [vmem:[#allocation47_spill] sm:$0xff] }
 0x202   :  { %v3257_v46 = vrot.slane %v13774_v15, %v13722_v23  ;;  %v10227_v50 = vadd.f32 %v2959_v18, %v2791_v39  ;;  %v3265_v44 = vcombine.high %v13777_v34, %v13777_v34  ;;  %v3266_v0 = vcombine.high %v13778_v13, %v13778_v13  ;;  %v13814_v15 = vld [vmem:[#allocation28_spill] sm:$0xff] }
 0x203   :  { %v3264_v51 = vrot.slane %v13776_v53, %v13722_v23  ;;  %v2982_v16 = vmul.f32 %v2946_v3, %v13756_v12  ;;  %v2954_v35 = vrot.slane %v2953_v7, 2  ;;  %v10236_v22 = vrot.slane %v13780_v57, %v13779_v10  ;;  %v13816_v3 = vld [vmem:[#allocation16_spill] sm:$0xff] }
 0x204   :  { %v3267_v19 = vcombine.high %v3257_v46, %v3257_v46  ;;  %v10240_v60 = vrot.slane %v13781_v9, %v13779_v10  ;;  %v13782_v23 = vcombine.high %v13780_v57, %v13780_v57  ;;  %v13783_v61 = vcombine.high %v13781_v9, %v13781_v9  ;;  %v13822_v57 = vld [vmem:[#allocation30_spill] sm:$0xff] }
 0x205   :  { %v10256_v5 = vrot.slane %v13784_v2, %v13779_v10  ;;  %v10260_v1 = vrot.slane %v13785_v4, %v13779_v10  ;;  %v3012_v8 = vsel %vm418_vm5, %v2982_v16, %v3011_v36  ;;  %v2955_v11 = vadd.f32 %v2954_v35, %v2953_v7 }
 0x206   :  { %v10246_v38 = vrot.slane %v13782_v23, %v13779_v10  ;;  %v10252_v27 = vrot.slane %v13783_v61, %v13779_v10  ;;  %v13786_v41 = vcombine.high %v13784_v2, %v13784_v2  ;;  %v13788_v25 = vcombine.high %v13785_v4, %v13785_v4  ;;  %v13824_v23 = vld [vmem:[#allocation54_spill] sm:$0xff] }
 0x207   :  { %v10277_v6 = vrot.slane %v13790_v52, %v13779_v10  ;;  %v10281_v14 = vrot.slane %v13792_v42, %v13779_v10  ;;  %v13794_v40 = vcombine.high %v13790_v52, %v13790_v52  ;;  %v13796_v17 = vcombine.high %v13792_v42, %v13792_v42  ;;  %v13830_v52 = vld [vmem:[#allocation63_spill] sm:$0xff] }
 0x208   :  { %v10267_v43 = vrot.slane %v13786_v41, %v13779_v10  ;;  %v10273_v56 = vrot.slane %v13788_v25, %v13779_v10  ;;  %v2956_v58 = vrot.slane %v2955_v11, 1  ;;  %v10297_v54 = vrot.slane %v13798_v31, %v13779_v10 }
 0x209   :  { %13791 = vst [vmem:[#allocation23_spill] sm:$0xff] %v10277_v6  ;;  %13793 = vst [vmem:[#allocation44_spill] sm:$0xff] %v10281_v14  ;;  %v10287_v21 = vrot.slane %v13794_v40, %v13779_v10  ;;  %v10293_v29 = vrot.slane %v13796_v17, %v13779_v10  ;;  %v10301_v26 = vrot.slane %v13800_v45, %v13779_v10 }
 0x20a   :  { %13787 = vst [vmem:[#allocation39_spill] sm:$0xff] %v10267_v43  ;;  %13789 = vst [vmem:[#allocation53_spill] sm:$0xff] %v10273_v56  ;;  %v13802_v48 = vcombine.high %v13798_v31, %v13798_v31  ;;  %v13804_v33 = vcombine.high %v13800_v45, %v13800_v45  ;;  %v10317_v59 = vrot.slane %v13806_v47, %v13779_v10 }
 0x20b   :  { %13795 = vst [vmem:[#allocation26_spill] sm:$0xff] %v10287_v21  ;;  %13797 = vst [vmem:[#allocation45_spill] sm:$0xff] %v10293_v29  ;;  %v10321_v28 = vrot.slane %v13808_v55, %v13779_v10  ;;  %v13810_v30 = vcombine.high %v13806_v47, %v13806_v47  ;;  %v2957_v62 = vadd.f32 %v2956_v58, %v2955_v11 }
 0x20c   :  { %13799 = vst [vmem:[#allocation15_spill] sm:$0xff] %v10297_v54  ;;  %13801 = vst [vmem:[#allocation34_spill] sm:$0xff] %v10301_v26  ;;  %v10307_v20 = vrot.slane %v13802_v48, %v13779_v10  ;;  %v10313_v32 = vrot.slane %v13804_v33, %v13779_v10  ;;  %v13812_v39 = vcombine.high %v13808_v55, %v13808_v55 }
 0x20d   :  { %13807 = vst [vmem:[#allocation65_spill] sm:$0xff] %v10317_v59  ;;  %13809 = vst [vmem:[#allocation72_spill] sm:$0xff] %v10321_v28  ;;  %v10327_v49 = vrot.slane %v13810_v30, %v13779_v10  ;;  %v10337_v36 = vrot.slane %v13814_v15, %v13779_v10  ;;  %v10341_v7 = vrot.slane %v13816_v3, %v13779_v10 }
 0x20e   :  { %13803 = vst [vmem:[#allocation71_spill] sm:$0xff] %v10307_v20  ;;  %13805 = vst [vmem:[#allocation36_spill] sm:$0xff] %v10313_v32  ;;  %v10333_v18 = vrot.slane %v13812_v39, %v13779_v10  ;;  %v13818_v24 = vcombine.high %v13814_v15, %v13814_v15  ;;  %v13820_v16 = vcombine.high %v13816_v3, %v13816_v3 }
 0x20f   :  { %13811 = vst [vmem:[#allocation62_spill] sm:$0xff] %v10327_v49  ;;  %13815 = vst [vmem:[#allocation76_spill] sm:$0xff] %v10337_v36  ;;  %v10357_v9 = vrot.slane %v13822_v57, %v13779_v10  ;;  %v10361_v61 = vrot.slane %v13824_v23, %v13779_v10  ;;  %v2983_v2 = vmul.f32 %v2957_v62, %v13756_v12 }
 0x210   :  { %13813 = vst [vmem:[#allocation74_spill] sm:$0xff] %v10333_v18  ;;  %13817 = vst [vmem:[#allocation32_spill] sm:$0xff] %v10341_v7  ;;  %v10347_v53 = vrot.slane %v13818_v24, %v13779_v10  ;;  %v10353_v35 = vrot.slane %v13820_v16, %v13779_v10  ;;  %v13826_v4 = vcombine.high %v13822_v57, %v13822_v57 }
 0x211   :  { %13823 = vst [vmem:[#allocation80_spill] sm:$0xff] %v10357_v9  ;;  %13825 = vst [vmem:[#allocation73_spill] sm:$0xff] %v10361_v61  ;;  %v13828_v41 = vcombine.high %v13824_v23, %v13824_v23  ;;  %v10378_v42 = vrot.slane %v13830_v52, %v13779_v10  ;;  %v10382_v40 = vrot.slane %v10052_v63, %v13779_v10 }
 0x212   :  { %13819 = vst [vmem:[#allocation57_spill] sm:$0xff] %v10347_v53  ;;  %13821 = vst [vmem:[#allocation8_spill] sm:$0xff] %v10353_v35  ;;  %v10368_v11 = vrot.slane %v13826_v4, %v13779_v10  ;;  %v13833_v17 = vcombine.high %v13830_v52, %v13830_v52  ;;  %v10391_v31 = vrot.slane %v3219_v37, %v13779_v10 }
 0x213   :  { %v10374_v25 = vrot.slane %v13828_v41, %v13779_v10  ;;  %13831 = vst [vmem:[#allocation75_spill] sm:$0xff] %v10378_v42  ;;  %13832 = vst [vmem:[#allocation27_spill] sm:$0xff] %v10382_v40  ;;  %v10395_v45 = vrot.slane %v13777_v34, %v13779_v10  ;;  %v10398_v48 = vsel %vm420_vm6, %v2983_v2, %v3012_v8  ;;  %v13843_v8 = vld [vmem:[#allocation20_spill] sm:$0xff] }
 0x214   :  { %13827 = vst [vmem:[#allocation12_spill] sm:$0xff] %v10368_v11  ;;  %v10388_v58 = vrot.slane %v13833_v17, %v13779_v10  ;;  %13835 = vst [vmem:[#allocation37_spill] sm:$0xff] %v10391_v31  ;;  %v10401_v33 = vrot.slane %v3257_v46, %v13779_v10  ;;  %v10404_v63 = vrot.slane %v3265_v44, %v13779_v10 }
 0x215   :  { %13829 = vst [vmem:[#allocation59_spill] sm:$0xff] %v10374_v25  ;;  %13836 = vst [vmem:[#allocation67_spill] sm:$0xff] %v10395_v45  ;;  %v10407_v47 = vrot.slane %v3267_v19, %v13779_v10  ;;  %v10411_v37 = vrot.slane %v13778_v13, %v13779_v10  ;;  %v10414_v55 = vrot.slane %v3264_v51, %v13779_v10 }
 0x216   :  { %13834 = vst [vmem:[#allocation43_spill] sm:$0xff] %v10388_v58  ;;  %13837 = vst [vmem:[#allocation48_spill] sm:$0xff] %v10401_v33  ;;  %v10417_v34 = vrot.slane %v3266_v0, %v13779_v10  ;;  %v10421_v46 = vmul.f32 %v10236_v22, %v13843_v8  ;;  %v10425_v44 = vmul.f32 %v10240_v60, %v13843_v8 }
 0x217   :  { %13838 = vst [vmem:[#allocation10_spill] sm:$0xff] %v10404_v63  ;;  %13839 = vst [vmem:[#allocation19_spill] sm:$0xff] %v10407_v47  ;;  %v10429_v19 = vmul.f32 %v10246_v38, %v13843_v8  ;;  %v10433_v13 = vmul.f32 %v10252_v27, %v13843_v8  ;;  %v10437_v51 = vmul.f32 %v10256_v5, %v13843_v8 }
 0x218   :  { %13840 = vst [vmem:[#allocation55_spill] sm:$0xff] %v10411_v37  ;;  %13841 = vst [vmem:[#allocation33_spill] sm:$0xff] %v10414_v55  ;;  %v10441_v0 = vmul.f32 %v10260_v1, %v13843_v8  ;;  %v10445_v10 = vmul.f32 %v10267_v43, %v13843_v8  ;;  %v10449_v30 = vmul.f32 %v10273_v56, %v13843_v8 }
 0x219   :  { %13842 = vst [vmem:[#allocation21_spill] sm:$0xff] %v10417_v34  ;;  %v10453_v62 = vmul.f32 %v10277_v6, %v13843_v8  ;;  %v10457_v39 = vmul.f32 %v10281_v14, %v13843_v8  ;;  %v10461_v15 = vmul.f32 %v10287_v21, %v13843_v8  ;;  %v10465_v3 = vmul.f32 %v10293_v29, %v13843_v8 }
 0x21a   :  { %v10469_v24 = vmul.f32 %v10297_v54, %v13843_v8  ;;  %v10473_v16 = vmul.f32 %v10301_v26, %v13843_v8  ;;  %v10477_v57 = vmul.f32 %v10307_v20, %v13843_v8  ;;  %v10481_v23 = vmul.f32 %v10313_v32, %v13843_v8 }
 0x21b   :  { %v10485_v2 = vmul.f32 %v10317_v59, %v13843_v8  ;;  %v10489_v4 = vmul.f32 %v10321_v28, %v13843_v8  ;;  %v10493_v41 = vmul.f32 %v10327_v49, %v13843_v8  ;;  %v10497_v52 = vmul.f32 %v10333_v18, %v13843_v8 }
 0x21c   :  { %v10501_v17 = vmul.f32 %v10337_v36, %v13843_v8  ;;  %v10505_v59 = vmul.f32 %v10341_v7, %v13843_v8  ;;  %v10509_v28 = vmul.f32 %v10347_v53, %v13843_v8  ;;  %v10513_v49 = vmul.f32 %v10353_v35, %v13843_v8 }
 0x21d   :  { %v10517_v18 = vmul.f32 %v10357_v9, %v13843_v8  ;;  %v10521_v36 = vmul.f32 %v10361_v61, %v13843_v8  ;;  %v10525_v7 = vmul.f32 %v10368_v11, %v13843_v8  ;;  %v10529_v53 = vmul.f32 %v10374_v25, %v13843_v8 }
 0x21e   :  { %v10533_v35 = vmul.f32 %v10378_v42, %v13843_v8  ;;  %v10537_v9 = vmul.f32 %v10382_v40, %v13843_v8  ;;  %v10541_v61 = vmul.f32 %v10388_v58, %v13843_v8  ;;  %v10545_v11 = vmul.f32 %v10391_v31, %v13843_v8 }
 0x21f   :  { %13844 = vst [vmem:[#allocation70_spill] sm:$0xff] %v10517_v18  ;;  %13845 = vst [vmem:[#allocation60_spill] sm:$0xff] %v10521_v36  ;;  %v10549_v25 = vmul.f32 %v10395_v45, %v13843_v8  ;;  %v10553_v42 = vmul.f32 %v10401_v33, %v13843_v8  ;;  %v10557_v40 = vmul.f32 %v10404_v63, %v13843_v8  ;;  %v3503_v63 = vsel %vm489_vm0, %v10421_v46, -inf }
 0x220   :  { %v10561_v58 = vmul.f32 %v10407_v47, %v13843_v8  ;;  %v10565_v31 = vmul.f32 %v10411_v37, %v13843_v8  ;;  %v10569_v45 = vmul.f32 %v10414_v55, %v13843_v8  ;;  %v10573_v33 = vmul.f32 %v10417_v34, %v13843_v8 }
 0x221   :  { %v3504_v32 = vsel %vm489_vm0, %v10425_v44, -inf  ;;  %v3505_v47 = vsel %vm489_vm0, %v10429_v19, -inf  ;;  %v3506_v37 = vsel %vm489_vm0, %v10433_v13, -inf  ;;  %v3507_v55 = vsel %vm489_vm0, %v10437_v51, -inf }
 0x222   :  { %v3509_v20 = vsel %vm489_vm0, %v10441_v0, -inf  ;;  %v3508_v8 = vmax.f32 %v3503_v63, %v3507_v55  ;;  %v3511_v26 = vsel %vm489_vm0, %v10445_v10, -inf  ;;  %v3513_v54 = vsel %vm489_vm0, %v10449_v30, -inf }
 0x223   :  { %v3510_v34 = vmax.f32 %v3504_v32, %v3509_v20  ;;  %v3512_v29 = vmax.f32 %v3505_v47, %v3511_v26  ;;  %v3514_v21 = vmax.f32 %v3506_v37, %v3513_v54  ;;  %v3515_v14 = vsel %vm489_vm0, %v10453_v62, -inf }
 0x224   :  { %v3517_v6 = vsel %vm489_vm0, %v10457_v39, -inf  ;;  %v3516_v56 = vmax.f32 %v3508_v8, %v3515_v14  ;;  %v3519_v63 = vsel %vm489_vm0, %v10461_v15, -inf  ;;  %v3521_v20 = vsel %vm489_vm0, %v10465_v3, -inf }
 0x225   :  { %v3518_v43 = vmax.f32 %v3510_v34, %v3517_v6  ;;  %v3520_v32 = vmax.f32 %v3512_v29, %v3519_v63  ;;  %v3522_v55 = vmax.f32 %v3514_v21, %v3521_v20  ;;  %v3523_v26 = vsel %vm489_vm0, %v10469_v24, -inf }
 0x226   :  { %v3525_v54 = vsel %vm489_vm0, %v10473_v16, -inf  ;;  %v3524_v47 = vmax.f32 %v3516_v56, %v3523_v26  ;;  %v3527_v14 = vsel %vm489_vm0, %v10477_v57, -inf  ;;  %v3529_v6 = vsel %vm489_vm0, %v10481_v23, -inf }
 0x227   :  { %v3526_v37 = vmax.f32 %v3518_v43, %v3525_v54  ;;  %v3528_v34 = vmax.f32 %v3520_v32, %v3527_v14  ;;  %v3530_v8 = vmax.f32 %v3522_v55, %v3529_v6  ;;  %v3531_v29 = vsel %vm489_vm0, %v10485_v2, -inf }
 0x228   :  { %v3533_v21 = vsel %vm489_vm0, %v10489_v4, -inf  ;;  %v3532_v63 = vmax.f32 %v3524_v47, %v3531_v29  ;;  %v3535_v56 = vsel %vm489_vm0, %v10493_v41, -inf  ;;  %v3537_v43 = vsel %vm489_vm0, %v10497_v52, -inf }
 0x229   :  { %v3534_v20 = vmax.f32 %v3526_v37, %v3533_v21  ;;  %v3536_v26 = vmax.f32 %v3528_v34, %v3535_v56  ;;  %v3538_v54 = vmax.f32 %v3530_v8, %v3537_v43  ;;  %v3539_v32 = vsel %vm489_vm0, %v10501_v17, -inf  ;;  %v5057_v56 = vld [vmem:[%s12821_s9 + $0xc8] sm:$0xff] }
 0x22a   :  { %v3541_v55 = vsel %vm489_vm0, %v10505_v59, -inf  ;;  %v3540_v14 = vmax.f32 %v3532_v63, %v3539_v32  ;;  %v3543_v47 = vsel %vm489_vm0, %v10509_v28, -inf  ;;  %v3545_v37 = vsel %vm489_vm0, %v10513_v49, -inf  ;;  %v5056_v63 = vld [vmem:[%s12821_s9 + $0xc0] sm:$0xff]  ;;  %5237 = vperm.xlu1 %6002, %v5057_v56   ;;  %v5059_v56 = vld [vmem:[%s12821_s9 + $0xd8] sm:$0xff] }
 0x22b   :  { %v3542_v6 = vmax.f32 %v3534_v20, %v3541_v55  ;;  %v3544_v29 = vmax.f32 %v3536_v26, %v3543_v47  ;;  %v3546_v21 = vmax.f32 %v3538_v54, %v3545_v37  ;;  %v3547_v34 = vsel %vm489_vm0, %v10517_v18, -inf  ;;  %5232 = vperm.xlu0 %6001, %v5056_v63   ;;  %v5058_v63 = vld [vmem:[%s12821_s9 + $0xd0] sm:$0xff] }
 0x22c   :  { %v3549_v8 = vsel %vm489_vm0, %v10521_v36, -inf  ;;  %v3548_v20 = vmax.f32 %v3540_v14, %v3547_v34  ;;  %v3551_v26 = vsel %vm489_vm0, %v10525_v7, -inf  ;;  %v3553_v54 = vsel %vm489_vm0, %v10529_v53, -inf }
 0x22d   :  { %v3550_v43 = vmax.f32 %v3542_v6, %v3549_v8  ;;  %v3552_v32 = vmax.f32 %v3544_v29, %v3551_v26  ;;  %v3554_v55 = vmax.f32 %v3546_v21, %v3553_v54  ;;  %v3555_v47 = vsel %vm489_vm0, %v10533_v35, -inf }
 0x22e   :  { %v3557_v37 = vsel %vm489_vm0, %v10537_v9, -inf  ;;  %v3556_v36 = vmax.f32 %v3548_v20, %v3555_v47  ;;  %v3559_v14 = vsel %vm489_vm0, %v10541_v61, -inf  ;;  %v3561_v6 = vsel %vm489_vm0, %v10545_v11, -inf  ;;  %5247 = vperm.xlu1 %6002, %v5059_v56  }
 0x22f   :  { %v3558_v18 = vmax.f32 %v3550_v43, %v3557_v37  ;;  %v3560_v34 = vmax.f32 %v3552_v32, %v3559_v14  ;;  %v3562_v8 = vmax.f32 %v3554_v55, %v3561_v6  ;;  %v3563_v29 = vsel %vm489_vm0, %v10549_v25, -inf  ;;  %5242 = vperm.xlu0 %6001, %v5058_v63   ;;  %v5062_v63 = vld [vmem:[%s12821_s9 + $0xf0] sm:$0xff] }
 0x230   :  { %v3565_v21 = vsel %vm489_vm0, %v10553_v42, -inf  ;;  %v3564_v20 = vmax.f32 %v3556_v36, %v3563_v29  ;;  %v3567_v26 = vsel %vm489_vm0, %v10557_v40, -inf  ;;  %v3569_v54 = vsel %vm489_vm0, %v10561_v58, -inf  ;;  %v5061_v29 = vld [vmem:[%s12821_s9 + $0xe8] sm:$0xff] }
 0x231   :  { %v3566_v43 = vmax.f32 %v3558_v18, %v3565_v21  ;;  %v3568_v32 = vmax.f32 %v3560_v34, %v3567_v26  ;;  %v3571_v55 = vsel %vm489_vm0, %v10565_v31, -inf  ;;  %v3573_v47 = vsel %vm489_vm0, %v10569_v45, -inf  ;;  %v5060_v34 = vld [vmem:[%s12821_s9 + $0xe0] sm:$0xff]  ;;  %v13847_v26 = vld [vmem:[#allocation78_spill] sm:$0xff] }
 0x232   :  { %v3570_v37 = vmax.f32 %v3562_v8, %v3569_v54  ;;  %v3572_v14 = vmax.f32 %v3564_v20, %v3571_v55  ;;  %v3575_v18 = vsel %vm489_vm0, %v10573_v33, -inf  ;;  %5257 = vperm.xlu1 %6002, %v5061_v29   ;;  %v5063_v8 = vld [vmem:[%s12821_s9 + $0xf8] sm:$0xff] }
 0x233   :  { %v3574_v6 = vmax.f32 %v3566_v43, %v3573_v47  ;;  %v3576_v36 = vmax.f32 %v3568_v32, %v3575_v18  ;;  %5252 = vperm.xlu0 %6001, %v5060_v34   ;;  %v13846_v43 = vld [vmem:[#allocation68_spill] sm:$0xff] }
 0x234   :  { %v2232_v54 = vmul.f32 %v13847_v26, %v13846_v43 }
 0x235   :  { %v3577_v21 = vmax.f32 %v3572_v14, %v3574_v6  ;;  %v3578_v56 = vmax.f32 %v3576_v36, %v3570_v37  ;;  %v5065_v14 = vld [vmem:[%s12821_s9 + $0x108] sm:$0xff]  ;;  %v5064_v6 = vld [vmem:[%s12821_s9 + $0x100] sm:$0xff] }
 0x236   :  { %5267 = vperm.xlu1 %6002, %v5063_v8  }
 0x237   :  { %5262 = vperm.xlu0 %6001, %v5062_v63   ;;  %v10677_v20 = vmax.f32 %v3577_v21, %v3578_v56  ;;  %v5066_v21 = vld [vmem:[%s12821_s9 + $0x110] sm:$0xff] }
 0x239   :  { %v3580_v32 = vsub.f32 %v10421_v46, %v10677_v20  ;;  %v3581_v55 = vsub.f32 %v10425_v44, %v10677_v20  ;;  %v3582_v47 = vsub.f32 %v10429_v19, %v10677_v20  ;;  %v3583_v37 = vsub.f32 %v10433_v13, %v10677_v20  ;;  %v13872_v13 = vld [vmem:[#allocation23_spill] sm:$0xff] }
 0x23a   :  { %v3584_v46 = vsub.f32 %v10437_v51, %v10677_v20  ;;  %v3585_v44 = vsub.f32 %v10441_v0, %v10677_v20  ;;  %5277 = vperm.xlu1 %6002, %v5065_v14   ;;  %v2711_v14 = vpop.permute.xlu0 %2710  ;;  %v3586_v56 = vsub.f32 %v10445_v10, %v10677_v20  ;;  %v3588_v29 = vsub.f32 %v10453_v62, %v10677_v20 }
 0x23b   :  { %5272 = vperm.xlu0 %6001, %v5064_v6   ;;  %v3619_v26 = vmul.f32 1.442695, %v3580_v32  ;;  %v5067_v6 = vld [vmem:[%s12821_s9 + $0x118] sm:$0xff]  ;;  %v3621_v8 = vmul.f32 1.442695, %v3581_v55  ;;  %v3587_v32 = vsub.f32 %v10449_v30, %v10677_v20  ;;  %v2792_v51 = vmul.f32 %v2711_v14, %v2232_v54 }
 0x23c   :  { %v3623_v34 = vmul.f32 1.442695, %v3582_v47  ;;  %v3625_v0 = vmul.f32 1.442695, %v3583_v37  ;;  %v3627_v63 = vmul.f32 1.442695, %v3584_v46  ;;  %v3589_v10 = vsub.f32 %v10457_v39, %v10677_v20 }
 0x23d   :  { %6327 = vpow2.f32 %v3619_v26  ;;  %v3629_v43 = vmul.f32 1.442695, %v3585_v44  ;;  %v3631_v36 = vmul.f32 1.442695, %v3586_v56  ;;  %v3633_v55 = vmul.f32 1.442695, %v3587_v32 }
 0x23e   :  { %5287 = vperm.xlu1 %6002, %v5067_v6   ;;  %6329 = vpow2.f32 %v3621_v8  ;;  %v2961_v47 = vsel %vm489_vm0, %v2792_v51, 0.0  ;;  %v3590_v30 = vsub.f32 %v10461_v15, %v10677_v20  ;;  %v3635_v37 = vmul.f32 1.442695, %v3588_v29  ;;  %v5070_v6 = vld [vmem:[%s12821_s9 + $0x130] sm:$0xff] }
 0x23f   :  { %5282 = vperm.xlu0 %6001, %v5066_v21   ;;  %6331 = vpow2.f32 %v3623_v34  ;;  %v2962_v54 = vadd.f32 %v2961_v47, %v10227_v50  ;;  %v3591_v62 = vsub.f32 %v10465_v3, %v10677_v20  ;;  %v3637_v46 = vmul.f32 1.442695, %v3589_v10  ;;  %v5069_v50 = vld [vmem:[%s12821_s9 + $0x128] sm:$0xff] }
 0x240   :  { %6333 = vpow2.f32 %v3625_v0  ;;  %v3592_v39 = vsub.f32 %v10469_v24, %v10677_v20  ;;  %v3639_v51 = vmul.f32 1.442695, %v3590_v30  ;;  %v3593_v3 = vsub.f32 %v10473_v16, %v10677_v20  ;;  %v5068_v24 = vld [vmem:[%s12821_s9 + $0x120] sm:$0xff]  ;;  %v5071_v16 = vld [vmem:[%s12821_s9 + $0x138] sm:$0xff] }
 0x241   :  { %6335 = vpow2.f32 %v3627_v63  ;;  %v2963_v34 = vrot.slane %v2962_v54, 4  ;;  %v3641_v56 = vmul.f32 1.442695, %v3591_v62  ;;  %v3594_v10 = vsub.f32 %v10477_v57, %v10677_v20  ;;  %v5073_v57 = vld [vmem:[%s12821_s9 + $0x148] sm:$0xff] }
 0x242   :  { %6337 = vpow2.f32 %v3629_v43  ;;  %5297 = vperm.xlu1 %6002, %v5069_v50  }
 0x243   :  { %6339 = vpow2.f32 %v3631_v36  ;;  %5292 = vperm.xlu0 %6001, %v5068_v24   ;;  %v2964_v14 = vadd.f32 %v2963_v34, %v2962_v54  ;;  %v3595_v54 = vsub.f32 %v10481_v23, %v10677_v20  ;;  %v5072_v23 = vld [vmem:[%s12821_s9 + $0x140] sm:$0xff]  ;;  %v3596_v24 = vsub.f32 %v10485_v2, %v10677_v20  ;;  %v5075_v2 = vld [vmem:[%s12821_s9 + $0x158] sm:$0xff] }
 0x244   :  { %6341 = vpow2.f32 %v3633_v55  ;;  %v3643_v55 = vmul.f32 1.442695, %v3592_v39  ;;  %v6579_v39 = vld [vmem:[%s12814_s2 + $0x8] sm:$0xff] }
 0x245   :  { %6343 = vpow2.f32 %v3635_v37  ;;  %v2965_v37 = vrot.slane %v2964_v14, 2 }
 0x246   :  { %6345 = vpow2.f32 %v3637_v46  ;;  %5307 = vperm.xlu1 %6002, %v5071_v16   ;;  %v3645_v46 = vmul.f32 1.442695, %v3593_v3 }
 0x247   :  { %v10745_v44 = vpop.eup %6327  ;;  %6347 = vpow2.f32 %v3639_v51  ;;  %5302 = vperm.xlu0 %6001, %v5070_v6   ;;  %v13855_v51 = vld [vmem:[#allocation58_spill] sm:$0xff]  ;;  %v2966_v34 = vadd.f32 %v2965_v37, %v2964_v14  ;;  %v3597_v14 = vsub.f32 %v10489_v4, %v10677_v20  ;;  %v3649_v6 = vmul.f32 1.442695, %v3595_v54 }
 0x248   :  { %13848 = vst [vmem:[#allocation69_spill] sm:$0xff] %v10745_v44  ;;  %v10747_v0 = vpop.eup %6329  ;;  %v3697_v15 = vsel %vm489_vm0, %v10745_v44, 0.0  ;;  %6349 = vpow2.f32 %v3641_v56  ;;  %v10796_v50 = vmul.f32 %v6579_v39, %v13855_v51  ;;  %v3647_v56 = vmul.f32 1.442695, %v3594_v10  ;;  %v6580_v10 = vld [vmem:[%s12814_s2] sm:$0xff]  ;;  %v5074_v4 = vld [vmem:[%s12821_s9 + $0x150] sm:$0xff] }
 0x249   :  { %13849 = vst [vmem:[#allocation35_spill] sm:$0xff] %v10747_v0  ;;  %v10756_v36 = vpop.eup %6331  ;;  %v3698_v29 = vsel %vm489_vm0, %v10747_v0, 0.0  ;;  %6351 = vpow2.f32 %v3643_v55  ;;  %v2967_v16 = vrot.slane %v2966_v34, 1  ;;  %v10820_v55 = vmul.f32 %v6580_v10, %v13855_v51 }
 0x24a   :  { %13850 = vst [vmem:[#allocation64_spill] sm:$0xff] %v10756_v36  ;;  %v10765_v21 = vpop.eup %6333  ;;  %v3699_v8 = vadd.f32 %v3698_v29, %v3697_v15  ;;  %v3700_v63 = vsel %vm489_vm0, %v10756_v36, 0.0  ;;  %5317 = vperm.xlu1 %6002, %v5073_v57   ;;  %6353 = vpow2.f32 %v3645_v46  ;;  %v10829_v54 = vmul.f32 %v10796_v50, %v10236_v22 }
 0x24b   :  { %13851 = vst [vmem:[#allocation66_spill] sm:$0xff] %v10765_v21  ;;  %v10772_v43 = vpop.eup %6335  ;;  %v3702_v26 = vsel %vm489_vm0, %v10765_v21, 0.0  ;;  %5312 = vperm.xlu0 %6001, %v5072_v23   ;;  %13858 = vst [vmem:[#allocation42_spill] sm:$0xff] %v10820_v55  ;;  %v2968_v37 = vadd.f32 %v2967_v16, %v2966_v34  ;;  %6355 = vpow2.f32 %v3647_v56  ;;  %v3651_v57 = vmul.f32 1.442695, %v3596_v24 }
 0x24c   :  { %13852 = vst [vmem:[#allocation51_spill] sm:$0xff] %v10772_v43  ;;  %v10779_v32 = vpop.eup %6337  ;;  %v3701_v47 = vadd.f32 %v3700_v63, %v3699_v8  ;;  %v3704_v30 = vsel %vm489_vm0, %v10772_v43, 0.0  ;;  %v10840_v34 = vmul.f32 %v10796_v50, %v10240_v60  ;;  %v10844_v23 = vmul.f32 %v10796_v50, %v10246_v38 }
 0x24d   :  { %13853 = vst [vmem:[#allocation77_spill] sm:$0xff] %v10779_v32  ;;  %v10785_v62 = vpop.eup %6339  ;;  %v3706_v29 = vsel %vm489_vm0, %v10779_v32, 0.0  ;;  %6357 = vpow2.f32 %v3649_v6  ;;  %v3653_v24 = vmul.f32 1.442695, %v3597_v14  ;;  %v10866_v14 = vmul.f32 %v10796_v50, %v10256_v5 }
 0x24e   :  { %13854 = vst [vmem:[#allocation40_spill] sm:$0xff] %v10785_v62  ;;  %v3703_v15 = vadd.f32 %v3702_v26, %v3701_v47  ;;  %v10803_v3 = vpop.eup %6341  ;;  %v3708_v63 = vsel %vm489_vm0, %v10785_v62, 0.0  ;;  %5327 = vperm.xlu1 %6002, %v5075_v2   ;;  %13860 = vst [vmem:[#allocation31_spill] sm:$0xff] %v10840_v34  ;;  %v3600_v2 = vsub.f32 %v10501_v17, %v10677_v20  ;;  %6359 = vpow2.f32 %v3651_v57  ;;  %v13881_v62 = vld [vmem:[#allocation15_spill] sm:$0xff] }
 0x24f   :  { %13856 = vst [vmem:[#allocation25_spill] sm:$0xff] %v10803_v3  ;;  %v10809_v26 = vpop.eup %6343  ;;  %13861 = vst [vmem:[#allocation22_spill] sm:$0xff] %v10844_v23  ;;  %5322 = vperm.xlu0 %6001, %v5074_v4   ;;  %v13867_v4 = vld [vmem:[#allocation39_spill] sm:$0xff]  ;;  %6361 = vpow2.f32 %v3653_v24  ;;  %v10900_v19 = vmul.f32 %v10796_v50, %v13872_v13  ;;  %v13876_v24 = vld [vmem:[#allocation26_spill] sm:$0xff]  ;;  %v10924_v21 = vmul.f32 %v10796_v50, %v13881_v62 }
 0x250   :  { %v3705_v8 = vadd.f32 %v3704_v30, %v3703_v15  ;;  %13857 = vst [vmem:[#allocation79_spill] sm:$0xff] %v10809_v26  ;;  %v3710_v30 = vsel %vm489_vm0, %v10803_v3, 0.0  ;;  %v10831_v46 = vpop.eup %6345  ;;  %v3598_v15 = vsub.f32 %v10493_v41, %v10677_v20  ;;  %v3712_v51 = vsel %vm489_vm0, %v10809_v26, 0.0  ;;  %13864 = vst [vmem:[#allocation41_spill] sm:$0xff] %v10866_v14  ;;  %v13879_v26 = vld [vmem:[#allocation45_spill] sm:$0xff] }
 0x251   :  { %13859 = vst [vmem:[#allocation50_spill] sm:$0xff] %v10831_v46  ;;  %v3599_v41 = vsub.f32 %v10497_v52, %v10677_v20  ;;  %v10862_v52 = vmul.f32 %v10796_v50, %v10252_v27  ;;  %13873 = vst [vmem:[#allocation24_spill] sm:$0xff] %v10900_v19  ;;  %v10920_v32 = vmul.f32 %v10796_v50, %v13879_v26 }
 0x252   :  { %v3707_v47 = vadd.f32 %v3706_v29, %v3705_v8  ;;  %v2984_v29 = vmul.f32 %v2968_v37, %v13756_v12  ;;  %v10846_v8 = vpop.eup %6347  ;;  %v5077_v12 = vld [vmem:[%s12821_s9 + $0x168] sm:$0xff]  ;;  %v3655_v10 = vmul.f32 1.442695, %v3598_v15  ;;  %v10876_v37 = vmul.f32 %v10796_v50, %v10260_v1  ;;  %13882 = vst [vmem:[#allocation47_spill] sm:$0xff] %v10924_v21 }
 0x253   :  { %13862 = vst [vmem:[#allocation49_spill] sm:$0xff] %v10846_v8  ;;  %13863 = vst [vmem:[#allocation11_spill] sm:$0xff] %v10862_v52  ;;  %v10868_v6 = vpop.eup %6349  ;;  %5337 = vperm.xlu1 %6002, %v5077_v12   ;;  %v3601_v15 = vsub.f32 %v10505_v59, %v10677_v20  ;;  %v3657_v57 = vmul.f32 1.442695, %v3599_v41  ;;  %v13874_v59 = vld [vmem:[#allocation44_spill] sm:$0xff]  ;;  %v4603_v0 = vmax.f32 %v10840_v34, %v10862_v52 }
 0x254   :  { %v3709_v39 = vadd.f32 %v3708_v63, %v3707_v47  ;;  %v3714_v63 = vsel %vm489_vm0, %v10831_v46, 0.0  ;;  %v3014_v16 = vsel %vm1622_vm7, %v2984_v29, %v10398_v48  ;;  %v5076_v47 = vld [vmem:[%s12821_s9 + $0x160] sm:$0xff]  ;;  %13865 = vst [vmem:[#allocation61_spill] sm:$0xff] %v10868_v6  ;;  %13866 = vst [vmem:[#allocation46_spill] sm:$0xff] %v10876_v37  ;;  %v13869_v29 = vld [vmem:[#allocation53_spill] sm:$0xff]  ;;  %v10886_v17 = vpop.eup %6351  ;;  %v3718_v12 = vsel %vm489_vm0, %v10868_v6, 0.0 }
 0x255   :  { %3018 = vst [vmem:[#allocation5 + $0x28] sm:$0xff] %v3014_v16  ;;  %v10884_v18 = vmul.f32 %v10796_v50, %v13869_v29  ;;  %13871 = vst [vmem:[#allocation29_spill] sm:$0xff] %v10886_v17  ;;  %5332 = vperm.xlu0 %6001, %v5076_v47   ;;  %v5078_v16 = vld [vmem:[%s12821_s9 + $0x170] sm:$0xff]  ;;  %v10904_v41 = vmul.f32 %v10796_v50, %v13874_v59  ;;  %v10910_v47 = vpop.eup %6353  ;;  %6363 = vpow2.f32 %v3655_v10  ;;  %v3659_v6 = vmul.f32 1.442695, %v3600_v2 }
 0x256   :  { %v3711_v56 = vadd.f32 %v3710_v30, %v3709_v39  ;;  %v3716_v30 = vsel %vm489_vm0, %v10846_v8, 0.0  ;;  %v10880_v39 = vmul.f32 %v10796_v50, %v13867_v4  ;;  %13878 = vst [vmem:[#allocation14_spill] sm:$0xff] %v10910_v47  ;;  %v3603_v8 = vsub.f32 %v10513_v49, %v10677_v20  ;;  %13880 = vst [vmem:[#allocation13_spill] sm:$0xff] %v10920_v32  ;;  %v10926_v43 = vpop.eup %6355  ;;  %v13884_v10 = vld [vmem:[#allocation70_spill] sm:$0xff] }
 0x257   :  { %13870 = vst [vmem:[#allocation52_spill] sm:$0xff] %v10884_v18  ;;  %13875 = vst [vmem:[#allocation18_spill] sm:$0xff] %v10904_v41  ;;  %v3720_v3 = vsel %vm489_vm0, %v10886_v17, 0.0  ;;  %6365 = vpow2.f32 %v3657_v57  ;;  %v4602_v49 = vmax.f32 %v10829_v54, %v10844_v23  ;;  %v3722_v17 = vsel %vm489_vm0, %v10910_v47, 0.0  ;;  %v10938_v36 = vpop.eup %6357  ;;  %v5081_v57 = vld [vmem:[%s12821_s9 + $0x188] sm:$0xff] }
 0x258   :  { %v3713_v48 = vadd.f32 %v3712_v51, %v3711_v56  ;;  %13868 = vst [vmem:[#allocation9_spill] sm:$0xff] %v10880_v39  ;;  %v5079_v56 = vld [vmem:[%s12821_s9 + $0x178] sm:$0xff]  ;;  %13883 = vst [vmem:[#allocation56_spill] sm:$0xff] %v10926_v43  ;;  %6367 = vpow2.f32 %v3659_v6  ;;  %v3665_v44 = vmul.f32 1.442695, %v3603_v8 }
 0x259   :  { %5347 = vperm.xlu1 %6002, %v5079_v56   ;;  %5342 = vperm.xlu0 %6001, %v5078_v16   ;;  %13886 = vst [vmem:[#allocation38_spill] sm:$0xff] %v10938_v36  ;;  %v4604_v16 = vmax.f32 %v4602_v49, %v10866_v14  ;;  %v13889_v6 = vld [vmem:[#allocation71_spill] sm:$0xff]  ;;  %v3726_v14 = vsel %vm489_vm0, %v10938_v36, 0.0  ;;  %v13910_v36 = vsub.f32 %v10549_v25, %v10677_v20 }
 0x25a   :  { %v3715_v51 = vadd.f32 %v3714_v63, %v3713_v48  ;;  %v10908_v63 = vmul.f32 %v10796_v50, %v13876_v24  ;;  %v3602_v48 = vsub.f32 %v10509_v28, %v10677_v20  ;;  %v3661_v28 = vmul.f32 1.442695, %v3601_v15  ;;  %v5083_v8 = vld [vmem:[%s12821_s9 + $0x198] sm:$0xff] }
 0x25b   :  { %v4606_v49 = vmax.f32 %v4604_v16, %v10880_v39 }
 0x25c   :  { %13877 = vst [vmem:[#allocation17_spill] sm:$0xff] %v10908_v63  ;;  %v3717_v46 = vadd.f32 %v3716_v30, %v3715_v51  ;;  %v3604_v30 = vsub.f32 %v13884_v10, %v10677_v20  ;;  %v13885_v51 = vld [vmem:[#allocation60_spill] sm:$0xff]  ;;  %v3724_v10 = vsel %vm489_vm0, %v10926_v43, 0.0  ;;  %6369 = vpow2.f32 %v3661_v28 }
 0x25d   :  { %v3605_v56 = vsub.f32 %v13885_v51, %v10677_v20  ;;  %5357 = vperm.xlu1 %6002, %v5081_v57   ;;  %v13887_v51 = vld [vmem:[#allocation34_spill] sm:$0xff] }
 0x25e   :  { %v3719_v2 = vadd.f32 %v3718_v12, %v3717_v46  ;;  %v3663_v46 = vmul.f32 1.442695, %v3602_v48  ;;  %v5080_v12 = vld [vmem:[%s12821_s9 + $0x180] sm:$0xff]  ;;  %v10951_v47 = vmul.f32 %v10796_v50, %v13887_v51  ;;  %v4605_v48 = vmax.f32 %v4603_v0, %v10876_v37 }
 0x25f   :  { %5352 = vperm.xlu0 %6001, %v5080_v12   ;;  %v3667_v43 = vmul.f32 1.442695, %v3604_v30  ;;  %v3669_v57 = vmul.f32 1.442695, %v3605_v56  ;;  %v13893_v0 = vsub.f32 %v10525_v7, %v10677_v20  ;;  %v4608_v30 = vmax.f32 %v4606_v49, %v10900_v19 }
 0x260   :  { %v3721_v15 = vadd.f32 %v3720_v3, %v3719_v2  ;;  %13888 = vst [vmem:[#allocation28_spill] sm:$0xff] %v10951_v47  ;;  %v10955_v3 = vmul.f32 %v10796_v50, %v13889_v6  ;;  %v10958_v2 = vpop.eup %6359  ;;  %v4607_v23 = vmax.f32 %v4605_v48, %v10884_v18  ;;  %6371 = vpow2.f32 %v3663_v46 }
 0x261   :  { %13891 = vst [vmem:[#allocation30_spill] sm:$0xff] %v10958_v2  ;;  %v10964_v34 = vpop.eup %6361  ;;  %v3671_v37 = vmul.f32 1.442695, %v13893_v0  ;;  %v13894_v56 = vsub.f32 %v10529_v53, %v10677_v20  ;;  %v13895_v46 = vsub.f32 %v10533_v35, %v10677_v20  ;;  %5367 = vperm.xlu1 %6002, %v5083_v8   ;;  %6373 = vpow2.f32 %v3665_v44 }
 0x262   :  { %13890 = vst [vmem:[#allocation16_spill] sm:$0xff] %v10955_v3  ;;  %v3723_v52 = vadd.f32 %v3722_v17, %v3721_v15  ;;  %13892 = vst [vmem:[#allocation54_spill] sm:$0xff] %v10964_v34  ;;  %v5082_v17 = vld [vmem:[%s12821_s9 + $0x190] sm:$0xff]  ;;  %v4609_v12 = vmax.f32 %v4607_v23, %v10904_v41  ;;  %v10985_v16 = vpop.eup %6363  ;;  %v4610_v53 = vmax.f32 %v4608_v30, %v10908_v63  ;;  %v3730_v8 = vsel %vm489_vm0, %v10964_v34, 0.0  ;;  %v13899_v23 = vld [vmem:[#allocation36_spill] sm:$0xff] }
 0x263   :  { %v3673_v15 = vmul.f32 1.442695, %v13894_v56  ;;  %v3675_v7 = vmul.f32 1.442695, %v13895_v46  ;;  %13896 = vst [vmem:[#allocation63_spill] sm:$0xff] %v10985_v16  ;;  %5362 = vperm.xlu0 %6001, %v5082_v17   ;;  %v13898_v35 = vsub.f32 %v10541_v61, %v10677_v20  ;;  %v11000_v56 = vmul.f32 %v10796_v50, %v13899_v23  ;;  %v13929_v63 = vld [vmem:[#allocation73_spill] sm:$0xff] }
 0x264   :  { %v3725_v28 = vadd.f32 %v3724_v10, %v3723_v52  ;;  %v3728_v52 = vsel %vm489_vm0, %v10958_v2, 0.0  ;;  %v13897_v10 = vsub.f32 %v10537_v9, %v10677_v20  ;;  %v4611_v44 = vmax.f32 %v4609_v12, %v10920_v32  ;;  %v11003_v9 = vpop.eup %6365  ;;  %v5085_v12 = vld [vmem:[%s12821_s9 + $0x1a8] sm:$0xff] }
 0x265   :  { %v10994_v0 = vmul.f32 1.442695, %v13898_v35  ;;  %13900 = vst [vmem:[#allocation20_spill] sm:$0xff] %v11000_v56  ;;  %13901 = vst [vmem:[#allocation68_spill] sm:$0xff] %v11003_v9  ;;  %6375 = vpow2.f32 %v3667_v43  ;;  %v4612_v61 = vmax.f32 %v4610_v53, %v10924_v21  ;;  %v13904_v30 = vsub.f32 %v10545_v11, %v10677_v20  ;;  %v5084_v43 = vld [vmem:[%s12821_s9 + $0x1a0] sm:$0xff]  ;;  %v11028_v11 = vpop.eup %6367  ;;  %5377 = vperm.xlu1 %6002, %v5085_v12  }
 0x266   :  { %v3677_v48 = vmul.f32 1.442695, %v13897_v10  ;;  %v3727_v49 = vadd.f32 %v3726_v14, %v3725_v28  ;;  %v13902_v28 = vld [vmem:[#allocation65_spill] sm:$0xff]  ;;  %v3732_v10 = vsel %vm489_vm0, %v10985_v16, 0.0  ;;  %v4613_v53 = vmax.f32 %v4611_v44, %v10951_v47  ;;  %13907 = vst [vmem:[#allocation39_spill] sm:$0xff] %v11028_v11  ;;  %v13911_v47 = vld [vmem:[#allocation74_spill] sm:$0xff] }
 0x267   :  { %v11007_v17 = vmul.f32 %v10796_v50, %v13902_v28  ;;  %v11013_v46 = vmul.f32 1.442695, %v13904_v30  ;;  %6377 = vpow2.f32 %v3669_v57  ;;  %5372 = vperm.xlu0 %6001, %v5084_v43   ;;  %v13908_v30 = vld [vmem:[#allocation62_spill] sm:$0xff]  ;;  %v4614_v16 = vmax.f32 %v4612_v61, %v10955_v3  ;;  %v13914_v43 = vld [vmem:[#allocation76_spill] sm:$0xff] }
 0x268   :  { %v3729_v14 = vadd.f32 %v3728_v52, %v3727_v49  ;;  %v13905_v52 = vld [vmem:[#allocation72_spill] sm:$0xff]  ;;  %v11032_v34 = vmul.f32 %v10796_v50, %v13908_v30  ;;  %v11038_v2 = vmul.f32 1.442695, %v13910_v36  ;;  %v3734_v44 = vsel %vm489_vm0, %v11003_v9, 0.0 }
 0x269   :  { %13903 = vst [vmem:[#allocation78_spill] sm:$0xff] %v11007_v17  ;;  %v11025_v49 = vmul.f32 %v10796_v50, %v13905_v52  ;;  %v11044_v57 = vmul.f32 %v10796_v50, %v13911_v47  ;;  %6379 = vpow2.f32 %v3671_v37  ;;  %v11051_v61 = vmul.f32 %v10796_v50, %v13914_v43  ;;  %v5086_v37 = vld [vmem:[%s12821_s9 + $0x1b0] sm:$0xff] }
 0x26a   :  { %v3731_v35 = vadd.f32 %v3730_v8, %v3729_v14  ;;  %13909 = vst [vmem:[#allocation53_spill] sm:$0xff] %v11032_v34  ;;  %v4615_v8 = vmax.f32 %v4613_v53, %v11000_v56  ;;  %v11047_v14 = vpop.eup %6369  ;;  %v4616_v25 = vmax.f32 %v4614_v16, %v11007_v17  ;;  %v13916_v36 = vsub.f32 %v10553_v42, %v10677_v20  ;;  %v5087_v53 = vld [vmem:[%s12821_s9 + $0x1b8] sm:$0xff] }
 0x26b   :  { %13906 = vst [vmem:[#allocation58_spill] sm:$0xff] %v11025_v49  ;;  %13912 = vst [vmem:[#allocation23_spill] sm:$0xff] %v11044_v57  ;;  %v3736_v3 = vsel %vm489_vm0, %v11028_v11, 0.0  ;;  %v11072_v42 = vpop.eup %6371  ;;  %6381 = vpow2.f32 %v3673_v15  ;;  %5387 = vperm.xlu1 %6002, %v5087_v53   ;;  %5382 = vperm.xlu0 %6001, %v5086_v37   ;;  %v13920_v11 = vld [vmem:[#allocation57_spill] sm:$0xff]  ;;  %v13922_v21 = vsub.f32 %v10557_v40, %v10677_v20  ;;  %v13926_v37 = vld [vmem:[#allocation80_spill] sm:$0xff] }
 0x26c   :  { %13913 = vst [vmem:[#allocation44_spill] sm:$0xff] %v11047_v14  ;;  %v3733_v12 = vadd.f32 %v3732_v10, %v3731_v35  ;;  %13915 = vst [vmem:[#allocation26_spill] sm:$0xff] %v11051_v61  ;;  %v11057_v9 = vmul.f32 1.442695, %v13916_v36  ;;  %v13917_v10 = vld [vmem:[#allocation32_spill] sm:$0xff]  ;;  %v4617_v16 = vmax.f32 %v4615_v8, %v11025_v49  ;;  %v11076_v17 = vmul.f32 %v10796_v50, %v13920_v11 }
 0x26d   :  { %v11069_v35 = vmul.f32 %v10796_v50, %v13917_v10  ;;  %13919 = vst [vmem:[#allocation15_spill] sm:$0xff] %v11072_v42  ;;  %v4618_v56 = vmax.f32 %v4616_v25, %v11032_v34  ;;  %v11082_v32 = vmul.f32 1.442695, %v13922_v21  ;;  %v3738_v8 = vsel %vm489_vm0, %v11047_v14, 0.0  ;;  %v13923_v49 = vld [vmem:[#allocation8_spill] sm:$0xff] }
 0x26e   :  { %v3735_v36 = vadd.f32 %v3734_v44, %v3733_v12  ;;  %13921 = vst [vmem:[#allocation70_spill] sm:$0xff] %v11076_v17  ;;  %v11088_v15 = vmul.f32 %v10796_v50, %v13923_v49  ;;  %v4619_v44 = vmax.f32 %v4617_v16, %v11044_v57  ;;  %v11091_v12 = vpop.eup %6373  ;;  %6383 = vpow2.f32 %v3675_v7  ;;  %v13932_v57 = vld [vmem:[#allocation12_spill] sm:$0xff] }
 0x26f   :  { %13918 = vst [vmem:[#allocation45_spill] sm:$0xff] %v11069_v35  ;;  %13925 = vst [vmem:[#allocation34_spill] sm:$0xff] %v11091_v12  ;;  %v11095_v25 = vmul.f32 %v10796_v50, %v13926_v37  ;;  %v4620_v40 = vmax.f32 %v4618_v56, %v11051_v61  ;;  %v13928_v21 = vsub.f32 %v10561_v58, %v10677_v20  ;;  %v3740_v14 = vsel %vm489_vm0, %v11072_v42, 0.0  ;;  %v11110_v7 = vpop.eup %6375 }
 0x270   :  { %13924 = vst [vmem:[#allocation60_spill] sm:$0xff] %v11088_v15  ;;  %v3737_v53 = vadd.f32 %v3736_v3, %v3735_v36  ;;  %v11107_v16 = vmul.f32 %v10796_v50, %v13929_v63  ;;  %v4621_v3 = vmax.f32 %v4619_v44, %v11069_v35  ;;  %13931 = vst [vmem:[#allocation65_spill] sm:$0xff] %v11110_v7  ;;  %6385 = vpow2.f32 %v3677_v48  ;;  %v5097_v44 = vld [vmem:[%s12821_s9 + $0x208] sm:$0xff]  ;;  %v5096_v48 = vld [vmem:[%s12821_s9 + $0x200] sm:$0xff] }
 0x271   :  { %13927 = vst [vmem:[#allocation71_spill] sm:$0xff] %v11095_v25  ;;  %v11101_v34 = vmul.f32 1.442695, %v13928_v21  ;;  %v11114_v56 = vmul.f32 %v10796_v50, %v13932_v57  ;;  %v4622_v58 = vmax.f32 %v4620_v40, %v11076_v17  ;;  %v13934_v21 = vsub.f32 %v10565_v31, %v10677_v20  ;;  %v11135_v31 = vpop.eup %6377  ;;  %5437 = vperm.xlu1 %6002, %v5097_v44   ;;  %v13938_v17 = vld [vmem:[#allocation75_spill] sm:$0xff] }
 0x272   :  { %13930 = vst [vmem:[#allocation36_spill] sm:$0xff] %v11107_v16  ;;  %v3739_v36 = vadd.f32 %v3738_v8, %v3737_v53  ;;  %v3742_v42 = vsel %vm489_vm0, %v11091_v12, 0.0  ;;  %v13935_v8 = vld [vmem:[#allocation59_spill] sm:$0xff]  ;;  %v4623_v40 = vmax.f32 %v4621_v3, %v11088_v15  ;;  %13937 = vst [vmem:[#allocation74_spill] sm:$0xff] %v11135_v31  ;;  %6387 = vpow2.f32 %v10994_v0  ;;  %5432 = vperm.xlu0 %6001, %v5096_v48  }
 0x273   :  { %13933 = vst [vmem:[#allocation72_spill] sm:$0xff] %v11114_v56  ;;  %v11120_v61 = vmul.f32 1.442695, %v13934_v21  ;;  %v11132_v53 = vmul.f32 %v10796_v50, %v13935_v8  ;;  %v11140_v35 = vmul.f32 %v10796_v50, %v13938_v17  ;;  %v4624_v12 = vmax.f32 %v4622_v58, %v11095_v25  ;;  %v13941_v15 = vld [vmem:[#allocation27_spill] sm:$0xff] }
 0x274   :  { %v3741_v21 = vadd.f32 %v3740_v14, %v3739_v36  ;;  %v13940_v41 = vsub.f32 %v10569_v45, %v10677_v20  ;;  %v3744_v3 = vsel %vm489_vm0, %v11110_v7, 0.0  ;;  %v11152_v0 = vmul.f32 %v10796_v50, %v13941_v15  ;;  %v11155_v36 = vpop.eup %6379  ;;  %v13943_v58 = vld [vmem:[#allocation43_spill] sm:$0xff] }
 0x275   :  { %13936 = vst [vmem:[#allocation62_spill] sm:$0xff] %v11132_v53  ;;  %13939 = vst [vmem:[#allocation76_spill] sm:$0xff] %v11140_v35  ;;  %v4625_v14 = vmax.f32 %v4623_v40, %v11107_v16  ;;  %6389 = vpow2.f32 %v11013_v46  ;;  %v11160_v48 = vmul.f32 %v10796_v50, %v13943_v58  ;;  %v4626_v45 = vmax.f32 %v4624_v12, %v11114_v56  ;;  %v5099_v40 = vld [vmem:[%s12821_s9 + $0x218] sm:$0xff]  ;;  %v5098_v46 = vld [vmem:[%s12821_s9 + $0x210] sm:$0xff]  ;;  %v11182_v7 = vpop.eup %6381 }
 0x276   :  { %v11146_v19 = vmul.f32 1.442695, %v13940_v41  ;;  %13942 = vst [vmem:[#allocation32_spill] sm:$0xff] %v11152_v0  ;;  %v3743_v44 = vadd.f32 %v3742_v42, %v3741_v21  ;;  %v11163_v41 = vpop.permute.xlu1 %3856  ;;  %v3746_v25 = vsel %vm489_vm0, %v11135_v31, 0.0  ;;  %v13946_v42 = vld [vmem:[#allocation37_spill] sm:$0xff]  ;;  %v13948_v16 = vld [vmem:[#allocation67_spill] sm:$0xff]  ;;  %6391 = vpow2.f32 %v11038_v2  ;;  %5447 = vperm.xlu1 %6002, %v5099_v40   ;;  %5442 = vperm.xlu0 %6001, %v5098_v46  }
 0x277   :  { %13944 = vst [vmem:[#allocation57_spill] sm:$0xff] %v11160_v48  ;;  %13945 = vst [vmem:[#allocation8_spill] sm:$0xff] %v11163_v41  ;;  %v11175_v21 = vmul.f32 %v10796_v50, %v13946_v42  ;;  %v11179_v12 = vmul.f32 %v10796_v50, %v13948_v16  ;;  %v4627_v56 = vmax.f32 %v4625_v14, %v11132_v53  ;;  %v13951_v41 = vld [vmem:[#allocation48_spill] sm:$0xff]  ;;  %6393 = vpow2.f32 %v11057_v9  ;;  %v13953_v42 = vld [vmem:[#allocation10_spill] sm:$0xff] }
 0x278   :  { %13950 = vst [vmem:[#allocation12_spill] sm:$0xff] %v11182_v7  ;;  %v3745_v31 = vadd.f32 %v3744_v3, %v3743_v44  ;;  %v11187_v18 = vmul.f32 %v10796_v50, %v13951_v41  ;;  %v4628_v39 = vmax.f32 %v4626_v45, %v11140_v35  ;;  %v3748_v16 = vsel %vm489_vm0, %v11155_v36, 0.0  ;;  %v11198_v3 = vpop.eup %6383 }
 0x279   :  { %13947 = vst [vmem:[#allocation80_spill] sm:$0xff] %v11175_v21  ;;  %13949 = vst [vmem:[#allocation73_spill] sm:$0xff] %v11179_v12  ;;  %v11195_v14 = vmul.f32 %v10796_v50, %v13953_v42  ;;  %v4629_v2 = vmax.f32 %v4627_v56, %v11152_v0  ;;  %v11203_v46 = vmul.f32 %v10820_v55, %v10236_v22  ;;  %v3750_v45 = vsel %vm489_vm0, %v11182_v7, 0.0 }
 0x27a   :  { %13952 = vst [vmem:[#allocation59_spill] sm:$0xff] %v11187_v18  ;;  %v3747_v44 = vadd.f32 %v3746_v25, %v3745_v31  ;;  %v4630_v40 = vmax.f32 %v4628_v39, %v11160_v48  ;;  %v11207_v9 = vmul.f32 %v10820_v55, %v10246_v38  ;;  %v11214_v56 = vmul.f32 %v10820_v55, %v10240_v60  ;;  %v11220_v25 = vpop.eup %6385  ;;  %v13960_v38 = vld [vmem:[#allocation19_spill] sm:$0xff] }
 0x27b   :  { %13954 = vst [vmem:[#allocation75_spill] sm:$0xff] %v11195_v14  ;;  %13955 = vst [vmem:[#allocation27_spill] sm:$0xff] %v11203_v46  ;;  %v4631_v35 = vmax.f32 %v4629_v2, %v11175_v21  ;;  %v11218_v39 = vmul.f32 %v10820_v55, %v10252_v27  ;;  %6395 = vpow2.f32 %v11082_v32  ;;  %v11225_v31 = vmul.f32 %v10796_v50, %v13960_v38  ;;  %v11231_v2 = vpop.permute.xlu1 %3866  ;;  %v11233_v27 = vpop.permute.xlu0 %3861  ;;  %v13962_v21 = vld [vmem:[#allocation55_spill] sm:$0xff] }
 0x27c   :  { %13956 = vst [vmem:[#allocation43_spill] sm:$0xff] %v11207_v9  ;;  %13957 = vst [vmem:[#allocation48_spill] sm:$0xff] %v11214_v56  ;;  %v3749_v22 = vadd.f32 %v3748_v16, %v3747_v44  ;;  %v4632_v48 = vmax.f32 %v4630_v40, %v11179_v12  ;;  %6397 = vpow2.f32 %v11101_v34  ;;  %v3752_v60 = vsel %vm489_vm0, %v11198_v3, 0.0  ;;  %v11240_v16 = vpop.eup %6387  ;;  %v5101_v34 = vld [vmem:[%s12821_s9 + $0x228] sm:$0xff]  ;;  %v5100_v40 = vld [vmem:[%s12821_s9 + $0x220] sm:$0xff] }
 0x27d   :  { %13958 = vst [vmem:[#allocation10_spill] sm:$0xff] %v11218_v39  ;;  %13959 = vst [vmem:[#allocation81_spill] sm:$0xff] %v11220_v25  ;;  %v11237_v0 = vmul.f32 %v10796_v50, %v13962_v21  ;;  %v4633_v32 = vmax.f32 %v4631_v35, %v11187_v18  ;;  %v11251_v53 = vmul.f32 %v10820_v55, %v10256_v5  ;;  %v3754_v21 = vsel %vm489_vm0, %v11220_v25, 0.0 }
 0x27e   :  { %13961 = vst [vmem:[#allocation19_spill] sm:$0xff] %v11225_v31  ;;  %v3751_v44 = vadd.f32 %v3750_v45, %v3749_v22  ;;  %v4634_v12 = vmax.f32 %v4632_v48, %v11195_v14  ;;  %v4564_v35 = vmax.f32 %v11203_v46, %v11207_v9  ;;  %v13965_v45 = vsub.f32 %v10573_v33, %v10677_v20  ;;  %v13968_v46 = vld [vmem:[#allocation33_spill] sm:$0xff] }
 0x27f   :  { %13963 = vst [vmem:[#allocation82_spill] sm:$0xff] %v11237_v0  ;;  %13964 = vst [vmem:[#allocation83_spill] sm:$0xff] %v11251_v53  ;;  %5457 = vperm.xlu1 %6002, %v5101_v34   ;;  %5452 = vperm.xlu0 %6001, %v5100_v40   ;;  %v11262_v7 = vmul.f32 %v10820_v55, %v10260_v1  ;;  %v4565_v5 = vmax.f32 %v11214_v56, %v11218_v39  ;;  %v11266_v48 = vpop.eup %6389  ;;  %6399 = vpow2.f32 %v11120_v61  ;;  %v13970_v20 = vld [vmem:[#allocation21_spill] sm:$0xff] }
 0x280   :  { %v3695_v22 = vmul.f32 1.442695, %v13965_v45  ;;  %13967 = vst [vmem:[#allocation85_spill] sm:$0xff] %v11266_v48  ;;  %v3753_v9 = vadd.f32 %v3752_v60, %v3751_v44  ;;  %v11271_v33 = vmul.f32 %v10796_v50, %v13968_v46  ;;  %v11275_v34 = vmul.f32 %v10796_v50, %v13970_v20  ;;  %v11282_v39 = vpop.eup %6391  ;;  %v5089_v60 = vld [vmem:[%s12821_s9 + $0x1c8] sm:$0xff]  ;;  %v5088_v50 = vld [vmem:[%s12821_s9 + $0x1c0] sm:$0xff] }
 0x281   :  { %13966 = vst [vmem:[#allocation84_spill] sm:$0xff] %v11262_v7  ;;  %6401 = vpow2.f32 %v11146_v19  ;;  %v3756_v1 = vsel %vm489_vm0, %v11240_v16, 0.0  ;;  %v4635_v40 = vmax.f32 %v4633_v32, %v11225_v31  ;;  %v4636_v45 = vmax.f32 %v4634_v12, %v11237_v0  ;;  %v11295_v32 = vpop.eup %6393  ;;  %v11299_v12 = vpop.permute.xlu1 %3876 }
 0x282   :  { %13969 = vst [vmem:[#allocation86_spill] sm:$0xff] %v11271_v33  ;;  %13971 = vst [vmem:[#allocation87_spill] sm:$0xff] %v11275_v34  ;;  %v3755_v61 = vadd.f32 %v3754_v21, %v3753_v9  ;;  %v11292_v19 = vmul.f32 %v10820_v55, %v13867_v4  ;;  %v4566_v44 = vmax.f32 %v4564_v35, %v11251_v53  ;;  %v3758_v21 = vsel %vm489_vm0, %v11266_v48, 0.0  ;;  %v11301_v9 = vpop.permute.xlu0 %3871 }
 0x283   :  { %5397 = vperm.xlu1 %6002, %v5089_v60   ;;  %5392 = vperm.xlu0 %6001, %v5088_v50   ;;  %v11305_v56 = vmul.f32 %v10820_v55, %v13869_v29  ;;  %v4567_v4 = vmax.f32 %v4565_v5, %v11262_v7  ;;  %6403 = vpow2.f32 %v3695_v22  ;;  %v3760_v53 = vsel %vm489_vm0, %v11282_v39, 0.0 }
 0x284   :  { %13972 = vst [vmem:[#allocation88_spill] sm:$0xff] %v11292_v19  ;;  %v3757_v35 = vadd.f32 %v3756_v1, %v3755_v61  ;;  %v4637_v20 = vmax.f32 %v4635_v40, %v11271_v33  ;;  %v4638_v46 = vmax.f32 %v4636_v45, %v11275_v34  ;;  %v11316_v60 = vmul.f32 %v10820_v55, %v13872_v13  ;;  %v14011_v33 = vld [vmem:[#allocation13_spill] sm:$0xff] }
 0x285   :  { %13973 = vst [vmem:[#allocation89_spill] sm:$0xff] %v11305_v56  ;;  %v11312_v48 = vpop.eup %6395  ;;  %v4568_v29 = vmax.f32 %v4566_v44, %v11292_v19  ;;  %v3762_v22 = vsel %vm489_vm0, %v11295_v32, 0.0  ;;  %v11325_v5 = vmul.f32 %v10820_v55, %v13874_v59  ;;  %v4569_v1 = vmax.f32 %v4567_v4, %v11305_v56  ;;  %v3887_v0 = vpop.permute.xlu1 %3886 }
 0x286   :  { %v3759_v25 = vadd.f32 %v3758_v21, %v3757_v35  ;;  %13974 = vst [vmem:[#allocation90_spill] sm:$0xff] %v11316_v60  ;;  %v11319_v50 = vpop.eup %6397  ;;  %v3764_v45 = vsel %vm489_vm0, %v11312_v48, 0.0  ;;  %v11330_v61 = vmax.f32 %v4638_v46, %v4637_v20  ;;  %v11336_v21 = vmul.f32 %v10820_v55, %v13876_v24  ;;  %v3882_v18 = vpop.permute.xlu0 %3881 }
 0x287   :  { %13975 = vst [vmem:[#allocation91_spill] sm:$0xff] %v11325_v5  ;;  %v4570_v35 = vmax.f32 %v4568_v29, %v11316_v60  ;;  %v3766_v59 = vsel %vm489_vm0, %v11319_v50, 0.0  ;;  %v11347_v46 = vmul.f32 %v10820_v55, %v13879_v26  ;;  %v11352_v24 = vmul.f32 %v10820_v55, %v13881_v62 }
 0x288   :  { %v3761_v40 = vadd.f32 %v3760_v53, %v3759_v25  ;;  %13976 = vst [vmem:[#allocation92_spill] sm:$0xff] %v11330_v61  ;;  %13977 = vst [vmem:[#allocation93_spill] sm:$0xff] %v11336_v21  ;;  %v11343_v53 = vstv %s5994_s5  ;;  %v4571_v25 = vmax.f32 %v4569_v1, %v11325_v5  ;;  %v11356_v4 = vmul.f32 %v10820_v55, %v13887_v51  ;;  %v13983_v1 = vld [vmem:[#allocation31_spill] sm:$0xff] }
 0x289   :  { %v11332_v13 = vpop.eup %6399  ;;  %13978 = vst [vmem:[#allocation94_spill] sm:$0xff] %v11343_v53  ;;  %13979 = vst [vmem:[#allocation95_spill] sm:$0xff] %v11347_v46  ;;  %v11360_v29 = vmul.f32 %v10820_v55, %v13889_v6  ;;  %v4641_v26 = vsub.f32 %v10829_v54, %v11330_v61  ;;  %v11370_v62 = vmul.f32 %v10820_v55, %v13899_v23  ;;  %v3897_v56 = vpop.permute.xlu1 %3896 }
 0x28a   :  { %v3763_v44 = vadd.f32 %v3762_v22, %v3761_v40  ;;  %13980 = vst [vmem:[#allocation96_spill] sm:$0xff] %v11352_v24  ;;  %13981 = vst [vmem:[#allocation97_spill] sm:$0xff] %v11356_v4  ;;  %v3768_v22 = vsel %vm489_vm0, %v11332_v13, 0.0  ;;  %v4643_v40 = vsub.f32 %v13983_v1, %v11330_v61  ;;  %v4572_v5 = vmax.f32 %v4570_v35, %v11336_v21 }
 0x28b   :  { %v11339_v19 = vpop.eup %6401  ;;  %13982 = vst [vmem:[#allocation98_spill] sm:$0xff] %v11360_v29  ;;  %13984 = vst [vmem:[#allocation31_spill] sm:$0xff] %v11370_v62  ;;  %v11387_v23 = vmul.f32 %v10820_v55, %v13905_v52  ;;  %v4720_v52 = vmul.f32 1.442695, %v4641_v26  ;;  %v11411_v35 = vmul.f32 %v10820_v55, %v13914_v43  ;;  %v11415_v1 = vmul.f32 %v10820_v55, %v13917_v10 }
 0x28c   :  { %v3765_v20 = vadd.f32 %v3764_v45, %v3763_v44  ;;  %v3770_v6 = vsel %vm489_vm0, %v11339_v19, 0.0  ;;  %v11378_v44 = vmul.f32 %v10820_v55, %v13902_v28  ;;  %v4724_v14 = vmul.f32 1.442695, %v4643_v40 }
 0x28d   :  { %v11372_v45 = vpop.eup %6403  ;;  %13986 = vst [vmem:[#allocation100_spill] sm:$0xff] %v11387_v23  ;;  %v11419_v26 = vmul.f32 %v10820_v55, %v13920_v11  ;;  %6405 = vpow2.f32 %v4720_v52  ;;  %v11428_v43 = vmul.f32 %v10820_v55, %v13926_v37  ;;  %v11434_v11 = vmul.f32 %v10820_v55, %v13929_v63  ;;  %v13997_v52 = vld [vmem:[#allocation46_spill] sm:$0xff] }
 0x28e   :  { %v3767_v51 = vadd.f32 %v3766_v59, %v3765_v20  ;;  %13985 = vst [vmem:[#allocation99_spill] sm:$0xff] %v11378_v44  ;;  %v4573_v59 = vmax.f32 %v4571_v25, %v11347_v46  ;;  %v3772_v54 = vsel %vm489_vm0, %v11372_v45, 0.0  ;;  %v11402_v25 = vmul.f32 %v10820_v55, %v13908_v30 }
 0x28f   :  { %13988 = vst [vmem:[#allocation102_spill] sm:$0xff] %v11428_v43  ;;  %6407 = vpow2.f32 %v4724_v14  ;;  %v11444_v37 = vmul.f32 %v10820_v55, %v13935_v8  ;;  %v13994_v14 = vld [vmem:[#allocation41_spill] sm:$0xff]  ;;  %v11451_v63 = vmul.f32 %v10820_v55, %v13938_v17  ;;  %v11462_v8 = vmul.f32 %v10820_v55, %v13943_v58 }
 0x290   :  { %v3769_v20 = vadd.f32 %v3768_v22, %v3767_v51  ;;  %v11406_v22 = vmul.f32 %v10820_v55, %v13911_v47  ;;  %v4574_v51 = vmax.f32 %v4572_v5, %v11352_v24  ;;  %v4575_v30 = vmax.f32 %v4573_v59, %v11356_v4  ;;  %v13989_v5 = vld [vmem:[#allocation22_spill] sm:$0xff]  ;;  %v14012_v4 = vld [vmem:[#allocation47_spill] sm:$0xff] }
 0x291   :  { %v11424_v47 = vmul.f32 %v10820_v55, %v13923_v49  ;;  %v4645_v10 = vsub.f32 %v13989_v5, %v11330_v61  ;;  %13990 = vst [vmem:[#allocation22_spill] sm:$0xff] %v11434_v11  ;;  %v13992_v49 = vld [vmem:[#allocation11_spill] sm:$0xff]  ;;  %v4649_v59 = vsub.f32 %v13994_v14, %v11330_v61  ;;  %13995 = vst [vmem:[#allocation41_spill] sm:$0xff] %v11451_v63 }
 0x292   :  { %v3771_v21 = vadd.f32 %v3770_v6, %v3769_v20  ;;  %v4647_v6 = vsub.f32 %v13992_v49, %v11330_v61  ;;  %13993 = vst [vmem:[#allocation11_spill] sm:$0xff] %v11444_v37  ;;  %v4577_v20 = vmax.f32 %v4575_v30, %v11370_v62  ;;  %13998 = vst [vmem:[#allocation46_spill] sm:$0xff] %v11462_v8  ;;  %v14001_v49 = vld [vmem:[#allocation67_spill] sm:$0xff] }
 0x293   :  { %13987 = vst [vmem:[#allocation101_spill] sm:$0xff] %v11424_v47  ;;  %v11470_v17 = vmul.f32 %v10820_v55, %v14001_v49  ;;  %v4728_v28 = vmul.f32 1.442695, %v4645_v10  ;;  %v11476_v30 = vmul.f32 %v10820_v55, %v13951_v41  ;;  %v11480_v58 = vmul.f32 %v10820_v55, %v13953_v42  ;;  %v14008_v10 = vld [vmem:[#allocation24_spill] sm:$0xff]  ;;  %v14009_v41 = vld [vmem:[#allocation18_spill] sm:$0xff] }
 0x294   :  { %v3773_v40 = vadd.f32 %v3772_v54, %v3771_v21  ;;  %v11438_v21 = vmul.f32 %v10820_v55, %v13932_v57  ;;  %v4576_v54 = vmax.f32 %v4574_v51, %v11360_v29  ;;  %v11455_v57 = vmul.f32 %v10820_v55, %v13941_v15  ;;  %v13999_v51 = vld [vmem:[#allocation37_spill] sm:$0xff] }
 0x295   :  { %v11466_v5 = vmul.f32 %v10820_v55, %v13999_v51  ;;  %14002 = vst [vmem:[#allocation67_spill] sm:$0xff] %v11470_v17  ;;  %v14003_v15 = vld [vmem:[#allocation9_spill] sm:$0xff]  ;;  %14005 = vst [vmem:[#allocation105_spill] sm:$0xff] %v11480_v58  ;;  %v4732_v60 = vmul.f32 1.442695, %v4647_v6  ;;  %v11486_v49 = vmul.f32 %v10820_v55, %v13960_v38  ;;  %v4659_v34 = vsub.f32 %v14009_v41, %v11330_v61  ;;  %v14014_v41 = vld [vmem:[#allocation16_spill] sm:$0xff] }
 0x296   :  { %13991 = vst [vmem:[#allocation103_spill] sm:$0xff] %v11438_v21  ;;  %6409 = vrcp.f32 %v3773_v40  ;;  %13996 = vst [vmem:[#allocation104_spill] sm:$0xff] %v11455_v57  ;;  %v4651_v40 = vsub.f32 %v13997_v52, %v11330_v61  ;;  %v4653_v14 = vsub.f32 %v14003_v15, %v11330_v61  ;;  %v14006_v52 = vld [vmem:[#allocation52_spill] sm:$0xff]  ;;  %v11489_v62 = vmax.f32 %v4576_v54, %v11378_v44 }
 0x297   :  { %14000 = vst [vmem:[#allocation37_spill] sm:$0xff] %v11466_v5  ;;  %14004 = vst [vmem:[#allocation9_spill] sm:$0xff] %v11476_v30  ;;  %v4655_v51 = vsub.f32 %v14006_v52, %v11330_v61  ;;  %v4657_v15 = vsub.f32 %v14008_v10, %v11330_v61  ;;  %v4736_v29 = vmul.f32 1.442695, %v4649_v59  ;;  %v11496_v42 = vmax.f32 %v4577_v20, %v11387_v23  ;;  %v14010_v52 = vld [vmem:[#allocation17_spill] sm:$0xff]  ;;  %v14013_v10 = vld [vmem:[#allocation28_spill] sm:$0xff]  ;;  %v11508_v23 = vpop.eup %6405  ;;  %v11565_v5 = vpop.permute.xlu0 %3891 }
 0x298   :  { %14007 = vst [vmem:[#allocation52_spill] sm:$0xff] %v11486_v49  ;;  %v4661_v6 = vsub.f32 %v14010_v52, %v11330_v61  ;;  %v4663_v38 = vsub.f32 %v14011_v33, %v11330_v61  ;;  %v4665_v54 = vsub.f32 %v14012_v4, %v11330_v61  ;;  %v4740_v44 = vmul.f32 1.442695, %v4651_v40  ;;  %14015 = vst [vmem:[#allocation24_spill] sm:$0xff] %v11508_v23  ;;  %v14016_v52 = vld [vmem:[#allocation20_spill] sm:$0xff] }
 0x299   :  { %v4667_v24 = vsub.f32 %v14013_v10, %v11330_v61  ;;  %v4669_v59 = vsub.f32 %v14014_v41, %v11330_v61  ;;  %6411 = vpow2.f32 %v4728_v28  ;;  %v4744_v20 = vmul.f32 1.442695, %v4653_v14  ;;  %v11514_v40 = vpop.eup %6407 }
 0x29a   :  { %6413 = vpow2.f32 %v4732_v60  ;;  %v4748_v4 = vmul.f32 1.442695, %v4655_v51  ;;  %14018 = vst [vmem:[#allocation18_spill] sm:$0xff] %v11514_v40  ;;  %v11518_v41 = vmul.f32 1.442695, %v4657_v15 }
 0x29b   :  { %6415 = vpow2.f32 %v4736_v29  ;;  %v11520_v28 = vmul.f32 1.442695, %v4659_v34  ;;  %v11522_v7 = vmul.f32 1.442695, %v4661_v6  ;;  %v11524_v31 = vmul.f32 1.442695, %v4663_v38 }
 0x29c   :  { %6417 = vpow2.f32 %v4740_v44  ;;  %v11526_v46 = vmul.f32 1.442695, %v4665_v54  ;;  %v6581_v60 = vld [vmem:[%s12813_s1] sm:$0x7f]  ;;  %v11533_v29 = vmul.f32 1.442695, %v4667_v24  ;;  %v11539_v34 = vadd.f32 %v11514_v40, %v11508_v23 }
 0x29d   :  { %14020 = vst [vmem:[#allocation17_spill] sm:$0xff] %v11522_v7  ;;  %14021 = vst [vmem:[#allocation13_spill] sm:$0xff] %v11524_v31  ;;  %6419 = vpow2.f32 %v4744_v20  ;;  %v11535_v15 = vmul.f32 1.442695, %v4669_v59  ;;  %v14025_v38 = vld [vmem:[#allocation69_spill] sm:$0xff]  ;;  %v14026_v20 = vld [vmem:[#allocation64_spill] sm:$0xff] }
 0x29e   :  { %14022 = vst [vmem:[#allocation47_spill] sm:$0xff] %v11526_v46  ;;  %14023 = vst [vmem:[#allocation28_spill] sm:$0xff] %v11533_v29  ;;  %6421 = vpow2.f32 %v4748_v4  ;;  %v14027_v59 = vld [vmem:[#allocation35_spill] sm:$0xff]  ;;  %v14029_v40 = vld [vmem:[#allocation66_spill] sm:$0xff] }
 0x29f   :  { %14024 = vst [vmem:[#allocation16_spill] sm:$0xff] %v11535_v15  ;;  %v14028_v4 = vld [vmem:[#allocation51_spill] sm:$0xff]  ;;  %v14030_v44 = vld [vmem:[#allocation40_spill] sm:$0xff]  ;;  %v14031_v6 = vld [vmem:[#allocation77_spill] sm:$0xff]  ;;  %6423 = vpow2.f32 %v11518_v41 }
 0x2a0   :  { %v6410_v14 = vpop.eup %6409  ;;  %6425 = vpow2.f32 %v11520_v28 }
 0x2a1   :  { %v11531_v51 = vmul.f32 %v6581_v60, %v6410_v14 }
 0x2a3   :  { %v3776_v54 = vmul.f32 %v14025_v38, %v11531_v51  ;;  %v3778_v24 = vmul.f32 %v14026_v20, %v11531_v51  ;;  %v3777_v14 = vmul.f32 %v14027_v59, %v11531_v51  ;;  %v3780_v60 = vmul.f32 %v14028_v4, %v11531_v51  ;;  %v14032_v38 = vld [vmem:[#allocation79_spill] sm:$0xff]  ;;  %v14033_v20 = vld [vmem:[#allocation8_spill] sm:$0xff]  ;;  %v11568_v57 = vpop.eup %6411 }
 0x2a4   :  { %v3779_v23 = vmul.f32 %v14029_v40, %v11531_v51  ;;  %v3782_v49 = vmul.f32 %v14030_v44, %v11531_v51  ;;  %v3781_v58 = vmul.f32 %v14031_v6, %v11531_v51  ;;  %v3784_v30 = vmul.f32 %v14032_v38, %v11531_v51 }
 0x2a5   :  { %v4049_v55 = vmul.f32 %v14033_v20, %v3776_v54  ;;  %v4051_v59 = vmul.f32 %v11231_v2, %v3778_v24  ;;  %v4050_v17 = vmul.f32 %v11233_v27, %v3777_v14  ;;  %v4053_v4 = vmul.f32 %v11299_v12, %v3780_v60  ;;  %v11574_v27 = vpop.eup %6413  ;;  %v3907_v20 = vpop.permute.xlu1 %3906 }
 0x2a6   :  { %v4052_v40 = vmul.f32 %v11301_v9, %v3779_v23  ;;  %v4055_v10 = vmul.f32 %v3887_v0, %v3782_v49  ;;  %v4054_v44 = vmul.f32 %v3882_v18, %v3781_v58  ;;  %v4057_v8 = vmul.f32 %v3897_v56, %v3784_v30  ;;  %v11576_v9 = vpop.eup %6415 }
 0x2a7   :  { %v4088_v6 = vsel %vm489_vm0, %v4049_v55, 0.0  ;;  %v4102_v38 = vsel %vm489_vm0, %v4051_v59, 0.0  ;;  %v4095_v54 = vsel %vm489_vm0, %v4050_v17, 0.0  ;;  %v4116_v2 = vsel %vm489_vm0, %v4053_v4, 0.0  ;;  %14034 = vst [vmem:[#allocation20_spill] sm:$0xff] %v11576_v9  ;;  %v11582_v23 = vpop.eup %6417 }
 0x2a8   :  { %v4089_v12 = vrot.slane %v4088_v6, 4  ;;  %v4103_v24 = vrot.slane %v4102_v38, 4  ;;  %v4096_v14 = vrot.slane %v4095_v54, 4  ;;  %v4117_v60 = vrot.slane %v4116_v2, 4  ;;  %14035 = vst [vmem:[#allocation69_spill] sm:$0xff] %v11582_v23  ;;  %v11584_v59 = vpop.eup %6419 }
 0x2a9   :  { %v4109_v18 = vsel %vm489_vm0, %v4052_v40, 0.0  ;;  %v4130_v0 = vsel %vm489_vm0, %v4055_v10, 0.0  ;;  %v4123_v55 = vsel %vm489_vm0, %v4054_v44, 0.0  ;;  %v4144_v56 = vsel %vm489_vm0, %v4057_v8, 0.0  ;;  %14036 = vst [vmem:[#allocation64_spill] sm:$0xff] %v11584_v59  ;;  %v3902_v40 = vpop.permute.xlu0 %3901  ;;  %v11586_v29 = vpop.eup %6421 }
 0x2aa   :  { %v4090_v17 = vadd.f32 %v4089_v12, %v4088_v6  ;;  %v4104_v30 = vadd.f32 %v4103_v24, %v4102_v38  ;;  %v4097_v58 = vadd.f32 %v4096_v14, %v4095_v54  ;;  %v4118_v49 = vadd.f32 %v4117_v60, %v4116_v2  ;;  %14037 = vst [vmem:[#allocation35_spill] sm:$0xff] %v11586_v29  ;;  %v3917_v9 = vpop.permute.xlu1 %3916 }
 0x2ab   :  { %v4110_v4 = vrot.slane %v4109_v18, 4  ;;  %v4131_v15 = vrot.slane %v4130_v0, 4  ;;  %v4124_v33 = vrot.slane %v4123_v55, 4  ;;  %v4145_v63 = vrot.slane %v4144_v56, 4 }
 0x2ac   :  { %v4091_v10 = vrot.slane %v4090_v17, 2  ;;  %v4105_v44 = vrot.slane %v4104_v30, 2  ;;  %v4098_v37 = vrot.slane %v4097_v58, 2  ;;  %v4119_v8 = vrot.slane %v4118_v49, 2 }
 0x2ad   :  { %v4111_v21 = vadd.f32 %v4110_v4, %v4109_v18  ;;  %v4132_v11 = vadd.f32 %v4131_v15, %v4130_v0  ;;  %v4125_v6 = vadd.f32 %v4124_v33, %v4123_v55  ;;  %v4146_v38 = vadd.f32 %v4145_v63, %v4144_v56  ;;  %v3912_v15 = vpop.permute.xlu0 %3911 }
 0x2ae   :  { %v4092_v54 = vadd.f32 %v4091_v10, %v4090_v17  ;;  %v4106_v2 = vadd.f32 %v4105_v44, %v4104_v30  ;;  %v4099_v12 = vadd.f32 %v4098_v37, %v4097_v58  ;;  %v4120_v24 = vadd.f32 %v4119_v8, %v4118_v49  ;;  %v14040_v8 = vld [vmem:[#allocation50_spill] sm:$0xff] }
 0x2af   :  { %v4112_v14 = vrot.slane %v4111_v21, 2  ;;  %v4133_v60 = vrot.slane %v4132_v11, 2  ;;  %v4126_v59 = vrot.slane %v4125_v6, 2  ;;  %v4147_v23 = vrot.slane %v4146_v38, 2 }
 0x2b0   :  { %v4093_v46 = vrot.slane %v4092_v54, 1  ;;  %v4107_v43 = vrot.slane %v4106_v2, 1  ;;  %v4100_v31 = vrot.slane %v4099_v12, 1  ;;  %v4121_v29 = vrot.slane %v4120_v24, 1 }
 0x2b1   :  { %v4113_v7 = vadd.f32 %v4112_v14, %v4111_v21  ;;  %v4134_v47 = vadd.f32 %v4133_v60, %v4132_v11  ;;  %v4127_v61 = vadd.f32 %v4126_v59, %v4125_v6  ;;  %v4148_v18 = vadd.f32 %v4147_v23, %v4146_v38  ;;  %v3927_v38 = vpop.permute.xlu1 %3926 }
 0x2b2   :  { %v4094_v33 = vadd.f32 %v4093_v46, %v4092_v54  ;;  %v4108_v63 = vadd.f32 %v4107_v43, %v4106_v2  ;;  %v4101_v0 = vadd.f32 %v4100_v31, %v4099_v12  ;;  %v4122_v55 = vadd.f32 %v4121_v29, %v4120_v24  ;;  %v14038_v31 = vld [vmem:[#allocation25_spill] sm:$0xff] }
 0x2b3   :  { %v4114_v37 = vrot.slane %v4113_v7, 1  ;;  %v4135_v56 = vrot.slane %v4134_v47, 1  ;;  %v4128_v17 = vrot.slane %v4127_v61, 1  ;;  %v4149_v30 = vrot.slane %v4148_v18, 1  ;;  %v14039_v29 = vld [vmem:[#allocation49_spill] sm:$0xff] }
 0x2b4   :  { %v4362_v58 = vmul.f32 %v11343_v53, %v4094_v33  ;;  %v4364_v49 = vmul.f32 %v11343_v53, %v4108_v63  ;;  %v4363_v4 = vmul.f32 %v11343_v53, %v4101_v0  ;;  %v4366_v21 = vmul.f32 %v11343_v53, %v4122_v55  ;;  %v14041_v33 = vld [vmem:[#allocation29_spill] sm:$0xff] }
 0x2b5   :  { %v4115_v11 = vadd.f32 %v4114_v37, %v4113_v7  ;;  %v4136_v59 = vadd.f32 %v4135_v56, %v4134_v47  ;;  %v4129_v23 = vadd.f32 %v4128_v17, %v4127_v61  ;;  %v4150_v10 = vadd.f32 %v4149_v30, %v4148_v18  ;;  %v3922_v47 = vpop.permute.xlu0 %3921  ;;  %v14042_v0 = vld [vmem:[#allocation61_spill] sm:$0xff]  ;;  %v14043_v37 = vld [vmem:[#allocation56_spill] sm:$0xff] }
 0x2b6   :  { %v4440_v46 = vsel %vm410_vm1, %v4363_v4, %v4362_v58  ;;  %v3783_v43 = vmul.f32 %v14038_v31, %v11531_v51  ;;  %v3786_v44 = vmul.f32 %v14039_v29, %v11531_v51  ;;  %v3785_v6 = vmul.f32 %v14040_v8, %v11531_v51  ;;  %v14044_v29 = vld [vmem:[#allocation14_spill] sm:$0xff] }
 0x2b7   :  { %v4365_v54 = vmul.f32 %v11343_v53, %v4115_v11  ;;  %v4441_v2 = vsel %vm412_vm2, %v4364_v49, %v4440_v46  ;;  %v4368_v7 = vmul.f32 %v11343_v53, %v4136_v59  ;;  %v4367_v61 = vmul.f32 %v11343_v53, %v4129_v23  ;;  %v3937_v46 = vpop.permute.xlu1 %3936 }
 0x2b8   :  { %v11604_v12 = vmul.f32 %v11343_v53, %v4150_v10  ;;  %v4056_v24 = vmul.f32 %v11565_v5, %v3783_v43  ;;  %v4059_v14 = vmul.f32 %v3907_v20, %v3786_v44  ;;  %v4058_v60 = vmul.f32 %v3902_v40, %v3785_v6 }
 0x2b9   :  { %v4442_v18 = vsel %vm414_vm3, %v4365_v54, %v4441_v2  ;;  %v3788_v63 = vmul.f32 %v14041_v33, %v11531_v51  ;;  %v3787_v55 = vmul.f32 %v14042_v0, %v11531_v51  ;;  %v3790_v56 = vmul.f32 %v14043_v37, %v11531_v51  ;;  %v3932_v8 = vpop.permute.xlu0 %3931 }
 0x2ba   :  { %v4443_v17 = vsel %vm416_vm4, %v4366_v21, %v4442_v18  ;;  %v4137_v30 = vsel %vm489_vm0, %v4056_v24, 0.0  ;;  %v4158_v58 = vsel %vm489_vm0, %v4059_v14, 0.0  ;;  %v4151_v5 = vsel %vm489_vm0, %v4058_v60, 0.0 }
 0x2bb   :  { %v4444_v20 = vsel %vm418_vm5, %v4367_v61, %v4443_v17  ;;  %v4138_v40 = vrot.slane %v4137_v30, 4  ;;  %v4159_v49 = vrot.slane %v4158_v58, 4  ;;  %v4152_v4 = vrot.slane %v4151_v5, 4  ;;  %v14045_v61 = vld [vmem:[#allocation30_spill] sm:$0xff] }
 0x2bc   :  { %v4445_v11 = vsel %vm420_vm6, %v4368_v7, %v4444_v20  ;;  %v4061_v59 = vmul.f32 %v3917_v9, %v3788_v63  ;;  %v4060_v23 = vmul.f32 %v3912_v15, %v3787_v55  ;;  %v4063_v10 = vmul.f32 %v3927_v38, %v3790_v56 }
 0x2bd   :  { %v4139_v31 = vadd.f32 %v4138_v40, %v4137_v30  ;;  %v4160_v43 = vadd.f32 %v4159_v49, %v4158_v58  ;;  %v4153_v21 = vadd.f32 %v4152_v4, %v4151_v5  ;;  %v3789_v44 = vmul.f32 %v14044_v29, %v11531_v51  ;;  %v3947_v5 = vpop.permute.xlu1 %3946 }
 0x2be   :  { %v4172_v6 = vsel %vm489_vm0, %v4061_v59, 0.0  ;;  %v4165_v54 = vsel %vm489_vm0, %v4060_v23, 0.0  ;;  %v4186_v2 = vsel %vm489_vm0, %v4063_v10, 0.0  ;;  %v3792_v7 = vmul.f32 %v14045_v61, %v11531_v51  ;;  %v3942_v59 = vpop.permute.xlu0 %3941 }
 0x2bf   :  { %v4140_v9 = vrot.slane %v4139_v31, 2  ;;  %v4161_v15 = vrot.slane %v4160_v43, 2  ;;  %v4154_v38 = vrot.slane %v4153_v21, 2  ;;  %v4173_v24 = vrot.slane %v4172_v6, 4 }
 0x2c0   :  { %v4166_v14 = vrot.slane %v4165_v54, 4  ;;  %v4187_v60 = vrot.slane %v4186_v2, 4  ;;  %v4062_v18 = vmul.f32 %v3922_v47, %v3789_v44  ;;  %v4065_v33 = vmul.f32 %v3937_v46, %v3792_v7 }
 0x2c1   :  { %v4141_v63 = vadd.f32 %v4140_v9, %v4139_v31  ;;  %v4162_v0 = vadd.f32 %v4161_v15, %v4160_v43  ;;  %v4155_v55 = vadd.f32 %v4154_v38, %v4153_v21  ;;  %v4174_v37 = vadd.f32 %v4173_v24, %v4172_v6 }
 0x2c2   :  { %v4167_v56 = vadd.f32 %v4166_v14, %v4165_v54  ;;  %v4188_v17 = vadd.f32 %v4187_v60, %v4186_v2  ;;  %v4179_v30 = vsel %vm489_vm0, %v4062_v18, 0.0  ;;  %v4200_v58 = vsel %vm489_vm0, %v4065_v33, 0.0  ;;  %v3957_v18 = vpop.permute.xlu1 %3956 }
 0x2c3   :  { %v4142_v20 = vrot.slane %v4141_v63, 1  ;;  %v4163_v40 = vrot.slane %v4162_v0, 1  ;;  %v4156_v49 = vrot.slane %v4155_v55, 1  ;;  %v4175_v4 = vrot.slane %v4174_v37, 2 }
 0x2c4   :  { %v4168_v23 = vrot.slane %v4167_v56, 2  ;;  %v4189_v10 = vrot.slane %v4188_v17, 2  ;;  %v4180_v47 = vrot.slane %v4179_v30, 4  ;;  %v4201_v46 = vrot.slane %v4200_v58, 4 }
 0x2c5   :  { %v4143_v31 = vadd.f32 %v4142_v20, %v4141_v63  ;;  %v4164_v43 = vadd.f32 %v4163_v40, %v4162_v0  ;;  %v4157_v21 = vadd.f32 %v4156_v49, %v4155_v55  ;;  %v4176_v29 = vadd.f32 %v4175_v4, %v4174_v37  ;;  %v14046_v55 = vld [vmem:[#allocation38_spill] sm:$0xff] }
 0x2c6   :  { %v4169_v44 = vadd.f32 %v4168_v23, %v4167_v56  ;;  %v4190_v6 = vadd.f32 %v4189_v10, %v4188_v17  ;;  %v4181_v54 = vadd.f32 %v4180_v47, %v4179_v30  ;;  %v4202_v2 = vadd.f32 %v4201_v46, %v4200_v58  ;;  %v3952_v56 = vpop.permute.xlu0 %3951  ;;  %v14048_v46 = vld [vmem:[#allocation54_spill] sm:$0xff] }
 0x2c7   :  { %v4369_v61 = vmul.f32 %v11343_v53, %v4143_v31  ;;  %v4372_v7 = vmul.f32 %v11343_v53, %v4164_v43  ;;  %v4371_v9 = vmul.f32 %v11343_v53, %v4157_v21  ;;  %v4177_v15 = vrot.slane %v4176_v29, 1 }
 0x2c8   :  { %v4170_v38 = vrot.slane %v4169_v44, 1  ;;  %v4191_v24 = vrot.slane %v4190_v6, 1  ;;  %v4182_v14 = vrot.slane %v4181_v54, 2  ;;  %v4203_v60 = vrot.slane %v4202_v2, 2 }
 0x2c9   :  { %v4446_v33 = vsel %vm1622_vm7, %v4369_v61, %v4445_v11  ;;  %v4447_v63 = vsel %vm410_vm1, %v4371_v9, %v11604_v12  ;;  %v4178_v0 = vadd.f32 %v4177_v15, %v4176_v29  ;;  %v3791_v37 = vmul.f32 %v14046_v55, %v11531_v51  ;;  %v14047_v11 = vld [vmem:[#allocation63_spill] sm:$0xff] }
 0x2ca   :  { %4479 = vst [vmem:[#allocation5 + $0x30] sm:$0xff] %v4446_v33  ;;  %v4171_v17 = vadd.f32 %v4170_v38, %v4169_v44  ;;  %v4448_v30 = vsel %vm412_vm2, %v4372_v7, %v4447_v63  ;;  %v4192_v58 = vadd.f32 %v4191_v24, %v4190_v6  ;;  %v4183_v20 = vadd.f32 %v4182_v14, %v4181_v54  ;;  %v14049_v44 = vld [vmem:[#allocation39_spill] sm:$0xff]  ;;  %v3967_v7 = vpop.permute.xlu1 %3966  ;;  %v3962_v14 = vpop.permute.xlu0 %3961 }
 0x2cb   :  { %v4374_v40 = vmul.f32 %v11343_v53, %v4178_v0  ;;  %v4204_v49 = vadd.f32 %v4203_v60, %v4202_v2  ;;  %v4064_v4 = vmul.f32 %v3932_v8, %v3791_v37  ;;  %v3794_v23 = vmul.f32 %v14047_v11, %v11531_v51  ;;  %v14051_v11 = vld [vmem:[#allocation15_spill] sm:$0xff] }
 0x2cc   :  { %v4373_v12 = vmul.f32 %v11343_v53, %v4171_v17  ;;  %v4376_v10 = vmul.f32 %v11343_v53, %v4192_v58  ;;  %v4184_v47 = vrot.slane %v4183_v20, 1  ;;  %v3793_v31 = vmul.f32 %v14048_v46, %v11531_v51 }
 0x2cd   :  { %v4205_v43 = vrot.slane %v4204_v49, 1  ;;  %v4193_v21 = vsel %vm489_vm0, %v4064_v4, 0.0  ;;  %v4067_v29 = vmul.f32 %v3947_v5, %v3794_v23  ;;  %v3796_v6 = vmul.f32 %v14049_v44, %v11531_v51 }
 0x2ce   :  { %v4449_v8 = vsel %vm414_vm3, %v4373_v12, %v4448_v30  ;;  %v4185_v54 = vadd.f32 %v4184_v47, %v4183_v20  ;;  %v4194_v2 = vrot.slane %v4193_v21, 4  ;;  %v4066_v61 = vmul.f32 %v3942_v59, %v3793_v31  ;;  %v14050_v59 = vld [vmem:[#allocation68_spill] sm:$0xff] }
 0x2cf   :  { %v4450_v9 = vsel %vm416_vm4, %v4374_v40, %v4449_v8  ;;  %v4206_v15 = vadd.f32 %v4205_v43, %v4204_v49  ;;  %v4214_v38 = vsel %vm489_vm0, %v4067_v29, 0.0  ;;  %v4069_v24 = vmul.f32 %v3957_v18, %v3796_v6  ;;  %v14052_v31 = vld [vmem:[#allocation44_spill] sm:$0xff]  ;;  %v14053_v8 = vld [vmem:[#allocation65_spill] sm:$0xff] }
 0x2d0   :  { %v4375_v60 = vmul.f32 %v11343_v53, %v4185_v54  ;;  %v4195_v33 = vadd.f32 %v4194_v2, %v4193_v21  ;;  %v4215_v5 = vrot.slane %v4214_v38, 4  ;;  %v4207_v63 = vsel %vm489_vm0, %v4066_v61, 0.0  ;;  %v3977_v21 = vpop.permute.xlu1 %3976 }
 0x2d1   :  { %v4378_v0 = vmul.f32 %v11343_v53, %v4206_v15  ;;  %v4208_v55 = vrot.slane %v4207_v63, 4  ;;  %v4228_v37 = vsel %vm489_vm0, %v4069_v24, 0.0  ;;  %v3795_v17 = vmul.f32 %v14050_v59, %v11531_v51 }
 0x2d2   :  { %v4451_v30 = vsel %vm418_vm5, %v4375_v60, %v4450_v9  ;;  %v4196_v58 = vrot.slane %v4195_v33, 2  ;;  %v4216_v20 = vadd.f32 %v4215_v5, %v4214_v38  ;;  %v4229_v18 = vrot.slane %v4228_v37, 4 }
 0x2d3   :  { %v4452_v40 = vsel %vm420_vm6, %v4376_v10, %v4451_v30  ;;  %v4209_v49 = vadd.f32 %v4208_v55, %v4207_v63  ;;  %v4068_v4 = vmul.f32 %v3952_v56, %v3795_v17  ;;  %v3798_v23 = vmul.f32 %v14051_v11, %v11531_v51  ;;  %v3972_v10 = vpop.permute.xlu0 %3971 }
 0x2d4   :  { %v4197_v12 = vadd.f32 %v4196_v58, %v4195_v33  ;;  %v4217_v47 = vrot.slane %v4216_v20, 2  ;;  %v4230_v46 = vadd.f32 %v4229_v18, %v4228_v37  ;;  %v3797_v43 = vmul.f32 %v14052_v31, %v11531_v51 }
 0x2d5   :  { %v4210_v29 = vrot.slane %v4209_v49, 2  ;;  %v4221_v44 = vsel %vm489_vm0, %v4068_v4, 0.0  ;;  %v4071_v6 = vmul.f32 %v3967_v7, %v3798_v23  ;;  %v3800_v54 = vmul.f32 %v14053_v8, %v11531_v51  ;;  %v3987_v23 = vpop.permute.xlu1 %3986 }
 0x2d6   :  { %v4198_v2 = vrot.slane %v4197_v12, 1  ;;  %v4218_v56 = vadd.f32 %v4217_v47, %v4216_v20  ;;  %v4231_v61 = vrot.slane %v4230_v46, 2  ;;  %v4222_v9 = vrot.slane %v4221_v44, 4 }
 0x2d7   :  { %v4211_v15 = vadd.f32 %v4210_v29, %v4209_v49  ;;  %v4242_v38 = vsel %vm489_vm0, %v4071_v6, 0.0  ;;  %v4070_v24 = vmul.f32 %v3962_v14, %v3797_v43  ;;  %v4073_v60 = vmul.f32 %v3977_v21, %v3800_v54 }
 0x2d8   :  { %v4199_v33 = vadd.f32 %v4198_v2, %v4197_v12  ;;  %v4219_v5 = vrot.slane %v4218_v56, 1  ;;  %v4232_v63 = vadd.f32 %v4231_v61, %v4230_v46  ;;  %v4223_v55 = vadd.f32 %v4222_v9, %v4221_v44  ;;  %v3982_v12 = vpop.permute.xlu0 %3981  ;;  %v14054_v2 = vld [vmem:[#allocation34_spill] sm:$0xff] }
 0x2d9   :  { %v4212_v37 = vrot.slane %v4211_v15, 1  ;;  %v4243_v59 = vrot.slane %v4242_v38, 4  ;;  %v4235_v7 = vsel %vm489_vm0, %v4070_v24, 0.0  ;;  %v4256_v17 = vsel %vm489_vm0, %v4073_v60, 0.0 }
 0x2da   :  { %v4377_v30 = vmul.f32 %v11343_v53, %v4199_v33  ;;  %v4220_v58 = vadd.f32 %v4219_v5, %v4218_v56  ;;  %v4233_v20 = vrot.slane %v4232_v63, 1  ;;  %v4224_v18 = vrot.slane %v4223_v55, 2 }
 0x2db   :  { %v4213_v49 = vadd.f32 %v4212_v37, %v4211_v15  ;;  %v4244_v4 = vadd.f32 %v4243_v59, %v4242_v38  ;;  %v4236_v11 = vrot.slane %v4235_v7, 4  ;;  %v4257_v14 = vrot.slane %v4256_v17, 4  ;;  %v14055_v59 = vld [vmem:[#allocation74_spill] sm:$0xff] }
 0x2dc   :  { %v4453_v47 = vsel %vm1622_vm7, %v4377_v30, %v4452_v40  ;;  %v4380_v46 = vmul.f32 %v11343_v53, %v4220_v58  ;;  %v4234_v31 = vadd.f32 %v4233_v20, %v4232_v63  ;;  %v4225_v43 = vadd.f32 %v4224_v18, %v4223_v55  ;;  %v3992_v30 = vpop.permute.xlu0 %3991 }
 0x2dd   :  { %4480 = vst [vmem:[#allocation5 + $0x38] sm:$0xff] %v4453_v47  ;;  %v4379_v21 = vmul.f32 %v11343_v53, %v4213_v49  ;;  %v4245_v29 = vrot.slane %v4244_v4, 2  ;;  %v4237_v44 = vadd.f32 %v4236_v11, %v4235_v7  ;;  %v4258_v6 = vadd.f32 %v4257_v14, %v4256_v17  ;;  %v3997_v17 = vpop.permute.xlu1 %3996 }
 0x2de   :  { %v4382_v8 = vmul.f32 %v11343_v53, %v4234_v31  ;;  %v4226_v54 = vrot.slane %v4225_v43, 1  ;;  %v3799_v56 = vmul.f32 %v14054_v2, %v11531_v51  ;;  %v3802_v61 = vmul.f32 %v11155_v36, %v11531_v51 }
 0x2df   :  { %v4454_v40 = vsel %vm410_vm1, %v4379_v21, %v4378_v0  ;;  %v4246_v9 = vadd.f32 %v4245_v29, %v4244_v4  ;;  %v4238_v15 = vrot.slane %v4237_v44, 2  ;;  %v4259_v38 = vrot.slane %v4258_v6, 2 }
 0x2e0   :  { %v4227_v24 = vadd.f32 %v4226_v54, %v4225_v43  ;;  %v4455_v60 = vsel %vm412_vm2, %v4380_v46, %v4454_v40  ;;  %v4072_v33 = vmul.f32 %v3972_v10, %v3799_v56  ;;  %v4075_v5 = vmul.f32 %v3987_v23, %v3802_v61 }
 0x2e1   :  { %v4247_v63 = vrot.slane %v4246_v9, 1  ;;  %v4239_v55 = vadd.f32 %v4238_v15, %v4237_v44  ;;  %v4260_v37 = vadd.f32 %v4259_v38, %v4258_v6  ;;  %v3801_v7 = vmul.f32 %v14055_v59, %v11531_v51  ;;  %v4007_v40 = vpop.permute.xlu1 %4006 }
 0x2e2   :  { %v4381_v36 = vmul.f32 %v11343_v53, %v4227_v24  ;;  %v4249_v0 = vsel %vm489_vm0, %v4072_v33, 0.0  ;;  %v4270_v58 = vsel %vm489_vm0, %v4075_v5, 0.0  ;;  %v3804_v20 = vmul.f32 %v11198_v3, %v11531_v51 }
 0x2e3   :  { %v4248_v18 = vadd.f32 %v4247_v63, %v4246_v9  ;;  %v4240_v10 = vrot.slane %v4239_v55, 1  ;;  %v4261_v49 = vrot.slane %v4260_v37, 1  ;;  %v4250_v4 = vrot.slane %v4249_v0, 4  ;;  %v4002_v9 = vpop.permute.xlu0 %4001 }
 0x2e4   :  { %v4456_v11 = vsel %vm414_vm3, %v4381_v36, %v4455_v60  ;;  %v4271_v14 = vrot.slane %v4270_v58, 4  ;;  %v4074_v23 = vmul.f32 %v3982_v12, %v3801_v7  ;;  %v4077_v47 = vmul.f32 %v3997_v17, %v3804_v20 }
 0x2e5   :  { %v4384_v46 = vmul.f32 %v11343_v53, %v4248_v18  ;;  %v4241_v31 = vadd.f32 %v4240_v10, %v4239_v55  ;;  %v4262_v43 = vadd.f32 %v4261_v49, %v4260_v37  ;;  %v14056_v21 = vmax.f32 %v11489_v62, %v11402_v25  ;;  %v14057_v62 = vld [vmem:[#allocation12_spill] sm:$0xff]  ;;  %v14058_v55 = vld [vmem:[#allocation81_spill] sm:$0xff] }
 0x2e6   :  { %v4251_v3 = vadd.f32 %v4250_v4, %v4249_v0  ;;  %v4272_v44 = vadd.f32 %v4271_v14, %v4270_v58  ;;  %v4263_v6 = vsel %vm489_vm0, %v4074_v23, 0.0  ;;  %v4284_v54 = vsel %vm489_vm0, %v4077_v47, 0.0  ;;  %v4017_v47 = vpop.permute.xlu1 %4016 }
 0x2e7   :  { %v11693_v29 = vmax.f32 %v14056_v21, %v11411_v35  ;;  %v4383_v2 = vmul.f32 %v11343_v53, %v4241_v31  ;;  %v4457_v12 = vsel %vm416_vm4, %v4382_v8, %v4456_v11  ;;  %v4264_v56 = vrot.slane %v4263_v6, 4  ;;  %v4012_v31 = vpop.permute.xlu0 %4011 }
 0x2e8   :  { %v4285_v61 = vrot.slane %v4284_v54, 4  ;;  %v4252_v15 = vrot.slane %v4251_v3, 2  ;;  %v4273_v38 = vrot.slane %v4272_v44, 2  ;;  %v3803_v24 = vmul.f32 %v14057_v62, %v11531_v51 }
 0x2e9   :  { %v3806_v60 = vmul.f32 %v11240_v16, %v11531_v51  ;;  %v4386_v33 = vmul.f32 %v11343_v53, %v4262_v43  ;;  %v4265_v5 = vadd.f32 %v4264_v56, %v4263_v6  ;;  %v3805_v37 = vmul.f32 %v14058_v55, %v11531_v51 }
 0x2ea   :  { %v4286_v63 = vadd.f32 %v4285_v61, %v4284_v54  ;;  %v4458_v8 = vsel %vm418_vm5, %v4383_v2, %v4457_v12  ;;  %v4253_v59 = vadd.f32 %v4252_v15, %v4251_v3  ;;  %v4274_v7 = vadd.f32 %v4273_v38, %v4272_v44 }
 0x2eb   :  { %v4076_v17 = vmul.f32 %v3992_v30, %v3803_v24  ;;  %v4266_v36 = vrot.slane %v4265_v5, 2  ;;  %v4079_v58 = vmul.f32 %v4007_v40, %v3806_v60  ;;  %v4078_v20 = vmul.f32 %v4002_v9, %v3805_v37 }
 0x2ec   :  { %v4287_v0 = vrot.slane %v4286_v63, 2  ;;  %v4254_v18 = vrot.slane %v4253_v59, 1  ;;  %v4275_v10 = vrot.slane %v4274_v7, 1  ;;  %v3808_v49 = vmul.f32 %v11282_v39, %v11531_v51 }
 0x2ed   :  { %v4277_v16 = vsel %vm489_vm0, %v4076_v17, 0.0  ;;  %v4267_v4 = vadd.f32 %v4266_v36, %v4265_v5  ;;  %v4298_v23 = vsel %vm489_vm0, %v4079_v58, 0.0  ;;  %v4291_v3 = vsel %vm489_vm0, %v4078_v20, 0.0  ;;  %v14059_v5 = vld [vmem:[#allocation85_spill] sm:$0xff] }
 0x2ee   :  { %v4288_v11 = vadd.f32 %v4287_v0, %v4286_v63  ;;  %v4278_v14 = vrot.slane %v4277_v16, 4  ;;  %v4255_v43 = vadd.f32 %v4254_v18, %v4253_v59  ;;  %v4276_v30 = vadd.f32 %v4275_v10, %v4274_v7  ;;  %v4027_v59 = vpop.permute.xlu1 %4026  ;;  %v4022_v7 = vpop.permute.xlu0 %4021 }
 0x2ef   :  { %v4299_v21 = vrot.slane %v4298_v23, 4  ;;  %v4268_v44 = vrot.slane %v4267_v4, 1  ;;  %v4292_v2 = vrot.slane %v4291_v3, 4  ;;  %v4459_v39 = vsel %vm420_vm6, %v4384_v46, %v4458_v8 }
 0x2f0   :  { %v4289_v6 = vrot.slane %v4288_v11, 1  ;;  %v4279_v54 = vadd.f32 %v4278_v14, %v4277_v16  ;;  %v4385_v12 = vmul.f32 %v11343_v53, %v4255_v43  ;;  %v4081_v61 = vmul.f32 %v4017_v47, %v3808_v49 }
 0x2f1   :  { %v4300_v56 = vadd.f32 %v4299_v21, %v4298_v23  ;;  %v4269_v40 = vadd.f32 %v4268_v44, %v4267_v4  ;;  %v4293_v38 = vadd.f32 %v4292_v2, %v4291_v3  ;;  %v3807_v63 = vmul.f32 %v14059_v5, %v11531_v51 }
 0x2f2   :  { %v4290_v9 = vadd.f32 %v4289_v6, %v4288_v11  ;;  %v4280_v15 = vrot.slane %v4279_v54, 2  ;;  %v4460_v62 = vsel %vm1622_vm7, %v4385_v12, %v4459_v39  ;;  %v4312_v60 = vsel %vm489_vm0, %v4081_v61, 0.0  ;;  %v4032_v2 = vpop.permute.xlu0 %4031 }
 0x2f3   :  { %v4301_v24 = vrot.slane %v4300_v56, 2  ;;  %4481 = vst [vmem:[#allocation5 + $0x40] sm:$0xff] %v4460_v62  ;;  %v4388_v55 = vmul.f32 %v11343_v53, %v4276_v30  ;;  %v4387_v37 = vmul.f32 %v11343_v53, %v4269_v40  ;;  %v4294_v8 = vrot.slane %v4293_v38, 2 }
 0x2f4   :  { %v4281_v46 = vadd.f32 %v4280_v15, %v4279_v54  ;;  %v4313_v36 = vrot.slane %v4312_v60, 4  ;;  %v4080_v0 = vmul.f32 %v4012_v31, %v3807_v63  ;;  %v3810_v58 = vmul.f32 %v11312_v48, %v11531_v51  ;;  %v4037_v54 = vpop.permute.xlu1 %4036 }
 0x2f5   :  { %v4302_v17 = vadd.f32 %v4301_v24, %v4300_v56  ;;  %v4390_v20 = vmul.f32 %v11343_v53, %v4290_v9  ;;  %v4295_v10 = vadd.f32 %v4294_v8, %v4293_v38  ;;  %v3809_v16 = vmul.f32 %v11295_v32, %v11531_v51 }
 0x2f6   :  { %v4282_v18 = vrot.slane %v4281_v46, 1  ;;  %v4461_v49 = vsel %vm410_vm1, %v4387_v37, %v4386_v33  ;;  %v4314_v11 = vadd.f32 %v4313_v36, %v4312_v60  ;;  %v4305_v14 = vsel %vm489_vm0, %v4080_v0, 0.0 }
 0x2f7   :  { %v4303_v4 = vrot.slane %v4302_v17, 1  ;;  %v4296_v47 = vrot.slane %v4295_v10, 1  ;;  %v4306_v43 = vrot.slane %v4305_v14, 4  ;;  %v4083_v31 = vmul.f32 %v4027_v59, %v3810_v58 }
 0x2f8   :  { %v4283_v23 = vadd.f32 %v4282_v18, %v4281_v46  ;;  %v4315_v21 = vrot.slane %v4314_v11, 2  ;;  %v4082_v48 = vmul.f32 %v4022_v7, %v3809_v16  ;;  %v3812_v3 = vmul.f32 %v11332_v13, %v11531_v51  ;;  %v4047_v18 = vpop.permute.xlu1 %4046 }
 0x2f9   :  { %v4304_v30 = vadd.f32 %v4303_v4, %v4302_v17  ;;  %v4297_v6 = vadd.f32 %v4296_v47, %v4295_v10  ;;  %v4307_v32 = vadd.f32 %v4306_v43, %v4305_v14  ;;  %v4326_v33 = vsel %vm489_vm0, %v4083_v31, 0.0  ;;  %v4042_v10 = vpop.permute.xlu0 %4041 }
 0x2fa   :  { %v4389_v44 = vmul.f32 %v11343_v53, %v4283_v23  ;;  %v4462_v12 = vsel %vm412_vm2, %v4388_v55, %v4461_v49  ;;  %v4316_v39 = vadd.f32 %v4315_v21, %v4314_v11  ;;  %v4327_v56 = vrot.slane %v4326_v33, 4 }
 0x2fb   :  { %v4319_v61 = vsel %vm489_vm0, %v4082_v48, 0.0  ;;  %v4308_v9 = vrot.slane %v4307_v32, 2  ;;  %v14060_v13 = vmax.f32 %v11496_v42, %v11406_v22  ;;  %v4391_v62 = vmul.f32 %v11343_v53, %v4297_v6 }
 0x2fc   :  { %v4463_v40 = vsel %vm414_vm3, %v4389_v44, %v4462_v12  ;;  %v4320_v15 = vrot.slane %v4319_v61, 4  ;;  %v4328_v24 = vadd.f32 %v4327_v56, %v4326_v33  ;;  %v4085_v60 = vmul.f32 %v4037_v54, %v3812_v3 }
 0x2fd   :  { %v11738_v38 = vmax.f32 %v14060_v13, %v11415_v1  ;;  %v4913_v5 = vadd.f32 %v11568_v57, %v11539_v34  ;;  %v4392_v63 = vmul.f32 %v11343_v53, %v4304_v30  ;;  %v4309_v55 = vadd.f32 %v4308_v9, %v4307_v32 }
 0x2fe   :  { %v4321_v37 = vadd.f32 %v4320_v15, %v4319_v61  ;;  %v3811_v46 = vmul.f32 %v11319_v50, %v11531_v51  ;;  %v4464_v8 = vsel %vm416_vm4, %v4390_v20, %v4463_v40  ;;  %v4317_v59 = vrot.slane %v4316_v39, 1 }
 0x2ff   :  { %v4329_v42 = vrot.slane %v4328_v24, 2  ;;  %v4340_v7 = vsel %vm489_vm0, %v4085_v60, 0.0  ;;  %v4310_v17 = vrot.slane %v4309_v55, 1  ;;  %v4465_v34 = vsel %vm418_vm5, %v4391_v62, %v4464_v8 }
 0x300   :  { %v4322_v36 = vrot.slane %v4321_v37, 2  ;;  %v4341_v0 = vrot.slane %v4340_v7, 4  ;;  %v4084_v58 = vmul.f32 %v4032_v2, %v3811_v46  ;;  %v3814_v49 = vmul.f32 %v11372_v45, %v11531_v51 }
 0x301   :  { %v4330_v16 = vadd.f32 %v4329_v42, %v4328_v24  ;;  %v3813_v50 = vmul.f32 %v11339_v19, %v11531_v51  ;;  %v4311_v20 = vadd.f32 %v4310_v17, %v4309_v55  ;;  %v4318_v30 = vadd.f32 %v4317_v59, %v4316_v39  ;;  %v14064_v42 = vld [vmem:[#allocation17_spill] sm:$0xff]  ;;  %v14065_v17 = vld [vmem:[#allocation20_spill] sm:$0xff] }
 0x302   :  { %v4323_v4 = vadd.f32 %v4322_v36, %v4321_v37  ;;  %v4342_v11 = vadd.f32 %v4341_v0, %v4340_v7  ;;  %v4333_v14 = vsel %vm489_vm0, %v4084_v58, 0.0  ;;  %v4087_v43 = vmul.f32 %v4047_v18, %v3814_v49  ;;  %v14063_v37 = vld [vmem:[#allocation101_spill] sm:$0xff] }
 0x303   :  { %v4331_v23 = vrot.slane %v4330_v16, 1  ;;  %v4334_v47 = vrot.slane %v4333_v14, 4  ;;  %v4086_v31 = vmul.f32 %v4042_v10, %v3813_v50  ;;  %v4393_v21 = vmul.f32 %v11343_v53, %v4311_v20  ;;  %v14066_v18 = vld [vmem:[#allocation13_spill] sm:$0xff]  ;;  %v14070_v50 = vld [vmem:[#allocation22_spill] sm:$0xff] }
 0x304   :  { %v4324_v48 = vrot.slane %v4323_v4, 1  ;;  %v4343_v3 = vrot.slane %v4342_v11, 2  ;;  %v4466_v44 = vsel %vm420_vm6, %v4392_v63, %v4465_v34  ;;  %v4354_v6 = vsel %vm489_vm0, %v4087_v43, 0.0  ;;  %v14061_v63 = vld [vmem:[#allocation92_spill] sm:$0xff] }
 0x305   :  { %v4335_v45 = vadd.f32 %v4334_v47, %v4333_v14  ;;  %v4347_v19 = vsel %vm489_vm0, %v4086_v31, 0.0  ;;  %v4467_v51 = vsel %vm1622_vm7, %v4393_v21, %v4466_v44  ;;  %v4355_v54 = vrot.slane %v4354_v6, 4  ;;  %v11786_v44 = vpop.eup %6423 }
 0x306   :  { %v4325_v32 = vadd.f32 %v4324_v48, %v4323_v4  ;;  %v4344_v33 = vadd.f32 %v4343_v3, %v4342_v11  ;;  %4482 = vst [vmem:[#allocation5 + $0x48] sm:$0xff] %v4467_v51  ;;  %v4332_v2 = vadd.f32 %v4331_v23, %v4330_v16  ;;  %v4348_v39 = vrot.slane %v4347_v19, 4  ;;  %v14069_v16 = vld [vmem:[#allocation69_spill] sm:$0xff]  ;;  %v14071_v23 = vld [vmem:[#allocation103_spill] sm:$0xff]  ;;  %14074 = vst [vmem:[#allocation51_spill] sm:$0xff] %v11786_v44 }
 0x307   :  { %v4336_v12 = vrot.slane %v4335_v45, 2  ;;  %v4356_v40 = vadd.f32 %v4355_v54, %v4354_v6  ;;  %v4914_v13 = vadd.f32 %v11574_v27, %v4913_v5  ;;  %v4584_v62 = vmax.f32 %v11693_v29, %v11419_v26  ;;  %v14073_v48 = vld [vmem:[#allocation11_spill] sm:$0xff]  ;;  %v14075_v51 = vld [vmem:[#allocation28_spill] sm:$0xff] }
 0x308   :  { %v4395_v56 = vmul.f32 %v11343_v53, %v4325_v32  ;;  %v4345_v61 = vrot.slane %v4344_v33, 1  ;;  %v4349_v15 = vadd.f32 %v4348_v39, %v4347_v19  ;;  %v4394_v24 = vmul.f32 %v11343_v53, %v4318_v30  ;;  %v14072_v30 = vld [vmem:[#allocation64_spill] sm:$0xff]  ;;  %v11789_v19 = vpop.permute.xlu1 %5117  ;;  %v11792_v32 = vpop.permute.xlu0 %5112  ;;  %v14079_v39 = vld [vmem:[#allocation53_spill] sm:$0xff] }
 0x309   :  { %v4337_v9 = vadd.f32 %v4336_v12, %v4335_v45  ;;  %v4357_v60 = vrot.slane %v4356_v40, 2  ;;  %v14062_v55 = vsub.f32 %v14016_v52, %v14061_v63  ;;  %v4585_v46 = vmax.f32 %v11738_v38, %v14063_v37  ;;  %v14067_v52 = vld [vmem:[#allocation102_spill] sm:$0xff]  ;;  %v14068_v38 = vld [vmem:[#allocation47_spill] sm:$0xff]  ;;  %14076 = vst [vmem:[#allocation66_spill] sm:$0xff] %v11792_v32  ;;  %v14131_v32 = vld [vmem:[#allocation57_spill] sm:$0xff] }
 0x30a   :  { %v4396_v8 = vmul.f32 %v11343_v53, %v4332_v2  ;;  %v4350_v59 = vrot.slane %v4349_v15, 2  ;;  %6427 = vpow2.f32 %v14064_v42  ;;  %v4468_v5 = vsel %vm410_vm1, %v4395_v56, %v4394_v24  ;;  %v11795_v2 = vpop.eup %6425  ;;  %v14083_v24 = vld [vmem:[#allocation16_spill] sm:$0xff] }
 0x30b   :  { %v4780_v41 = vmul.f32 1.442695, %v14062_v55  ;;  %v4338_v28 = vrot.slane %v4337_v9, 1  ;;  %v4346_v7 = vadd.f32 %v4345_v61, %v4344_v33  ;;  %v4358_v29 = vadd.f32 %v4357_v60, %v4356_v40  ;;  %v14077_v33 = vld [vmem:[#allocation41_spill] sm:$0xff]  ;;  %14078 = vst [vmem:[#allocation40_spill] sm:$0xff] %v11795_v2  ;;  %v14080_v61 = vld [vmem:[#allocation78_spill] sm:$0xff] }
 0x30c   :  { %v4915_v36 = vadd.f32 %v14065_v17, %v4914_v13  ;;  %v4351_v58 = vadd.f32 %v4350_v59, %v4349_v15  ;;  %6429 = vpow2.f32 %v14066_v18  ;;  %v4586_v10 = vmax.f32 %v4584_v62, %v14067_v52  ;;  %v14082_v15 = vld [vmem:[#allocation35_spill] sm:$0xff]  ;;  %v14084_v60 = vld [vmem:[#allocation104_spill] sm:$0xff]  ;;  %v5102_v59 = vld [vmem:[%s12821_s9 + $0x230] sm:$0xff] }
 0x30d   :  { %v4339_v0 = vadd.f32 %v4338_v28, %v4337_v9  ;;  %v4359_v34 = vrot.slane %v4358_v29, 1  ;;  %6431 = vpow2.f32 %v14068_v38  ;;  %v4587_v20 = vmax.f32 %v4585_v46, %v14070_v50  ;;  %v14085_v46 = vld [vmem:[#allocation46_spill] sm:$0xff]  ;;  %v5103_v28 = vld [vmem:[%s12821_s9 + $0x238] sm:$0xff]  ;;  %5462 = vperm.xlu0 %6001, %v5102_v59  }
 0x30e   :  { %v4916_v49 = vadd.f32 %v14069_v16, %v4915_v36  ;;  %v4469_v11 = vsel %vm412_vm2, %v4396_v8, %v4468_v5  ;;  %v4352_v14 = vrot.slane %v4351_v58, 1  ;;  %v4588_v47 = vmax.f32 %v4586_v10, %v14071_v23  ;;  %v14086_v5 = vld [vmem:[#allocation23_spill] sm:$0xff]  ;;  %5467 = vperm.xlu1 %6002, %v5103_v28   ;;  %v14103_v28 = vld [vmem:[#allocation21_spill] sm:$0xff] }
 0x30f   :  { %v4397_v4 = vmul.f32 %v11343_v53, %v4339_v0  ;;  %v4398_v43 = vmul.f32 %v11343_v53, %v4346_v7  ;;  %v4360_v31 = vadd.f32 %v4359_v34, %v4358_v29  ;;  %v4589_v3 = vmax.f32 %v4587_v20, %v14073_v48  ;;  %v14087_v29 = vld [vmem:[#allocation58_spill] sm:$0xff]  ;;  %v14090_v34 = vld [vmem:[#allocation37_spill] sm:$0xff] }
 0x310   :  { %v4917_v21 = vadd.f32 %v14072_v30, %v4916_v49  ;;  %v4353_v6 = vadd.f32 %v4352_v14, %v4351_v58  ;;  %6433 = vpow2.f32 %v14075_v51  ;;  %v4590_v54 = vmax.f32 %v4588_v47, %v14077_v33  ;;  %v14091_v49 = vld [vmem:[#allocation67_spill] sm:$0xff]  ;;  %v14097_v51 = vld [vmem:[#allocation105_spill] sm:$0xff] }
 0x311   :  { %v4470_v45 = vsel %vm414_vm3, %v4397_v4, %v4469_v11  ;;  %v4400_v12 = vmul.f32 %v11343_v53, %v4360_v31  ;;  %v4677_v56 = vsub.f32 %v14079_v39, %v14061_v63  ;;  %v14081_v40 = vsub.f32 %v14080_v61, %v14061_v63  ;;  %v14092_v11 = vld [vmem:[#allocation26_spill] sm:$0xff]  ;;  %v11838_v39 = vpop.permute.xlu1 %5127  ;;  %v5091_v61 = vld [vmem:[%s12821_s9 + $0x1d8] sm:$0xff] }
 0x312   :  { %v4918_v13 = vadd.f32 %v14082_v15, %v4917_v21  ;;  %v4399_v62 = vmul.f32 %v11343_v53, %v4353_v6  ;;  %6435 = vpow2.f32 %v14083_v24  ;;  %v4591_v55 = vmax.f32 %v4589_v3, %v14084_v60  ;;  %v14094_v31 = vld [vmem:[#allocation42_spill] sm:$0xff]  ;;  %14098 = vst [vmem:[#allocation8_spill] sm:$0xff] %v11838_v39  ;;  %5407 = vperm.xlu1 %6002, %v5091_v61   ;;  %v14102_v24 = vld [vmem:[#allocation45_spill] sm:$0xff] }
 0x313   :  { %v4784_v9 = vmul.f32 1.442695, %v14081_v40  ;;  %v4592_v8 = vmax.f32 %v4590_v54, %v14085_v46  ;;  %v4471_v42 = vsel %vm416_vm4, %v4398_v43, %v4470_v45  ;;  %v4679_v7 = vsub.f32 %v14086_v5, %v14061_v63  ;;  %v14093_v43 = vld [vmem:[#allocation55_spill] sm:$0xff]  ;;  %v14096_v45 = vld [vmem:[#allocation9_spill] sm:$0xff]  ;;  %v5090_v40 = vld [vmem:[%s12821_s9 + $0x1d0] sm:$0xff] }
 0x314   :  { %v14088_v36 = vsub.f32 %v14087_v29, %v14061_v63  ;;  %v4919_v58 = vadd.f32 %v11786_v44, %v4918_v13  ;;  %v11821_v18 = vpop.eup %6427  ;;  %v4472_v10 = vsel %vm418_vm5, %v4399_v62, %v4471_v42  ;;  %6437 = vpow2.f32 %v4780_v41  ;;  %5402 = vperm.xlu0 %6001, %v5090_v40   ;;  %v14104_v42 = vld [vmem:[#allocation70_spill] sm:$0xff] }
 0x315   :  { %14089 = vst [vmem:[#allocation77_spill] sm:$0xff] %v11821_v18  ;;  %v4593_v38 = vmax.f32 %v4591_v55, %v14090_v34  ;;  %v4594_v20 = vmax.f32 %v4592_v8, %v14091_v49  ;;  %v4473_v4 = vsel %vm420_vm6, %v4400_v12, %v4472_v10  ;;  %v4681_v14 = vsub.f32 %v14092_v11, %v14061_v63  ;;  %v11840_v12 = vpop.permute.xlu0 %5122 }
 0x316   :  { %v4788_v0 = vmul.f32 1.442695, %v14088_v36  ;;  %v4920_v47 = vadd.f32 %v11795_v2, %v4919_v58  ;;  %v11832_v21 = vmul.f32 %v14094_v31, %v14093_v43  ;;  %v11834_v3 = vpop.eup %6429  ;;  %4483 = vst [vmem:[#allocation5 + $0x50] sm:$0x7f] %v4473_v4  ;;  %6439 = vpow2.f32 %v4784_v9  ;;  %14099 = vst [vmem:[#allocation25_spill] sm:$0xff] %v11840_v12  ;;  %v14101_v9 = vld [vmem:[#allocation33_spill] sm:$0xff] }
 0x317   :  { %14095 = vst [vmem:[#allocation79_spill] sm:$0xff] %v11834_v3  ;;  %v4792_v41 = vmul.f32 1.442695, %v4677_v56  ;;  %v4595_v6 = vmax.f32 %v4593_v38, %v14096_v45  ;;  %v4596_v54 = vmax.f32 %v4594_v20, %v14097_v51  ;;  %v11848_v13 = vpop.eup %6431  ;;  %v11853_v62 = vmul.f32 %v14094_v31, %v14101_v9  ;;  %v14105_v36 = vld [vmem:[#allocation52_spill] sm:$0xff]  ;;  %v14129_v12 = vld [vmem:[#allocation83_spill] sm:$0xff] }
 0x318   :  { %14100 = vst [vmem:[#allocation49_spill] sm:$0xff] %v11848_v13  ;;  %v4921_v56 = vadd.f32 %v11821_v18, %v4920_v47  ;;  %v4683_v55 = vsub.f32 %v14102_v24, %v14061_v63  ;;  %6441 = vpow2.f32 %v4788_v0  ;;  %v4796_v8 = vmul.f32 1.442695, %v4679_v7  ;;  %v14107_v20 = vld [vmem:[#allocation60_spill] sm:$0xff]  ;;  %v11870_v0 = vpop.permute.xlu1 %5137  ;;  %v5105_v47 = vld [vmem:[%s12821_s9 + $0x248] sm:$0xff] }
 0x319   :  { %v11859_v59 = vmul.f32 %v14094_v31, %v14103_v28  ;;  %v4685_v5 = vsub.f32 %v14104_v42, %v14061_v63  ;;  %v4597_v58 = vmax.f32 %v4595_v6, %v14105_v36  ;;  %v4598_v10 = vmax.f32 %v4596_v54, %v11832_v21  ;;  %14108 = vst [vmem:[#allocation29_spill] sm:$0xff] %v11870_v0  ;;  %v11872_v11 = vpop.permute.xlu0 %5132  ;;  %v5104_v43 = vld [vmem:[%s12821_s9 + $0x240] sm:$0xff]  ;;  %v14110_v31 = vld [vmem:[#allocation71_spill] sm:$0xff] }
 0x31a   :  { %v4922_v29 = vadd.f32 %v11834_v3, %v4921_v56  ;;  %v11866_v38 = vpop.eup %6433  ;;  %v4687_v4 = vsub.f32 %v14107_v20, %v14061_v63  ;;  %6443 = vpow2.f32 %v4792_v41  ;;  %v4800_v7 = vmul.f32 1.442695, %v4681_v14  ;;  %14109 = vst [vmem:[#allocation61_spill] sm:$0xff] %v11872_v11  ;;  %5477 = vperm.xlu1 %6002, %v5105_v47   ;;  %5472 = vperm.xlu0 %6001, %v5104_v43   ;;  %v14112_v41 = vld [vmem:[#allocation36_spill] sm:$0xff] }
 0x31b   :  { %14106 = vst [vmem:[#allocation50_spill] sm:$0xff] %v11866_v38  ;;  %v4689_v6 = vsub.f32 %v14110_v31, %v14061_v63  ;;  %v4691_v61 = vsub.f32 %v14112_v41, %v14061_v63  ;;  %6445 = vpow2.f32 %v4796_v8  ;;  %v4804_v40 = vmul.f32 1.442695, %v4683_v55  ;;  %v5093_v55 = vld [vmem:[%s12821_s9 + $0x1e8] sm:$0xff]  ;;  %v5092_v8 = vld [vmem:[%s12821_s9 + $0x1e0] sm:$0xff] }
 0x31c   :  { %v4923_v54 = vadd.f32 %v11848_v13, %v4922_v29  ;;  %v11883_v14 = vpop.eup %6435  ;;  %v4808_v56 = vmul.f32 1.442695, %v4685_v5  ;;  %v4599_v24 = vmax.f32 %v4597_v58, %v11853_v62  ;;  %v4600_v28 = vmax.f32 %v4598_v10, %v11859_v59  ;;  %v14114_v29 = vld [vmem:[#allocation72_spill] sm:$0xff]  ;;  %v11894_v43 = vpop.permute.xlu1 %5147 }
 0x31d   :  { %14111 = vst [vmem:[#allocation56_spill] sm:$0xff] %v11883_v14  ;;  %v4693_v20 = vsub.f32 %v14114_v29, %v14061_v63  ;;  %6447 = vpow2.f32 %v4800_v7  ;;  %v4812_v47 = vmul.f32 1.442695, %v4687_v4  ;;  %14115 = vst [vmem:[#allocation30_spill] sm:$0xff] %v11894_v43  ;;  %v11896_v31 = vpop.permute.xlu0 %5142  ;;  %v4816_v5 = vmul.f32 1.442695, %v4689_v6 }
 0x31e   :  { %v4924_v9 = vadd.f32 %v11866_v38, %v4923_v54  ;;  %v11890_v42 = vpop.eup %6437  ;;  %14116 = vst [vmem:[#allocation38_spill] sm:$0xff] %v11896_v31  ;;  %5417 = vperm.xlu1 %6002, %v5093_v55   ;;  %6449 = vpow2.f32 %v4804_v40  ;;  %v4820_v4 = vmul.f32 1.442695, %v4691_v61  ;;  %5412 = vperm.xlu0 %6001, %v5092_v8   ;;  %v11908_v54 = vmax.f32 %v4600_v28, %v4599_v24  ;;  %v14119_v29 = vld [vmem:[#allocation62_spill] sm:$0xff]  ;;  %v5107_v61 = vld [vmem:[%s12821_s9 + $0x258] sm:$0xff]  ;;  %v14122_v28 = vld [vmem:[#allocation76_spill] sm:$0xff] }
 0x31f   :  { %14113 = vst [vmem:[#allocation14_spill] sm:$0xff] %v11890_v42  ;;  %6451 = vpow2.f32 %v4808_v56  ;;  %v4695_v53 = vsub.f32 %v14119_v29, %v14061_v63  ;;  %v4824_v6 = vmul.f32 1.442695, %v4693_v20  ;;  %v5106_v40 = vld [vmem:[%s12821_s9 + $0x250] sm:$0xff]  ;;  %v4697_v20 = vsub.f32 %v14122_v28, %v14061_v63  ;;  %v14123_v55 = vld [vmem:[#allocation27_spill] sm:$0xff] }
 0x320   :  { %v4925_v58 = vadd.f32 %v11883_v14, %v4924_v9  ;;  %v11905_v10 = vpop.eup %6439  ;;  %6453 = vpow2.f32 %v4812_v47  ;;  %v11914_v31 = vpop.permute.xlu1 %5157  ;;  %v4640_v8 = vsub.f32 %v14123_v55, %v11908_v54  ;;  %v5095_v55 = vld [vmem:[%s12821_s9 + $0x1f8] sm:$0xff]  ;;  %v4701_v0 = vsub.f32 %v14131_v32, %v14061_v63  ;;  %v5108_v32 = vld [vmem:[%s12821_s9 + $0x260] sm:$0xff]  ;;  %v14136_v14 = vld [vmem:[#allocation73_spill] sm:$0xff] }
 0x321   :  { %14117 = vst [vmem:[#allocation63_spill] sm:$0xff] %v11905_v10  ;;  %14120 = vst [vmem:[#allocation39_spill] sm:$0xff] %v11914_v31  ;;  %v11916_v9 = vpop.permute.xlu0 %5152  ;;  %6455 = vpow2.f32 %v4816_v5  ;;  %v14125_v5 = vld [vmem:[#allocation43_spill] sm:$0xff]  ;;  %v4828_v28 = vmul.f32 1.442695, %v4695_v53  ;;  %v4705_v38 = vsub.f32 %v14136_v14, %v14061_v63  ;;  %v14140_v14 = vld [vmem:[#allocation90_spill] sm:$0xff] }
 0x322   :  { %v4926_v7 = vadd.f32 %v11890_v42, %v4925_v58  ;;  %v11910_v41 = vpop.eup %6441  ;;  %14121 = vst [vmem:[#allocation68_spill] sm:$0xff] %v11916_v9  ;;  %5487 = vperm.xlu1 %6002, %v5107_v61   ;;  %6457 = vpow2.f32 %v4820_v4  ;;  %5482 = vperm.xlu0 %6001, %v5106_v40   ;;  %v14124_v58 = vld [vmem:[#allocation48_spill] sm:$0xff]  ;;  %v4644_v9 = vsub.f32 %v14125_v5, %v11908_v54  ;;  %v14127_v4 = vld [vmem:[#allocation10_spill] sm:$0xff] }
 0x323   :  { %14118 = vst [vmem:[#allocation54_spill] sm:$0xff] %v11910_v41  ;;  %v4642_v29 = vsub.f32 %v14124_v58, %v11908_v54  ;;  %v14126_v61 = vld [vmem:[#allocation32_spill] sm:$0xff]  ;;  %6459 = vpow2.f32 %v4824_v6  ;;  %v4646_v40 = vsub.f32 %v14127_v4, %v11908_v54  ;;  %v5094_v58 = vld [vmem:[%s12821_s9 + $0x1f0] sm:$0xff] }
 0x324   :  { %v4927_v56 = vadd.f32 %v11905_v10, %v4926_v7  ;;  %v11925_v24 = vpop.eup %6443  ;;  %v4699_v11 = vsub.f32 %v14126_v61, %v14061_v63  ;;  %v4648_v61 = vsub.f32 %v14129_v12, %v11908_v54  ;;  %v4726_v31 = vmul.f32 1.442695, %v4644_v9  ;;  %v5109_v9 = vld [vmem:[%s12821_s9 + $0x268] sm:$0xff] }
 0x325   :  { %v11936_v7 = vpop.eup %6445  ;;  %v4722_v53 = vmul.f32 1.442695, %v4642_v29  ;;  %6461 = vpow2.f32 %v4828_v28  ;;  %v14134_v29 = vld [vmem:[#allocation80_spill] sm:$0xff] }
 0x326   :  { %v4928_v47 = vadd.f32 %v11910_v41, %v4927_v56  ;;  %v11942_v56 = vpop.permute.xlu1 %5167  ;;  %5427 = vperm.xlu1 %6002, %v5095_v55   ;;  %v11967_v41 = vpop.permute.xlu0 %5162  ;;  %5422 = vperm.xlu0 %6001, %v5094_v58   ;;  %v4718_v55 = vmul.f32 1.442695, %v4640_v8  ;;  %v14133_v58 = vld [vmem:[#allocation84_spill] sm:$0xff]  ;;  %v4730_v8 = vmul.f32 1.442695, %v4646_v40  ;;  %v4703_v28 = vsub.f32 %v14134_v29, %v14061_v63 }
 0x327   :  { %14128 = vst [vmem:[#allocation15_spill] sm:$0xff] %v11942_v56  ;;  %v11957_v4 = vpop.eup %6447  ;;  %14130 = vst [vmem:[#allocation44_spill] sm:$0xff] %v11967_v41  ;;  %v4832_v56 = vmul.f32 1.442695, %v4697_v20  ;;  %v4650_v41 = vsub.f32 %v14133_v58, %v11908_v54  ;;  %v4840_v29 = vmul.f32 1.442695, %v4701_v0  ;;  %v4656_v0 = vsub.f32 %v14140_v14, %v11908_v54 }
 0x328   :  { %v4929_v5 = vadd.f32 %v11925_v24, %v4928_v47  ;;  %v11970_v43 = vpop.eup %6449  ;;  %6463 = vpow2.f32 %v4718_v55  ;;  %v14135_v55 = vld [vmem:[#allocation88_spill] sm:$0xff] }
 0x329   :  { %v11976_v47 = vpop.eup %6451  ;;  %6465 = vpow2.f32 %v4722_v53  ;;  %v4652_v58 = vsub.f32 %v14135_v55, %v11908_v54  ;;  %v4738_v55 = vmul.f32 1.442695, %v4650_v41 }
 0x32a   :  { %v4930_v6 = vadd.f32 %v11936_v7, %v4929_v5  ;;  %v11974_v10 = vpop.permute.xlu1 %5177  ;;  %v11987_v20 = vpop.eup %6453  ;;  %v4836_v5 = vmul.f32 1.442695, %v4699_v11  ;;  %5497 = vperm.xlu1 %6002, %v5109_v9   ;;  %5492 = vperm.xlu0 %6001, %v5108_v32   ;;  %6467 = vpow2.f32 %v4726_v31 }
 0x32b   :  { %14132 = vst [vmem:[#allocation65_spill] sm:$0xff] %v11974_v10  ;;  %v4734_v10 = vmul.f32 1.442695, %v4648_v61  ;;  %6469 = vpow2.f32 %v4832_v56  ;;  %v12000_v11 = vpop.permute.xlu0 %5172  ;;  %v4844_v61 = vmul.f32 1.442695, %v4703_v28  ;;  %v14143_v28 = vld [vmem:[#allocation59_spill] sm:$0xff] }
 0x32c   :  { %v4931_v12 = vadd.f32 %v11957_v4, %v4930_v6  ;;  %v11991_v6 = vpop.eup %6455  ;;  %14137 = vst [vmem:[#allocation34_spill] sm:$0xff] %v12000_v11  ;;  %6471 = vpow2.f32 %v4730_v8  ;;  %v4742_v56 = vmul.f32 1.442695, %v4652_v58  ;;  %v4848_v11 = vmul.f32 1.442695, %v4705_v38  ;;  %v14142_v8 = vld [vmem:[#allocation91_spill] sm:$0xff] }
 0x32d   :  { %v11996_v42 = vpop.eup %6457  ;;  %6473 = vpow2.f32 %v4836_v5  ;;  %v4658_v41 = vsub.f32 %v14142_v8, %v11908_v54  ;;  %v4750_v8 = vmul.f32 1.442695, %v4656_v0  ;;  %v14154_v0 = vld [vmem:[#allocation19_spill] sm:$0xff] }
 0x32e   :  { %v4932_v40 = vadd.f32 %v11970_v43, %v4931_v12  ;;  %v12002_v53 = vpop.permute.xlu1 %5187  ;;  %v14139_v12 = vld [vmem:[#allocation89_spill] sm:$0xff]  ;;  %v12007_v31 = vpop.eup %6459  ;;  %6475 = vpow2.f32 %v4734_v10 }
 0x32f   :  { %14138 = vst [vmem:[#allocation74_spill] sm:$0xff] %v12002_v53  ;;  %v4654_v32 = vsub.f32 %v14139_v12, %v11908_v54  ;;  %6477 = vpow2.f32 %v4840_v29  ;;  %v12017_v5 = vpop.eup %6461  ;;  %v12022_v10 = vpop.permute.xlu0 %5182 }
 0x330   :  { %v4933_v9 = vadd.f32 %v11976_v47, %v4932_v40  ;;  %6479 = vpow2.f32 %v4738_v55  ;;  %14145 = vst [vmem:[#allocation81_spill] sm:$0xff] %v12022_v10 }
 0x331   :  { %v4746_v12 = vmul.f32 1.442695, %v4654_v32  ;;  %6481 = vpow2.f32 %v4844_v61  ;;  %v14149_v32 = vld [vmem:[#allocation75_spill] sm:$0xff] }
 0x332   :  { %v4934_v13 = vadd.f32 %v11987_v20, %v4933_v9  ;;  %v12012_v53 = vpop.permute.xlu1 %5197  ;;  %v14144_v9 = vsub.f32 %v14143_v28, %v14061_v63  ;;  %v12024_v58 = vpop.eup %6463  ;;  %6483 = vpow2.f32 %v4742_v56  ;;  %v14150_v61 = vsub.f32 %v14149_v32, %v14061_v63 }
 0x333   :  { %14141 = vst [vmem:[#allocation12_spill] sm:$0xff] %v12012_v53  ;;  %14146 = vst [vmem:[#allocation85_spill] sm:$0xff] %v12024_v58  ;;  %v12029_v55 = vpop.eup %6465  ;;  %6485 = vpow2.f32 %v4848_v11  ;;  %v14155_v11 = vsub.f32 %v14154_v0, %v14061_v63  ;;  %v12059_v44 = vpop.permute.xlu0 %5192 }
 0x334   :  { %v4935_v40 = vadd.f32 %v11991_v6, %v4934_v13  ;;  %v4852_v14 = vmul.f32 1.442695, %v14144_v9  ;;  %v14147_v13 = vld [vmem:[#allocation93_spill] sm:$0xff]  ;;  %14148 = vst [vmem:[#allocation92_spill] sm:$0xff] %v12029_v55  ;;  %v4856_v53 = vmul.f32 1.442695, %v14150_v61  ;;  %v12036_v9 = vpop.eup %6467  ;;  %6487 = vpow2.f32 %v4746_v12 }
 0x335   :  { %v4660_v29 = vsub.f32 %v14147_v13, %v11908_v54  ;;  %14152 = vst [vmem:[#allocation17_spill] sm:$0xff] %v12036_v9  ;;  %v4754_v13 = vmul.f32 1.442695, %v4658_v41  ;;  %v12041_v56 = vpop.eup %6469  ;;  %v4860_v18 = vmul.f32 1.442695, %v14155_v11  ;;  %v4874_v32 = vadd.f32 %v12029_v55, %v12024_v58  ;;  %14160 = vst [vmem:[#allocation13_spill] sm:$0xff] %v12059_v44 }
 0x336   :  { %v4936_v38 = vadd.f32 %v11996_v42, %v4935_v40  ;;  %v12034_v28 = vpop.permute.xlu1 %5207  ;;  %v14153_v40 = vld [vmem:[#allocation95_spill] sm:$0xff]  ;;  %6489 = vpow2.f32 %v4852_v14  ;;  %v12048_v61 = vpop.eup %6471  ;;  %v14158_v14 = vld [vmem:[#allocation82_spill] sm:$0xff] }
 0x337   :  { %14151 = vst [vmem:[#allocation101_spill] sm:$0xff] %v12034_v28  ;;  %v4662_v3 = vsub.f32 %v14153_v40, %v11908_v54  ;;  %14156 = vst [vmem:[#allocation20_spill] sm:$0xff] %v12048_v61  ;;  %6491 = vpow2.f32 %v4750_v8  ;;  %v4758_v12 = vmul.f32 1.442695, %v4660_v29  ;;  %v12053_v41 = vpop.eup %6473  ;;  %v14159_v40 = vsub.f32 %v14158_v14, %v14061_v63  ;;  %v14163_v8 = vld [vmem:[#allocation97_spill] sm:$0xff]  ;;  %v14164_v14 = vld [vmem:[#allocation86_spill] sm:$0xff] }
 0x338   :  { %v4937_v10 = vadd.f32 %v12007_v31, %v4936_v38  ;;  %v14157_v38 = vld [vmem:[#allocation96_spill] sm:$0xff]  ;;  %6493 = vpow2.f32 %v4856_v53  ;;  %v4875_v11 = vadd.f32 %v12036_v9, %v4874_v32  ;;  %v12063_v58 = vpop.eup %6475  ;;  %v4666_v29 = vsub.f32 %v14163_v8, %v11908_v54 }
 0x339   :  { %v4664_v2 = vsub.f32 %v14157_v38, %v11908_v54  ;;  %v4864_v0 = vmul.f32 1.442695, %v14159_v40  ;;  %14162 = vst [vmem:[#allocation47_spill] sm:$0xff] %v12063_v58  ;;  %6495 = vpow2.f32 %v4754_v13  ;;  %v4762_v38 = vmul.f32 1.442695, %v4662_v3  ;;  %v12068_v53 = vpop.eup %6477  ;;  %v14168_v3 = vld [vmem:[#allocation87_spill] sm:$0xff] }
 0x33a   :  { %v4938_v28 = vadd.f32 %v12017_v5, %v4937_v10  ;;  %v12061_v55 = vpop.permute.xlu1 %5217  ;;  %6497 = vpow2.f32 %v4860_v18  ;;  %v14165_v40 = vsub.f32 %v14164_v14, %v14061_v63  ;;  %v4876_v44 = vadd.f32 %v12048_v61, %v4875_v11  ;;  %v12074_v9 = vpop.eup %6479  ;;  %v14172_v61 = vld [vmem:[#allocation31_spill] sm:$0xff] }
 0x33b   :  { %14161 = vst [vmem:[#allocation102_spill] sm:$0xff] %v12061_v55  ;;  %14166 = vst [vmem:[#allocation69_spill] sm:$0xff] %v12074_v9  ;;  %6499 = vpow2.f32 %v4758_v12  ;;  %v4766_v8 = vmul.f32 1.442695, %v4664_v2  ;;  %v12079_v13 = vpop.eup %6481  ;;  %v14169_v18 = vsub.f32 %v14168_v3, %v14061_v63  ;;  %v4770_v2 = vmul.f32 1.442695, %v4666_v29  ;;  %v12095_v63 = vpop.permute.xlu0 %5202 }
 0x33c   :  { %v4939_v10 = vadd.f32 %v12041_v56, %v4938_v28  ;;  %v4868_v32 = vmul.f32 1.442695, %v14165_v40  ;;  %v14167_v28 = vld [vmem:[#allocation98_spill] sm:$0xff]  ;;  %6501 = vpow2.f32 %v4864_v0  ;;  %v4877_v14 = vadd.f32 %v12063_v58, %v4876_v44  ;;  %v12087_v11 = vpop.eup %6483  ;;  %14173 = vst [vmem:[#allocation64_spill] sm:$0xff] %v12095_v63 }
 0x33d   :  { %v4668_v15 = vsub.f32 %v14167_v28, %v11908_v54  ;;  %v4872_v39 = vmul.f32 1.442695, %v14169_v18  ;;  %14171 = vst [vmem:[#allocation103_spill] sm:$0xff] %v12087_v11  ;;  %v4670_v28 = vsub.f32 %v14172_v61, %v11908_v54  ;;  %6503 = vpow2.f32 %v4762_v38  ;;  %v12092_v12 = vpop.eup %6485  ;;  %v14175_v18 = vld [vmem:[#allocation99_spill] sm:$0xff] }
 0x33e   :  { %v4940_v55 = vadd.f32 %v12053_v41, %v4939_v10  ;;  %v12085_v40 = vpop.permute.xlu1 %5227  ;;  %6505 = vpow2.f32 %v4868_v32  ;;  %v4878_v0 = vadd.f32 %v12074_v9, %v4877_v14  ;;  %v12097_v3 = vpop.eup %6487  ;;  %v4672_v58 = vsub.f32 %v14175_v18, %v11908_v54  ;;  %v14177_v14 = vld [vmem:[#allocation100_spill] sm:$0xff] }
 0x33f   :  { %14170 = vst [vmem:[#allocation22_spill] sm:$0xff] %v12085_v40  ;;  %14174 = vst [vmem:[#allocation11_spill] sm:$0xff] %v12097_v3  ;;  %6507 = vpow2.f32 %v4766_v8  ;;  %v4674_v63 = vsub.f32 %v14177_v14, %v11908_v54  ;;  %v12123_v14 = vpop.permute.xlu0 %5212 }
 0x340   :  { %v4941_v10 = vadd.f32 %v12068_v53, %v4940_v55  ;;  %v4774_v55 = vmul.f32 1.442695, %v4668_v15  ;;  %v12102_v40 = vpop.eup %6489  ;;  %6509 = vpow2.f32 %v4872_v39  ;;  %v4879_v61 = vadd.f32 %v12087_v11, %v4878_v0  ;;  %14179 = vst [vmem:[#allocation53_spill] sm:$0xff] %v12123_v14 }
 0x341   :  { %v12107_v38 = vpop.eup %6491  ;;  %6511 = vpow2.f32 %v4770_v2  ;;  %v4676_v0 = vsub.f32 %v11402_v25, %v11908_v54  ;;  %v4782_v18 = vmul.f32 1.442695, %v4672_v58  ;;  %v4680_v14 = vsub.f32 %v11411_v35, %v11908_v54 }
 0x342   :  { %v4942_v44 = vadd.f32 %v12079_v13, %v4941_v10  ;;  %v12105_v29 = vpop.permute.xlu1 %5237  ;;  %14176 = vst [vmem:[#allocation28_spill] sm:$0xff] %v12107_v38  ;;  %v4778_v10 = vmul.f32 1.442695, %v4670_v28  ;;  %v12112_v9 = vpop.eup %6493  ;;  %v4880_v15 = vadd.f32 %v12097_v3, %v4879_v61  ;;  %6513 = vpow2.f32 %v4774_v55 }
 0x343   :  { %v12115_v8 = vpop.eup %6495  ;;  %v4786_v3 = vmul.f32 1.442695, %v4674_v63 }
 0x344   :  { %v4943_v32 = vadd.f32 %v12092_v12, %v4942_v44  ;;  %14178 = vst [vmem:[#allocation41_spill] sm:$0xff] %v12115_v8  ;;  %v12120_v11 = vpop.eup %6497  ;;  %v4881_v44 = vadd.f32 %v12107_v38, %v4880_v15  ;;  %6515 = vpow2.f32 %v4778_v10  ;;  %v4790_v38 = vmul.f32 1.442695, %v4676_v0  ;;  %v12153_v0 = vpop.permute.xlu0 %5222 }
 0x345   :  { %v12127_v2 = vpop.eup %6499  ;;  %6517 = vpow2.f32 %v4782_v18  ;;  %14185 = vst [vmem:[#allocation58_spill] sm:$0xff] %v12153_v0 }
 0x346   :  { %v4944_v39 = vadd.f32 %v12102_v40, %v4943_v32  ;;  %v12125_v28 = vpop.permute.xlu1 %5247  ;;  %14181 = vst [vmem:[#allocation16_spill] sm:$0xff] %v12127_v2  ;;  %v4678_v32 = vsub.f32 %v11406_v22, %v11908_v54  ;;  %v12132_v25 = vpop.eup %6501  ;;  %v4882_v58 = vadd.f32 %v12115_v8, %v4881_v44  ;;  %v4682_v44 = vsub.f32 %v11415_v1, %v11908_v54 }
 0x347   :  { %14180 = vst [vmem:[#allocation78_spill] sm:$0xff] %v12125_v28  ;;  %v12135_v55 = vpop.eup %6503  ;;  %6519 = vpow2.f32 %v4786_v3 }
 0x348   :  { %v4945_v61 = vadd.f32 %v12112_v9, %v4944_v39  ;;  %14182 = vst [vmem:[#allocation104_spill] sm:$0xff] %v12135_v55  ;;  %v12140_v28 = vpop.eup %6505  ;;  %v4883_v39 = vadd.f32 %v12127_v2, %v4882_v58  ;;  %v4684_v2 = vsub.f32 %v11419_v26, %v11908_v54  ;;  %6521 = vpow2.f32 %v4790_v38 }
 0x349   :  { %v12145_v63 = vpop.eup %6507  ;;  %v4802_v0 = vmul.f32 1.442695, %v4682_v44  ;;  %v4688_v26 = vsub.f32 %v14067_v52, %v11908_v54  ;;  %v4692_v52 = vsub.f32 %v14071_v23, %v11908_v54  ;;  %v4696_v23 = vsub.f32 %v14077_v33, %v11908_v54 }
 0x34a   :  { %v4946_v15 = vadd.f32 %v12120_v11, %v4945_v61  ;;  %v12143_v22 = vpop.permute.xlu1 %5257  ;;  %14184 = vst [vmem:[#allocation23_spill] sm:$0xff] %v12145_v63  ;;  %v4794_v61 = vmul.f32 1.442695, %v4678_v32  ;;  %v12150_v8 = vpop.eup %6509  ;;  %v4884_v35 = vadd.f32 %v12135_v55, %v4883_v39  ;;  %v4686_v39 = vsub.f32 %v14063_v37, %v11908_v54 }
 0x34b   :  { %14183 = vst [vmem:[#allocation46_spill] sm:$0xff] %v12143_v22  ;;  %v12155_v18 = vpop.eup %6511  ;;  %v4806_v38 = vmul.f32 1.442695, %v4684_v2  ;;  %v4690_v37 = vsub.f32 %v14070_v50, %v11908_v54  ;;  %v4814_v2 = vmul.f32 1.442695, %v4688_v26  ;;  %v4694_v50 = vsub.f32 %v14073_v48, %v11908_v54 }
 0x34c   :  { %v4947_v10 = vadd.f32 %v12132_v25, %v4946_v15  ;;  %14186 = vst [vmem:[#allocation37_spill] sm:$0xff] %v12155_v18  ;;  %v4798_v15 = vmul.f32 1.442695, %v4680_v14  ;;  %v4885_v22 = vadd.f32 %v12145_v63, %v4884_v35  ;;  %v12163_v3 = vpop.eup %6513  ;;  %6523 = vpow2.f32 %v4794_v61  ;;  %v12174_v35 = vpop.permute.xlu0 %5232 }
 0x34d   :  { %14187 = vst [vmem:[#allocation67_spill] sm:$0xff] %v12163_v3  ;;  %14189 = vst [vmem:[#allocation55_spill] sm:$0xff] %v12174_v35  ;;  %v4822_v26 = vmul.f32 1.442695, %v4692_v52  ;;  %v4698_v48 = vsub.f32 %v14084_v60, %v11908_v54  ;;  %v4700_v33 = vsub.f32 %v14085_v46, %v11908_v54  ;;  %v4830_v52 = vmul.f32 1.442695, %v4696_v23 }
 0x34e   :  { %v4948_v58 = vadd.f32 %v12140_v28, %v4947_v10  ;;  %v12161_v1 = vpop.permute.xlu1 %5267  ;;  %v4886_v10 = vadd.f32 %v12155_v18, %v4885_v22  ;;  %v12169_v55 = vpop.eup %6515  ;;  %6525 = vpow2.f32 %v4798_v15  ;;  %v4810_v22 = vmul.f32 1.442695, %v4686_v39  ;;  %v14257_v18 = vld [vmem:[#allocation74_spill] sm:$0xff] }
 0x34f   :  { %14188 = vst [vmem:[#allocation26_spill] sm:$0xff] %v12169_v55  ;;  %6527 = vpow2.f32 %v4802_v0  ;;  %v4818_v0 = vmul.f32 1.442695, %v4690_v37  ;;  %v4702_v60 = vsub.f32 %v14090_v34, %v11908_v54  ;;  %v4838_v23 = vmul.f32 1.442695, %v4700_v33  ;;  %v6582_v33 = vld [vmem:[%s12814_s2 + $0x8] sm:$0xff] }
 0x350   :  { %v4949_v32 = vadd.f32 %v12150_v8, %v4948_v58  ;;  %v4887_v14 = vadd.f32 %v12163_v3, %v4886_v10  ;;  %v12178_v58 = vpop.eup %6517  ;;  %6529 = vpow2.f32 %v4806_v38 }
 0x351   :  { %14190 = vst [vmem:[#allocation42_spill] sm:$0xff] %v12178_v58  ;;  %v12183_v61 = vpop.eup %6519  ;;  %6531 = vpow2.f32 %v4810_v22  ;;  %v4842_v34 = vmul.f32 1.442695, %v4702_v60 }
 0x352   :  { %v12176_v63 = vpop.permute.xlu1 %5277  ;;  %v4888_v44 = vadd.f32 %v12169_v55, %v4887_v14  ;;  %14191 = vst [vmem:[#allocation9_spill] sm:$0xff] %v12183_v61  ;;  %v12190_v3 = vpop.eup %6521  ;;  %6533 = vrcp.f32 %v4949_v32  ;;  %v4826_v32 = vmul.f32 1.442695, %v4694_v50  ;;  %v4834_v50 = vmul.f32 1.442695, %v4698_v48 }
 0x353   :  { %14192 = vst [vmem:[#allocation105_spill] sm:$0xff] %v12190_v3  ;;  %v12195_v14 = vpop.permute.xlu0 %5242  ;;  %6535 = vpow2.f32 %v4814_v2 }
 0x354   :  { %v4889_v15 = vadd.f32 %v12178_v58, %v4888_v44  ;;  %14193 = vst [vmem:[#allocation33_spill] sm:$0xff] %v12195_v14  ;;  %6537 = vpow2.f32 %v4818_v0  ;;  %v4704_v0 = vsub.f32 %v14091_v49, %v11908_v54 }
 0x355   :  { %6539 = vpow2.f32 %v4822_v26 }
 0x356   :  { %v12188_v10 = vpop.permute.xlu1 %5287  ;;  %v4890_v39 = vadd.f32 %v12183_v61, %v4889_v15  ;;  %v12197_v55 = vpop.eup %6523  ;;  %6541 = vpow2.f32 %v4826_v32  ;;  %v4846_v32 = vmul.f32 1.442695, %v4704_v0 }
 0x357   :  { %14194 = vst [vmem:[#allocation45_spill] sm:$0xff] %v12197_v55  ;;  %v12214_v15 = vpop.permute.xlu0 %5252  ;;  %6543 = vpow2.f32 %v4830_v52 }
 0x358   :  { %v4891_v38 = vadd.f32 %v12190_v3, %v4890_v39  ;;  %v12204_v58 = vpop.eup %6525  ;;  %14197 = vst [vmem:[#allocation52_spill] sm:$0xff] %v12214_v15  ;;  %6545 = vpow2.f32 %v4834_v50  ;;  %v14255_v15 = vld [vmem:[#allocation15_spill] sm:$0xff] }
 0x359   :  { %14195 = vst [vmem:[#allocation21_spill] sm:$0xff] %v12204_v58  ;;  %v12209_v22 = vpop.eup %6527  ;;  %6547 = vpow2.f32 %v4838_v23 }
 0x35a   :  { %v12202_v44 = vpop.permute.xlu1 %5297  ;;  %v4892_v37 = vadd.f32 %v12197_v55, %v4891_v38  ;;  %14196 = vst [vmem:[#allocation70_spill] sm:$0xff] %v12209_v22  ;;  %v12218_v3 = vpop.eup %6529  ;;  %6549 = vpow2.f32 %v4842_v34 }
 0x35b   :  { %14198 = vst [vmem:[#allocation60_spill] sm:$0xff] %v12218_v3  ;;  %v12225_v26 = vpop.eup %6531  ;;  %v12233_v61 = vpop.permute.xlu0 %5262  ;;  %6551 = vpow2.f32 %v4846_v32 }
 0x35c   :  { %v4893_v2 = vadd.f32 %v12204_v58, %v4892_v37  ;;  %14199 = vst [vmem:[#allocation71_spill] sm:$0xff] %v12225_v26  ;;  %v6534_v38 = vpop.eup %6533  ;;  %14201 = vst [vmem:[#allocation72_spill] sm:$0xff] %v12233_v61  ;;  %v14254_v61 = vld [vmem:[#allocation54_spill] sm:$0xff] }
 0x35d   :  { %v12230_v55 = vpop.eup %6535  ;;  %v12240_v52 = vmul.f32 %v6582_v33, %v6534_v38 }
 0x35e   :  { %v12216_v39 = vpop.permute.xlu1 %5307  ;;  %v4894_v46 = vadd.f32 %v12209_v22, %v4893_v2  ;;  %14200 = vst [vmem:[#allocation36_spill] sm:$0xff] %v12230_v55  ;;  %v12235_v49 = vpop.eup %6537  ;;  %v14203_v2 = vsub.f32 %v14096_v45, %v11908_v54  ;;  %v14205_v45 = vsub.f32 %v14097_v51, %v11908_v54 }
 0x35f   :  { %14202 = vst [vmem:[#allocation62_spill] sm:$0xff] %v12235_v49  ;;  %v12248_v0 = vpop.eup %6539  ;;  %v12256_v38 = vmul.f32 %v11936_v7, %v12240_v52  ;;  %v12260_v23 = vmul.f32 %v11957_v4, %v12240_v52  ;;  %v12276_v4 = vmul.f32 %v11970_v43, %v12240_v52  ;;  %v12282_v51 = vmul.f32 %v11976_v47, %v12240_v52 }
 0x360   :  { %v4895_v37 = vadd.f32 %v12218_v3, %v4894_v46  ;;  %v4850_v46 = vmul.f32 1.442695, %v14203_v2  ;;  %14204 = vst [vmem:[#allocation76_spill] sm:$0xff] %v12248_v0  ;;  %v12266_v34 = vpop.eup %6541  ;;  %v12296_v43 = vmul.f32 %v11996_v42, %v12240_v52  ;;  %v12304_v47 = vmul.f32 %v12017_v5, %v12240_v52 }
 0x361   :  { %14206 = vst [vmem:[#allocation27_spill] sm:$0xff] %v12266_v34  ;;  %v12322_v5 = vmul.f32 %v12112_v9, %v12240_v52 }
 0x362   :  { %v12228_v58 = vpop.permute.xlu1 %5317  ;;  %v4896_v48 = vadd.f32 %v12225_v26, %v4895_v37  ;;  %v12252_v37 = vmul.f32 %v11925_v24, %v12240_v52  ;;  %6553 = vpow2.f32 %v4850_v46  ;;  %v14207_v24 = vsub.f32 %v14105_v36, %v11908_v54  ;;  %v12288_v36 = vpop.eup %6543 }
 0x363   :  { %v12286_v46 = vmul.f32 %v11987_v20, %v12240_v52  ;;  %14209 = vst [vmem:[#allocation43_spill] sm:$0xff] %v12288_v36  ;;  %v14210_v20 = vsub.f32 %v11832_v21, %v11908_v54  ;;  %v12314_v42 = vpop.eup %6545  ;;  %v12326_v21 = vmul.f32 %v12041_v56, %v12240_v52 }
 0x364   :  { %v4897_v60 = vadd.f32 %v12230_v55, %v4896_v48  ;;  %v4854_v48 = vmul.f32 1.442695, %v14205_v45  ;;  %v4858_v2 = vmul.f32 1.442695, %v14207_v24  ;;  %v12272_v55 = vpop.permute.xlu0 %5272  ;;  %v12300_v45 = vmul.f32 %v12007_v31, %v12240_v52  ;;  %14211 = vst [vmem:[#allocation32_spill] sm:$0xff] %v12314_v42 }
 0x365   :  { %14208 = vst [vmem:[#allocation48_spill] sm:$0xff] %v12272_v55  ;;  %v12312_v24 = vmul.f32 %v12092_v12, %v12240_v52  ;;  %v12318_v31 = vmul.f32 %v12102_v40, %v12240_v52  ;;  %14212 = vst [vmem:[#allocation10_spill] sm:$0xff] %v12326_v21  ;;  %v14215_v40 = vsub.f32 %v11853_v62, %v11908_v54  ;;  %v14253_v55 = vld [vmem:[#allocation39_spill] sm:$0xff] }
 0x366   :  { %v12246_v50 = vpop.permute.xlu1 %5327  ;;  %v4898_v33 = vadd.f32 %v12235_v49, %v4897_v60  ;;  %v12292_v60 = vmul.f32 %v11991_v6, %v12240_v52  ;;  %6555 = vpow2.f32 %v4854_v48  ;;  %v12330_v48 = vmul.f32 %v12120_v11, %v12240_v52 }
 0x367   :  { %6557 = vpow2.f32 %v4858_v2  ;;  %v4866_v9 = vmul.f32 1.442695, %v14215_v40  ;;  %v14218_v11 = vsub.f32 %v11859_v59, %v11908_v54  ;;  %v12365_v54 = vmul.f32 %v12053_v41, %v12240_v52 }
 0x368   :  { %v4899_v7 = vadd.f32 %v12248_v0, %v4898_v33  ;;  %v4862_v33 = vmul.f32 1.442695, %v14210_v20  ;;  %14213 = vst [vmem:[#allocation83_spill] sm:$0xff] %v12330_v48  ;;  %v12335_v20 = vpop.eup %6547  ;;  %v12341_v0 = vpop.permute.xlu0 %5282 }
 0x369   :  { %14214 = vst [vmem:[#allocation57_spill] sm:$0xff] %v12335_v20  ;;  %14216 = vst [vmem:[#allocation84_spill] sm:$0xff] %v12341_v0  ;;  %v12343_v56 = vpop.eup %6549 }
 0x36a   :  { %v12278_v32 = vpop.permute.xlu1 %5337  ;;  %v4900_v6 = vadd.f32 %v12266_v34, %v4899_v7  ;;  %14217 = vst [vmem:[#allocation80_spill] sm:$0xff] %v12343_v56  ;;  %6559 = vpow2.f32 %v4862_v33  ;;  %v12348_v48 = vpop.eup %6551  ;;  %14223 = vst [vmem:[#allocation91_spill] sm:$0xff] %v12365_v54  ;;  %v12397_v54 = vmul.f32 %v12079_v13, %v12240_v52  ;;  %v4959_v13 = vmul.f32 %v11568_v57, %v12240_v52  ;;  %v14240_v57 = vld [vmem:[#allocation35_spill] sm:$0xff] }
 0x36b   :  { %14219 = vst [vmem:[#allocation88_spill] sm:$0xff] %v12348_v48  ;;  %6561 = vpow2.f32 %v4866_v9 }
 0x36c   :  { %v4901_v12 = vadd.f32 %v12288_v36, %v4900_v6  ;;  %v4870_v6 = vmul.f32 1.442695, %v14218_v11  ;;  %v12353_v49 = vpop.eup %6553  ;;  %v12359_v40 = vpop.permute.xlu0 %5292  ;;  %14232 = vst [vmem:[#allocation86_spill] sm:$0xff] %v12397_v54 }
 0x36d   :  { %14220 = vst [vmem:[#allocation73_spill] sm:$0xff] %v12353_v49  ;;  %14222 = vst [vmem:[#allocation90_spill] sm:$0xff] %v12359_v40 }
 0x36e   :  { %v12333_v7 = vpop.permute.xlu1 %5347  ;;  %v4902_v34 = vadd.f32 %v12314_v42, %v4901_v12  ;;  %6563 = vpow2.f32 %v4870_v6  ;;  %v12375_v6 = vmul.f32 %v12132_v25, %v12240_v52 }
 0x370   :  { %v4903_v36 = vadd.f32 %v12335_v20, %v4902_v34  ;;  %v12356_v12 = vpop.eup %6555  ;;  %14225 = vst [vmem:[#allocation93_spill] sm:$0xff] %v12375_v6  ;;  %v12384_v20 = vpop.permute.xlu0 %5302 }
 0x371   :  { %14221 = vst [vmem:[#allocation89_spill] sm:$0xff] %v12356_v12  ;;  %v12368_v11 = vpop.eup %6557  ;;  %14228 = vst [vmem:[#allocation19_spill] sm:$0xff] %v12384_v20 }
 0x372   :  { %v12351_v2 = vpop.permute.xlu1 %5357  ;;  %v4904_v62 = vadd.f32 %v12343_v56, %v4903_v36  ;;  %14224 = vst [vmem:[#allocation59_spill] sm:$0xff] %v12368_v11  ;;  %v12381_v56 = vmul.f32 %v12068_v53, %v12240_v52 }
 0x374   :  { %v4905_v33 = vadd.f32 %v12348_v48, %v4904_v62  ;;  %v12377_v62 = vpop.eup %6559  ;;  %14227 = vst [vmem:[#allocation95_spill] sm:$0xff] %v12381_v56 }
 0x375   :  { %14226 = vst [vmem:[#allocation75_spill] sm:$0xff] %v12377_v62 }
 0x376   :  { %v12361_v59 = vpop.permute.xlu1 %5367  ;;  %v4906_v34 = vadd.f32 %v12353_v49, %v4905_v33  ;;  %v12388_v33 = vmul.f32 %v12140_v28, %v12240_v52  ;;  %v14234_v28 = vld [vmem:[#allocation18_spill] sm:$0xff] }
 0x378   :  { %v4907_v9 = vadd.f32 %v12356_v12, %v4906_v34  ;;  %14229 = vst [vmem:[#allocation96_spill] sm:$0xff] %v12388_v33  ;;  %v12390_v34 = vpop.eup %6561  ;;  %v4957_v33 = vmul.f32 %v14234_v28, %v12240_v52  ;;  %v12405_v12 = vpop.permute.xlu0 %5312  ;;  %v4967_v28 = vmul.f32 %v14072_v30, %v12240_v52  ;;  %v14244_v30 = vld [vmem:[#allocation79_spill] sm:$0xff] }
 0x379   :  { %14230 = vst [vmem:[#allocation82_spill] sm:$0xff] %v12390_v34  ;;  %v12393_v6 = vpop.eup %6563  ;;  %14235 = vst [vmem:[#allocation98_spill] sm:$0xff] %v12405_v12 }
 0x37a   :  { %v12371_v36 = vpop.permute.xlu1 %5377  ;;  %v4908_v41 = vadd.f32 %v12368_v11, %v4907_v9  ;;  %14231 = vst [vmem:[#allocation97_spill] sm:$0xff] %v12393_v6  ;;  %v14233_v9 = vld [vmem:[#allocation24_spill] sm:$0xff] }
 0x37b   :  { %v4955_v56 = vmul.f32 %v14233_v9, %v12240_v52  ;;  %v4965_v9 = vmul.f32 %v14069_v16, %v12240_v52  ;;  %v14243_v16 = vld [vmem:[#allocation77_spill] sm:$0xff] }
 0x37c   :  { %v4909_v42 = vadd.f32 %v12377_v62, %v4908_v41  ;;  %v12409_v62 = vmul.f32 %v12150_v8, %v12240_v52  ;;  %v14238_v8 = vld [vmem:[#allocation8_spill] sm:$0xff]  ;;  %v4975_v48 = vmul.f32 %v14243_v16, %v12240_v52  ;;  %v12447_v20 = vpop.permute.xlu0 %5322  ;;  %v14251_v16 = vld [vmem:[#allocation29_spill] sm:$0xff] }
 0x37d   :  { %14250 = vst [vmem:[#allocation100_spill] sm:$0xff] %v12447_v20  ;;  %v5505_v40 = vmul.f32 %v14251_v16, %v4959_v13  ;;  %v5511_v14 = vmul.f32 %v14255_v15, %v4965_v9  ;;  %v14259_v20 = vld [vmem:[#allocation101_spill] sm:$0xff]  ;;  %v14260_v13 = vld [vmem:[#allocation102_spill] sm:$0xff]  ;;  %v14272_v9 = vld [vmem:[#allocation11_spill] sm:$0xff] }
 0x37e   :  { %v5388_v25 = vpop.permute.xlu1 %5387  ;;  %v4910_v53 = vadd.f32 %v12390_v34, %v4909_v42  ;;  %14236 = vst [vmem:[#allocation87_spill] sm:$0xff] %v12409_v62  ;;  %v4961_v42 = vmul.f32 %v11574_v27, %v12240_v52  ;;  %v4969_v62 = vmul.f32 %v14240_v57, %v12240_v52  ;;  %v14241_v27 = vld [vmem:[#allocation51_spill] sm:$0xff]  ;;  %v14247_v57 = vld [vmem:[#allocation56_spill] sm:$0xff]  ;;  %v14262_v15 = vld [vmem:[#allocation78_spill] sm:$0xff] }
 0x37f   :  { %v4971_v54 = vmul.f32 %v14241_v27, %v12240_v52  ;;  %v4983_v3 = vmul.f32 %v14247_v57, %v12240_v52  ;;  %v14248_v27 = vld [vmem:[#allocation14_spill] sm:$0xff]  ;;  %v14256_v57 = vld [vmem:[#allocation65_spill] sm:$0xff] }
 0x380   :  { %v4911_v11 = vadd.f32 %v12393_v6, %v4910_v53  ;;  %v4963_v53 = vmul.f32 %v14065_v17, %v12240_v52  ;;  %v12422_v6 = vmul.f32 %v11789_v19, %v4955_v56  ;;  %v14242_v17 = vld [vmem:[#allocation40_spill] sm:$0xff]  ;;  %v4977_v19 = vmul.f32 %v14244_v30, %v12240_v52  ;;  %v14245_v56 = vld [vmem:[#allocation49_spill] sm:$0xff]  ;;  %v14252_v30 = vld [vmem:[#allocation30_spill] sm:$0xff] }
 0x381   :  { %v4973_v49 = vmul.f32 %v14242_v17, %v12240_v52  ;;  %v4985_v12 = vmul.f32 %v14248_v27, %v12240_v52  ;;  %v14249_v17 = vld [vmem:[#allocation63_spill] sm:$0xff]  ;;  %v5507_v0 = vmul.f32 %v14252_v30, %v4961_v42  ;;  %v5513_v35 = vmul.f32 %v14256_v57, %v4967_v28  ;;  %v14275_v30 = vld [vmem:[#allocation61_spill] sm:$0xff]  ;;  %v14276_v57 = vld [vmem:[#allocation38_spill] sm:$0xff] }
 0x382   :  { %v5438_v41 = vpop.permute.xlu1 %5437  ;;  %6565 = vrcp.f32 %v4911_v11  ;;  %14237 = vst [vmem:[#allocation31_spill] sm:$0xff] %v12422_v6  ;;  %v12425_v11 = vmul.f32 %v14238_v8, %v4957_v33  ;;  %v4979_v33 = vmul.f32 %v14245_v56, %v12240_v52  ;;  %v14246_v8 = vld [vmem:[#allocation50_spill] sm:$0xff]  ;;  %v4987_v22 = vmul.f32 %v14249_v17, %v12240_v52 }
 0x383   :  { %v4981_v26 = vmul.f32 %v14246_v8, %v12240_v52  ;;  %v5509_v56 = vmul.f32 %v14253_v55, %v4963_v53  ;;  %v4989_v8 = vmul.f32 %v14254_v61, %v12240_v52  ;;  %v5515_v27 = vmul.f32 %v14257_v18, %v4969_v62  ;;  %v14261_v55 = vld [vmem:[#allocation22_spill] sm:$0xff] }
 0x384   :  { %14239 = vst [vmem:[#allocation99_spill] sm:$0xff] %v12425_v11  ;;  %v14258_v11 = vld [vmem:[#allocation12_spill] sm:$0xff]  ;;  %v12461_v21 = vmul.f32 %v14259_v20, %v4973_v49  ;;  %v12464_v42 = vmul.f32 %v14260_v13, %v4975_v48  ;;  %v12467_v53 = vmul.f32 %v14261_v55, %v4977_v19  ;;  %v12470_v61 = vmul.f32 %v12105_v29, %v4979_v33  ;;  %v14263_v18 = vld [vmem:[#allocation46_spill] sm:$0xff]  ;;  %v14274_v33 = vld [vmem:[#allocation25_spill] sm:$0xff] }
 0x385   :  { %v12458_v6 = vmul.f32 %v14258_v11, %v4971_v54  ;;  %v12473_v52 = vmul.f32 %v14262_v15, %v4981_v26  ;;  %v12476_v62 = vmul.f32 %v14263_v18, %v4983_v3  ;;  %v12479_v54 = vmul.f32 %v12161_v1, %v4985_v12  ;;  %v6583_v26 = vld [vmem:[%s12814_s2] sm:$0xff]  ;;  %v14273_v11 = vld [vmem:[#allocation66_spill] sm:$0xff]  ;;  %s6625_s2 = smov [#allocation5]  }
 0x386   :  { %v5448_v34 = vpop.permute.xlu1 %5447  ;;  %v12482_v49 = vmul.f32 %v12176_v63, %v4987_v22  ;;  %v12485_v48 = vmul.f32 %v12188_v10, %v4989_v8  ;;  %v12489_v20 = vmul.f32 %v12202_v44, %v12252_v37  ;;  %v12493_v29 = vmul.f32 %v12216_v39, %v12256_v38  ;;  %v12507_v22 = vpop.permute.xlu0 %5332  ;;  %v14277_v13 = vld [vmem:[#allocation68_spill] sm:$0xff]  ;;  %s5978_s30 = sshll.u32 %s6625_s2, 4  ;;  %s5979_s30 = int_to_ptr.vmem [resolvable:$true] %s5978_s30 }
 0x387   :  { %v12497_v3 = vmul.f32 %v12228_v58, %v12260_v23  ;;  %v12501_v63 = vmul.f32 %v12246_v50, %v12276_v4  ;;  %v12505_v10 = vmul.f32 %v12278_v32, %v12282_v51  ;;  %v12511_v44 = vmul.f32 %v12333_v7, %v12286_v46  ;;  %v14264_v46 = vld [vmem:[#allocation10_spill] sm:$0xff]  ;;  %v14278_v15 = vld [vmem:[#allocation44_spill] sm:$0xff]  ;;  %s6596_s11 = scalar_lea.vmem %s5979_s30, 2048  ;;  %p6601_p6 = scmp.lt.s32.totalorder %s5979_s30, %s5979_s30 }
 0x388   :  { %v12515_v39 = vmul.f32 %v12351_v2, %v12292_v60  ;;  %v12524_v37 = vmul.f32 %v12361_v59, %v12296_v43  ;;  %v12528_v38 = vmul.f32 %v12371_v36, %v12300_v45  ;;  %v12531_v23 = vmul.f32 %v5388_v25, %v12304_v47  ;;  %v14265_v43 = vld [vmem:[#allocation85_spill] sm:$0xff]  ;;  %v14266_v45 = vld [vmem:[#allocation92_spill] sm:$0xff]  ;;  %v14271_v25 = vld [vmem:[#allocation103_spill] sm:$0xff]  ;;  %p6597_p5 = scmp.ne.s32.totalorder %s5979_s30, %s6596_s11  ;;  %p6602_p7 = scmp.lt.s32.totalorder %s6596_s11, %s6596_s11 }
 0x389   :  { %v12534_v4 = vmul.f32 %v5438_v41, %v12312_v24  ;;  %v12537_v32 = vmul.f32 %v5448_v34, %v12318_v31  ;;  %v14267_v47 = vld [vmem:[#allocation17_spill] sm:$0xff]  ;;  %v14268_v24 = vld [vmem:[#allocation20_spill] sm:$0xff]  ;;  %v14269_v31 = vld [vmem:[#allocation47_spill] sm:$0xff] }
 0x38a   :  { %v5458_v17 = vpop.permute.xlu1 %5457  ;;  %p6603_p8 = por %p6602_p7, %p6601_p6 }
 0x38b   :  { %v12540_v51 = vmul.f32 %v5458_v17, %v12322_v5  ;;  %v14270_v5 = vld [vmem:[#allocation69_spill] sm:$0xff] }
 0x38c   :  { %v6566_v1 = vpop.eup %6565  ;;  %p6604_p9 = pnand %p6603_p8, %p6597_p5 }
 0x38d   :  { %v12520_v50 = vmul.f32 %v6583_v26, %v6566_v1  ;;  %v14279_v1 = vld [vmem:[#allocation34_spill] sm:$0xff]  ;;  %v14280_v26 = vld [vmem:[#allocation81_spill] sm:$0xff] }
 0x38e   :  { %v5398_v58 = vpop.permute.xlu1 %5397 }
 0x38f   :  { %v12543_v60 = vmul.f32 %v5398_v58, %v14264_v46  ;;  %v4954_v7 = vmul.f32 %v14265_v43, %v12520_v50  ;;  %v4956_v2 = vmul.f32 %v14266_v45, %v12520_v50  ;;  %v4958_v12 = vmul.f32 %v14267_v47, %v12520_v50  ;;  %v12569_v43 = vpop.permute.xlu0 %5342  ;;  %v14281_v45 = vld [vmem:[#allocation31_spill] sm:$0xff] }
 0x390   :  { %v4960_v59 = vmul.f32 %v14268_v24, %v12520_v50  ;;  %v4962_v36 = vmul.f32 %v14269_v31, %v12520_v50  ;;  %v4964_v34 = vmul.f32 %v14270_v5, %v12520_v50  ;;  %v4966_v41 = vmul.f32 %v14271_v25, %v12520_v50  ;;  %v14282_v24 = vld [vmem:[#allocation99_spill] sm:$0xff] }
 0x391   :  { %v4968_v28 = vmul.f32 %v14272_v9, %v12520_v50  ;;  %v5500_v19 = vmul.f32 %v14273_v11, %v4954_v7  ;;  %v5502_v16 = vmul.f32 %v14274_v33, %v4956_v2  ;;  %v5504_v8 = vmul.f32 %v14275_v30, %v4958_v12 }
 0x392   :  { %v5506_v17 = vmul.f32 %v14276_v57, %v4960_v59  ;;  %v5508_v55 = vmul.f32 %v14277_v13, %v4962_v36  ;;  %v5510_v18 = vmul.f32 %v14278_v15, %v4964_v34  ;;  %v5512_v58 = vmul.f32 %v14279_v1, %v4966_v41 }
 0x393   :  { %v5514_v46 = vmul.f32 %v14280_v26, %v4968_v28  ;;  %v5578_v47 = vadd.f32 %v14281_v45, %v5500_v19  ;;  %v5585_v7 = vadd.f32 %v14282_v24, %v5502_v16  ;;  %v5592_v31 = vadd.f32 %v5505_v40, %v5504_v8 }
 0x394   :  { %v5599_v2 = vadd.f32 %v5507_v0, %v5506_v17  ;;  %v5606_v5 = vadd.f32 %v5509_v56, %v5508_v55  ;;  %v5613_v12 = vadd.f32 %v5511_v14, %v5510_v18  ;;  %v5620_v25 = vadd.f32 %v5513_v35, %v5512_v58  ;;  %v12573_v56 = vpop.permute.xlu0 %5352 }
 0x395   :  { %v5627_v59 = vadd.f32 %v5515_v27, %v5514_v46  ;;  %v5579_v9 = vrot.slane %v5578_v47, 4  ;;  %v5586_v36 = vrot.slane %v5585_v7, 4  ;;  %v5593_v11 = vrot.slane %v5592_v31, 4 }
 0x396   :  { %v5600_v34 = vrot.slane %v5599_v2, 4  ;;  %v5607_v33 = vrot.slane %v5606_v5, 4  ;;  %v5614_v41 = vrot.slane %v5613_v12, 4  ;;  %v5621_v30 = vrot.slane %v5620_v25, 4 }
 0x397   :  { %v5628_v28 = vrot.slane %v5627_v59, 4  ;;  %v5580_v57 = vadd.f32 %v5579_v9, %v5578_v47  ;;  %v5587_v13 = vadd.f32 %v5586_v36, %v5585_v7  ;;  %v5594_v15 = vadd.f32 %v5593_v11, %v5592_v31 }
 0x398   :  { %v5601_v19 = vadd.f32 %v5600_v34, %v5599_v2  ;;  %v5608_v1 = vadd.f32 %v5607_v33, %v5606_v5  ;;  %v5615_v16 = vadd.f32 %v5614_v41, %v5613_v12  ;;  %v5622_v40 = vadd.f32 %v5621_v30, %v5620_v25  ;;  %v12575_v33 = vpop.permute.xlu0 %5362 }
 0x399   :  { %v5629_v0 = vadd.f32 %v5628_v28, %v5627_v59  ;;  %v5581_v35 = vrot.slane %v5580_v57, 2  ;;  %v5588_v14 = vrot.slane %v5587_v13, 2  ;;  %v5595_v27 = vrot.slane %v5594_v15, 2 }
 0x39a   :  { %v5602_v8 = vrot.slane %v5601_v19, 2  ;;  %v5609_v17 = vrot.slane %v5608_v1, 2  ;;  %v5616_v55 = vrot.slane %v5615_v16, 2  ;;  %v5623_v18 = vrot.slane %v5622_v40, 2 }
 0x39b   :  { %v5630_v58 = vrot.slane %v5629_v0, 2  ;;  %v5582_v26 = vadd.f32 %v5581_v35, %v5580_v57  ;;  %v5589_v46 = vadd.f32 %v5588_v14, %v5587_v13  ;;  %v5596_v45 = vadd.f32 %v5595_v27, %v5594_v15 }
 0x39c   :  { %v5603_v47 = vadd.f32 %v5602_v8, %v5601_v19  ;;  %v5610_v24 = vadd.f32 %v5609_v17, %v5608_v1  ;;  %v5617_v7 = vadd.f32 %v5616_v55, %v5615_v16  ;;  %v5624_v31 = vadd.f32 %v5623_v18, %v5622_v40  ;;  %v14283_v16 = vld [vmem:[#allocation94_spill] sm:$0xff] }
 0x39d   :  { %v5631_v2 = vadd.f32 %v5630_v58, %v5629_v0  ;;  %v5583_v5 = vrot.slane %v5582_v26, 1  ;;  %v5590_v12 = vrot.slane %v5589_v46, 1  ;;  %v5597_v25 = vrot.slane %v5596_v45, 1  ;;  %v14284_v58 = vld [vmem:[#allocation28_spill] sm:$0xff] }
 0x39e   :  { %v5604_v59 = vrot.slane %v5603_v47, 1  ;;  %v5611_v9 = vrot.slane %v5610_v24, 1  ;;  %v5618_v36 = vrot.slane %v5617_v7, 1  ;;  %v5625_v11 = vrot.slane %v5624_v31, 1 }
 0x39f   :  { %v5632_v34 = vrot.slane %v5631_v2, 1  ;;  %v5584_v41 = vadd.f32 %v5583_v5, %v5582_v26  ;;  %v5591_v30 = vadd.f32 %v5590_v12, %v5589_v46  ;;  %v5598_v28 = vadd.f32 %v5597_v25, %v5596_v45  ;;  %v14285_v46 = vld [vmem:[#allocation41_spill] sm:$0xff]  ;;  %v14288_v5 = vld [vmem:[#allocation23_spill] sm:$0xff] }
 0x3a0   :  { %v5605_v57 = vadd.f32 %v5604_v59, %v5603_v47  ;;  %v5612_v13 = vadd.f32 %v5611_v9, %v5610_v24  ;;  %v5619_v15 = vadd.f32 %v5618_v36, %v5617_v7  ;;  %v5626_v19 = vadd.f32 %v5625_v11, %v5624_v31  ;;  %v14286_v47 = vld [vmem:[#allocation16_spill] sm:$0xff]  ;;  %v14289_v25 = vld [vmem:[#allocation37_spill] sm:$0xff]  ;;  %v12599_v9 = vpop.permute.xlu0 %5372 }
 0x3a1   :  { %v5633_v1 = vadd.f32 %v5632_v34, %v5631_v2  ;;  %v5851_v40 = vmul.f32 %v5584_v41, %v14283_v16  ;;  %v5852_v0 = vmul.f32 %v5591_v30, %v14283_v16  ;;  %v5853_v35 = vmul.f32 %v5598_v28, %v14283_v16  ;;  %v14287_v31 = vld [vmem:[#allocation104_spill] sm:$0xff]  ;;  %v14290_v11 = vld [vmem:[#allocation13_spill] sm:$0xff] }
 0x3a2   :  { %v5854_v14 = vmul.f32 %v5605_v57, %v14283_v16  ;;  %v5855_v27 = vmul.f32 %v5612_v13, %v14283_v16  ;;  %v5856_v8 = vmul.f32 %v5619_v15, %v14283_v16  ;;  %v5857_v17 = vmul.f32 %v5626_v19, %v14283_v16  ;;  %v14291_v41 = vld [vmem:[#allocation64_spill] sm:$0xff]  ;;  %v14292_v28 = vld [vmem:[#allocation53_spill] sm:$0xff]  ;;  %v14293_v15 = vld [vmem:[#allocation58_spill] sm:$0xff] }
 0x3a3   :  { %v5858_v55 = vmul.f32 %v5633_v1, %v14283_v16  ;;  %v5929_v18 = vsel %vm410_vm1, %v5852_v0, %v5851_v40  ;;  %v4970_v26 = vmul.f32 %v14284_v58, %v12520_v50  ;;  %v4972_v45 = vmul.f32 %v14285_v46, %v12520_v50  ;;  %v14294_v1 = vld [vmem:[#allocation55_spill] sm:$0xff]  ;;  %v14295_v0 = vld [vmem:[#allocation33_spill] sm:$0xff] }
 0x3a4   :  { %v4974_v24 = vmul.f32 %v14286_v47, %v12520_v50  ;;  %v5930_v7 = vsel %vm412_vm2, %v5853_v35, %v5929_v18  ;;  %v4976_v2 = vmul.f32 %v14287_v31, %v12520_v50  ;;  %v4978_v12 = vmul.f32 %v14288_v5, %v12520_v50 }
 0x3a5   :  { %v4980_v59 = vmul.f32 %v14289_v25, %v12520_v50  ;;  %v5931_v36 = vsel %vm414_vm3, %v5854_v14, %v5930_v7  ;;  %v5516_v34 = vmul.f32 %v14290_v11, %v4970_v26  ;;  %v5518_v30 = vmul.f32 %v14291_v41, %v4972_v45  ;;  %v14298_v11 = vld [vmem:[#allocation52_spill] sm:$0xff] }
 0x3a6   :  { %v5520_v57 = vmul.f32 %v14292_v28, %v4974_v24  ;;  %v5932_v13 = vsel %vm416_vm4, %v5855_v27, %v5931_v36  ;;  %v5522_v19 = vmul.f32 %v14293_v15, %v4976_v2  ;;  %v5524_v40 = vmul.f32 %v14294_v1, %v4978_v12  ;;  %v12620_v12 = vpop.permute.xlu0 %5382 }
 0x3a7   :  { %v5526_v35 = vmul.f32 %v14295_v0, %v4980_v59  ;;  %v5933_v18 = vsel %vm418_vm5, %v5856_v8, %v5932_v13  ;;  %v5634_v58 = vadd.f32 %v12458_v6, %v5516_v34  ;;  %v5641_v14 = vadd.f32 %v12461_v21, %v5518_v30  ;;  %v14296_v21 = vld [vmem:[#allocation67_spill] sm:$0xff] }
 0x3a8   :  { %v5648_v26 = vadd.f32 %v12464_v42, %v5520_v57  ;;  %v5934_v46 = vsel %vm420_vm6, %v5857_v17, %v5933_v18  ;;  %v5655_v45 = vadd.f32 %v12467_v53, %v5522_v19  ;;  %v5662_v27 = vadd.f32 %v12470_v61, %v5524_v40  ;;  %v14297_v61 = vld [vmem:[#allocation26_spill] sm:$0xff]  ;;  %v14299_v57 = vld [vmem:[#allocation72_spill] sm:$0xff] }
 0x3a9   :  { %v5669_v47 = vadd.f32 %v12473_v52, %v5526_v35  ;;  %v5935_v24 = vsel %vm1622_vm7, %v5858_v55, %v5934_v46  ;;  %v5635_v7 = vrot.slane %v5634_v58, 4  ;;  %v5642_v31 = vrot.slane %v5641_v14, 4 }
 0x3aa   :  { %v5649_v2 = vrot.slane %v5648_v26, 4  ;;  %5968 = vst [vmem:[#allocation5 + $0x58] sm:$0xff] %v5935_v24  ;;  %v5656_v8 = vrot.slane %v5655_v45, 4  ;;  %v5663_v6 = vrot.slane %v5662_v27, 4  ;;  %v4982_v42 = vmul.f32 %v14296_v21, %v12520_v50 }
 0x3ab   :  { %v5670_v5 = vrot.slane %v5669_v47, 4  ;;  %v5636_v17 = vadd.f32 %v5635_v7, %v5634_v58  ;;  %v5643_v53 = vadd.f32 %v5642_v31, %v5641_v14  ;;  %v4984_v52 = vmul.f32 %v14297_v61, %v12520_v50 }
 0x3ac   :  { %v5650_v25 = vadd.f32 %v5649_v2, %v5648_v26  ;;  %v5657_v59 = vadd.f32 %v5656_v8, %v5655_v45  ;;  %v5664_v55 = vadd.f32 %v5663_v6, %v5662_v27  ;;  %v5528_v34 = vmul.f32 %v14298_v11, %v4982_v42  ;;  %v12628_v27 = vpop.permute.xlu0 %5432 }
 0x3ad   :  { %v5671_v36 = vadd.f32 %v5670_v5, %v5669_v47  ;;  %v5637_v41 = vrot.slane %v5636_v17, 2  ;;  %v5644_v30 = vrot.slane %v5643_v53, 2  ;;  %v5530_v13 = vmul.f32 %v14299_v57, %v4984_v52 }
 0x3ae   :  { %v5651_v28 = vrot.slane %v5650_v25, 2  ;;  %v5658_v15 = vrot.slane %v5657_v59, 2  ;;  %v5665_v19 = vrot.slane %v5664_v55, 2  ;;  %v5676_v40 = vadd.f32 %v12476_v62, %v5528_v34 }
 0x3af   :  { %v5672_v1 = vrot.slane %v5671_v36, 2  ;;  %v5638_v0 = vadd.f32 %v5637_v41, %v5636_v17  ;;  %v5645_v35 = vadd.f32 %v5644_v30, %v5643_v53  ;;  %v5683_v58 = vadd.f32 %v12479_v54, %v5530_v13 }
 0x3b0   :  { %v5652_v18 = vadd.f32 %v5651_v28, %v5650_v25  ;;  %v5659_v14 = vadd.f32 %v5658_v15, %v5657_v59  ;;  %v5666_v26 = vadd.f32 %v5665_v19, %v5664_v55  ;;  %v5677_v45 = vrot.slane %v5676_v40, 4  ;;  %v12636_v28 = vpop.permute.xlu0 %5442  ;;  %v14300_v15 = vld [vmem:[#allocation42_spill] sm:$0xff] }
 0x3b1   :  { %v5673_v46 = vadd.f32 %v5672_v1, %v5671_v36  ;;  %v5639_v47 = vrot.slane %v5638_v0, 1  ;;  %v5646_v24 = vrot.slane %v5645_v35, 1  ;;  %v5684_v31 = vrot.slane %v5683_v58, 4  ;;  %v14301_v1 = vld [vmem:[#allocation9_spill] sm:$0xff] }
 0x3b2   :  { %v5653_v7 = vrot.slane %v5652_v18, 1  ;;  %v5660_v2 = vrot.slane %v5659_v14, 1  ;;  %v5667_v8 = vrot.slane %v5666_v26, 1  ;;  %v5678_v5 = vadd.f32 %v5677_v45, %v5676_v40 }
 0x3b3   :  { %v5674_v6 = vrot.slane %v5673_v46, 1  ;;  %v5640_v62 = vadd.f32 %v5639_v47, %v5638_v0  ;;  %v5647_v21 = vadd.f32 %v5646_v24, %v5645_v35  ;;  %v5685_v17 = vadd.f32 %v5684_v31, %v5683_v58  ;;  %v14304_v47 = vld [vmem:[#allocation48_spill] sm:$0xff] }
 0x3b4   :  { %v5654_v42 = vadd.f32 %v5653_v7, %v5652_v18  ;;  %v5661_v53 = vadd.f32 %v5660_v2, %v5659_v14  ;;  %v5668_v54 = vadd.f32 %v5667_v8, %v5666_v26  ;;  %v5679_v61 = vrot.slane %v5678_v5, 2  ;;  %v14302_v18 = vld [vmem:[#allocation105_spill] sm:$0xff]  ;;  %v14305_v7 = vld [vmem:[#allocation84_spill] sm:$0xff] }
 0x3b5   :  { %v5675_v25 = vadd.f32 %v5674_v6, %v5673_v46  ;;  %v5859_v52 = vmul.f32 %v5640_v62, %v14283_v16  ;;  %v5860_v59 = vmul.f32 %v5647_v21, %v14283_v16  ;;  %v5686_v36 = vrot.slane %v5685_v17, 2  ;;  %v14303_v14 = vld [vmem:[#allocation45_spill] sm:$0xff]  ;;  %v14306_v6 = vld [vmem:[#allocation90_spill] sm:$0xff]  ;;  %v14307_v62 = vld [vmem:[#allocation19_spill] sm:$0xff] }
 0x3b6   :  { %v5861_v55 = vmul.f32 %v5654_v42, %v14283_v16  ;;  %v5862_v11 = vmul.f32 %v5661_v53, %v14283_v16  ;;  %v5863_v34 = vmul.f32 %v5668_v54, %v14283_v16  ;;  %v5680_v30 = vadd.f32 %v5679_v61, %v5678_v5 }
 0x3b7   :  { %v5864_v41 = vmul.f32 %v5675_v25, %v14283_v16  ;;  %v5936_v57 = vsel %vm410_vm1, %v5860_v59, %v5859_v52  ;;  %v5687_v13 = vadd.f32 %v5686_v36, %v5685_v17  ;;  %v4986_v19 = vmul.f32 %v14300_v15, %v12520_v50  ;;  %v14308_v59 = vld [vmem:[#allocation21_spill] sm:$0xff]  ;;  %v12662_v36 = vpop.permute.xlu0 %5452  ;;  %v14310_v15 = vld [vmem:[#allocation98_spill] sm:$0xff] }
 0x3b8   :  { %v4988_v40 = vmul.f32 %v14301_v1, %v12520_v50  ;;  %v5937_v0 = vsel %vm412_vm2, %v5861_v55, %v5936_v57  ;;  %v5681_v35 = vrot.slane %v5680_v30, 1  ;;  %v4990_v58 = vmul.f32 %v14302_v18, %v12520_v50 }
 0x3b9   :  { %v4992_v26 = vmul.f32 %v14303_v14, %v12520_v50  ;;  %v5938_v46 = vsel %vm414_vm3, %v5862_v11, %v5937_v0  ;;  %v5688_v45 = vrot.slane %v5687_v13, 1  ;;  %v5532_v24 = vmul.f32 %v14304_v47, %v4986_v19  ;;  %v14312_v14 = vld [vmem:[#allocation60_spill] sm:$0xff] }
 0x3ba   :  { %v5534_v31 = vmul.f32 %v14305_v7, %v4988_v40  ;;  %v5939_v2 = vsel %vm416_vm4, %v5863_v34, %v5938_v46  ;;  %v5682_v8 = vadd.f32 %v5681_v35, %v5680_v30  ;;  %v5536_v5 = vmul.f32 %v14306_v6, %v4990_v58  ;;  %v14309_v30 = vld [vmem:[#allocation70_spill] sm:$0xff]  ;;  %v14311_v40 = vld [vmem:[#allocation100_spill] sm:$0xff] }
 0x3bb   :  { %v5538_v21 = vmul.f32 %v14307_v62, %v4992_v26  ;;  %v5940_v42 = vsel %vm418_vm5, %v5864_v41, %v5939_v2  ;;  %v5689_v17 = vadd.f32 %v5688_v45, %v5687_v13  ;;  %v5690_v53 = vadd.f32 %v12482_v49, %v5532_v24  ;;  %v14313_v24 = vld [vmem:[#allocation71_spill] sm:$0xff] }
 0x3bc   :  { %v5697_v54 = vadd.f32 %v12485_v48, %v5534_v31  ;;  %v5865_v25 = vmul.f32 %v5682_v8, %v14283_v16  ;;  %v5704_v61 = vadd.f32 %v12489_v20, %v5536_v5  ;;  %v4994_v55 = vmul.f32 %v14308_v59, %v12520_v50  ;;  %v12678_v5 = vpop.permute.xlu0 %5392 }
 0x3bd   :  { %v5711_v52 = vadd.f32 %v12493_v29, %v5538_v21  ;;  %v5866_v11 = vmul.f32 %v5689_v17, %v14283_v16  ;;  %v5691_v34 = vrot.slane %v5690_v53, 4  ;;  %v4996_v49 = vmul.f32 %v14309_v30, %v12520_v50 }
 0x3be   :  { %v5698_v41 = vrot.slane %v5697_v54, 4  ;;  %v5941_v48 = vsel %vm420_vm6, %v5865_v25, %v5940_v42  ;;  %v5705_v57 = vrot.slane %v5704_v61, 4  ;;  %v5540_v20 = vmul.f32 %v14310_v15, %v4994_v55  ;;  %v12683_v55 = vpop.permute.xlu1 %5467 }
 0x3bf   :  { %v5712_v13 = vrot.slane %v5711_v52, 4  ;;  %v5942_v29 = vsel %vm1622_vm7, %v5866_v11, %v5941_v48  ;;  %v5692_v19 = vadd.f32 %v5691_v34, %v5690_v53  ;;  %v5542_v0 = vmul.f32 %v14311_v40, %v4996_v49 }
 0x3c0   :  { %v5699_v1 = vadd.f32 %v5698_v41, %v5697_v54  ;;  %5969 = vst [vmem:[#allocation5 + $0x60] sm:$0xff] %v5942_v29  ;;  %v5706_v35 = vadd.f32 %v5705_v57, %v5704_v61  ;;  %v5718_v58 = vadd.f32 %v12497_v3, %v5540_v20  ;;  %v4998_v26 = vmul.f32 %v14312_v14, %v12520_v50 }
 0x3c1   :  { %v5713_v18 = vadd.f32 %v5712_v13, %v5711_v52  ;;  %v5693_v46 = vrot.slane %v5692_v19, 2  ;;  %v5725_v47 = vadd.f32 %v12501_v63, %v5542_v0  ;;  %v5000_v7 = vmul.f32 %v14313_v24, %v12520_v50 }
 0x3c2   :  { %v5700_v45 = vrot.slane %v5699_v1, 2  ;;  %v5707_v31 = vrot.slane %v5706_v35, 2  ;;  %v5719_v8 = vrot.slane %v5718_v58, 4  ;;  %v5544_v6 = vmul.f32 %v12507_v22, %v4998_v26 }
 0x3c3   :  { %v5714_v2 = vrot.slane %v5713_v18, 2  ;;  %v5694_v62 = vadd.f32 %v5693_v46, %v5692_v19  ;;  %v5726_v3 = vrot.slane %v5725_v47, 4  ;;  %v5546_v42 = vmul.f32 %v12569_v43, %v5000_v7  ;;  %v14314_v46 = vld [vmem:[#allocation36_spill] sm:$0xff] }
 0x3c4   :  { %v5701_v21 = vadd.f32 %v5700_v45, %v5699_v1  ;;  %v5708_v17 = vadd.f32 %v5707_v31, %v5706_v35  ;;  %v5720_v54 = vadd.f32 %v5719_v8, %v5718_v58  ;;  %v5732_v63 = vadd.f32 %v12505_v10, %v5544_v6  ;;  %v12685_v10 = vpop.permute.xlu0 %5462 }
 0x3c5   :  { %v5715_v53 = vadd.f32 %v5714_v2, %v5713_v18  ;;  %v5695_v25 = vrot.slane %v5694_v62, 1  ;;  %v5727_v52 = vadd.f32 %v5726_v3, %v5725_v47  ;;  %v5739_v59 = vadd.f32 %v12511_v44, %v5546_v42  ;;  %v12694_v47 = vpop.permute.xlu1 %5407  ;;  %v14315_v2 = vld [vmem:[#allocation62_spill] sm:$0xff] }
 0x3c6   :  { %v5702_v61 = vrot.slane %v5701_v21, 1  ;;  %v5709_v22 = vrot.slane %v5708_v17, 1  ;;  %v5721_v34 = vrot.slane %v5720_v54, 2  ;;  %v5733_v41 = vrot.slane %v5732_v63, 4 }
 0x3c7   :  { %v5716_v11 = vrot.slane %v5715_v53, 1  ;;  %v5696_v30 = vadd.f32 %v5695_v25, %v5694_v62  ;;  %v5728_v48 = vrot.slane %v5727_v52, 2  ;;  %v5740_v43 = vrot.slane %v5739_v59, 4 }
 0x3c8   :  { %v5703_v49 = vadd.f32 %v5702_v61, %v5701_v21  ;;  %v5710_v57 = vadd.f32 %v5709_v22, %v5708_v17  ;;  %v5722_v15 = vadd.f32 %v5721_v34, %v5720_v54  ;;  %v5734_v20 = vadd.f32 %v5733_v41, %v5732_v63  ;;  %v14316_v54 = vld [vmem:[#allocation76_spill] sm:$0xff]  ;;  %v12705_v25 = vpop.permute.xlu0 %5402  ;;  %v14317_v22 = vld [vmem:[#allocation27_spill] sm:$0xff] }
 0x3c9   :  { %v5717_v13 = vadd.f32 %v5716_v11, %v5715_v53  ;;  %v5867_v29 = vmul.f32 %v5696_v30, %v14283_v16  ;;  %v5729_v19 = vadd.f32 %v5728_v48, %v5727_v52  ;;  %v5741_v1 = vadd.f32 %v5740_v43, %v5739_v59 }
 0x3ca   :  { %v5868_v44 = vmul.f32 %v5703_v49, %v14283_v16  ;;  %v5869_v40 = vmul.f32 %v5710_v57, %v14283_v16  ;;  %v5723_v35 = vrot.slane %v5722_v15, 1  ;;  %v5735_v18 = vrot.slane %v5734_v20, 2  ;;  %v12716_v57 = vpop.permute.xlu1 %5477 }
 0x3cb   :  { %v5870_v0 = vmul.f32 %v5717_v13, %v14283_v16  ;;  %v5730_v14 = vrot.slane %v5729_v19, 1  ;;  %v5742_v26 = vrot.slane %v5741_v1, 2  ;;  %v5002_v45 = vmul.f32 %v14314_v46, %v12520_v50 }
 0x3cc   :  { %v5943_v58 = vsel %vm410_vm1, %v5868_v44, %v5867_v29  ;;  %v5724_v7 = vadd.f32 %v5723_v35, %v5722_v15  ;;  %v5736_v31 = vadd.f32 %v5735_v18, %v5734_v20  ;;  %v5004_v8 = vmul.f32 %v14315_v2, %v12520_v50  ;;  %v14318_v20 = vld [vmem:[#allocation88_spill] sm:$0xff]  ;;  %v12728_v18 = vpop.permute.xlu0 %5472 }
 0x3cd   :  { %v5944_v24 = vsel %vm412_vm2, %v5869_v40, %v5943_v58  ;;  %v5731_v62 = vadd.f32 %v5730_v14, %v5729_v19  ;;  %v5743_v21 = vadd.f32 %v5742_v26, %v5741_v1  ;;  %v5548_v3 = vmul.f32 %v12573_v56, %v5002_v45  ;;  %v14319_v19 = vld [vmem:[#allocation73_spill] sm:$0xff] }
 0x3ce   :  { %v5945_v6 = vsel %vm414_vm3, %v5870_v0, %v5944_v24  ;;  %v5871_v42 = vmul.f32 %v5724_v7, %v14283_v16  ;;  %v5737_v17 = vrot.slane %v5736_v31, 1  ;;  %v5550_v53 = vmul.f32 %v12575_v33, %v5004_v8  ;;  %v14320_v24 = vld [vmem:[#allocation89_spill] sm:$0xff]  ;;  %v14321_v8 = vld [vmem:[#allocation43_spill] sm:$0xff] }
 0x3cf   :  { %v5006_v63 = vmul.f32 %v14316_v54, %v12520_v50  ;;  %v5872_v61 = vmul.f32 %v5731_v62, %v14283_v16  ;;  %v5744_v52 = vrot.slane %v5743_v21, 1  ;;  %v5746_v59 = vadd.f32 %v12515_v39, %v5548_v3  ;;  %v12738_v62 = vpop.permute.xlu1 %5417 }
 0x3d0   :  { %v5008_v11 = vmul.f32 %v14317_v22, %v12520_v50  ;;  %v5946_v56 = vsel %vm416_vm4, %v5871_v42, %v5945_v6  ;;  %v5738_v34 = vadd.f32 %v5737_v17, %v5736_v31  ;;  %v5753_v41 = vadd.f32 %v12524_v37, %v5550_v53 }
 0x3d1   :  { %v5552_v33 = vmul.f32 %v12599_v9, %v5006_v63  ;;  %v5947_v30 = vsel %vm418_vm5, %v5872_v61, %v5946_v56  ;;  %v5745_v49 = vadd.f32 %v5744_v52, %v5743_v21  ;;  %v5747_v48 = vrot.slane %v5746_v59, 4 }
 0x3d2   :  { %v5554_v43 = vmul.f32 %v12620_v12, %v5008_v11  ;;  %v5873_v39 = vmul.f32 %v5738_v34, %v14283_v16  ;;  %v5754_v13 = vrot.slane %v5753_v41, 4  ;;  %v5018_v29 = vmul.f32 %v14318_v20, %v12520_v50 }
 0x3d3   :  { %v5760_v15 = vadd.f32 %v12528_v38, %v5552_v33  ;;  %v5874_v37 = vmul.f32 %v5745_v49, %v14283_v16  ;;  %v5748_v44 = vadd.f32 %v5747_v48, %v5746_v59  ;;  %v5020_v1 = vmul.f32 %v14319_v19, %v12520_v50  ;;  %v5413_v59 = vpop.permute.xlu0 %5412 }
 0x3d4   :  { %v5767_v9 = vadd.f32 %v12531_v23, %v5554_v43  ;;  %v5948_v12 = vsel %vm420_vm6, %v5873_v39, %v5947_v30  ;;  %v5755_v40 = vadd.f32 %v5754_v13, %v5753_v41  ;;  %v5564_v35 = vmul.f32 %v12628_v27, %v5018_v29  ;;  %v5488_v39 = vpop.permute.xlu1 %5487 }
 0x3d5   :  { %v5761_v0 = vrot.slane %v5760_v15, 4  ;;  %v5949_v38 = vsel %vm1622_vm7, %v5874_v37, %v5948_v12  ;;  %v5749_v58 = vrot.slane %v5748_v44, 2  ;;  %v5566_v26 = vmul.f32 %v12636_v28, %v5020_v1 }
 0x3d6   :  { %v5768_v14 = vrot.slane %v5767_v9, 4  ;;  %5970 = vst [vmem:[#allocation5 + $0x68] sm:$0xff] %v5949_v38  ;;  %v5756_v46 = vrot.slane %v5755_v40, 2  ;;  %v5802_v45 = vadd.f32 %v12534_v4, %v5564_v35  ;;  %v5022_v7 = vmul.f32 %v14320_v24, %v12520_v50  ;;  %v14324_v24 = vld [vmem:[#allocation91_spill] sm:$0xff] }
 0x3d7   :  { %v5762_v23 = vadd.f32 %v5761_v0, %v5760_v15  ;;  %v5750_v31 = vadd.f32 %v5749_v58, %v5748_v44  ;;  %v5809_v27 = vadd.f32 %v12537_v32, %v5566_v26  ;;  %v5010_v6 = vmul.f32 %v14321_v8, %v12520_v50  ;;  %v5483_v0 = vpop.permute.xlu0 %5482 }
 0x3d8   :  { %v5769_v2 = vadd.f32 %v5768_v14, %v5767_v9  ;;  %v5757_v21 = vadd.f32 %v5756_v46, %v5755_v40  ;;  %v5803_v28 = vrot.slane %v5802_v45, 4  ;;  %v5568_v42 = vmul.f32 %v12662_v36, %v5022_v7  ;;  %v14322_v9 = vld [vmem:[#allocation83_spill] sm:$0xff]  ;;  %v5428_v8 = vpop.permute.xlu1 %5427 }
 0x3d9   :  { %v5763_v3 = vrot.slane %v5762_v23, 2  ;;  %v5751_v17 = vrot.slane %v5750_v31, 1  ;;  %v5810_v4 = vrot.slane %v5809_v27, 4  ;;  %v5556_v54 = vmul.f32 %v12678_v5, %v5010_v6  ;;  %v14323_v14 = vld [vmem:[#allocation59_spill] sm:$0xff] }
 0x3da   :  { %v5770_v53 = vrot.slane %v5769_v2, 2  ;;  %v5758_v63 = vrot.slane %v5757_v21, 1  ;;  %v5804_v52 = vadd.f32 %v5803_v28, %v5802_v45  ;;  %v5816_v32 = vadd.f32 %v12540_v51, %v5568_v42  ;;  %v14326_v42 = vld [vmem:[#allocation93_spill] sm:$0xff] }
 0x3db   :  { %v5764_v61 = vadd.f32 %v5763_v3, %v5762_v23  ;;  %v5752_v22 = vadd.f32 %v5751_v17, %v5750_v31  ;;  %v5811_v56 = vadd.f32 %v5810_v4, %v5809_v27  ;;  %v5774_v34 = vadd.f32 %v12543_v60, %v5556_v54  ;;  %v14325_v3 = vld [vmem:[#allocation32_spill] sm:$0xff]  ;;  %v14327_v54 = vld [vmem:[#allocation75_spill] sm:$0xff] }
 0x3dc   :  { %v5771_v11 = vadd.f32 %v5770_v53, %v5769_v2  ;;  %v5759_v41 = vadd.f32 %v5758_v63, %v5757_v21  ;;  %v5805_v30 = vrot.slane %v5804_v52, 2  ;;  %v5817_v36 = vrot.slane %v5816_v32, 4 }
 0x3dd   :  { %v5765_v33 = vrot.slane %v5764_v61, 1  ;;  %v5875_v49 = vmul.f32 %v5752_v22, %v14283_v16  ;;  %v5812_v43 = vrot.slane %v5811_v56, 2  ;;  %v5775_v5 = vrot.slane %v5774_v34, 4  ;;  %v14329_v22 = vld [vmem:[#allocation57_spill] sm:$0xff] }
 0x3de   :  { %v5772_v48 = vrot.slane %v5771_v11, 1  ;;  %v5876_v13 = vmul.f32 %v5759_v41, %v14283_v16  ;;  %v5806_v51 = vadd.f32 %v5805_v30, %v5804_v52  ;;  %v5818_v20 = vadd.f32 %v5817_v36, %v5816_v32  ;;  %v14328_v52 = vld [vmem:[#allocation95_spill] sm:$0xff] }
 0x3df   :  { %v5766_v15 = vadd.f32 %v5765_v33, %v5764_v61  ;;  %v5813_v37 = vadd.f32 %v5812_v43, %v5811_v56  ;;  %v5776_v44 = vadd.f32 %v5775_v5, %v5774_v34  ;;  %v5571_v60 = vmul.f32 %v12683_v55, %v14322_v9  ;;  %v5423_v56 = vpop.permute.xlu0 %5422 }
 0x3e0   :  { %v5773_v29 = vadd.f32 %v5772_v48, %v5771_v11  ;;  %v5950_v19 = vsel %vm410_vm1, %v5876_v13, %v5875_v49  ;;  %v5807_v12 = vrot.slane %v5806_v51, 1  ;;  %v5819_v40 = vrot.slane %v5818_v20, 2  ;;  %v14330_v48 = vld [vmem:[#allocation96_spill] sm:$0xff]  ;;  %v14331_v13 = vld [vmem:[#allocation82_spill] sm:$0xff] }
 0x3e1   :  { %v5877_v1 = vmul.f32 %v5766_v15, %v14283_v16  ;;  %v5814_v38 = vrot.slane %v5813_v37, 1  ;;  %v5777_v58 = vrot.slane %v5776_v44, 2  ;;  %v5024_v26 = vmul.f32 %v14323_v14, %v12520_v50 }
 0x3e2   :  { %v5878_v35 = vmul.f32 %v5773_v29, %v14283_v16  ;;  %v5808_v23 = vadd.f32 %v5807_v12, %v5806_v51  ;;  %v5820_v45 = vadd.f32 %v5819_v40, %v5818_v20  ;;  %v5559_v55 = vmul.f32 %v12694_v47, %v14324_v24  ;;  %v5498_v51 = vpop.permute.xlu1 %5497  ;;  %v14333_v12 = vld [vmem:[#allocation80_spill] sm:$0xff] }
 0x3e3   :  { %v5951_v46 = vsel %vm412_vm2, %v5877_v1, %v5950_v19  ;;  %v5815_v31 = vadd.f32 %v5814_v38, %v5813_v37  ;;  %v5778_v2 = vadd.f32 %v5777_v58, %v5776_v44  ;;  %v5570_v27 = vmul.f32 %v12685_v10, %v5024_v26  ;;  %v14332_v44 = vld [vmem:[#allocation86_spill] sm:$0xff]  ;;  %v5493_v58 = vpop.permute.xlu0 %5492 }
 0x3e4   :  { %v5952_v7 = vsel %vm414_vm3, %v5878_v35, %v5951_v46  ;;  %v5883_v6 = vmul.f32 %v5808_v23, %v14283_v16  ;;  %v5821_v21 = vrot.slane %v5820_v45, 1  ;;  %v5012_v28 = vmul.f32 %v14325_v3, %v12520_v50  ;;  %v14334_v35 = vld [vmem:[#allocation87_spill] sm:$0xff]  ;;  %v14335_v23 = vld [vmem:[#allocation97_spill] sm:$0xff] }
 0x3e5   :  { %v5573_v17 = vmul.f32 %v12716_v57, %v14326_v42  ;;  %v5884_v53 = vmul.f32 %v5815_v31, %v14283_v16  ;;  %v5779_v4 = vrot.slane %v5778_v2, 1  ;;  %v5823_v47 = vadd.f32 %v5571_v60, %v5570_v27 }
 0x3e6   :  { %v5026_v63 = vmul.f32 %v14327_v54, %v12520_v50  ;;  %v5822_v61 = vadd.f32 %v5821_v21, %v5820_v45  ;;  %v5558_v10 = vmul.f32 %v12705_v25, %v5012_v28  ;;  %v5561_v32 = vmul.f32 %v12738_v62, %v14328_v52 }
 0x3e7   :  { %v5014_v11 = vmul.f32 %v14329_v22, %v12520_v50  ;;  %v5957_v34 = vsel %vm410_vm1, %v5884_v53, %v5883_v6  ;;  %v5780_v57 = vadd.f32 %v5779_v4, %v5778_v2  ;;  %v5824_v41 = vrot.slane %v5823_v47, 4 }
 0x3e8   :  { %v5572_v33 = vmul.f32 %v12728_v18, %v5026_v63  ;;  %v5885_v30 = vmul.f32 %v5822_v61, %v14283_v16  ;;  %v5781_v36 = vadd.f32 %v5559_v55, %v5558_v10  ;;  %v5575_v43 = vmul.f32 %v5488_v39, %v14330_v48 }
 0x3e9   :  { %v5560_v49 = vmul.f32 %v5413_v59, %v5014_v11  ;;  %v5879_v25 = vmul.f32 %v5780_v57, %v14283_v16  ;;  %v5825_v5 = vadd.f32 %v5824_v41, %v5823_v47  ;;  %v5028_v15 = vmul.f32 %v14331_v13, %v12520_v50 }
 0x3ea   :  { %v5830_v62 = vadd.f32 %v5573_v17, %v5572_v33  ;;  %v5958_v20 = vsel %vm412_vm2, %v5885_v30, %v5957_v34  ;;  %v5782_v29 = vrot.slane %v5781_v36, 4  ;;  %v5563_v18 = vmul.f32 %v5428_v8, %v14332_v44 }
 0x3eb   :  { %v5788_v37 = vadd.f32 %v5561_v32, %v5560_v49  ;;  %v5953_v9 = vsel %vm416_vm4, %v5879_v25, %v5952_v7  ;;  %v5826_v60 = vrot.slane %v5825_v5, 2  ;;  %v5574_v19 = vmul.f32 %v5483_v0, %v5028_v15 }
 0x3ec   :  { %v5831_v59 = vrot.slane %v5830_v62, 4  ;;  %v5783_v39 = vadd.f32 %v5782_v29, %v5781_v36  ;;  %v5016_v40 = vmul.f32 %v14333_v12, %v12520_v50  ;;  %v5577_v38 = vmul.f32 %v5498_v51, %v14334_v35 }
 0x3ed   :  { %v5789_v1 = vrot.slane %v5788_v37, 4  ;;  %v5827_v14 = vadd.f32 %v5826_v60, %v5825_v5  ;;  %v5837_v46 = vadd.f32 %v5575_v43, %v5574_v19  ;;  %v5030_v45 = vmul.f32 %v14335_v23, %v12520_v50 }
 0x3ee   :  { %v5832_v26 = vadd.f32 %v5831_v59, %v5830_v62  ;;  %v5784_v24 = vrot.slane %v5783_v39, 2  ;;  %v5562_v7 = vmul.f32 %v5423_v56, %v5016_v40 }
 0x3ef   :  { %v5790_v55 = vadd.f32 %v5789_v1, %v5788_v37  ;;  %v5828_v31 = vrot.slane %v5827_v14, 1  ;;  %v5838_v0 = vrot.slane %v5837_v46, 4  ;;  %v5576_v27 = vmul.f32 %v5493_v58, %v5030_v45 }
 0x3f0   :  { %v5833_v2 = vrot.slane %v5832_v26, 2  ;;  %v5785_v8 = vadd.f32 %v5784_v24, %v5783_v39  ;;  %v5795_v21 = vadd.f32 %v5563_v18, %v5562_v7 }
 0x3f1   :  { %v5791_v6 = vrot.slane %v5790_v55, 2  ;;  %v5829_v3 = vadd.f32 %v5828_v31, %v5827_v14  ;;  %v5839_v42 = vadd.f32 %v5838_v0, %v5837_v46  ;;  %v5844_v17 = vadd.f32 %v5577_v38, %v5576_v27 }
 0x3f2   :  { %v5834_v28 = vadd.f32 %v5833_v2, %v5832_v26  ;;  %v5786_v53 = vrot.slane %v5785_v8, 1  ;;  %v5796_v47 = vrot.slane %v5795_v21, 4 }
 0x3f3   :  { %v5792_v4 = vadd.f32 %v5791_v6, %v5790_v55  ;;  %v5886_v54 = vmul.f32 %v5829_v3, %v14283_v16  ;;  %v5840_v63 = vrot.slane %v5839_v42, 2  ;;  %v5845_v61 = vrot.slane %v5844_v17, 4 }
 0x3f4   :  { %v5835_v50 = vrot.slane %v5834_v28, 1  ;;  %v5787_v10 = vadd.f32 %v5786_v53, %v5785_v8  ;;  %v5797_v32 = vadd.f32 %v5796_v47, %v5795_v21 }
 0x3f5   :  { %v5793_v52 = vrot.slane %v5792_v4, 1  ;;  %v5959_v22 = vsel %vm414_vm3, %v5886_v54, %v5958_v20  ;;  %v5841_v56 = vadd.f32 %v5840_v63, %v5839_v42  ;;  %v5846_v34 = vadd.f32 %v5845_v61, %v5844_v17 }
 0x3f6   :  { %v5836_v11 = vadd.f32 %v5835_v50, %v5834_v28  ;;  %v5880_v57 = vmul.f32 %v5787_v10, %v14283_v16  ;;  %v5798_v33 = vrot.slane %v5797_v32, 2 }
 0x3f7   :  { %v5794_v41 = vadd.f32 %v5793_v52, %v5792_v4  ;;  %v5842_v36 = vrot.slane %v5841_v56, 1  ;;  %v5847_v49 = vrot.slane %v5846_v34, 2 }
 0x3f8   :  { %v5887_v30 = vmul.f32 %v5836_v11, %v14283_v16  ;;  %v5954_v48 = vsel %vm418_vm5, %v5880_v57, %v5953_v9  ;;  %v5799_v25 = vadd.f32 %v5798_v33, %v5797_v32 }
 0x3f9   :  { %v5881_v43 = vmul.f32 %v5794_v41, %v14283_v16  ;;  %v5843_v62 = vadd.f32 %v5842_v36, %v5841_v56  ;;  %v5848_v13 = vadd.f32 %v5847_v49, %v5846_v34 }
 0x3fa   :  { %v5960_v5 = vsel %vm416_vm4, %v5887_v30, %v5959_v22  ;;  %v5800_v51 = vrot.slane %v5799_v25, 1 }
 0x3fb   :  { %v5955_v15 = vsel %vm420_vm6, %v5881_v43, %v5954_v48  ;;  %v5888_v20 = vmul.f32 %v5843_v62, %v14283_v16  ;;  %v5849_v29 = vrot.slane %v5848_v13, 1 }
 0x3fc   :  { %v5801_v37 = vadd.f32 %v5800_v51, %v5799_v25 }
 0x3fd   :  { %v5961_v44 = vsel %vm418_vm5, %v5888_v20, %v5960_v5  ;;  %v5850_v18 = vadd.f32 %v5849_v29, %v5848_v13 }
 0x3fe   :  { %v5882_v9 = vmul.f32 %v5801_v37, %v14283_v16 }
 0x3ff   :  { %v5889_v60 = vmul.f32 %v5850_v18, %v14283_v16 }
 0x400   :  { %v5956_v59 = vsel %vm1622_vm7, %v5882_v9, %v5955_v15 }
 0x401   :  { %5971 = vst [vmem:[#allocation5 + $0x70] sm:$0xff] %v5956_v59  ;;  %v5962_v19 = vsel %vm420_vm6, %v5889_v60, %v5961_v44 }
 0x402   :  { %5972 = vst [vmem:[#allocation5 + $0x78] sm:$0x7f] %v5962_v19 }
 0x403   :  { %6607 = shalt.err (!%p6604_p9)
}
 0x404   :  { %s6608_s13 = scalar_lea.hbm %s12822_s10, 2048 }
 0x405   :  { %p6609_p10 = scmp.ne.s32.totalorder %s12822_s10, %s6608_s13  ;;  %p6612_p11 = scmp.lt.u32.totalorder %s6608_s13, %s12822_s10 }
 0x407   :  { %p6614_p12 = pnand %p6612_p11, %p6609_p10 }
 0x409   :  { %6617 = shalt.err (!%p6614_p12)
}
 0x40a   :  { %s6626_s17 = smov 128   ;;  %s6627_s18 = smov 8  }
 0x40b   :  { %5984 = dma.vmem_to_hbm [thread:$0]  %s5979_s30, 2048, %s12822_s10, [#allocation3], %s6626_s17, %s6626_s17, %s6627_s18  }
 0x40c   :  { %6620 = dma.done.wait [#allocation3], 2048  }
 0x40d   :  { %6621 = vsyncadd [#allocation3], 4294965248 }
 0x40e   :  { %5988 = vsyncpa [#allocation3], 1 }
 0x40f   :  { %5989 = vsyncpa [#allocation4], 1 }

</bundles_post_ra>
